<compile_context>
chip_gen: v7x
topology: tpu7x:2x2x1
jax: 0.10.0
libtpu: 0.0.40
codegen_flags: <defaults>
</compile_context>

<pallas_src>
import functools

import jax
import jax.numpy as jnp
from jax import lax
from jax.experimental import pallas as pl
from jax.experimental.pallas import tpu as pltpu

C_IN = 11
C_PAD = 16                          # input channels zero-padded 11 -> 16
EMBED_SCALING = 1
NEW_ARCH = False

C1 = 11 * EMBED_SCALING                                    # conv1 (1x1)
C2 = 15 * EMBED_SCALING                                    # conv2 (3x3)
C3 = 20 * EMBED_SCALING                                    # conv3 (5x5)
C4 = (33 * EMBED_SCALING + EMBED_SCALING - 1) if not NEW_ARCH \
     else (33 * EMBED_SCALING + EMBED_SCALING - 2)         # conv4 (1x1)
C_OUT = C4 + C3 + C2 + C1                                  # 79
N_PAD = 128                                                # lane-dense padded out channels
K_FUSED = 25 * C_PAD                                       # 400 fused contraction dim

# Output channel offsets in the fused weight (PyTorch concat order: x4,x3,x2,x1).
O4, O3, O2, O1 = 0, C4, C4 + C3, C4 + C3 + C2

ROW_CAP = 2048                      # target matmul rows per grid step


def _embed_kernel(x_ref, w_ref, b_ref, o_ref, *, tile_h, w_pad, b_blk):
    """x_ref: (b_blk, tile_h+4, w_pad+4, 16)  halo'd, channel-padded NHWC chunks
       w_ref: (400, 128) bf16 fused weight      b_ref: (1, 128) f32 fused bias
       o_ref: (b_blk, tile_h, w_pad, 128) lane-dense f32 output block."""
    wmat = w_ref[...]
    bias = b_ref[...]

    def body(b, carry):
        xb = x_ref[b]                                      # (tile_h+4, w_pad+4, 16)
        # im2col patch build: 25 taps, each 16 lanes wide at a 16-aligned lane
        # offset; column order (dh, dw, c) matches the fused-weight row order.
        pieces = []
        for dh in range(5):
            for dw in range(5):
                pieces.append(xb[dh:dh + tile_h, dw:dw + w_pad, :])
        patches = jnp.concatenate(pieces, axis=-1)         # (tile_h, w_pad, 400)
        # w_pad % 8 == 0  ->  this reshape is a layout no-op.
        patches = patches.reshape(tile_h * w_pad, K_FUSED).astype(jnp.bfloat16)
        # Single fused MXU matmul (bf16 operands, f32 accumulate) + f32 bias.
        y = jnp.dot(patches, wmat, preferred_element_type=jnp.float32) + bias
        o_ref[b] = y.reshape(tile_h, w_pad, N_PAD)
        return carry

    lax.fori_loop(0, b_blk, body, None)


def _prep_fused(params):
    """Fold the four conv weights/biases into one (400, 128) bf16 weight + (1, 128) f32 bias."""
    w1, b1, w2, b2, w3, b3, w4, b4 = params               # HWIO weights
    wfull = jnp.zeros((5, 5, C_PAD, N_PAD), jnp.float32)
    wfull = wfull.at[2, 2, :C_IN, O4:O4 + C4].set(w4[0, 0])   # 1x1 -> centre tap
    wfull = wfull.at[:, :, :C_IN, O3:O3 + C3].set(w3)         # 5x5 -> all taps
    wfull = wfull.at[1:4, 1:4, :C_IN, O2:O2 + C2].set(w2)     # 3x3 -> centred 3x3 taps
    wfull = wfull.at[2, 2, :C_IN, O1:O1 + C1].set(w1[0, 0])   # 1x1 -> centre tap
    wfused = wfull.reshape(K_FUSED, N_PAD).astype(jnp.bfloat16)

    bfused = jnp.zeros((1, N_PAD), jnp.float32)
    bfused = bfused.at[0, O4:O4 + C4].set(b4)
    bfused = bfused.at[0, O3:O3 + C3].set(b3)
    bfused = bfused.at[0, O2:O2 + C2].set(b2)
    bfused = bfused.at[0, O1:O1 + C1].set(b1)
    return wfused, bfused


@jax.jit
def embedding2d_forward(x_nchw, params):
    """x_nchw: (N, 11, H, W) float32 -> (N, 79, H, W) float32."""
    n, c, h, w = x_nchw.shape
    assert c == C_IN
    wfused, bfused = _prep_fused(params)

    # ---- static tiling decisions -------------------------------------------
    w_pad = ((w + 7) // 8) * 8                      # keep reshapes layout no-ops
    if h * w_pad <= ROW_CAP:
        tile_h = h                                  # whole image per chunk
    else:
        tile_h = max(8, (ROW_CAP // w_pad) // 8 * 8)
    n_chunks = -(-h // tile_h)
    h_pad = tile_h * n_chunks
    G = n * n_chunks                                # independent (image, chunk) tiles
    rows_per_img = tile_h * w_pad
    b_blk = 1                                       # tiles per grid step (amortize overhead)
    for d in range(1, G + 1):
        if G % d == 0 and d * rows_per_img <= ROW_CAP:
            b_blk = d

    # ---- wrapper layout pass: NCHW -> NHWC, C pad 11->16, 2px halo, w/h pad --
    x_nhwc = jnp.transpose(x_nchw, (0, 2, 3, 1))
    x_slab = jnp.pad(x_nhwc, ((0, 0), (2, 2 + h_pad - h),
                              (2, 2 + w_pad - w), (0, C_PAD - C_IN)))
    if n_chunks == 1:
        x_chunks = x_slab                           # (G, tile_h+4, w_pad+4, 16)
    else:
        # Overlapping row chunks carry their own halo (4 duplicated rows per
        # chunk in the small 16-ch input; output is never duplicated).
        x_chunks = jnp.stack(
            [x_slab[:, r * tile_h:r * tile_h + tile_h + 4] for r in range(n_chunks)],
            axis=1).reshape(G, tile_h + 4, w_pad + 4, C_PAD)

    kernel = functools.partial(_embed_kernel, tile_h=tile_h, w_pad=w_pad, b_blk=b_blk)

    out_pad = pl.pallas_call(
        kernel,
        out_shape=jax.ShapeDtypeStruct((G, tile_h, w_pad, N_PAD), jnp.float32),
        grid_spec=pltpu.PrefetchScalarGridSpec(
            num_scalar_prefetch=0,
            grid=(G // b_blk,),
            in_specs=[
                pl.BlockSpec((b_blk, tile_h + 4, w_pad + 4, C_PAD),
                             lambda i: (i, 0, 0, 0)),
                pl.BlockSpec((K_FUSED, N_PAD), lambda i: (0, 0)),
                pl.BlockSpec((1, N_PAD), lambda i: (0, 0)),
            ],
            out_specs=pl.BlockSpec((b_blk, tile_h, w_pad, N_PAD),
                                   lambda i: (i, 0, 0, 0)),
        ),
        compiler_params=pltpu.CompilerParams(
            dimension_semantics=("parallel",),
            vmem_limit_bytes=32 * 1024 * 1024),
    )(x_chunks, wfused, bfused)

    # TODO(synk): for consumers that accept NHWC (or an NCHW-native output block
    # layout), drop this XLA slice+transpose epilogue to cut ~2x output HBM traffic.
    out = out_pad.reshape(n, h_pad, w_pad, N_PAD)[:, :h, :w, :C_OUT]
    return jnp.transpose(out, (0, 3, 1, 2))


def init_params(key):
    """Deterministic synthetic parameters; weights stored HWIO (kh, kw, c_in, c_out)."""
    ks = jax.random.split(key, 8)
    def wt(k, kh, kw, co):
        return (jax.random.normal(k, (kh, kw, C_IN, co), jnp.float32)
                * (1.0 / (kh * kw * C_IN) ** 0.5))
    w1 = wt(ks[0], 1, 1, C1); b1 = jax.random.normal(ks[1], (C1,), jnp.float32) * 0.1
    w2 = wt(ks[2], 3, 3, C2); b2 = jax.random.normal(ks[3], (C2,), jnp.float32) * 0.1
    w3 = wt(ks[4], 5, 5, C3); b3 = jax.random.normal(ks[5], (C3,), jnp.float32) * 0.1
    w4 = wt(ks[6], 1, 1, C4); b4 = jax.random.normal(ks[7], (C4,), jnp.float32) * 0.1
    return (w1, b1, w2, b2, w3, b3, w4, b4)


def _reference(x_nchw, params):
    """Pure-JAX f32 reference using lax conv, mirroring the PyTorch module."""
    w1, b1, w2, b2, w3, b3, w4, b4 = params
    x = jnp.transpose(x_nchw, (0, 2, 3, 1))  # NHWC
    dn = ("NHWC", "HWIO", "NHWC")
    def conv(w, b):
        return lax.conv_general_dilated(x, w, (1, 1), "SAME",
                                        dimension_numbers=dn) + b
    y = jnp.concatenate([conv(w4, b4), conv(w3, b3),
                         conv(w2, b2), conv(w1, b1)], axis=-1)
    return jnp.transpose(y, (0, 3, 1, 2))


if __name__ == "__main__":
    key = jax.random.PRNGKey(0)
    k_x, k_p, k_x2 = jax.random.split(key, 3)
    params = init_params(k_p)

    # Primary shape consistent with the module: batch=2, 11 channels, 16x16.
    x = jax.random.normal(k_x, (2, C_IN, 16, 16), jnp.float32)
    out = jax.block_until_ready(embedding2d_forward(x, params))
    assert out.shape == (2, C_OUT, 16, 16), out.shape
    ref = jax.block_until_ready(_reference(x, params))
    err = float(jnp.max(jnp.abs(out - ref)))
    # bf16 MXU operands with f32 accumulation -> relaxed (not exact-match) tolerance.
    assert jnp.allclose(out, ref, atol=5e-2, rtol=5e-2), f"max abs err {err}"

    # Secondary check: non-square H != W, w padded to a multiple of 8, and
    # multiple halo'd row chunks per image (exercises the tiled grid path).
    x2 = jax.random.normal(k_x2, (1, C_IN, 90, 21), jnp.float32)
    out2 = jax.block_until_ready(embedding2d_forward(x2, params))
    assert out2.shape == (1, C_OUT, 90, 21), out2.shape
    ref2 = jax.block_until_ready(_reference(x2, params))
    err2 = float(jnp.max(jnp.abs(out2 - ref2)))
    assert jnp.allclose(out2, ref2, atol=5e-2, rtol=5e-2), f"max abs err {err2}"

    print("KERNEL_OK")
</pallas_src>

<mosaic_0001>
module attributes {stable_mosaic.version = 11 : i64} {
  func.func @_embed_kernel(%arg0: i32, %arg1: memref<2x20x20x16xf32, #tpu.memory_space<vmem>>, %arg2: memref<400x128xbf16, #tpu.memory_space<vmem>>, %arg3: memref<1x128xf32, #tpu.memory_space<vmem>>, %arg4: memref<2x16x16x128xf32, #tpu.memory_space<vmem>>) attributes {dimension_semantics = [#tpu.dimension_semantics<parallel>], iteration_bounds = array<i64: 1>, scalar_prefetch = 0 : i64, scratch_operands = 0 : i64, tpu.core_type = #tpu.core_type<tc>, window_params = [{transform_indices = @transform_0, window_bounds = array<i64: 2, 20, 20, 16>}, {pipeline_mode = #tpu.pipeline_mode<synchronous>, transform_indices = @transform_1, window_bounds = array<i64: 400, 128>}, {pipeline_mode = #tpu.pipeline_mode<synchronous>, transform_indices = @transform_2, window_bounds = array<i64: 1, 128>}, {transform_indices = @transform_3, window_bounds = array<i64: 2, 16, 16, 128>}]} {
    %c0 = arith.constant 0 : index
    %c0_0 = arith.constant 0 : index
    %0 = vector.load %arg2[%c0, %c0_0] : memref<400x128xbf16, #tpu.memory_space<vmem>>, vector<400x128xbf16>
    %c0_1 = arith.constant 0 : index
    %c0_2 = arith.constant 0 : index
    %1 = vector.load %arg3[%c0_1, %c0_2] : memref<1x128xf32, #tpu.memory_space<vmem>>, vector<1x128xf32>
    %c0_i32 = arith.constant 0 : i32
    %c2_i32 = arith.constant 2 : i32
    %2 = arith.addi %c0_i32, %c2_i32 : i32
    %c1_i32 = arith.constant 1 : i32
    scf.for %arg5 = %c0_i32 to %2 step %c1_i32  : i32 {
      %3 = arith.index_cast %arg5 : i32 to index
      %c0_4 = arith.constant 0 : index
      %c0_5 = arith.constant 0 : index
      %c0_6 = arith.constant 0 : index
      %4 = vector.load %arg1[%3, %c0_4, %c0_5, %c0_6] : memref<2x20x20x16xf32, #tpu.memory_space<vmem>>, vector<1x20x20x16xf32>
      %5 = vector.shape_cast %4 : vector<1x20x20x16xf32> to vector<20x20x16xf32>
      %6 = vector.extract_strided_slice %5 {offsets = [0, 0, 0], sizes = [16, 16, 16], strides = [1, 1, 1]} : vector<20x20x16xf32> to vector<16x16x16xf32>
      %7 = vector.extract_strided_slice %5 {offsets = [0, 1, 0], sizes = [16, 16, 16], strides = [1, 1, 1]} : vector<20x20x16xf32> to vector<16x16x16xf32>
      %8 = vector.extract_strided_slice %5 {offsets = [0, 2, 0], sizes = [16, 16, 16], strides = [1, 1, 1]} : vector<20x20x16xf32> to vector<16x16x16xf32>
      %9 = vector.extract_strided_slice %5 {offsets = [0, 3, 0], sizes = [16, 16, 16], strides = [1, 1, 1]} : vector<20x20x16xf32> to vector<16x16x16xf32>
      %10 = vector.extract_strided_slice %5 {offsets = [0, 4, 0], sizes = [16, 16, 16], strides = [1, 1, 1]} : vector<20x20x16xf32> to vector<16x16x16xf32>
      %11 = vector.extract_strided_slice %5 {offsets = [1, 0, 0], sizes = [16, 16, 16], strides = [1, 1, 1]} : vector<20x20x16xf32> to vector<16x16x16xf32>
      %12 = vector.extract_strided_slice %5 {offsets = [1, 1, 0], sizes = [16, 16, 16], strides = [1, 1, 1]} : vector<20x20x16xf32> to vector<16x16x16xf32>
      %13 = vector.extract_strided_slice %5 {offsets = [1, 2, 0], sizes = [16, 16, 16], strides = [1, 1, 1]} : vector<20x20x16xf32> to vector<16x16x16xf32>
      %14 = vector.extract_strided_slice %5 {offsets = [1, 3, 0], sizes = [16, 16, 16], strides = [1, 1, 1]} : vector<20x20x16xf32> to vector<16x16x16xf32>
      %15 = vector.extract_strided_slice %5 {offsets = [1, 4, 0], sizes = [16, 16, 16], strides = [1, 1, 1]} : vector<20x20x16xf32> to vector<16x16x16xf32>
      %16 = vector.extract_strided_slice %5 {offsets = [2, 0, 0], sizes = [16, 16, 16], strides = [1, 1, 1]} : vector<20x20x16xf32> to vector<16x16x16xf32>
      %17 = vector.extract_strided_slice %5 {offsets = [2, 1, 0], sizes = [16, 16, 16], strides = [1, 1, 1]} : vector<20x20x16xf32> to vector<16x16x16xf32>
      %18 = vector.extract_strided_slice %5 {offsets = [2, 2, 0], sizes = [16, 16, 16], strides = [1, 1, 1]} : vector<20x20x16xf32> to vector<16x16x16xf32>
      %19 = vector.extract_strided_slice %5 {offsets = [2, 3, 0], sizes = [16, 16, 16], strides = [1, 1, 1]} : vector<20x20x16xf32> to vector<16x16x16xf32>
      %20 = vector.extract_strided_slice %5 {offsets = [2, 4, 0], sizes = [16, 16, 16], strides = [1, 1, 1]} : vector<20x20x16xf32> to vector<16x16x16xf32>
      %21 = vector.extract_strided_slice %5 {offsets = [3, 0, 0], sizes = [16, 16, 16], strides = [1, 1, 1]} : vector<20x20x16xf32> to vector<16x16x16xf32>
      %22 = vector.extract_strided_slice %5 {offsets = [3, 1, 0], sizes = [16, 16, 16], strides = [1, 1, 1]} : vector<20x20x16xf32> to vector<16x16x16xf32>
      %23 = vector.extract_strided_slice %5 {offsets = [3, 2, 0], sizes = [16, 16, 16], strides = [1, 1, 1]} : vector<20x20x16xf32> to vector<16x16x16xf32>
      %24 = vector.extract_strided_slice %5 {offsets = [3, 3, 0], sizes = [16, 16, 16], strides = [1, 1, 1]} : vector<20x20x16xf32> to vector<16x16x16xf32>
      %25 = vector.extract_strided_slice %5 {offsets = [3, 4, 0], sizes = [16, 16, 16], strides = [1, 1, 1]} : vector<20x20x16xf32> to vector<16x16x16xf32>
      %26 = vector.extract_strided_slice %5 {offsets = [4, 0, 0], sizes = [16, 16, 16], strides = [1, 1, 1]} : vector<20x20x16xf32> to vector<16x16x16xf32>
      %27 = vector.extract_strided_slice %5 {offsets = [4, 1, 0], sizes = [16, 16, 16], strides = [1, 1, 1]} : vector<20x20x16xf32> to vector<16x16x16xf32>
      %28 = vector.extract_strided_slice %5 {offsets = [4, 2, 0], sizes = [16, 16, 16], strides = [1, 1, 1]} : vector<20x20x16xf32> to vector<16x16x16xf32>
      %29 = vector.extract_strided_slice %5 {offsets = [4, 3, 0], sizes = [16, 16, 16], strides = [1, 1, 1]} : vector<20x20x16xf32> to vector<16x16x16xf32>
      %30 = vector.extract_strided_slice %5 {offsets = [4, 4, 0], sizes = [16, 16, 16], strides = [1, 1, 1]} : vector<20x20x16xf32> to vector<16x16x16xf32>
      %31 = tpu.concatenate %6, %7, %8, %9, %10, %11, %12, %13, %14, %15, %16, %17, %18, %19, %20, %21 in 2 : vector<16x16x16xf32>, vector<16x16x16xf32>, vector<16x16x16xf32>, vector<16x16x16xf32>, vector<16x16x16xf32>, vector<16x16x16xf32>, vector<16x16x16xf32>, vector<16x16x16xf32>, vector<16x16x16xf32>, vector<16x16x16xf32>, vector<16x16x16xf32>, vector<16x16x16xf32>, vector<16x16x16xf32>, vector<16x16x16xf32>, vector<16x16x16xf32>, vector<16x16x16xf32> -> vector<16x16x256xf32>
      %32 = tpu.concatenate %22, %23, %24, %25, %26, %27, %28, %29, %30 in 2 : vector<16x16x16xf32>, vector<16x16x16xf32>, vector<16x16x16xf32>, vector<16x16x16xf32>, vector<16x16x16xf32>, vector<16x16x16xf32>, vector<16x16x16xf32>, vector<16x16x16xf32>, vector<16x16x16xf32> -> vector<16x16x144xf32>
      %33 = tpu.concatenate %31, %32 in 2 : vector<16x16x256xf32>, vector<16x16x144xf32> -> vector<16x16x400xf32>
      %34 = vector.shape_cast %33 : vector<16x16x400xf32> to vector<256x400xf32>
      %35 = arith.truncf %34 : vector<256x400xf32> to vector<256x400xbf16>
      %cst = arith.constant dense<0.000000e+00> : vector<256x128xf32>
      %36 = tpu.matmul %35, %0, %cst {dimension_numbers = #tpu.dot_dimension_numbers<[1], [0], [0], [1], [0, 0, 1, 1], [], []>} : vector<256x400xbf16>, vector<400x128xbf16>, vector<256x128xf32> -> vector<256x128xf32>
      %37 = vector.broadcast %1 : vector<1x128xf32> to vector<256x128xf32>
      %38 = arith.addf %36, %37 : vector<256x128xf32>
      %39 = vector.shape_cast %38 : vector<256x128xf32> to vector<16x16x128xf32>
      %40 = arith.index_cast %arg5 : i32 to index
      %c0_7 = arith.constant 0 : index
      %c0_8 = arith.constant 0 : index
      %c0_9 = arith.constant 0 : index
      %41 = vector.load %arg4[%40, %c0_7, %c0_8, %c0_9] : memref<2x16x16x128xf32, #tpu.memory_space<vmem>>, vector<1x16x16x128xf32>
      %42 = vector.shape_cast %41 : vector<1x16x16x128xf32> to vector<16x16x128xf32>
      %43 = vector.shape_cast %39 : vector<16x16x128xf32> to vector<1x16x16x128xf32>
      tpu.vector_store %arg4[%40, %c0_7, %c0_8, %c0_9], %43 {strides = array<i32>} : memref<2x16x16x128xf32, #tpu.memory_space<vmem>>, vector<1x16x16x128xf32>,
    }
    %c2_i32_3 = arith.constant 2 : i32
    return
  }
  func.func @transform_0(%arg0: i32) -> (i32, i32, i32, i32) {
    %c0_i32 = arith.constant 0 : i32
    %c0_i32_0 = arith.constant 0 : i32
    %c0_i32_1 = arith.constant 0 : i32
    %c0_i32_2 = arith.constant 0 : i32
    return %arg0, %c0_i32, %c0_i32_0, %c0_i32_1 : i32, i32, i32, i32
  }
  func.func @transform_1(%arg0: i32) -> (i32, i32) {
    %c0_i32 = arith.constant 0 : i32
    %c0_i32_0 = arith.constant 0 : i32
    %c0_i32_1 = arith.constant 0 : i32
    return %c0_i32, %c0_i32_0 : i32, i32
  }
  func.func @transform_2(%arg0: i32) -> (i32, i32) {
    %c0_i32 = arith.constant 0 : i32
    %c0_i32_0 = arith.constant 0 : i32
    %c0_i32_1 = arith.constant 0 : i32
    return %c0_i32, %c0_i32_0 : i32, i32
  }
  func.func @transform_3(%arg0: i32) -> (i32, i32, i32, i32) {
    %c0_i32 = arith.constant 0 : i32
    %c0_i32_0 = arith.constant 0 : i32
    %c0_i32_1 = arith.constant 0 : i32
    %c0_i32_2 = arith.constant 0 : i32
    return %arg0, %c0_i32, %c0_i32_0, %c0_i32_1 : i32, i32, i32, i32
  }
}

</mosaic_0001>

<bundles_post_ra>
// kernel: embedding2d_forward.1
= control target key start
LH: loop header
LB: loop body
LE: loop exit
PB: predicated region body
PF: predicated region fallthrough
CT: control target
= control target key end

     0   :  { %s6313_s6 = smov 0   ;;  %s12275_s0 = inlined_call_operand.vmem [shape: f32[2,20,20,16], index: 0, kind: input, shape index: {}]   ;;  %s12276_s1 = inlined_call_operand.vmem [shape: bf16[400,128], index: 1, kind: input, shape index: {}]   ;;  %s12277_s3 = inlined_call_operand.vmem [shape: f32[2,16,16,128], index: 3, kind: output, shape index: {}]   ;;  %s12278_s2 = inlined_call_operand.vmem [shape: f32[1,128], index: 2, kind: input, shape index: {}]  }
   0x1   :  { %v6061_v0 = vld [vmem:[%s12276_s1] sm:$0xf]  ;;  %v6066_v1 = vld [vmem:[%s12276_s1 + $0x4] sm:$0xf]  ;;  %v6071_v2 = vld [vmem:[%s12276_s1 + $0x8] sm:$0xf] }
   0x2   :  { %12901 = vst [vmem:[#allocation2_spill] sm:$0xff] %v6061_v0  ;;  %12902 = vst [vmem:[#allocation3_spill] sm:$0xff] %v6066_v1  ;;  %v6076_v3 = vld [vmem:[%s12276_s1 + $0xc] sm:$0xf]  ;;  %v6081_v4 = vld [vmem:[%s12276_s1 + $0x10] sm:$0xf] }
   0x3   :  { %12903 = vst [vmem:[#allocation4_spill] sm:$0xff] %v6071_v2  ;;  %12904 = vst [vmem:[#allocation5_spill] sm:$0xff] %v6076_v3  ;;  %v6086_v5 = vld [vmem:[%s12276_s1 + $0x14] sm:$0xf]  ;;  %v6091_v6 = vld [vmem:[%s12276_s1 + $0x18] sm:$0xf] }
   0x4   :  { %12905 = vst [vmem:[#allocation6_spill] sm:$0xff] %v6081_v4  ;;  %12906 = vst [vmem:[#allocation7_spill] sm:$0xff] %v6086_v5  ;;  %v6096_v7 = vld [vmem:[%s12276_s1 + $0x1c] sm:$0xf]  ;;  %v6101_v8 = vld [vmem:[%s12276_s1 + $0x20] sm:$0xf] }
   0x5   :  { %12907 = vst [vmem:[#allocation8_spill] sm:$0xff] %v6091_v6  ;;  %12908 = vst [vmem:[#allocation9_spill] sm:$0xff] %v6096_v7  ;;  %v6106_v9 = vld [vmem:[%s12276_s1 + $0x24] sm:$0xf]  ;;  %v6111_v10 = vld [vmem:[%s12276_s1 + $0x28] sm:$0xf] }
   0x6   :  { %12909 = vst [vmem:[#allocation10_spill] sm:$0xff] %v6101_v8  ;;  %12910 = vst [vmem:[#allocation11_spill] sm:$0xff] %v6106_v9  ;;  %v6116_v11 = vld [vmem:[%s12276_s1 + $0x2c] sm:$0xf]  ;;  %v6121_v12 = vld [vmem:[%s12276_s1 + $0x30] sm:$0xf] }
   0x7   :  { %12911 = vst [vmem:[#allocation12_spill] sm:$0xff] %v6111_v10  ;;  %12912 = vst [vmem:[#allocation13_spill] sm:$0xff] %v6116_v11  ;;  %v6126_v13 = vld [vmem:[%s12276_s1 + $0x34] sm:$0xf]  ;;  %v6131_v14 = vld [vmem:[%s12276_s1 + $0x38] sm:$0xf] }
   0x8   :  { %12913 = vst [vmem:[#allocation14_spill] sm:$0xff] %v6121_v12  ;;  %12914 = vst [vmem:[#allocation15_spill] sm:$0xff] %v6126_v13  ;;  %v6136_v15 = vld [vmem:[%s12276_s1 + $0x3c] sm:$0xf]  ;;  %v6141_v16 = vld [vmem:[%s12276_s1 + $0x40] sm:$0xf] }
   0x9   :  { %12915 = vst [vmem:[#allocation16_spill] sm:$0xff] %v6131_v14  ;;  %12916 = vst [vmem:[#allocation17_spill] sm:$0xff] %v6136_v15  ;;  %v6146_v17 = vld [vmem:[%s12276_s1 + $0x44] sm:$0xf]  ;;  %v6151_v18 = vld [vmem:[%s12276_s1 + $0x48] sm:$0xf] }
   0xa   :  { %12917 = vst [vmem:[#allocation18_spill] sm:$0xff] %v6141_v16  ;;  %12918 = vst [vmem:[#allocation19_spill] sm:$0xff] %v6146_v17  ;;  %v6156_v19 = vld [vmem:[%s12276_s1 + $0x4c] sm:$0xf]  ;;  %v6161_v20 = vld [vmem:[%s12276_s1 + $0x50] sm:$0xf] }
   0xb   :  { %12919 = vst [vmem:[#allocation20_spill] sm:$0xff] %v6151_v18  ;;  %12920 = vst [vmem:[#allocation21_spill] sm:$0xff] %v6156_v19  ;;  %v6166_v21 = vld [vmem:[%s12276_s1 + $0x54] sm:$0xf]  ;;  %v6171_v22 = vld [vmem:[%s12276_s1 + $0x58] sm:$0xf] }
   0xc   :  { %12921 = vst [vmem:[#allocation22_spill] sm:$0xff] %v6161_v20  ;;  %12922 = vst [vmem:[#allocation23_spill] sm:$0xff] %v6166_v21  ;;  %v6176_v23 = vld [vmem:[%s12276_s1 + $0x5c] sm:$0xf]  ;;  %v6181_v24 = vld [vmem:[%s12276_s1 + $0x60] sm:$0xf] }
   0xd   :  { %12923 = vst [vmem:[#allocation24_spill] sm:$0xff] %v6171_v22  ;;  %12924 = vst [vmem:[#allocation25_spill] sm:$0xff] %v6176_v23  ;;  %v6186_v25 = vld [vmem:[%s12276_s1 + $0x64] sm:$0xf]  ;;  %v6191_v26 = vld [vmem:[%s12276_s1 + $0x68] sm:$0xf] }
   0xe   :  { %12925 = vst [vmem:[#allocation26_spill] sm:$0xff] %v6181_v24  ;;  %12926 = vst [vmem:[#allocation27_spill] sm:$0xff] %v6186_v25  ;;  %v6196_v27 = vld [vmem:[%s12276_s1 + $0x6c] sm:$0xf]  ;;  %v6201_v28 = vld [vmem:[%s12276_s1 + $0x70] sm:$0xf] }
   0xf   :  { %12927 = vst [vmem:[#allocation28_spill] sm:$0xff] %v6191_v26  ;;  %12928 = vst [vmem:[#allocation29_spill] sm:$0xff] %v6196_v27  ;;  %v6206_v29 = vld [vmem:[%s12276_s1 + $0x74] sm:$0xf]  ;;  %v6211_v30 = vld [vmem:[%s12276_s1 + $0x78] sm:$0xf] }
  0x10   :  { %12929 = vst [vmem:[#allocation30_spill] sm:$0xff] %v6201_v28  ;;  %12930 = vst [vmem:[#allocation31_spill] sm:$0xff] %v6206_v29  ;;  %v6216_v31 = vld [vmem:[%s12276_s1 + $0x7c] sm:$0xf]  ;;  %v6221_v32 = vld [vmem:[%s12276_s1 + $0x80] sm:$0xf] }
  0x11   :  { %12931 = vst [vmem:[#allocation32_spill] sm:$0xff] %v6211_v30  ;;  %12932 = vst [vmem:[#allocation33_spill] sm:$0xff] %v6216_v31  ;;  %v6226_v33 = vld [vmem:[%s12276_s1 + $0x84] sm:$0xf]  ;;  %v6231_v34 = vld [vmem:[%s12276_s1 + $0x88] sm:$0xf] }
  0x12   :  { %12933 = vst [vmem:[#allocation34_spill] sm:$0xff] %v6221_v32  ;;  %12934 = vst [vmem:[#allocation35_spill] sm:$0xff] %v6226_v33  ;;  %v6236_v35 = vld [vmem:[%s12276_s1 + $0x8c] sm:$0xf]  ;;  %v6241_v36 = vld [vmem:[%s12276_s1 + $0x90] sm:$0xf] }
  0x13   :  { %12935 = vst [vmem:[#allocation36_spill] sm:$0xff] %v6231_v34  ;;  %12936 = vst [vmem:[#allocation37_spill] sm:$0xff] %v6236_v35  ;;  %v6246_v37 = vld [vmem:[%s12276_s1 + $0x94] sm:$0xf]  ;;  %v6251_v38 = vld [vmem:[%s12276_s1 + $0x98] sm:$0xf] }
  0x14   :  { %12937 = vst [vmem:[#allocation38_spill] sm:$0xff] %v6241_v36  ;;  %12938 = vst [vmem:[#allocation39_spill] sm:$0xff] %v6246_v37  ;;  %v6256_v39 = vld [vmem:[%s12276_s1 + $0x9c] sm:$0xf]  ;;  %v6261_v40 = vld [vmem:[%s12276_s1 + $0xa0] sm:$0xf] }
  0x15   :  { %12939 = vst [vmem:[#allocation40_spill] sm:$0xff] %v6251_v38  ;;  %12940 = vst [vmem:[#allocation41_spill] sm:$0xff] %v6256_v39  ;;  %v6266_v41 = vld [vmem:[%s12276_s1 + $0xa4] sm:$0xf]  ;;  %v6271_v42 = vld [vmem:[%s12276_s1 + $0xa8] sm:$0xf] }
  0x16   :  { %12941 = vst [vmem:[#allocation42_spill] sm:$0xff] %v6261_v40  ;;  %12942 = vst [vmem:[#allocation43_spill] sm:$0xff] %v6266_v41  ;;  %v6276_v43 = vld [vmem:[%s12276_s1 + $0xac] sm:$0xf]  ;;  %v6281_v44 = vld [vmem:[%s12276_s1 + $0xb0] sm:$0xf] }
  0x17   :  { %12943 = vst [vmem:[#allocation44_spill] sm:$0xff] %v6271_v42  ;;  %12944 = vst [vmem:[#allocation45_spill] sm:$0xff] %v6276_v43  ;;  %v6286_v45 = vld [vmem:[%s12276_s1 + $0xb4] sm:$0xf]  ;;  %v6291_v46 = vld [vmem:[%s12276_s1 + $0xb8] sm:$0xf] }
  0x18   :  { %12945 = vst [vmem:[#allocation46_spill] sm:$0xff] %v6281_v44  ;;  %12946 = vst [vmem:[#allocation47_spill] sm:$0xff] %v6286_v45  ;;  %v6296_v47 = vld [vmem:[%s12276_s1 + $0xbc] sm:$0xf]  ;;  %v6301_v48 = vld [vmem:[%s12276_s1 + $0xc0] sm:$0xf] }
  0x19   :  { %12947 = vst [vmem:[#allocation48_spill] sm:$0xff] %v6291_v46  ;;  %12948 = vst [vmem:[#allocation49_spill] sm:$0xff] %v6296_v47  ;;  %v6306_v49 = vld [vmem:[%s12276_s1 + $0xc4] sm:$0xf]  ;;  %v6311_v50 = vld [vmem:[%s12278_s2] ss:$0 sm:$0xff] }
  0x1a   :  { %12949 = vst [vmem:[#allocation50_spill] sm:$0xff] %v6301_v48  ;;  %12950 = vst [vmem:[#allocation51_spill] sm:$0xff] %v6306_v49 }
  0x1b   :  { %12951 = vst [vmem:[#allocation52_spill] sm:$0xff] %v6311_v50 }
  0x1c LB: > { %s72_s7 = smul.u32 480, %s6028_s6  ;;  %vm182_vm0 = vcmask 1046528   ;;  %s6030_s1 = smov 16   ;;  %vm359_vm1 = vcmask 1045504   ;;  %vm536_vm2 = vcmask 1044480   ;;  %vm713_vm3 = vcmask 1043456   ;;  %s6028_s6 = sphi %s6313_s6, %s71_s6  }
  0x1d   : > { %s6031_s2 = smov 32   ;;  %s6032_s11 = smov 48   ;;  %vm1930_vm4 = vcmask 130048   ;;  %vm1963_vm5 = vcmask 261120   ;;  %vm1996_vm6 = vcmask 392192   ;;  %vm2029_vm7 = vcmask 523264  }
  0x1e   : > { %s6322_s10 = scalar_lea.vmem %s12275_s0, %s72_s7  ;;  %s6033_s12 = smov 64   ;;  %vm2062_vm8 = vcmask 654336   ;;  %vm2095_vm9 = vcmask 785408   ;;  %vm2128_vm10 = vcmask 916480   ;;  %vm2601_vm11 = vcmask 1040384  }
  0x1f   : > { %v6325_v51 = vld [vmem:[%s6322_s10 + $0x30] sm:$0xff]  ;;  %v6328_v52 = vld [vmem:[%s6322_s10 + $0x38] sm:$0xff]  ;;  %v6331_v53 = vld [vmem:[%s6322_s10 + $0x40] sm:$0xf]  ;;  %s6034_s13 = smov 80   ;;  %s6035_s14 = smov 96  }
  0x20   : > { %v193_v54 = vrot.slane %v6325_v51, 1  ;;  %v194_v55 = vrot.slane %v6328_v52, 1  ;;  %v196_v56 = vrot.slane %v6331_v53, 1  ;;  %v6337_v57 = vld [vmem:[%s6322_s10] sm:$0xff]  ;;  %v6340_v58 = vld [vmem:[%s6322_s10 + $0x8] sm:$0xff]  ;;  %v6351_v63 = vld [vmem:[%s6322_s10 + $0x50] sm:$0xff] }
  0x21   : > { %v6343_v59 = vld [vmem:[%s6322_s10 + $0x48] sm:$0xff]  ;;  %v6346_v60 = vld [vmem:[%s6322_s10 + $0x10] sm:$0xf]  ;;  %v183_v61 = vrot.slane %v6337_v57, 1  ;;  %v184_v62 = vrot.slane %v6340_v58, 1  ;;  %v199_v44 = vrot.slane %v6351_v63, 1 }
  0x22   : > { %12952 = vst [vmem:[#allocation53_spill] sm:$0xff] %v6346_v60  ;;  %v198_v50 = vrot.slane %v6343_v59, 1  ;;  %v195_v48 = vsel %vm182_vm0, %v193_v54, %v194_v55  ;;  %v197_v49 = vsel %vm182_vm0, %v194_v55, %v196_v56  ;;  %v186_v46 = vrot.slane %v6346_v60, 1  ;;  %v6358_v47 = vld [vmem:[%s6322_s10 + $0x58] sm:$0xf]  ;;  %v6365_v42 = vld [vmem:[%s6322_s10 + $0x20] sm:$0xff] }
  0x23   : > { %12953 = vst [vmem:[#allocation54_spill] sm:$0xff] %v6358_v47  ;;  %v6362_v45 = vld [vmem:[%s6322_s10 + $0x18] sm:$0xff]  ;;  %12955 = vst [vmem:[#allocation56_spill] sm:$0xff] %v6365_v42  ;;  %v6367_v43 = vpack.i.bf16 %v197_v49, %v195_v48  ;;  %v185_v40 = vsel %vm182_vm0, %v183_v61, %v184_v62  ;;  %v6372_v55 = vld [vmem:[%s6322_s10 + $0x28] sm:$0xf]  ;;  %v189_v48 = vrot.slane %v6365_v42, 1 }
  0x24   : > { %12954 = vst [vmem:[#allocation55_spill] sm:$0xff] %v6362_v45  ;;  %v6375_v56 = vld [vmem:[%s6322_s10 + $0x78] sm:$0xff]  ;;  %v6378_v41 = vld [vmem:[%s6322_s10 + $0x80] sm:$0xff]  ;;  %v187_v38 = vsel %vm182_vm0, %v184_v62, %v186_v46  ;;  %v200_v39 = vsel %vm182_vm0, %v198_v50, %v199_v44  ;;  %v188_v36 = vrot.slane %v6362_v45, 1  ;;  %v6385_v49 = vld [vmem:[%s6322_s10 + $0x88] sm:$0xf] }
  0x25   : > { %12956 = vst [vmem:[#allocation57_spill] sm:$0xff] %v6367_v43  ;;  %12957 = vst [vmem:[#allocation58_spill] sm:$0xff] %v6385_v49  ;;  %v6388_v61 = vld [vmem:[%s6322_s10 + $0x60] sm:$0xff]  ;;  %v6391_v54 = vld [vmem:[%s6322_s10 + $0x68] sm:$0xff]  ;;  %4357 = vrot.lane.b32.xlu1 %v6367_v43, %s6030_s1  ;;  %v4346_v37 = vpack.i.bf16 %v187_v38, %v185_v40  ;;  %v12958_v46 = vrot.slane %v6358_v47, 1  ;;  %v191_v62 = vrot.slane %v6372_v55, 1 }
  0x26   : > { %v208_v14 = vrot.slane %v6375_v56, 1  ;;  %v6401_v15 = vld [vmem:[%s6322_s10 + $0x70] sm:$0xf]  ;;  %v6404_v30 = vld [vmem:[%s6322_s10 + $0xa8] sm:$0xff]  ;;  %v190_v34 = vsel %vm182_vm0, %v188_v36, %v189_v48  ;;  %v209_v38 = vrot.slane %v6378_v41, 1  ;;  %v6411_v40 = vrot.slane %v6385_v49, 1 }
  0x27   : > { %v202_v50 = vsel %vm182_vm0, %v199_v44, %v12958_v46  ;;  %v6414_v44 = vld [vmem:[%s6322_s10 + $0xb0] sm:$0xff]  ;;  %v6417_v46 = vld [vmem:[%s6322_s10 + $0xb8] sm:$0xf]  ;;  %4347 = vrot.lane.b32.xlu0 %v4346_v37, %s6030_s1  ;;  %v192_v35 = vsel %vm182_vm0, %v189_v48, %v191_v62  ;;  %v204_v36 = vrot.slane %v6391_v54, 1  ;;  %v218_v48 = vrot.slane %v6404_v30, 1  ;;  %v6445_v33 = vld [vmem:[%s6322_s10 + $0xe0] sm:$0xff] }
  0x28   : > { %v6406_v31 = vpack.i.bf16 %v202_v50, %v200_v39  ;;  %12960 = vst [vmem:[#allocation60_spill] sm:$0xff] %v6411_v40  ;;  %v203_v39 = vrot.slane %v6388_v61, 1  ;;  %v6424_v50 = vrot.slane %v6401_v15, 1  ;;  %v6427_v12 = vld [vmem:[%s6322_s10 + $0x90] sm:$0xff]  ;;  %v6430_v13 = vld [vmem:[%s6322_s10 + $0x98] sm:$0xff]  ;;  %v6432_v28 = vpack.i.bf16 %v192_v35, %v190_v34  ;;  %v6483_v8 = vld [vmem:[%s6322_s10 + $0x108] sm:$0xff] }
  0x29   : > { %v210_v29 = vsel %vm182_vm0, %v208_v14, %v209_v38  ;;  %v212_v37 = vsel %vm182_vm0, %v209_v38, %v6411_v40  ;;  %v6439_v62 = vld [vmem:[%s6322_s10 + $0xa0] sm:$0xf]  ;;  %v6442_v32 = vld [vmem:[%s6322_s10 + $0xd8] sm:$0xff]  ;;  %v219_v35 = vrot.slane %v6414_v44, 1  ;;  %v6456_v38 = vld [vmem:[%s6322_s10 + $0xe8] sm:$0xf] }
  0x2a   : > { %12959 = vst [vmem:[#allocation59_spill] sm:$0xff] %v6406_v31  ;;  %12961 = vst [vmem:[#allocation61_spill] sm:$0xff] %v6424_v50  ;;  %4362 = vrot.lane.b32.xlu1 %v6406_v31, %s6030_s1  ;;  %v6449_v10 = vpack.i.bf16 %v212_v37, %v210_v29  ;;  %v205_v14 = vsel %vm182_vm0, %v203_v39, %v204_v36  ;;  %v207_v34 = vsel %vm182_vm0, %v204_v36, %v6424_v50  ;;  %v6459_v40 = vld [vmem:[%s6322_s10 + $0xc0] sm:$0xff]  ;;  %v6469_v37 = vld [vmem:[%s6322_s10 + $0xc8] sm:$0xff]  ;;  %s6036_s15 = smov 112   ;;  %s4217_s16 = sshll.u32 %s6028_s6, 8 }
  0x2b   : > { %12962 = vst [vmem:[#allocation62_spill] sm:$0xff] %v6432_v28  ;;  %12963 = vst [vmem:[#allocation63_spill] sm:$0xff] %v6439_v62  ;;  %v6461_v11 = vpack.i.bf16 %v207_v34, %v205_v14  ;;  %v6464_v26 = vrot.slane %v6417_v46, 1  ;;  %v213_v29 = vrot.slane %v6427_v12, 1  ;;  %v214_v39 = vrot.slane %v6430_v13, 1  ;;  %4352 = vrot.lane.b32.xlu0 %v6432_v28, %s6030_s1  ;;  %v6493_v6 = vld [vmem:[%s6322_s10 + $0x110] sm:$0xff]  ;;  %s12207_s19 = scalar_lea.vmem %s12277_s3, %s4217_s16 }
  0x2c   : > { %12964 = vst [vmem:[#allocation64_spill] sm:$0xff] %v6449_v10  ;;  %v220_v36 = vsel %vm182_vm0, %v218_v48, %v219_v35  ;;  %v6475_v14 = vrot.slane %v6439_v62, 1  ;;  %v228_v34 = vrot.slane %v6442_v32, 1  ;;  %v229_v50 = vrot.slane %v6445_v33, 1  ;;  %v6480_v27 = vld [vmem:[%s6322_s10 + $0xd0] sm:$0xf] }
  0x2d   : > { %12965 = vst [vmem:[#allocation65_spill] sm:$0xff] %v6461_v11  ;;  %12966 = vst [vmem:[#allocation66_spill] sm:$0xff] %v6464_v26  ;;  %v222_v9 = vsel %vm182_vm0, %v219_v35, %v6464_v26  ;;  %v215_v24 = vsel %vm182_vm0, %v213_v29, %v214_v39  ;;  %v6489_v48 = vrot.slane %v6456_v38, 1  ;;  %v223_v25 = vrot.slane %v6459_v40, 1  ;;  %v6496_v7 = vld [vmem:[%s6322_s10 + $0x118] sm:$0xf] }
  0x2e   : > { %12967 = vst [vmem:[#allocation67_spill] sm:$0xff] %v6475_v14  ;;  %4372 = vrot.lane.b32.xlu1 %v6449_v10, %s6030_s1  ;;  %v6500_v22 = vpack.i.bf16 %v222_v9, %v220_v36  ;;  %v217_v35 = vsel %vm182_vm0, %v214_v39, %v6475_v14  ;;  %v224_v29 = vrot.slane %v6469_v37, 1  ;;  %v6506_v26 = vld [vmem:[%s6322_s10 + $0xf0] sm:$0xff]  ;;  %v6509_v23 = vld [vmem:[%s6322_s10 + $0xf8] sm:$0xff]  ;;  %v6512_v4 = vld [vmem:[%s6322_s10 + $0x100] sm:$0xf]  ;;  %v230_v5 = vsel %vm182_vm0, %v228_v34, %v229_v50 }
  0x2f   : > { %12968 = vst [vmem:[#allocation68_spill] sm:$0xff] %v6489_v48  ;;  %v232_v9 = vsel %vm182_vm0, %v229_v50, %v6489_v48  ;;  %v6518_v36 = vrot.slane %v6480_v27, 1  ;;  %v238_v39 = vrot.slane %v6483_v8, 1  ;;  %v6522_v14 = vld [vmem:[%s6322_s10 + $0x138] sm:$0xff]  ;;  %4367 = vrot.lane.b32.xlu0 %v6461_v11, %s6030_s1  ;;  %v6526_v20 = vpack.i.bf16 %v217_v35, %v215_v24  ;;  %v6534_v48 = vld [vmem:[%s6322_s10 + $0x140] sm:$0xff]  ;;  %v6550_v19 = vld [vmem:[%s6322_s10 + $0x128] sm:$0xff] }
  0x30   : > { %12969 = vst [vmem:[#allocation69_spill] sm:$0xff] %v6500_v22  ;;  %12971 = vst [vmem:[#allocation71_spill] sm:$0xff] %v6522_v14  ;;  %v225_v34 = vsel %vm182_vm0, %v223_v25, %v224_v29  ;;  %v239_v21 = vrot.slane %v6493_v6, 1  ;;  %v6531_v50 = vrot.slane %v6496_v7, 1  ;;  %v6537_v2 = vld [vmem:[%s6322_s10 + $0x120] sm:$0xff]  ;;  %v233_v18 = vrot.slane %v6506_v26, 1 }
  0x31   : > { %12970 = vst [vmem:[#allocation70_spill] sm:$0xff] %v6518_v36  ;;  %12972 = vst [vmem:[#allocation72_spill] sm:$0xff] %v6526_v20  ;;  %v227_v3 = vsel %vm182_vm0, %v224_v29, %v6518_v36  ;;  %v234_v24 = vrot.slane %v6509_v23, 1  ;;  %v6544_v35 = vrot.slane %v6512_v4, 1  ;;  %v6547_v25 = vld [vmem:[%s6322_s10 + $0x148] sm:$0xf]  ;;  %v6554_v0 = vpack.i.bf16 %v232_v9, %v230_v5 }
  0x32   : > { %12973 = vst [vmem:[#allocation73_spill] sm:$0xff] %v6531_v50  ;;  %12974 = vst [vmem:[#allocation74_spill] sm:$0xff] %v6534_v48  ;;  %4382 = vrot.lane.b32.xlu1 %v6500_v22, %s6030_s1  ;;  %v248_v29 = vrot.slane %v6522_v14, 1  ;;  %v6558_v36 = vld [vmem:[%s6322_s10 + $0x130] sm:$0xf]  ;;  %v240_v1 = vsel %vm182_vm0, %v238_v39, %v239_v21  ;;  %v242_v16 = vsel %vm182_vm0, %v239_v21, %v6531_v50  ;;  %v249_v17 = vrot.slane %v6534_v48, 1 }
  0x33   : > { %12975 = vst [vmem:[#allocation75_spill] sm:$0xff] %v6544_v35  ;;  %12976 = vst [vmem:[#allocation76_spill] sm:$0xff] %v6550_v19  ;;  %v6565_v10 = vld [vmem:[%s6322_s10 + $0x168] sm:$0xff]  ;;  %4377 = vrot.lane.b32.xlu0 %v6526_v20, %s6030_s1  ;;  %v6569_v5 = vpack.i.bf16 %v227_v3, %v225_v34  ;;  %v6572_v9 = vrot.slane %v6547_v25, 1  ;;  %v243_v39 = vrot.slane %v6537_v2, 1  ;;  %v244_v22 = vrot.slane %v6550_v19, 1 }
  0x34   : > { %12977 = vst [vmem:[#allocation77_spill] sm:$0xff] %v6554_v0  ;;  %12978 = vst [vmem:[#allocation78_spill] sm:$0xff] %v6558_v36  ;;  %v6577_v21 = vld [vmem:[%s6322_s10 + $0x170] sm:$0xff]  ;;  %v6580_v50 = vld [vmem:[%s6322_s10 + $0x178] sm:$0xf]  ;;  %v235_v31 = vsel %vm182_vm0, %v233_v18, %v234_v24  ;;  %v237_v11 = vsel %vm182_vm0, %v234_v24, %v6544_v35  ;;  %v6586_v20 = vrot.slane %v6558_v36, 1  ;;  %v6590_v3 = vpack.i.bf16 %v242_v16, %v240_v1 }
  0x35   : > { %12979 = vst [vmem:[#allocation79_spill] sm:$0xff] %v6569_v5  ;;  %12980 = vst [vmem:[#allocation80_spill] sm:$0xff] %v6572_v9  ;;  %v250_v34 = vsel %vm182_vm0, %v248_v29, %v249_v17  ;;  %v6594_v28 = vld [vmem:[%s6322_s10 + $0x150] sm:$0xff]  ;;  %v6597_v43 = vld [vmem:[%s6322_s10 + $0x158] sm:$0xff]  ;;  %v252_v18 = vsel %vm182_vm0, %v249_v17, %v6572_v9  ;;  %v258_v24 = vrot.slane %v6565_v10, 1  ;;  %v259_v35 = vrot.slane %v6577_v21, 1 }
  0x36   : > { %12981 = vst [vmem:[#allocation81_spill] sm:$0xff] %v6580_v50  ;;  %12982 = vst [vmem:[#allocation82_spill] sm:$0xff] %v6586_v20  ;;  %4392 = vrot.lane.b32.xlu1 %v6554_v0, %s6030_s1  ;;  %v6600_v19 = vld [vmem:[%s6322_s10 + $0x160] sm:$0xf]  ;;  %v6607_v36 = vrot.slane %v6580_v50, 1  ;;  %v6611_v1 = vpack.i.bf16 %v237_v11, %v235_v31  ;;  %v245_v16 = vsel %vm182_vm0, %v243_v39, %v244_v22  ;;  %v253_v0 = vrot.slane %v6594_v28, 1 }
  0x37   : > { %12983 = vst [vmem:[#allocation83_spill] sm:$0xff] %v6590_v3  ;;  %12984 = vst [vmem:[#allocation84_spill] sm:$0xff] %v6600_v19  ;;  %4387 = vrot.lane.b32.xlu0 %v6569_v5, %s6030_s1  ;;  %v247_v29 = vsel %vm182_vm0, %v244_v22, %v6586_v20  ;;  %v254_v17 = vrot.slane %v6597_v43, 1  ;;  %v6619_v9 = vrot.slane %v6600_v19, 1  ;;  %v6623_v50 = vpack.i.bf16 %v252_v18, %v250_v34  ;;  %s71_s6 = sadd.s32 1, %s6028_s6  }
  0x38   : > { %12985 = vst [vmem:[#allocation85_spill] sm:$0xff] %v6607_v36  ;;  %12986 = vst [vmem:[#allocation86_spill] sm:$0xff] %v6611_v1  ;;  %v365_v11 = vrot.slane %v6362_v45, 2  ;;  %v366_v31 = vrot.slane %v6365_v42, 2  ;;  %v260_v39 = vsel %vm182_vm0, %v258_v24, %v259_v35  ;;  %v262_v22 = vsel %vm182_vm0, %v259_v35, %v6607_v36  ;;  %p68_p0 = scmp.ge.s32.totalorder %s71_s6, 2  }
  0x39   : > { %12987 = vst [vmem:[#allocation87_spill] sm:$0xff] %v6619_v9  ;;  %12988 = vst [vmem:[#allocation88_spill] sm:$0xff] %v6623_v50  ;;  %v368_v20 = vrot.slane %v6372_v55, 2  ;;  %v6633_v5 = vpack.i.bf16 %v247_v29, %v245_v16  ;;  %v360_v34 = vrot.slane %v6337_v57, 2  ;;  %v361_v18 = vrot.slane %v6340_v58, 2 }
  0x3a   : > { %4402 = vrot.lane.b32.xlu1 %v6590_v3, %s6030_s1  ;;  %v255_v3 = vsel %vm182_vm0, %v253_v0, %v254_v17  ;;  %v257_v24 = vsel %vm182_vm0, %v254_v17, %v6619_v9  ;;  %v363_v42 = vrot.slane %v6346_v60, 2  ;;  %v6643_v35 = vpack.i.bf16 %v262_v22, %v260_v39 }
  0x3b   : > { %4397 = vrot.lane.b32.xlu0 %v6611_v1, %s6030_s1  ;;  %12989 = vst [vmem:[#allocation89_spill] sm:$0xff] %v6633_v5  ;;  %v367_v36 = vsel %vm359_vm1, %v365_v11, %v366_v31  ;;  %v369_v16 = vsel %vm359_vm1, %v366_v31, %v368_v20  ;;  %v375_v29 = vrot.slane %v6343_v59, 2  ;;  %v376_v1 = vrot.slane %v6351_v63, 2 }
  0x3c   : > { %12990 = vst [vmem:[#allocation90_spill] sm:$0xff] %v6643_v35  ;;  %v6652_v17 = vpack.i.bf16 %v257_v24, %v255_v3  ;;  %v362_v9 = vsel %vm359_vm1, %v360_v34, %v361_v18  ;;  %v364_v39 = vsel %vm359_vm1, %v361_v18, %v363_v42  ;;  %v370_v22 = vrot.slane %v6325_v51, 2 }
  0x3d   : > { %v371_v11 = vrot.slane %v6328_v52, 2  ;;  %v373_v20 = vrot.slane %v6331_v53, 2  ;;  %v6661_v31 = vpack.i.bf16 %v369_v16, %v367_v36  ;;  %v385_v0 = vrot.slane %v6375_v56, 2 }
  0x3e   : > { %4412 = vrot.lane.b32.xlu1 %v6623_v50, %s6030_s1  ;;  %12991 = vst [vmem:[#allocation91_spill] sm:$0xff] %v6652_v17  ;;  %v386_v3 = vrot.slane %v6378_v41, 2  ;;  %v377_v24 = vsel %vm359_vm1, %v375_v29, %v376_v1  ;;  %v12993_v34 = vrot.slane %v6358_v47, 2  ;;  %v12339_v18 = vrot.slane %v6385_v49, 2 }
  0x3f   : > { %4407 = vrot.lane.b32.xlu0 %v6633_v5, %s6030_s1  ;;  %12992 = vst [vmem:[#allocation92_spill] sm:$0xff] %v6661_v31  ;;  %v4426_v50 = vpack.i.bf16 %v364_v39, %v362_v9  ;;  %v381_v36 = vrot.slane %v6391_v54, 2  ;;  %v372_v16 = vsel %vm359_vm1, %v370_v22, %v371_v11  ;;  %v374_v5 = vsel %vm359_vm1, %v371_v11, %v373_v20 }
  0x40   : > { %v379_v42 = vsel %vm359_vm1, %v376_v1, %v12993_v34  ;;  %v6677_v29 = vrot.slane %v6401_v15, 2  ;;  %v387_v34 = vsel %vm359_vm1, %v385_v0, %v386_v3  ;;  %v389_v9 = vsel %vm359_vm1, %v386_v3, %v12339_v18 }
  0x41   : > { %v6681_v1 = vpack.i.bf16 %v379_v42, %v377_v24  ;;  %v395_v39 = vrot.slane %v6404_v30, 2  ;;  %v396_v22 = vrot.slane %v6414_v44, 2  ;;  %v6690_v11 = vrot.slane %v6417_v46, 2 }
  0x42   : > { %4422 = vrot.lane.b32.xlu1 %v6643_v35, %s6030_s1  ;;  %v380_v35 = vrot.slane %v6388_v61, 2  ;;  %12994 = vst [vmem:[#allocation93_spill] sm:$0xff] %v6677_v29  ;;  %v6693_v20 = vpack.i.bf16 %v374_v5, %v372_v16  ;;  %v384_v0 = vsel %vm359_vm1, %v381_v36, %v6677_v29  ;;  %v390_v42 = vrot.slane %v6427_v12, 2 }
  0x43   : > { %4417 = vrot.lane.b32.xlu0 %v6652_v17, %s6030_s1  ;;  %12995 = vst [vmem:[#allocation94_spill] sm:$0xff] %v6681_v1  ;;  %12996 = vst [vmem:[#allocation95_spill] sm:$0xff] %v6690_v11  ;;  %v391_v3 = vrot.slane %v6430_v13, 2  ;;  %v406_v5 = vrot.slane %v6445_v33, 2  ;;  %v6711_v16 = vrot.slane %v6456_v38, 2  ;;  %v6736_v17 = vrot.slane %v6496_v7, 2 }
  0x44   : > { %12997 = vst [vmem:[#allocation96_spill] sm:$0xff] %v6693_v20  ;;  %v382_v24 = vsel %vm359_vm1, %v380_v35, %v381_v36  ;;  %v397_v35 = vsel %vm359_vm1, %v395_v39, %v396_v22  ;;  %v399_v36 = vsel %vm359_vm1, %v396_v22, %v6690_v11  ;;  %v6724_v22 = vrot.slane %v6480_v27, 2 }
  0x45   : > { %12999 = vst [vmem:[#allocation98_spill] sm:$0xff] %v6711_v16  ;;  %v6715_v18 = vpack.i.bf16 %v384_v0, %v382_v24  ;;  %v392_v29 = vsel %vm359_vm1, %v390_v42, %v391_v3  ;;  %v6728_v11 = vpack.i.bf16 %v399_v36, %v397_v35  ;;  %v409_v0 = vsel %vm359_vm1, %v406_v5, %v6711_v16 }
  0x46   : > { %4432 = vrot.lane.b32.xlu1 %v6661_v31, %s6031_s2  ;;  %v6703_v31 = vpack.i.bf16 %v389_v9, %v387_v34  ;;  %v400_v34 = vrot.slane %v6459_v40, 2  ;;  %v401_v9 = vrot.slane %v6469_v37, 2  ;;  %13002 = vst [vmem:[#allocation100_spill] sm:$0xff] %v6724_v22  ;;  %v416_v42 = vrot.slane %v6493_v6, 2  ;;  %13004 = vst [vmem:[#allocation102_spill] sm:$0xff] %v6736_v17 }
  0x47   : > { %4427 = vrot.lane.b32.xlu0 %v4426_v50, %s6031_s2  ;;  %v405_v50 = vrot.slane %v6442_v32, 2  ;;  %13000 = vst [vmem:[#allocation99_spill] sm:$0xff] %v6715_v18  ;;  %13003 = vst [vmem:[#allocation101_spill] sm:$0xff] %v6728_v11  ;;  %v410_v35 = vrot.slane %v6506_v26, 2  ;;  %v6748_v36 = vrot.slane %v6512_v4, 2 }
  0x48   : > { %12998 = vst [vmem:[#allocation97_spill] sm:$0xff] %v6703_v31 }
  0x49   : > { %v407_v24 = vsel %vm359_vm1, %v405_v50, %v406_v5  ;;  %v404_v50 = vsel %vm359_vm1, %v401_v9, %v6724_v22  ;;  %v411_v5 = vrot.slane %v6509_v23, 2  ;;  %13006 = vst [vmem:[#allocation104_spill] sm:$0xff] %v6748_v36  ;;  %v6760_v22 = vrot.slane %v6547_v25, 2 }
  0x4a   : > { %4442 = vrot.lane.b32.xlu1 %v6681_v1, %s6031_s2  ;;  %v13001_v1 = vrot.slane %v6439_v62, 2  ;;  %v6752_v16 = vpack.i.bf16 %v409_v0, %v407_v24  ;;  %v420_v24 = vrot.slane %v6537_v2, 2  ;;  %v13010_v0 = vld [vmem:[#allocation76_spill] sm:$0xff] }
  0x4b   : > { %4437 = vrot.lane.b32.xlu0 %v6693_v20, %s6031_s2  ;;  %v415_v20 = vrot.slane %v6483_v8, 2  ;;  %13008 = vst [vmem:[#allocation106_spill] sm:$0xff] %v6760_v22 }
  0x4c   : > { %v394_v39 = vsel %vm359_vm1, %v391_v3, %v13001_v1  ;;  %v402_v3 = vsel %vm359_vm1, %v400_v34, %v401_v9  ;;  %13007 = vst [vmem:[#allocation105_spill] sm:$0xff] %v6752_v16  ;;  %v419_v9 = vsel %vm359_vm1, %v416_v42, %v6736_v17  ;;  %v435_v17 = vrot.slane %v6565_v10, 2 }
  0x4d   : > { %v6740_v1 = vpack.i.bf16 %v394_v39, %v392_v29  ;;  %v425_v29 = vrot.slane %v6522_v14, 2  ;;  %v426_v39 = vrot.slane %v6534_v48, 2  ;;  %v417_v34 = vsel %vm359_vm1, %v415_v20, %v416_v42  ;;  %v13011_v48 = vld [vmem:[#allocation78_spill] sm:$0xff] }
  0x4e   : > { %4452 = vrot.lane.b32.xlu1 %v6703_v31, %s6031_s2  ;;  %v6764_v31 = vpack.i.bf16 %v404_v50, %v402_v3  ;;  %v414_v20 = vsel %vm359_vm1, %v411_v5, %v6748_v36  ;;  %v6772_v14 = vrot.slane %v13011_v48, 2  ;;  %v6776_v42 = vpack.i.bf16 %v419_v9, %v417_v34 }
  0x4f   : > { %4447 = vrot.lane.b32.xlu0 %v6715_v18, %s6031_s2  ;;  %13005 = vst [vmem:[#allocation103_spill] sm:$0xff] %v6740_v1  ;;  %v412_v18 = vsel %vm359_vm1, %v410_v35, %v411_v5  ;;  %v427_v3 = vsel %vm359_vm1, %v425_v29, %v426_v39  ;;  %v429_v50 = vsel %vm359_vm1, %v426_v39, %v6760_v22  ;;  %v436_v35 = vrot.slane %v6577_v21, 2 }
  0x50   : > { %13009 = vst [vmem:[#allocation107_spill] sm:$0xff] %v6764_v31  ;;  %13012 = vst [vmem:[#allocation78_spill] sm:$0xff] %v6772_v14  ;;  %v6788_v5 = vpack.i.bf16 %v414_v20, %v412_v18  ;;  %v430_v9 = vrot.slane %v6594_v28, 2  ;;  %v431_v39 = vrot.slane %v6597_v43, 2  ;;  %v6796_v22 = vrot.slane %v6600_v19, 2  ;;  %v13019_v20 = vld [vmem:[#allocation56_spill] sm:$0xff] }
  0x51   : > { %13013 = vst [vmem:[#allocation108_spill] sm:$0xff] %v6776_v42  ;;  %v6800_v36 = vpack.i.bf16 %v429_v50, %v427_v3  ;;  %v542_v18 = vrot.slane %v6362_v45, 3  ;;  %v537_v3 = vrot.slane %v6337_v57, 3  ;;  %v538_v50 = vrot.slane %v6340_v58, 3 }
  0x52   : > { %4462 = vrot.lane.b32.xlu1 %v6728_v11, %s6031_s2  ;;  %v421_v11 = vrot.slane %v13010_v0, 2  ;;  %13016 = vst [vmem:[#allocation109_spill] sm:$0xff] %v6788_v5  ;;  %13017 = vst [vmem:[#allocation110_spill] sm:$0xff] %v6796_v22  ;;  %v432_v19 = vsel %vm359_vm1, %v430_v9, %v431_v39  ;;  %v6843_v9 = vrot.slane %v6385_v49, 3 }
  0x53   : > { %4457 = vrot.lane.b32.xlu0 %v6740_v1, %s6031_s2  ;;  %v13014_v1 = vld [vmem:[#allocation81_spill] sm:$0xff]  ;;  %13018 = vst [vmem:[#allocation111_spill] sm:$0xff] %v6800_v36 }
  0x54   : > { %v6784_v0 = vrot.slane %v13014_v1, 2  ;;  %v422_v34 = vsel %vm359_vm1, %v420_v24, %v421_v11  ;;  %v424_v29 = vsel %vm359_vm1, %v421_v11, %v6772_v14  ;;  %v545_v24 = vrot.slane %v6372_v55, 3  ;;  %13025 = vst [vmem:[#allocation117_spill] sm:$0xff] %v6843_v9 }
  0x55   : > { %v437_v11 = vsel %vm359_vm1, %v435_v17, %v436_v35  ;;  %v434_v17 = vsel %vm359_vm1, %v431_v39, %v6796_v22  ;;  %v548_v39 = vrot.slane %v6328_v52, 3  ;;  %v563_v22 = vrot.slane %v6378_v41, 3 }
  0x56   : > { %4472 = vrot.lane.b32.xlu1 %v6752_v16, %s6031_s2  ;;  %13015 = vst [vmem:[#allocation81_spill] sm:$0xff] %v6784_v0  ;;  %v543_v16 = vrot.slane %v13019_v20, 3  ;;  %v439_v14 = vsel %vm359_vm1, %v436_v35, %v6784_v0 }
  0x57   : > { %4467 = vrot.lane.b32.xlu0 %v6764_v31, %s6031_s2  ;;  %v6810_v31 = vpack.i.bf16 %v424_v29, %v422_v34  ;;  %v6820_v35 = vpack.i.bf16 %v439_v14, %v437_v11  ;;  %v552_v29 = vrot.slane %v6343_v59, 3  ;;  %v6835_v14 = vpack.i.bf16 %v434_v17, %v432_v19 }
  0x58   : > { %v6823_v0 = vsel %vm536_vm2, %v542_v18, %v543_v16  ;;  %v6826_v34 = vsel %vm536_vm2, %v543_v16, %v545_v24  ;;  %v539_v18 = vsel %vm536_vm2, %v537_v3, %v538_v50  ;;  %v550_v24 = vrot.slane %v6331_v53, 3 }
  0x59   : > { %13020 = vst [vmem:[#allocation112_spill] sm:$0xff] %v6810_v31  ;;  %13021 = vst [vmem:[#allocation113_spill] sm:$0xff] %v6820_v35  ;;  %v562_v11 = vrot.slane %v6375_v56, 3  ;;  %v4511_v19 = vpack.i.bf16 %v6826_v34, %v6823_v0 }
  0x5a   : > { %4482 = vrot.lane.b32.xlu1 %v6776_v42, %s6031_s2  ;;  %v540_v42 = vrot.slane %v6346_v60, 3  ;;  %13022 = vst [vmem:[#allocation114_spill] sm:$0xff] %v6823_v0  ;;  %13023 = vst [vmem:[#allocation115_spill] sm:$0xff] %v6826_v34  ;;  %v547_v60 = vrot.slane %v6325_v51, 3  ;;  %v557_v0 = vrot.slane %v6388_v61, 3 }
  0x5b   : > { %4477 = vrot.lane.b32.xlu0 %v6788_v5, %s6031_s2  ;;  %v553_v5 = vrot.slane %v6351_v63, 3  ;;  %13024 = vst [vmem:[#allocation116_spill] sm:$0xff] %v6835_v14 }
  0x5c   : > { %v541_v16 = vsel %vm536_vm2, %v538_v50, %v540_v42  ;;  %v13027_v42 = vrot.slane %v6358_v47, 3 }
  0x5d   : > { %v4506_v17 = vpack.i.bf16 %v541_v16, %v539_v18  ;;  %v6850_v3 = vsel %vm536_vm2, %v552_v29, %v553_v5  ;;  %v558_v18 = vrot.slane %v6391_v54, 3  ;;  %v6868_v29 = vrot.slane %v6401_v15, 3 }
  0x5e   : > { %4492 = vrot.lane.b32.xlu1 %v6800_v36, %s6031_s2  ;;  %13026 = vst [vmem:[#allocation118_spill] sm:$0xff] %v6850_v3  ;;  %v6855_v50 = vsel %vm536_vm2, %v553_v5, %v13027_v42  ;;  %v6858_v36 = vsel %vm536_vm2, %v547_v60, %v548_v39  ;;  %v6871_v16 = vsel %vm536_vm2, %v562_v11, %v563_v22  ;;  %v572_v5 = vrot.slane %v6404_v30, 3 }
  0x5f   : > { %4487 = vrot.lane.b32.xlu0 %v6810_v31, %s6031_s2  ;;  %13028 = vst [vmem:[#allocation119_spill] sm:$0xff] %v6855_v50  ;;  %13029 = vst [vmem:[#allocation120_spill] sm:$0xff] %v6858_v36  ;;  %v6875_v60 = vsel %vm536_vm2, %v563_v22, %v6843_v9  ;;  %v573_v42 = vrot.slane %v6414_v44, 3  ;;  %v6897_v34 = vsel %vm536_vm2, %v557_v0, %v558_v18 }
  0x60   : > { %13031 = vst [vmem:[#allocation122_spill] sm:$0xff] %v6868_v29  ;;  %13032 = vst [vmem:[#allocation123_spill] sm:$0xff] %v6871_v16  ;;  %v6894_v11 = vpack.i.bf16 %v6875_v60, %v6871_v16 }
  0x61   : > { %13033 = vst [vmem:[#allocation124_spill] sm:$0xff] %v6875_v60  ;;  %13038 = vst [vmem:[#allocation129_spill] sm:$0xff] %v6897_v34  ;;  %v588_v60 = vrot.slane %v6509_v23, 3 }
  0x62   : > { %4502 = vrot.lane.b32.xlu1 %v6820_v35, %s6031_s2  ;;  %v6863_v35 = vsel %vm536_vm2, %v548_v39, %v550_v24  ;;  %v6882_v39 = vpack.i.bf16 %v6855_v50, %v6850_v3  ;;  %v6885_v24 = vrot.slane %v6417_v46, 3  ;;  %13037 = vst [vmem:[#allocation128_spill] sm:$0xff] %v6894_v11  ;;  %v6904_v3 = vsel %vm536_vm2, %v572_v5, %v573_v42 }
  0x63   : > { %4497 = vrot.lane.b32.xlu0 %v6835_v14, %s6031_s2  ;;  %13030 = vst [vmem:[#allocation121_spill] sm:$0xff] %v6863_v35  ;;  %v6890_v22 = vpack.i.bf16 %v6863_v35, %v6858_v36  ;;  %13040 = vst [vmem:[#allocation131_spill] sm:$0xff] %v6904_v3  ;;  %v568_v50 = vrot.slane %v6430_v13, 3  ;;  %v6909_v36 = vrot.slane %v6439_v62, 3  ;;  %v583_v35 = vrot.slane %v6445_v33, 3 }
  0x64   : > { %13034 = vst [vmem:[#allocation125_spill] sm:$0xff] %v6882_v39  ;;  %13035 = vst [vmem:[#allocation126_spill] sm:$0xff] %v6885_v24  ;;  %v6915_v0 = vsel %vm536_vm2, %v573_v42, %v6885_v24  ;;  %v6920_v5 = vrot.slane %v6456_v38, 3 }
  0x65   : > { %13036 = vst [vmem:[#allocation127_spill] sm:$0xff] %v6890_v22  ;;  %13041 = vst [vmem:[#allocation132_spill] sm:$0xff] %v6909_v36  ;;  %v6932_v42 = vpack.i.bf16 %v6915_v0, %v6904_v3  ;;  %v6939_v16 = vsel %vm536_vm2, %v568_v50, %v6909_v36  ;;  %v593_v3 = vrot.slane %v6493_v6, 3  ;;  %v719_v36 = vrot.slane %v6362_v45, 4 }
  0x66   : > { %4512 = vrot.lane.b32.xlu1 %v4511_v19, %s6032_s11  ;;  %v6901_v19 = vsel %vm536_vm2, %v558_v18, %v6868_v29  ;;  %13042 = vst [vmem:[#allocation133_spill] sm:$0xff] %v6915_v0  ;;  %v582_v18 = vrot.slane %v6442_v32, 3  ;;  %13043 = vst [vmem:[#allocation134_spill] sm:$0xff] %v6920_v5  ;;  %v577_v29 = vrot.slane %v6459_v40, 3  ;;  %v720_v0 = vrot.slane %v13019_v20, 4  ;;  %v13058_v20 = vld [vmem:[#allocation74_spill] sm:$0xff] }
  0x67   : > { %4507 = vrot.lane.b32.xlu0 %v4506_v17, %s6032_s11  ;;  %13039 = vst [vmem:[#allocation130_spill] sm:$0xff] %v6901_v19  ;;  %v567_v17 = vrot.slane %v6427_v12, 3  ;;  %v6926_v9 = vpack.i.bf16 %v6901_v19, %v6897_v34  ;;  %13045 = vst [vmem:[#allocation136_spill] sm:$0xff] %v6932_v42  ;;  %v6951_v34 = vsel %vm536_vm2, %v583_v35, %v6920_v5  ;;  %v587_v5 = vrot.slane %v6506_v26, 3 }
  0x68   : > { %13047 = vst [vmem:[#allocation138_spill] sm:$0xff] %v6939_v16  ;;  %v6947_v19 = vsel %vm536_vm2, %v582_v18, %v583_v35  ;;  %13050 = vst [vmem:[#allocation141_spill] sm:$0xff] %v6951_v34  ;;  %v603_v45 = vrot.slane %v13058_v20, 3 }
  0x69   : > { %13044 = vst [vmem:[#allocation135_spill] sm:$0xff] %v6926_v9  ;;  %v6935_v24 = vsel %vm536_vm2, %v567_v17, %v568_v50  ;;  %13049 = vst [vmem:[#allocation140_spill] sm:$0xff] %v6947_v19  ;;  %v592_v17 = vrot.slane %v6483_v8, 3  ;;  %v6956_v50 = vrot.slane %v6496_v7, 3 }
  0x6a   : > { %4522 = vrot.lane.b32.xlu1 %v6882_v39, %s6032_s11  ;;  %v578_v39 = vrot.slane %v6469_v37, 3  ;;  %13046 = vst [vmem:[#allocation137_spill] sm:$0xff] %v6935_v24  ;;  %v6965_v35 = vpack.i.bf16 %v6939_v16, %v6935_v24  ;;  %v13057_v24 = vld [vmem:[#allocation71_spill] sm:$0xff] }
  0x6b   : > { %4517 = vrot.lane.b32.xlu0 %v6890_v22, %s6032_s11  ;;  %v6942_v22 = vrot.slane %v6480_v27, 3  ;;  %13051 = vst [vmem:[#allocation142_spill] sm:$0xff] %v6956_v50  ;;  %v602_v16 = vrot.slane %v13057_v24, 3 }
  0x6c   : > { %13052 = vst [vmem:[#allocation143_spill] sm:$0xff] %v6965_v35  ;;  %v6968_v18 = vsel %vm536_vm2, %v577_v29, %v578_v39  ;;  %v6985_v29 = vpack.i.bf16 %v6951_v34, %v6947_v19  ;;  %v5944_v34 = vld [vmem:[%s6322_s10 + $0x8] sm:$0xff] }
  0x6d   : > { %13048 = vst [vmem:[#allocation139_spill] sm:$0xff] %v6942_v22  ;;  %13053 = vst [vmem:[#allocation144_spill] sm:$0xff] %v6968_v18  ;;  %v6974_v14 = vsel %vm536_vm2, %v578_v39, %v6942_v22  ;;  %v6992_v22 = vsel %vm536_vm2, %v592_v17, %v593_v3  ;;  %v13065_v17 = vld [vmem:[#allocation76_spill] sm:$0xff] }
  0x6e   : > { %4532 = vrot.lane.b32.xlu1 %v6894_v11, %s6032_s11  ;;  %v722_v11 = vrot.slane %v6372_v55, 4  ;;  %13054 = vst [vmem:[#allocation145_spill] sm:$0xff] %v6974_v14  ;;  %v6977_v55 = vrot.slane %v6512_v4, 3  ;;  %13056 = vst [vmem:[#allocation147_spill] sm:$0xff] %v6985_v29 }
  0x6f   : > { %4527 = vrot.lane.b32.xlu0 %v6926_v9, %s6032_s11  ;;  %v721_v9 = vsel %vm713_vm3, %v719_v36, %v720_v0  ;;  %13059 = vst [vmem:[#allocation71_spill] sm:$0xff] %v6992_v22  ;;  %v6996_v36 = vsel %vm536_vm2, %v593_v3, %v6956_v50  ;;  %v597_v3 = vrot.slane %v6537_v2, 3  ;;  %v598_v50 = vrot.slane %v13065_v17, 3 }
  0x70   : > { %13055 = vst [vmem:[#allocation146_spill] sm:$0xff] %v6977_v55  ;;  %v723_v31 = vsel %vm713_vm3, %v720_v0, %v722_v11  ;;  %13060 = vst [vmem:[#allocation74_spill] sm:$0xff] %v6996_v36  ;;  %v6999_v11 = vrot.slane %v6547_v25, 3  ;;  %v7005_v0 = vpack.i.bf16 %v6974_v14, %v6968_v18  ;;  %v613_v18 = vrot.slane %v6577_v21, 3 }
  0x71   : > { %v6989_v39 = vpack.i.bf16 %v723_v31, %v721_v9  ;;  %v7008_v31 = vsel %vm536_vm2, %v587_v5, %v588_v60  ;;  %v7012_v9 = vsel %vm536_vm2, %v588_v60, %v6977_v55  ;;  %v7026_v5 = vsel %vm536_vm2, %v602_v16, %v603_v45 }
  0x72   : > { %4542 = vrot.lane.b32.xlu1 %v6932_v42, %s6032_s11  ;;  %13061 = vst [vmem:[#allocation148_spill] sm:$0xff] %v6999_v11  ;;  %13062 = vst [vmem:[#allocation149_spill] sm:$0xff] %v7005_v0  ;;  %v7017_v42 = vrot.slane %v13011_v48, 3  ;;  %v7030_v60 = vsel %vm536_vm2, %v603_v45, %v6999_v11  ;;  %v612_v55 = vrot.slane %v6565_v10, 3  ;;  %v7035_v14 = vrot.slane %v13014_v1, 3 }
  0x73   : > { %4537 = vrot.lane.b32.xlu0 %v6965_v35, %s6032_s11  ;;  %13063 = vst [vmem:[#allocation150_spill] sm:$0xff] %v7008_v31  ;;  %13064 = vst [vmem:[#allocation151_spill] sm:$0xff] %v7012_v9  ;;  %v7023_v35 = vpack.i.bf16 %v6996_v36, %v6992_v22  ;;  %v607_v16 = vrot.slane %v6594_v28, 3  ;;  %v7045_v22 = vsel %vm536_vm2, %v597_v3, %v598_v50  ;;  %v608_v11 = vrot.slane %v6597_v43, 3  ;;  %v13074_v36 = vld [vmem:[#allocation84_spill] sm:$0xff] }
  0x74   : > { %13066 = vst [vmem:[#allocation76_spill] sm:$0xff] %v7017_v42  ;;  %13068 = vst [vmem:[#allocation153_spill] sm:$0xff] %v7026_v5  ;;  %v7049_v45 = vsel %vm536_vm2, %v598_v50, %v7017_v42  ;;  %v7053_v19 = vrot.slane %v13074_v36, 3  ;;  %v7066_v3 = vsel %vm536_vm2, %v613_v18, %v7035_v14  ;;  %v714_v42 = vrot.slane %v6337_v57, 4 }
  0x75   : > { %13067 = vst [vmem:[#allocation152_spill] sm:$0xff] %v7023_v35  ;;  %13069 = vst [vmem:[#allocation154_spill] sm:$0xff] %v7030_v60  ;;  %v7072_v50 = vpack.i.bf16 %v7049_v45, %v7045_v22  ;;  %v729_v57 = vrot.slane %v6343_v59, 4 }
  0x76   : > { %4552 = vrot.lane.b32.xlu1 %v6985_v29, %s6032_s11  ;;  %13070 = vst [vmem:[#allocation155_spill] sm:$0xff] %v7035_v14  ;;  %v7041_v29 = vpack.i.bf16 %v7012_v9, %v7008_v31  ;;  %13072 = vst [vmem:[#allocation157_spill] sm:$0xff] %v7045_v22  ;;  %v7062_v31 = vsel %vm536_vm2, %v612_v55, %v613_v18  ;;  %v7081_v55 = vsel %vm536_vm2, %v608_v11, %v7053_v19  ;;  %v13082_v18 = vld [vmem:[#allocation53_spill] sm:$0xff] }
  0x77   : > { %4547 = vrot.lane.b32.xlu0 %v7005_v0, %s6032_s11  ;;  %13073 = vst [vmem:[#allocation158_spill] sm:$0xff] %v7049_v45  ;;  %13075 = vst [vmem:[#allocation84_spill] sm:$0xff] %v7053_v19  ;;  %v7059_v0 = vpack.i.bf16 %v7030_v60, %v7026_v5  ;;  %v7077_v5 = vsel %vm536_vm2, %v607_v16, %v608_v11  ;;  %v717_v14 = vrot.slane %v13082_v18, 4  ;;  %v732_v16 = vrot.slane %v6358_v47, 4 }
  0x78   : > { %13071 = vst [vmem:[#allocation156_spill] sm:$0xff] %v7041_v29  ;;  %13077 = vst [vmem:[#allocation160_spill] sm:$0xff] %v7062_v31  ;;  %v7097_v11 = vpack.i.bf16 %v7081_v55, %v7077_v5 }
  0x79   : > { %13076 = vst [vmem:[#allocation159_spill] sm:$0xff] %v7059_v0  ;;  %13078 = vst [vmem:[#allocation161_spill] sm:$0xff] %v7066_v3 }
  0x7a   : > { %4562 = vrot.lane.b32.xlu1 %v7023_v35, %s6032_s11  ;;  %13079 = vst [vmem:[#allocation162_spill] sm:$0xff] %v7072_v50  ;;  %v715_v35 = vrot.slane %v6340_v58, 4  ;;  %13080 = vst [vmem:[#allocation163_spill] sm:$0xff] %v7077_v5  ;;  %v730_v58 = vrot.slane %v6351_v63, 4  ;;  %v739_v5 = vrot.slane %v6375_v56, 4 }
  0x7b   : > { %4557 = vrot.lane.b32.xlu0 %v7041_v29, %s6032_s11  ;;  %13081 = vst [vmem:[#allocation164_spill] sm:$0xff] %v7081_v55  ;;  %v7088_v29 = vpack.i.bf16 %v7066_v3, %v7062_v31  ;;  %13084 = vst [vmem:[#allocation165_spill] sm:$0xff] %v7097_v11  ;;  %v725_v3 = vrot.slane %v6328_v52, 4  ;;  %v727_v31 = vrot.slane %v6331_v53, 4  ;;  %v740_v55 = vrot.slane %v6378_v41, 4 }
  0x7c   : > { %v716_v18 = vsel %vm713_vm3, %v714_v42, %v715_v35  ;;  %v718_v19 = vsel %vm713_vm3, %v715_v35, %v717_v14  ;;  %v731_v47 = vsel %vm713_vm3, %v729_v57, %v730_v58  ;;  %v742_v42 = vrot.slane %v6385_v49, 4 }
  0x7d   : > { %13083 = vst [vmem:[#allocation53_spill] sm:$0xff] %v7088_v29  ;;  %v4586_v14 = vpack.i.bf16 %v718_v19, %v716_v18  ;;  %v734_v35 = vrot.slane %v6388_v61, 4  ;;  %v735_v53 = vrot.slane %v6391_v54, 4  ;;  %v728_v57 = vsel %vm713_vm3, %v725_v3, %v727_v31 }
  0x7e   : > { %4572 = vrot.lane.b32.xlu1 %v7059_v0, %s6032_s11  ;;  %v724_v0 = vrot.slane %v6325_v51, 4  ;;  %v749_v49 = vrot.slane %v6404_v30, 4  ;;  %v741_v19 = vsel %vm713_vm3, %v739_v5, %v740_v55  ;;  %v743_v18 = vsel %vm713_vm3, %v740_v55, %v742_v42 }
  0x7f   : > { %4567 = vrot.lane.b32.xlu0 %v7072_v50, %s6032_s11  ;;  %v733_v50 = vsel %vm713_vm3, %v730_v58, %v732_v16  ;;  %v737_v58 = vrot.slane %v6401_v15, 4  ;;  %v736_v15 = vsel %vm713_vm3, %v734_v35, %v735_v53  ;;  %v747_v5 = vrot.slane %v6439_v62, 4 }
  0x80   : > { %v7120_v16 = vpack.i.bf16 %v733_v50, %v731_v47  ;;  %v744_v47 = vrot.slane %v6427_v12, 4  ;;  %v745_v50 = vrot.slane %v6430_v13, 4  ;;  %v7137_v55 = vpack.i.bf16 %v743_v18, %v741_v19 }
  0x81   : > { %v762_v35 = vrot.slane %v6456_v38, 4  ;;  %v757_v62 = vrot.slane %v6480_v27, 4 }
  0x82   : > { %4582 = vrot.lane.b32.xlu1 %v7088_v29, %s6032_s11  ;;  %v726_v29 = vsel %vm713_vm3, %v724_v0, %v725_v3  ;;  %13085 = vst [vmem:[#allocation166_spill] sm:$0xff] %v7120_v16  ;;  %v752_v0 = vrot.slane %v6417_v46, 4  ;;  %v738_v3 = vsel %vm713_vm3, %v735_v53, %v737_v58  ;;  %13087 = vst [vmem:[#allocation168_spill] sm:$0xff] %v7137_v55  ;;  %v759_v46 = vrot.slane %v6442_v32, 4 }
  0x83   : > { %4577 = vrot.lane.b32.xlu0 %v7097_v11, %s6032_s11  ;;  %v750_v11 = vrot.slane %v6414_v44, 4  ;;  %v7128_v31 = vpack.i.bf16 %v728_v57, %v726_v29  ;;  %v760_v29 = vrot.slane %v6445_v33, 4  ;;  %v7146_v53 = vpack.i.bf16 %v738_v3, %v736_v15 }
  0x84   : > { %v754_v57 = vrot.slane %v6459_v40, 4  ;;  %v755_v58 = vrot.slane %v6469_v37, 4  ;;  %v746_v19 = vsel %vm713_vm3, %v744_v47, %v745_v50  ;;  %v748_v18 = vsel %vm713_vm3, %v745_v50, %v747_v5 }
  0x85   : > { %13086 = vst [vmem:[#allocation167_spill] sm:$0xff] %v7128_v31  ;;  %v751_v42 = vsel %vm713_vm3, %v749_v49, %v750_v11  ;;  %13088 = vst [vmem:[#allocation169_spill] sm:$0xff] %v7146_v53  ;;  %v761_v38 = vsel %vm713_vm3, %v759_v46, %v760_v29  ;;  %v770_v15 = vrot.slane %v6493_v6, 4  ;;  %v772_v3 = vrot.slane %v6496_v7, 4 }
  0x86   : > { %4592 = vrot.lane.b32.xlu1 %v6989_v39, %s6033_s12  ;;  %v7164_v47 = vpack.i.bf16 %v748_v18, %v746_v19  ;;  %v756_v27 = vsel %vm713_vm3, %v754_v57, %v755_v58  ;;  %v758_v50 = vsel %vm713_vm3, %v755_v58, %v757_v62  ;;  %v764_v5 = vrot.slane %v6506_v26, 4 }
  0x87   : > { %4587 = vrot.lane.b32.xlu0 %v4586_v14, %s6033_s12  ;;  %v753_v14 = vsel %vm713_vm3, %v750_v11, %v752_v0  ;;  %v763_v11 = vsel %vm713_vm3, %v760_v29, %v762_v35  ;;  %v769_v0 = vrot.slane %v6483_v8, 4  ;;  %v765_v46 = vrot.slane %v6509_v23, 4 }
  0x88   : > { %v7155_v49 = vpack.i.bf16 %v753_v14, %v751_v42  ;;  %13090 = vst [vmem:[#allocation171_spill] sm:$0xff] %v7164_v47  ;;  %v767_v29 = vrot.slane %v6512_v4, 4  ;;  %v7173_v42 = vpack.i.bf16 %v763_v11, %v761_v38  ;;  %v779_v7 = vrot.slane %v13057_v24, 4 }
  0x89   : > { %v780_v14 = vrot.slane %v13058_v20, 4  ;;  %v771_v35 = vsel %vm713_vm3, %v769_v0, %v770_v15  ;;  %v773_v57 = vsel %vm713_vm3, %v770_v15, %v772_v3  ;;  %v782_v62 = vrot.slane %v6547_v25, 4 }
  0x8a   : > { %4602 = vrot.lane.b32.xlu1 %v7120_v16, %s6033_s12  ;;  %13089 = vst [vmem:[#allocation170_spill] sm:$0xff] %v7155_v49  ;;  %13091 = vst [vmem:[#allocation172_spill] sm:$0xff] %v7173_v42  ;;  %v7182_v58 = vpack.i.bf16 %v758_v50, %v756_v27  ;;  %v774_v4 = vrot.slane %v6537_v2, 4  ;;  %v775_v19 = vrot.slane %v13065_v17, 4  ;;  %v766_v18 = vsel %vm713_vm3, %v764_v5, %v765_v46 }
  0x8b   : > { %4597 = vrot.lane.b32.xlu0 %v7128_v31, %s6033_s12  ;;  %v768_v38 = vsel %vm713_vm3, %v765_v46, %v767_v29  ;;  %v777_v11 = vrot.slane %v13011_v48, 4  ;;  %v7191_v0 = vpack.i.bf16 %v773_v57, %v771_v35  ;;  %v781_v25 = vsel %vm713_vm3, %v779_v7, %v780_v14 }
  0x8c   : > { %13092 = vst [vmem:[#allocation173_spill] sm:$0xff] %v7182_v58  ;;  %v783_v15 = vsel %vm713_vm3, %v780_v14, %v782_v62  ;;  %v789_v3 = vrot.slane %v6565_v10, 4  ;;  %v790_v27 = vrot.slane %v6577_v21, 4  ;;  %v792_v50 = vrot.slane %v13014_v1, 4 }
  0x8d   : > { %13093 = vst [vmem:[#allocation174_spill] sm:$0xff] %v7191_v0  ;;  %v7202_v48 = vpack.i.bf16 %v768_v38, %v766_v18  ;;  %v776_v46 = vsel %vm713_vm3, %v774_v4, %v775_v19  ;;  %v778_v29 = vsel %vm713_vm3, %v775_v19, %v777_v11  ;;  %v784_v7 = vrot.slane %v6594_v28, 4 }
  0x8e   : > { %4612 = vrot.lane.b32.xlu1 %v7137_v55, %s6033_s12  ;;  %v785_v14 = vrot.slane %v6597_v43, 4  ;;  %v787_v35 = vrot.slane %v13074_v36, 4  ;;  %v7213_v1 = vpack.i.bf16 %v783_v15, %v781_v25  ;;  %v791_v62 = vsel %vm713_vm3, %v789_v3, %v790_v27 }
  0x8f   : > { %4607 = vrot.lane.b32.xlu0 %v7146_v53, %s6033_s12  ;;  %13094 = vst [vmem:[#allocation175_spill] sm:$0xff] %v7202_v48  ;;  %v793_v18 = vsel %vm713_vm3, %v790_v27, %v792_v50  ;;  %v7221_v19 = vpack.i.bf16 %v778_v29, %v776_v46  ;;  %v4671_v50 = vpack.i.bf16 %v6328_v52, %v6325_v51  ;;  %v13099_v29 = vld [vmem:[#allocation55_spill] sm:$0xff] }
  0x90   : > { %13095 = vst [vmem:[#allocation176_spill] sm:$0xff] %v7213_v1  ;;  %v786_v36 = vsel %vm713_vm3, %v784_v7, %v785_v14  ;;  %v788_v38 = vsel %vm713_vm3, %v785_v14, %v787_v35  ;;  %v7229_v25 = vpack.i.bf16 %v793_v18, %v791_v62  ;;  %v13100_v7 = vld [vmem:[#allocation56_spill] sm:$0xff]  ;;  %v4681_v62 = vpack.i.bf16 %v6391_v54, %v6388_v61 }
  0x91   : > { %13096 = vst [vmem:[#allocation177_spill] sm:$0xff] %v7221_v19  ;;  %v7235_v3 = vpack.i.bf16 %v788_v38, %v786_v36  ;;  %v4666_v14 = vpack.i.bf16 %v13100_v7, %v13099_v29  ;;  %v4676_v51 = vpack.i.bf16 %v6351_v63, %v6343_v59  ;;  %v4691_v36 = vpack.i.bf16 %v6430_v13, %v6427_v12  ;;  %v13110_v7 = vld [vmem:[#allocation57_spill] sm:$0xff] }
  0x92   : > { %4622 = vrot.lane.b32.xlu1 %v7155_v49, %s6033_s12  ;;  %13097 = vst [vmem:[#allocation178_spill] sm:$0xff] %v7229_v25  ;;  %v4686_v54 = vpack.i.bf16 %v6378_v41, %v6375_v56  ;;  %v4701_v59 = vpack.i.bf16 %v6469_v37, %v6459_v40  ;;  %v4696_v12 = vpack.i.bf16 %v6414_v44, %v6404_v30 }
  0x93   : > { %4617 = vrot.lane.b32.xlu0 %v7164_v47, %s6033_s12  ;;  %13098 = vst [vmem:[#allocation179_spill] sm:$0xff] %v7235_v3  ;;  %v4711_v41 = vpack.i.bf16 %v6509_v23, %v6506_v26  ;;  %v4706_v40 = vpack.i.bf16 %v6445_v33, %v6442_v32  ;;  %v4721_v30 = vpack.i.bf16 %v13065_v17, %v6537_v2  ;;  %v7305_v33 = vld [vmem:[%s6322_s10 + $0x180] sm:$0xff] }
  0x94   : > { %v4716_v23 = vpack.i.bf16 %v6493_v6, %v6483_v8  ;;  %v4731_v32 = vpack.i.bf16 %v6597_v43, %v6594_v28  ;;  %v4726_v17 = vpack.i.bf16 %v13058_v20, %v13057_v24  ;;  %v4736_v28 = vpack.i.bf16 %v6577_v21, %v6565_v10 }
  0x96   : > { %4632 = vrot.lane.b32.xlu1 %v7173_v42, %s6033_s12 }
  0x97   : > { %4627 = vrot.lane.b32.xlu0 %v7182_v58, %s6033_s12  ;;  %v7200_v5 = vpop.permute.xlu1 %4357 }
  0x99   : > { %v7209_v57 = vpop.permute.xlu0 %4347 }
  0x9a   : > { %4642 = vrot.lane.b32.xlu1 %v7191_v0, %s6033_s12 }
  0x9b   : > { %4637 = vrot.lane.b32.xlu0 %v7202_v48, %s6033_s12 }
  0x9c   : > { %v7219_v4 = vpop.permute.xlu1 %4362 }
  0x9d   : > { %v7225_v11 = vpop.permute.xlu0 %4352  ;;  %v4365_v9 = vunpack.i.h.bf16 %v7219_v4 }
  0x9e   : > { %4652 = vrot.lane.b32.xlu1 %v7213_v1, %s6033_s12  ;;  %v4355_v60 = vunpack.i.h.bf16 %v7225_v11 }
  0x9f   : > { %4647 = vrot.lane.b32.xlu0 %v7221_v19, %s6033_s12 }
  0xa0   : > { %v7233_v15 = vpop.permute.xlu1 %4372 }
  0xa1   : > { %v7237_v27 = vpop.permute.xlu0 %4367 }
  0xa2   : > { %4662 = vrot.lane.b32.xlu1 %v7229_v25, %s6033_s12 }
  0xa3   : > { %4657 = vrot.lane.b32.xlu0 %v7235_v3, %s6033_s12 }
  0xa4   : > { %v7245_v46 = vpop.permute.xlu1 %4382 }
  0xa5   : > { %v7249_v35 = vpop.permute.xlu0 %4377 }
  0xa6   : > { %4672 = vrot.lane.b32.xlu1 %v4671_v50, %s6034_s13  ;;  %v7308_v50 = vld [vmem:[%s6322_s10 + $0x188] sm:$0xff] }
  0xa7   : > { %4667 = vrot.lane.b32.xlu0 %v4666_v14, %s6034_s13  ;;  %v7320_v6 = vpack.i.bf16 %v7308_v50, %v7305_v33  ;;  %v13111_v14 = vld [vmem:[#allocation62_spill] sm:$0xff] }
  0xa8   : > { %v7255_v18 = vpop.permute.xlu1 %4392 }
  0xa9   : > { %v7259_v52 = vpop.permute.xlu0 %4387 }
  0xaa   : > { %4682 = vrot.lane.b32.xlu1 %v4681_v62, %s6034_s13  ;;  %v13114_v62 = vld [vmem:[#allocation65_spill] sm:$0xff] }
  0xab   : > { %4677 = vrot.lane.b32.xlu0 %v4676_v51, %s6034_s13  ;;  %v13115_v51 = vld [vmem:[#allocation59_spill] sm:$0xff] }
  0xac   : > { %v7265_v38 = vpop.permute.xlu1 %4402 }
  0xad   : > { %v7269_v61 = vpop.permute.xlu0 %4397 }
  0xae   : > { %4692 = vrot.lane.b32.xlu1 %v4691_v36, %s6034_s13 }
  0xaf   : > { %4687 = vrot.lane.b32.xlu0 %v4686_v54, %s6034_s13 }
  0xb0   : > { %v7275_v63 = vpop.permute.xlu1 %4412 }
  0xb1   : > { %v7279_v13 = vpop.permute.xlu0 %4407 }
  0xb2   : > { %4702 = vrot.lane.b32.xlu1 %v4701_v59, %s6034_s13  ;;  %v13118_v59 = vld [vmem:[#allocation72_spill] sm:$0xff] }
  0xb3   : > { %4697 = vrot.lane.b32.xlu0 %v4696_v12, %s6034_s13  ;;  %v13119_v12 = vld [vmem:[#allocation64_spill] sm:$0xff] }
  0xb4   : > { %v7285_v56 = vpop.permute.xlu1 %4422 }
  0xb5   : > { %v7289_v37 = vpop.permute.xlu0 %4417 }
  0xb6   : > { %13101 = vst [vmem:[#allocation55_spill] sm:$0xff] %v7289_v37  ;;  %4712 = vrot.lane.b32.xlu1 %v4711_v41, %s6034_s13 }
  0xb7   : > { %4707 = vrot.lane.b32.xlu0 %v4706_v40, %s6034_s13 }
  0xb8   : > { %v7295_v44 = vpop.permute.xlu1 %4432 }
  0xb9   : > { %13102 = vst [vmem:[#allocation56_spill] sm:$0xff] %v7295_v44  ;;  %v7299_v26 = vpop.permute.xlu0 %4427 }
  0xba   : > { %13103 = vst [vmem:[#allocation180_spill] sm:$0xff] %v7299_v26  ;;  %4722 = vrot.lane.b32.xlu1 %v4721_v30, %s6034_s13  ;;  %v13122_v30 = vld [vmem:[#allocation79_spill] sm:$0xff] }
  0xbb   : > { %4717 = vrot.lane.b32.xlu0 %v4716_v23, %s6034_s13  ;;  %v13123_v23 = vld [vmem:[#allocation69_spill] sm:$0xff] }
  0xbc   : > { %v7311_v2 = vpop.permute.xlu1 %4442 }
  0xbd   : > { %13104 = vst [vmem:[#allocation181_spill] sm:$0xff] %v7311_v2  ;;  %v7315_v29 = vpop.permute.xlu0 %4437  ;;  %v7701_v2 = vld [vmem:[%s6322_s10 + $0x170] sm:$0xff] }
  0xbe   : > { %13105 = vst [vmem:[#allocation182_spill] sm:$0xff] %v7315_v29  ;;  %4732 = vrot.lane.b32.xlu1 %v4731_v32, %s6034_s13  ;;  %v7698_v29 = vld [vmem:[%s6322_s10 + $0x168] sm:$0xff]  ;;  %13214 = vst [vmem:[#allocation253_spill] sm:$0xff] %v7701_v2 }
  0xbf   : > { %4727 = vrot.lane.b32.xlu0 %v4726_v17, %s6034_s13  ;;  %v7367_v17 = vld [vmem:[%s6322_s10 + $0x190] sm:$0xf]  ;;  %13213 = vst [vmem:[#allocation252_spill] sm:$0xff] %v7698_v29 }
  0xc0   : > { %v7323_v8 = vpop.permute.xlu1 %4452 }
  0xc1   : > { %13106 = vst [vmem:[#allocation183_spill] sm:$0xff] %v7323_v8  ;;  %v7327_v43 = vpop.permute.xlu0 %4447 }
  0xc2   : > { %13107 = vst [vmem:[#allocation184_spill] sm:$0xff] %v7327_v43  ;;  %4742 = vrot.lane.b32.xlu1 %v7320_v6, %s6034_s13 }
  0xc3   : > { %4737 = vrot.lane.b32.xlu0 %v4736_v28, %s6034_s13 }
  0xc4   : > { %v7332_v20 = vpop.permute.xlu1 %4462 }
  0xc5   : > { %13108 = vst [vmem:[#allocation185_spill] sm:$0xff] %v7332_v20  ;;  %v7334_v24 = vpop.permute.xlu0 %4457  ;;  %v13134_v20 = vld [vmem:[#allocation83_spill] sm:$0xff] }
  0xc6   : > { %13109 = vst [vmem:[#allocation186_spill] sm:$0xff] %v7334_v24  ;;  %4752 = vrot.lane.b32.xlu1 %v13110_v7, %s6035_s14 }
  0xc7   : > { %4747 = vrot.lane.b32.xlu0 %v13111_v14, %s6035_s14  ;;  %v13126_v14 = vld [vmem:[#allocation86_spill] sm:$0xff] }
  0xc8   : > { %v7340_v10 = vpop.permute.xlu1 %4472 }
  0xc9   : > { %13112 = vst [vmem:[#allocation57_spill] sm:$0xff] %v7340_v10  ;;  %v7342_v21 = vpop.permute.xlu0 %4467  ;;  %v13131_v10 = vld [vmem:[#allocation89_spill] sm:$0xff] }
  0xca   : > { %13113 = vst [vmem:[#allocation62_spill] sm:$0xff] %v7342_v21  ;;  %4762 = vrot.lane.b32.xlu1 %v13114_v62, %s6035_s14 }
  0xcb   : > { %4757 = vrot.lane.b32.xlu0 %v13115_v51, %s6035_s14 }
  0xcc   : > { %v7348_v36 = vpop.permute.xlu1 %4482 }
  0xcd   : > { %13116 = vst [vmem:[#allocation65_spill] sm:$0xff] %v7348_v36  ;;  %v7350_v54 = vpop.permute.xlu0 %4477  ;;  %v13128_v36 = vld [vmem:[#allocation77_spill] sm:$0xff] }
  0xce   : > { %13117 = vst [vmem:[#allocation59_spill] sm:$0xff] %v7350_v54  ;;  %4772 = vrot.lane.b32.xlu1 %v13118_v59, %s6035_s14  ;;  %v989_v54 = vrot.slane %v7305_v33, 1 }
  0xcf   : > { %4767 = vrot.lane.b32.xlu0 %v13119_v12, %s6035_s14 }
  0xd0   : > { %v7356_v41 = vpop.permute.xlu1 %4492 }
  0xd1   : > { %13120 = vst [vmem:[#allocation72_spill] sm:$0xff] %v7356_v41  ;;  %v7358_v40 = vpop.permute.xlu0 %4487  ;;  %v990_v41 = vrot.slane %v7308_v50, 1 }
  0xd2   : > { %13121 = vst [vmem:[#allocation64_spill] sm:$0xff] %v7358_v40  ;;  %4782 = vrot.lane.b32.xlu1 %v13122_v30, %s6035_s14  ;;  %v7376_v40 = vrot.slane %v7367_v17, 1  ;;  %v7715_v30 = vld [vmem:[%s6322_s10 + $0x150] sm:$0xff] }
  0xd3   : > { %4777 = vrot.lane.b32.xlu0 %v13123_v23, %s6035_s14  ;;  %13217 = vst [vmem:[#allocation256_spill] sm:$0xff] %v7715_v30 }
  0xd4   : > { %v7364_v32 = vpop.permute.xlu1 %4502  ;;  %13127 = vst [vmem:[#allocation188_spill] sm:$0xff] %v7376_v40  ;;  %v7391_v24 = vsel %vm182_vm0, %v990_v41, %v7376_v40  ;;  %v13142_v40 = vld [vmem:[#allocation90_spill] sm:$0xff] }
  0xd5   : > { %13124 = vst [vmem:[#allocation69_spill] sm:$0xff] %v7364_v32  ;;  %v7369_v28 = vpop.permute.xlu0 %4497  ;;  %13133 = vst [vmem:[#allocation192_spill] sm:$0xff] %v7391_v24 }
  0xd6   : > { %13125 = vst [vmem:[#allocation187_spill] sm:$0xff] %v7369_v28  ;;  %4792 = vrot.lane.b32.xlu1 %v13126_v14, %s6035_s14  ;;  %v7387_v28 = vsel %vm182_vm0, %v989_v54, %v990_v41  ;;  %v13139_v54 = vld [vmem:[#allocation88_spill] sm:$0xff] }
  0xd7   : > { %4787 = vrot.lane.b32.xlu0 %v13128_v36, %s6035_s14  ;;  %13132 = vst [vmem:[#allocation191_spill] sm:$0xff] %v7387_v28 }
  0xd8   : > { %v7380_v21 = vpop.permute.xlu1 %4512 }
  0xd9   : > { %13129 = vst [vmem:[#allocation189_spill] sm:$0xff] %v7380_v21  ;;  %v7382_v32 = vpop.permute.xlu0 %4507  ;;  %v13137_v21 = vld [vmem:[#allocation91_spill] sm:$0xff] }
  0xda   : > { %13130 = vst [vmem:[#allocation190_spill] sm:$0xff] %v7382_v32  ;;  %4802 = vrot.lane.b32.xlu1 %v13131_v10, %s6035_s14  ;;  %v7403_v32 = vpack.i.bf16 %v7391_v24, %v7387_v28  ;;  %v13145_v24 = vld [vmem:[#allocation96_spill] sm:$0xff] }
  0xdb   : > { %4797 = vrot.lane.b32.xlu0 %v13134_v20, %s6035_s14  ;;  %v13146_v28 = vld [vmem:[#allocation92_spill] sm:$0xff]  ;;  %v7706_v20 = vld [vmem:[%s6322_s10 + $0x198] sm:$0xff] }
  0xdc   : > { %v7395_v43 = vpop.permute.xlu1 %4522  ;;  %13138 = vst [vmem:[#allocation195_spill] sm:$0xff] %v7403_v32  ;;  %v13262_v44 = vld [vmem:[#allocation256_spill] sm:$0xff] }
  0xdd   : > { %13135 = vst [vmem:[#allocation193_spill] sm:$0xff] %v7395_v43  ;;  %v7397_v8 = vpop.permute.xlu0 %4517 }
  0xde   : > { %13136 = vst [vmem:[#allocation194_spill] sm:$0xff] %v7397_v8  ;;  %4812 = vrot.lane.b32.xlu1 %v13137_v21, %s6035_s14  ;;  %v13150_v21 = vld [vmem:[#allocation94_spill] sm:$0xff] }
  0xdf   : > { %4807 = vrot.lane.b32.xlu0 %v13139_v54, %s6035_s14  ;;  %v13169_v54 = vld [vmem:[#allocation108_spill] sm:$0xff] }
  0xe0   : > { %v7407_v10 = vpop.permute.xlu1 %4532 }
  0xe1   : > { %13140 = vst [vmem:[#allocation196_spill] sm:$0xff] %v7407_v10  ;;  %v7409_v41 = vpop.permute.xlu0 %4527 }
  0xe2   : > { %13141 = vst [vmem:[#allocation197_spill] sm:$0xff] %v7409_v41  ;;  %4822 = vrot.lane.b32.xlu1 %v7403_v32, %s6035_s14  ;;  %v13149_v32 = vld [vmem:[#allocation99_spill] sm:$0xff] }
  0xe3   : > { %4817 = vrot.lane.b32.xlu0 %v13142_v40, %s6035_s14  ;;  %v13153_v40 = vld [vmem:[#allocation103_spill] sm:$0xff] }
  0xe4   : > { %v7415_v8 = vpop.permute.xlu1 %4542 }
  0xe5   : > { %13143 = vst [vmem:[#allocation198_spill] sm:$0xff] %v7415_v8  ;;  %v7417_v43 = vpop.permute.xlu0 %4537 }
  0xe6   : > { %13144 = vst [vmem:[#allocation199_spill] sm:$0xff] %v7417_v43  ;;  %4832 = vrot.lane.b32.xlu1 %v13145_v24, %s6036_s15  ;;  %v13154_v24 = vld [vmem:[#allocation97_spill] sm:$0xff] }
  0xe7   : > { %4827 = vrot.lane.b32.xlu0 %v13146_v28, %s6036_s15 }
  0xe8   : > { %v7423_v10 = vpop.permute.xlu1 %4552 }
  0xe9   : > { %13147 = vst [vmem:[#allocation92_spill] sm:$0xff] %v7423_v10  ;;  %v7425_v41 = vpop.permute.xlu0 %4547 }
  0xea   : > { %13148 = vst [vmem:[#allocation200_spill] sm:$0xff] %v7425_v41  ;;  %4842 = vrot.lane.b32.xlu1 %v13149_v32, %s6036_s15  ;;  %v13157_v41 = vld [vmem:[#allocation107_spill] sm:$0xff]  ;;  %v13158_v32 = vld [vmem:[#allocation101_spill] sm:$0xff] }
  0xeb   : > { %4837 = vrot.lane.b32.xlu0 %v13150_v21, %s6036_s15 }
  0xec   : > { %v7431_v8 = vpop.permute.xlu1 %4562 }
  0xed   : > { %13151 = vst [vmem:[#allocation201_spill] sm:$0xff] %v7431_v8  ;;  %v7433_v43 = vpop.permute.xlu0 %4557 }
  0xee   : > { %13152 = vst [vmem:[#allocation202_spill] sm:$0xff] %v7433_v43  ;;  %4852 = vrot.lane.b32.xlu1 %v13153_v40, %s6036_s15  ;;  %v13161_v43 = vld [vmem:[#allocation109_spill] sm:$0xff]  ;;  %v1090_v40 = vrot.slane %v7305_v33, 2 }
  0xef   : > { %4847 = vrot.lane.b32.xlu0 %v13154_v24, %s6036_s15  ;;  %v1091_v24 = vrot.slane %v7308_v50, 2 }
  0xf0   : > { %v7439_v28 = vpop.permute.xlu1 %4572 }
  0xf1   : > { %13155 = vst [vmem:[#allocation203_spill] sm:$0xff] %v7439_v28  ;;  %v7441_v10 = vpop.permute.xlu0 %4567  ;;  %v7456_v28 = vrot.slane %v7367_v17, 2 }
  0xf2   : > { %13156 = vst [vmem:[#allocation204_spill] sm:$0xff] %v7441_v10  ;;  %4862 = vrot.lane.b32.xlu1 %v13157_v41, %s6036_s15  ;;  %v13163_v10 = vld [vmem:[#allocation105_spill] sm:$0xff] }
  0xf3   : > { %4857 = vrot.lane.b32.xlu0 %v13158_v32, %s6036_s15  ;;  %13162 = vst [vmem:[#allocation207_spill] sm:$0xff] %v7456_v28 }
  0xf4   : > { %v7447_v21 = vpop.permute.xlu1 %4582 }
  0xf5   : > { %13159 = vst [vmem:[#allocation205_spill] sm:$0xff] %v7447_v21  ;;  %v7449_v8 = vpop.permute.xlu0 %4577  ;;  %v13166_v21 = vld [vmem:[#allocation112_spill] sm:$0xff] }
  0xf6   : > { %13160 = vst [vmem:[#allocation206_spill] sm:$0xff] %v7449_v8  ;;  %4872 = vrot.lane.b32.xlu1 %v13161_v43, %s6036_s15  ;;  %v7467_v8 = vsel %vm359_vm1, %v1090_v40, %v1091_v24  ;;  %v7471_v43 = vsel %vm359_vm1, %v1091_v24, %v7456_v28  ;;  %v13174_v40 = vld [vmem:[#allocation111_spill] sm:$0xff]  ;;  %v13177_v28 = vld [vmem:[#allocation113_spill] sm:$0xff] }
  0xf7   : > { %4867 = vrot.lane.b32.xlu0 %v13163_v10, %s6036_s15  ;;  %13167 = vst [vmem:[#allocation210_spill] sm:$0xff] %v7467_v8  ;;  %13168 = vst [vmem:[#allocation211_spill] sm:$0xff] %v7471_v43 }
  0xf8   : > { %v7460_v41 = vpop.permute.xlu1 %4592 }
  0xf9   : > { %13164 = vst [vmem:[#allocation208_spill] sm:$0xff] %v7460_v41  ;;  %v7462_v32 = vpop.permute.xlu0 %4587  ;;  %v13172_v41 = vld [vmem:[#allocation116_spill] sm:$0xff] }
  0xfa   : > { %13165 = vst [vmem:[#allocation209_spill] sm:$0xff] %v7462_v32  ;;  %4882 = vrot.lane.b32.xlu1 %v13166_v21, %s6036_s15  ;;  %v7483_v21 = vpack.i.bf16 %v7471_v43, %v7467_v8 }
  0xfb   : > { %4877 = vrot.lane.b32.xlu0 %v13169_v54, %s6036_s15  ;;  %v7690_v54 = vld [vmem:[%s6322_s10 + $0x128] sm:$0xff] }
  0xfc   : > { %v7475_v14 = vpop.permute.xlu1 %4602  ;;  %13173 = vst [vmem:[#allocation214_spill] sm:$0xff] %v7483_v21  ;;  %13211 = vst [vmem:[#allocation250_spill] sm:$0xff] %v7690_v54 }
  0xfd   : > { %13170 = vst [vmem:[#allocation212_spill] sm:$0xff] %v7475_v14  ;;  %v7477_v10 = vpop.permute.xlu0 %4597 }
  0xfe   : > { %13171 = vst [vmem:[#allocation213_spill] sm:$0xff] %v7477_v10  ;;  %4892 = vrot.lane.b32.xlu1 %v13172_v41, %s6036_s15 }
  0xff   : > { %4887 = vrot.lane.b32.xlu0 %v13174_v40, %s6036_s15  ;;  %v7687_v40 = vld [vmem:[%s6322_s10 + $0x120] sm:$0xff] }
 0x100   : > { %v7487_v32 = vpop.permute.xlu1 %4612  ;;  %13210 = vst [vmem:[#allocation249_spill] sm:$0xff] %v7687_v40 }
 0x101   : > { %13175 = vst [vmem:[#allocation215_spill] sm:$0xff] %v7487_v32  ;;  %v7489_v24 = vpop.permute.xlu0 %4607 }
 0x102   : > { %13176 = vst [vmem:[#allocation216_spill] sm:$0xff] %v7489_v24  ;;  %4902 = vrot.lane.b32.xlu1 %v7483_v21, %s6036_s15  ;;  %v7665_v24 = vld [vmem:[%s6322_s10 + $0xf0] sm:$0xff] }
 0x103   : > { %4897 = vrot.lane.b32.xlu0 %v13177_v28, %s6036_s15  ;;  %13204 = vst [vmem:[#allocation243_spill] sm:$0xff] %v7665_v24  ;;  %v7676_v28 = vld [vmem:[%s6322_s10 + $0x138] sm:$0xff] }
 0x104   : > { %v7495_v10 = vpop.permute.xlu1 %4622  ;;  %13207 = vst [vmem:[#allocation246_spill] sm:$0xff] %v7676_v28 }
 0x105   : > { %13178 = vst [vmem:[#allocation217_spill] sm:$0xff] %v7495_v10  ;;  %v7497_v41 = vpop.permute.xlu0 %4617 }
 0x106   : > { %13179 = vst [vmem:[#allocation218_spill] sm:$0xff] %v7497_v41  ;;  %4912 = vrot.lane.b32.xlu1 %v7128_v31, %s6030_s1 }
 0x107   : > { %4907 = vrot.lane.b32.xlu0 %v6989_v39, %s6030_s1 }
 0x108   : > { %v7503_v43 = vpop.permute.xlu1 %4632 }
 0x109   : > { %13180 = vst [vmem:[#allocation219_spill] sm:$0xff] %v7503_v43  ;;  %v7505_v8 = vpop.permute.xlu0 %4627  ;;  %v7654_v43 = vld [vmem:[%s6322_s10 + $0x108] sm:$0xff] }
 0x10a   : > { %13181 = vst [vmem:[#allocation220_spill] sm:$0xff] %v7505_v8  ;;  %4922 = vrot.lane.b32.xlu1 %v7146_v53, %s6030_s1 }
 0x10b   : > { %4917 = vrot.lane.b32.xlu0 %v7120_v16, %s6030_s1 }
 0x10c   : > { %v7511_v21 = vpop.permute.xlu1 %4642 }
 0x10d   : > { %13182 = vst [vmem:[#allocation221_spill] sm:$0xff] %v7511_v21  ;;  %v7513_v10 = vpop.permute.xlu0 %4637  ;;  %v7643_v21 = vld [vmem:[%s6322_s10 + $0xc0] sm:$0xff] }
 0x10e   : > { %13183 = vst [vmem:[#allocation222_spill] sm:$0xff] %v7513_v10  ;;  %4932 = vrot.lane.b32.xlu1 %v7164_v47, %s6030_s1  ;;  %v1228_v47 = vrot.slane %v7305_v33, 4 }
 0x10f   : > { %4927 = vrot.lane.b32.xlu0 %v7137_v55, %s6030_s1  ;;  %v1229_v55 = vrot.slane %v7308_v50, 4 }
 0x110   : > { %v7519_v39 = vpop.permute.xlu1 %4652 }
 0x111   : > { %13184 = vst [vmem:[#allocation223_spill] sm:$0xff] %v7519_v39  ;;  %v7521_v31 = vpop.permute.xlu0 %4647  ;;  %v1231_v39 = vrot.slane %v7367_v17, 4 }
 0x112   : > { %13185 = vst [vmem:[#allocation224_spill] sm:$0xff] %v7521_v31  ;;  %4942 = vrot.lane.b32.xlu1 %v7182_v58, %s6030_s1  ;;  %v7632_v31 = vld [vmem:[%s6322_s10 + $0xd8] sm:$0xff] }
 0x113   : > { %4937 = vrot.lane.b32.xlu0 %v7155_v49, %s6030_s1  ;;  %v1232_v33 = vsel %vm713_vm3, %v1229_v55, %v1231_v39  ;;  %v7565_v39 = vld [vmem:[%s6322_s10 + $0x48] sm:$0xff] }
 0x114   : > { %v7527_v53 = vpop.permute.xlu1 %4662 }
 0x115   : > { %13186 = vst [vmem:[#allocation225_spill] sm:$0xff] %v7527_v53  ;;  %v7529_v16 = vpop.permute.xlu0 %4657 }
 0x116   : > { %13187 = vst [vmem:[#allocation226_spill] sm:$0xff] %v7529_v16  ;;  %4952 = vrot.lane.b32.xlu1 %v7202_v48, %s6030_s1  ;;  %v1230_v48 = vsel %vm713_vm3, %v1228_v47, %v1229_v55  ;;  %v7621_v16 = vld [vmem:[%s6322_s10 + $0x90] sm:$0xff] }
 0x117   : > { %4947 = vrot.lane.b32.xlu0 %v7173_v42, %s6030_s1  ;;  %v7554_v42 = vpack.i.bf16 %v1232_v33, %v1230_v48 }
 0x118   : > { %v7538_v58 = vpop.permute.xlu1 %4672 }
 0x119   : > { %13188 = vst [vmem:[#allocation227_spill] sm:$0xff] %v7538_v58  ;;  %v7540_v49 = vpop.permute.xlu0 %4667  ;;  %13192 = vst [vmem:[#allocation231_spill] sm:$0xff] %v7554_v42 }
 0x11a   : > { %13189 = vst [vmem:[#allocation228_spill] sm:$0xff] %v7540_v49  ;;  %4962 = vrot.lane.b32.xlu1 %v7221_v19, %s6030_s1  ;;  %v7568_v19 = vld [vmem:[%s6322_s10 + $0x50] sm:$0xff]  ;;  %v7610_v49 = vld [vmem:[%s6322_s10 + $0xa8] sm:$0xff] }
 0x11b   : > { %4957 = vrot.lane.b32.xlu0 %v7191_v0, %s6030_s1  ;;  %v4991_v48 = vpack.i.bf16 %v7568_v19, %v7565_v39 }
 0x11c   : > { %v7548_v50 = vpop.permute.xlu1 %4682 }
 0x11d   : > { %13190 = vst [vmem:[#allocation229_spill] sm:$0xff] %v7548_v50  ;;  %v7550_v17 = vpop.permute.xlu0 %4677 }
 0x11e   : > { %13191 = vst [vmem:[#allocation230_spill] sm:$0xff] %v7550_v17  ;;  %4972 = vrot.lane.b32.xlu1 %v7235_v3, %s6030_s1  ;;  %v7577_v3 = vld [vmem:[%s6322_s10 + $0x30] sm:$0xff]  ;;  %v7599_v17 = vld [vmem:[%s6322_s10 + $0x60] sm:$0xff] }
 0x11f   : > { %4967 = vrot.lane.b32.xlu0 %v7213_v1, %s6030_s1  ;;  %v7580_v1 = vld [vmem:[%s6322_s10 + $0x38] sm:$0xff] }
 0x120   : > { %v7558_v47 = vpop.permute.xlu1 %4692 }
 0x121   : > { %13193 = vst [vmem:[#allocation232_spill] sm:$0xff] %v7558_v47  ;;  %v7560_v55 = vpop.permute.xlu0 %4687 }
 0x122   : > { %13194 = vst [vmem:[#allocation233_spill] sm:$0xff] %v7560_v55  ;;  %4982 = vrot.lane.b32.xlu1 %v7554_v42, %s6030_s1  ;;  %v4986_v42 = vpack.i.bf16 %v7580_v1, %v7577_v3  ;;  %v7588_v55 = vld [vmem:[%s6322_s10 + $0x78] sm:$0xff] }
 0x123   : > { %4977 = vrot.lane.b32.xlu0 %v7229_v25, %s6030_s1  ;;  %v7591_v25 = vld [vmem:[%s6322_s10 + $0x80] sm:$0xff] }
 0x124   : > { %v7574_v33 = vpop.permute.xlu1 %4702 }
 0x125   : > { %13195 = vst [vmem:[#allocation234_spill] sm:$0xff] %v7574_v33  ;;  %v7584_v0 = vpop.permute.xlu0 %4697  ;;  %v5001_v33 = vpack.i.bf16 %v7591_v25, %v7588_v55 }
 0x126   : > { %13196 = vst [vmem:[#allocation235_spill] sm:$0xff] %v7584_v0  ;;  %4992 = vrot.lane.b32.xlu1 %v4991_v48, %s6031_s2  ;;  %v7602_v0 = vld [vmem:[%s6322_s10 + $0x68] sm:$0xff] }
 0x127   : > { %4987 = vrot.lane.b32.xlu0 %v4986_v42, %s6031_s2  ;;  %v4996_v48 = vpack.i.bf16 %v7602_v0, %v7599_v17  ;;  %v7613_v42 = vld [vmem:[%s6322_s10 + $0xb0] sm:$0xff] }
 0x128   : > { %v7596_v47 = vpop.permute.xlu1 %4712 }
 0x129   : > { %13197 = vst [vmem:[#allocation236_spill] sm:$0xff] %v7596_v47  ;;  %v7606_v50 = vpop.permute.xlu0 %4707  ;;  %v5011_v47 = vpack.i.bf16 %v7613_v42, %v7610_v49 }
 0x12a   : > { %13198 = vst [vmem:[#allocation237_spill] sm:$0xff] %v7606_v50  ;;  %5002 = vrot.lane.b32.xlu1 %v5001_v33, %s6031_s2  ;;  %v7624_v50 = vld [vmem:[%s6322_s10 + $0x98] sm:$0xff] }
 0x12b   : > { %4997 = vrot.lane.b32.xlu0 %v4996_v48, %s6031_s2  ;;  %v5006_v33 = vpack.i.bf16 %v7624_v50, %v7621_v16  ;;  %v7635_v48 = vld [vmem:[%s6322_s10 + $0xe0] sm:$0xff] }
 0x12c   : > { %v7618_v58 = vpop.permute.xlu1 %4722 }
 0x12d   : > { %13199 = vst [vmem:[#allocation238_spill] sm:$0xff] %v7618_v58  ;;  %v7628_v53 = vpop.permute.xlu0 %4717  ;;  %v5021_v58 = vpack.i.bf16 %v7635_v48, %v7632_v31 }
 0x12e   : > { %13200 = vst [vmem:[#allocation239_spill] sm:$0xff] %v7628_v53  ;;  %5012 = vrot.lane.b32.xlu1 %v5011_v47, %s6031_s2  ;;  %v7646_v53 = vld [vmem:[%s6322_s10 + $0xc8] sm:$0xff] }
 0x12f   : > { %5007 = vrot.lane.b32.xlu0 %v5006_v33, %s6031_s2  ;;  %v5016_v47 = vpack.i.bf16 %v7646_v53, %v7643_v21  ;;  %v7657_v33 = vld [vmem:[%s6322_s10 + $0x110] sm:$0xff] }
 0x130   : > { %v7640_v10 = vpop.permute.xlu1 %4732 }
 0x131   : > { %13201 = vst [vmem:[#allocation240_spill] sm:$0xff] %v7640_v10  ;;  %v7650_v8 = vpop.permute.xlu0 %4727  ;;  %v5031_v10 = vpack.i.bf16 %v7657_v33, %v7654_v43 }
 0x132   : > { %13202 = vst [vmem:[#allocation241_spill] sm:$0xff] %v7650_v8  ;;  %5022 = vrot.lane.b32.xlu1 %v5021_v58, %s6031_s2  ;;  %v7668_v8 = vld [vmem:[%s6322_s10 + $0xf8] sm:$0xff] }
 0x133   : > { %5017 = vrot.lane.b32.xlu0 %v5016_v47, %s6031_s2  ;;  %13205 = vst [vmem:[#allocation244_spill] sm:$0xff] %v7668_v8  ;;  %v5026_v58 = vpack.i.bf16 %v7668_v8, %v7665_v24  ;;  %v7679_v47 = vld [vmem:[%s6322_s10 + $0x140] sm:$0xff] }
 0x134   : > { %v7662_v41 = vpop.permute.xlu1 %4742  ;;  %13208 = vst [vmem:[#allocation247_spill] sm:$0xff] %v7679_v47 }
 0x135   : > { %13203 = vst [vmem:[#allocation242_spill] sm:$0xff] %v7662_v41  ;;  %v7672_v32 = vpop.permute.xlu0 %4737  ;;  %v5041_v41 = vpack.i.bf16 %v7679_v47, %v7676_v28  ;;  %v4360_v28 = vunpack.i.h.bf16 %v7200_v5  ;;  %v4349_v47 = vunpack.i.l.bf16 %v7209_v57 }
 0x136   : > { %13206 = vst [vmem:[#allocation245_spill] sm:$0xff] %v7672_v32  ;;  %5032 = vrot.lane.b32.xlu1 %v5031_v10, %s6031_s2  ;;  %v5036_v10 = vpack.i.bf16 %v7690_v54, %v7687_v40  ;;  %v4364_v40 = vunpack.i.l.bf16 %v7219_v4  ;;  %v4375_v4 = vunpack.i.h.bf16 %v7233_v15 }
 0x137   : > { %5027 = vrot.lane.b32.xlu0 %v5026_v58, %s6031_s2  ;;  %v5051_v58 = vpack.i.bf16 %v7701_v2, %v7698_v29  ;;  %v4350_v29 = vunpack.i.h.bf16 %v7209_v57  ;;  %v7766_v8 = vsel %vm1930_vm4, %v7580_v1, %v4360_v28  ;;  %v13269_v2 = vld [vmem:[#allocation86_spill] sm:$0xff] }
 0x138   : > { %v7684_v14 = vpop.permute.xlu1 %4752 }
 0x139   : > { %13209 = vst [vmem:[#allocation248_spill] sm:$0xff] %v7684_v14  ;;  %v7694_v32 = vpop.permute.xlu0 %4747  ;;  %v7709_v14 = vld [vmem:[%s6322_s10 + $0x1a0] sm:$0xff] }
 0x13a   : > { %13212 = vst [vmem:[#allocation251_spill] sm:$0xff] %v7694_v32  ;;  %5042 = vrot.lane.b32.xlu1 %v5041_v41, %s6031_s2  ;;  %13215 = vst [vmem:[#allocation254_spill] sm:$0xff] %v7709_v14  ;;  %v7718_v32 = vld [vmem:[%s6322_s10 + $0x158] sm:$0xff] }
 0x13b   : > { %5037 = vrot.lane.b32.xlu0 %v5036_v10, %s6031_s2  ;;  %13218 = vst [vmem:[#allocation257_spill] sm:$0xff] %v7718_v32  ;;  %v5046_v41 = vpack.i.bf16 %v7718_v32, %v7715_v30  ;;  %v4359_v32 = vunpack.i.l.bf16 %v7200_v5  ;;  %v4354_v5 = vunpack.i.l.bf16 %v7225_v11  ;;  %v4374_v11 = vunpack.i.l.bf16 %v7233_v15  ;;  %v5947_v30 = vld [vmem:[%s6322_s10 + $0x18] sm:$0xff] }
 0x13c   : > { %v7712_v26 = vpop.permute.xlu1 %4762  ;;  %v7803_v15 = vsel %vm1930_vm4, %v7565_v39, %v4364_v40  ;;  %v4394_v10 = vunpack.i.l.bf16 %v7255_v18  ;;  %v4405_v39 = vunpack.i.h.bf16 %v7265_v38 }
 0x13d   : > { %13216 = vst [vmem:[#allocation255_spill] sm:$0xff] %v7712_v26  ;;  %v7727_v36 = vpop.permute.xlu0 %4757  ;;  %v5061_v26 = vpack.i.bf16 %v7709_v14, %v7706_v20  ;;  %v7773_v57 = vsel %vm1930_vm4, %v7577_v3, %v4359_v32  ;;  %v4370_v3 = vunpack.i.h.bf16 %v7237_v27  ;;  %v4369_v32 = vunpack.i.l.bf16 %v7237_v27 }
 0x13e   : > { %13224 = vst [vmem:[#allocation258_spill] sm:$0xff] %v7727_v36  ;;  %5052 = vrot.lane.b32.xlu1 %v5051_v58, %s6031_s2  ;;  %v5945_v36 = vld [vmem:[%s6322_s10] sm:$0xff] }
 0x13f   : > { %5047 = vrot.lane.b32.xlu0 %v5046_v41, %s6031_s2  ;;  %v7781_v1 = vsel %vm1930_vm4, %v5945_v36, %v4349_v47  ;;  %v4384_v36 = vunpack.i.l.bf16 %v7245_v46  ;;  %v5946_v47 = vld [vmem:[%s6322_s10 + $0x20] sm:$0xff] }
 0x140   : > { %v7740_v58 = vpop.permute.xlu1 %4772  ;;  %v7807_v27 = vsel %vm1930_vm4, %v5946_v47, %v4355_v60  ;;  %v7823_v60 = vsel %vm1930_vm4, %v7591_v25, %v4375_v4  ;;  %v4414_v4 = vunpack.i.l.bf16 %v7275_v63 }
 0x141   : > { %13231 = vst [vmem:[#allocation259_spill] sm:$0xff] %v7740_v58  ;;  %v7749_v24 = vpop.permute.xlu0 %4767  ;;  %v7843_v25 = vsel %vm1930_vm4, %v7610_v49, %v4384_v36  ;;  %v13266_v45 = vld [vmem:[#allocation254_spill] sm:$0xff] }
 0x142   : > { %13233 = vst [vmem:[#allocation260_spill] sm:$0xff] %v7749_v24  ;;  %5062 = vrot.lane.b32.xlu1 %v5061_v26, %s6031_s2 }
 0x143   : > { %5057 = vrot.lane.b32.xlu0 %v7320_v6, %s6031_s2  ;;  %v7777_v6 = vsel %vm1930_vm4, %v5944_v34, %v4350_v29  ;;  %v7793_v34 = vsel %vm1930_vm4, %v7568_v19, %v4365_v9  ;;  %v4385_v29 = vunpack.i.h.bf16 %v7245_v46  ;;  %v7811_v9 = vsel %vm1930_vm4, %v5947_v30, %v4354_v5 }
 0x144   : > { %v7762_v26 = vpop.permute.xlu1 %4782  ;;  %v4380_v19 = vunpack.i.h.bf16 %v7249_v35  ;;  %v4379_v46 = vunpack.i.l.bf16 %v7249_v35  ;;  %v7827_v30 = vsel %vm1930_vm4, %v7588_v55, %v4374_v11  ;;  %v7831_v35 = vsel %vm1930_vm4, %v7602_v0, %v4370_v3 }
 0x145   : > { %13239 = vst [vmem:[#allocation261_spill] sm:$0xff] %v7762_v26  ;;  %v7783_v28 = vpop.permute.xlu0 %4777  ;;  %v7839_v40 = vsel %vm1930_vm4, %v7613_v42, %v4385_v29  ;;  %v4404_v42 = vunpack.i.l.bf16 %v7265_v38  ;;  %v7867_v5 = vsel %vm1930_vm4, %v7632_v31, %v4394_v10  ;;  %v4399_v38 = vunpack.i.l.bf16 %v7269_v61 }
 0x146   : > { %13240 = vst [vmem:[#allocation262_spill] sm:$0xff] %v7783_v28  ;;  %5072 = vrot.lane.b32.xlu1 %v13115_v51, %s6032_s11  ;;  %v7852_v0 = vsel %vm1930_vm4, %v7624_v50, %v4380_v19  ;;  %v7859_v49 = vsel %vm1930_vm4, %v7621_v16, %v4379_v46  ;;  %v4415_v16 = vunpack.i.h.bf16 %v7275_v63  ;;  %v4410_v31 = vunpack.i.h.bf16 %v7279_v13  ;;  %v13251_v19 = vld [vmem:[#allocation247_spill] sm:$0xff]  ;;  %v13252_v46 = vld [vmem:[#allocation246_spill] sm:$0xff] }
 0x147   : > { %5067 = vrot.lane.b32.xlu0 %v13110_v7, %s6032_s11  ;;  %v4395_v7 = vunpack.i.h.bf16 %v7255_v18  ;;  %v7835_v18 = vsel %vm1930_vm4, %v7599_v17, %v4369_v32  ;;  %v4389_v17 = vunpack.i.l.bf16 %v7259_v52  ;;  %v4409_v10 = vunpack.i.l.bf16 %v7279_v13 }
 0x148   : > { %v7799_v51 = vpop.permute.xlu1 %4792  ;;  %v7893_v63 = vsel %vm1930_vm4, %v7657_v33, %v4405_v39  ;;  %v4425_v13 = vunpack.i.h.bf16 %v7285_v56  ;;  %v4424_v11 = vunpack.i.l.bf16 %v7285_v56  ;;  %v13249_v33 = vld [vmem:[#allocation244_spill] sm:$0xff]  ;;  %v7917_v56 = vsel %vm1930_vm4, %v13251_v19, %v4415_v16  ;;  %v13254_v39 = vld [vmem:[#allocation249_spill] sm:$0xff]  ;;  %v7937_v16 = vld [vmem:[%s6322_s10 + $0x1a8] sm:$0xf] }
 0x149   : > { %13241 = vst [vmem:[#allocation263_spill] sm:$0xff] %v7799_v51  ;;  %v7817_v14 = vpop.permute.xlu0 %4787 }
 0x14a   : > { %13242 = vst [vmem:[#allocation264_spill] sm:$0xff] %v7817_v14  ;;  %5082 = vrot.lane.b32.xlu1 %v13119_v12, %s6032_s11  ;;  %v4390_v12 = vunpack.i.h.bf16 %v7259_v52  ;;  %v4400_v52 = vunpack.i.h.bf16 %v7269_v61  ;;  %v7889_v61 = vsel %vm1930_vm4, %v7643_v21, %v4389_v17  ;;  %v13248_v21 = vld [vmem:[#allocation77_spill] sm:$0xff] }
 0x14b   : > { %5077 = vrot.lane.b32.xlu0 %v13114_v62, %s6032_s11  ;;  %v7863_v62 = vsel %vm1930_vm4, %v7635_v48, %v4395_v7  ;;  %v7921_v7 = vsel %vm1930_vm4, %v13252_v46, %v4414_v4  ;;  %v13260_v46 = vld [vmem:[#allocation252_spill] sm:$0xff] }
 0x14c   : > { %v7848_v55 = vpop.permute.xlu1 %4802  ;;  %v7879_v48 = vsel %vm1930_vm4, %v7646_v53, %v4390_v12  ;;  %v7897_v53 = vsel %vm1930_vm4, %v7654_v43, %v4404_v42  ;;  %v7909_v36 = vsel %vm1930_vm4, %v13249_v33, %v4400_v52  ;;  %v13250_v43 = vld [vmem:[#allocation243_spill] sm:$0xff]  ;;  %v13253_v12 = vld [vmem:[#allocation250_spill] sm:$0xff]  ;;  %v7929_v42 = vsel %vm1930_vm4, %v13254_v39, %v4409_v10  ;;  %v13255_v52 = vld [vmem:[#allocation56_spill] sm:$0xff] }
 0x14d   : > { %13243 = vst [vmem:[#allocation265_spill] sm:$0xff] %v7848_v55  ;;  %v7869_v50 = vpop.permute.xlu0 %4797  ;;  %v7913_v47 = vsel %vm1930_vm4, %v13250_v43, %v4399_v38  ;;  %v7925_v17 = vsel %vm1930_vm4, %v13253_v12, %v4410_v31  ;;  %v13256_v38 = vld [vmem:[#allocation79_spill] sm:$0xff]  ;;  %v13258_v33 = vld [vmem:[#allocation253_spill] sm:$0xff]  ;;  %v4435_v31 = vunpack.i.h.bf16 %v13255_v52  ;;  %v13259_v43 = vld [vmem:[#allocation180_spill] sm:$0xff]  ;;  %v7948_v12 = vsel %vm1930_vm4, %v13260_v46, %v4424_v11 }
 0x14e   : > { %13244 = vst [vmem:[#allocation266_spill] sm:$0xff] %v7869_v50  ;;  %5092 = vrot.lane.b32.xlu1 %v13123_v23, %s6032_s11  ;;  %v7941_v4 = vsel %vm1930_vm4, %v13258_v33, %v4425_v13  ;;  %v4430_v19 = vunpack.i.h.bf16 %v13259_v43  ;;  %v4429_v10 = vunpack.i.l.bf16 %v13259_v43  ;;  %v13261_v39 = vld [vmem:[#allocation257_spill] sm:$0xff]  ;;  %v1428_v43 = vrot.slane %v7706_v20, 1 }
 0x14f   : > { %5087 = vrot.lane.b32.xlu0 %v13118_v59, %s6032_s11  ;;  %v13246_v59 = vld [vmem:[#allocation55_spill] sm:$0xff]  ;;  %v13265_v33 = vld [vmem:[#allocation181_spill] sm:$0xff]  ;;  %v1429_v11 = vrot.slane %v13266_v45, 1  ;;  %v7966_v46 = vrot.slane %v7937_v16, 1  ;;  %v7980_v54 = vsel %vm1963_vm5, %v7807_v27, %v4435_v31  ;;  %v13274_v27 = vld [vmem:[#allocation88_spill] sm:$0xff] }
 0x150   : > { %v7885_v23 = vpop.permute.xlu1 %4812  ;;  %v4420_v3 = vunpack.i.h.bf16 %v13246_v59  ;;  %v4419_v32 = vunpack.i.l.bf16 %v13246_v59  ;;  %v4434_v59 = vunpack.i.l.bf16 %v13255_v52  ;;  %v13264_v52 = vld [vmem:[#allocation83_spill] sm:$0xff]  ;;  %v4445_v22 = vunpack.i.h.bf16 %v13265_v33 }
 0x151   : > { %13245 = vst [vmem:[#allocation267_spill] sm:$0xff] %v7885_v23  ;;  %v7903_v29 = vpop.permute.xlu0 %4807  ;;  %13267 = vst [vmem:[#allocation243_spill] sm:$0xff] %v7966_v46  ;;  %v7984_v37 = vsel %vm1963_vm5, %v7781_v1, %v4429_v10  ;;  %v8004_v31 = vsel %vm182_vm0, %v1428_v43, %v1429_v11 }
 0x152   : > { %13247 = vst [vmem:[#allocation55_spill] sm:$0xff] %v7903_v29  ;;  %5102 = vrot.lane.b32.xlu1 %v13248_v21, %s6032_s11  ;;  %v7956_v41 = vsel %vm1930_vm4, %v13262_v44, %v4419_v32  ;;  %v4444_v44 = vunpack.i.l.bf16 %v13265_v33  ;;  %v13268_v32 = vld [vmem:[#allocation182_spill] sm:$0xff]  ;;  %v13271_v33 = vld [vmem:[#allocation183_spill] sm:$0xff]  ;;  %v8000_v1 = vsel %vm1963_vm5, %v7793_v34, %v4445_v22  ;;  %13275 = vst [vmem:[#allocation250_spill] sm:$0xff] %v8004_v31 }
 0x153   : > { %5097 = vrot.lane.b32.xlu0 %v13256_v38, %s6032_s11  ;;  %v7952_v38 = vsel %vm1930_vm4, %v13261_v39, %v4420_v3  ;;  %v7970_v3 = vsel %vm1963_vm5, %v7811_v9, %v4434_v59  ;;  %v4440_v39 = vunpack.i.h.bf16 %v13268_v32  ;;  %v7988_v9 = vsel %vm1963_vm5, %v7777_v6, %v4430_v19  ;;  %v13278_v34 = vld [vmem:[#allocation89_spill] sm:$0xff] }
 0x154   : > { %v7934_v21 = vpop.permute.xlu1 %4822  ;;  %v4439_v59 = vunpack.i.l.bf16 %v13268_v32  ;;  %v8008_v19 = vsel %vm182_vm0, %v1429_v11, %v7966_v46  ;;  %v8012_v10 = vsel %vm1963_vm5, %v7803_v15, %v4444_v44  ;;  %v13286_v46 = vld [vmem:[#allocation65_spill] sm:$0xff] }
 0x155   : > { %13257 = vst [vmem:[#allocation77_spill] sm:$0xff] %v7934_v21  ;;  %v7958_v13 = vpop.permute.xlu0 %4817  ;;  %v13272_v21 = vld [vmem:[#allocation184_spill] sm:$0xff]  ;;  %13276 = vst [vmem:[#allocation249_spill] sm:$0xff] %v8008_v19  ;;  %v8016_v32 = vsel %vm1963_vm5, %v7766_v8, %v4440_v39 }
 0x156   : > { %13263 = vst [vmem:[#allocation244_spill] sm:$0xff] %v7958_v13  ;;  %5112 = vrot.lane.b32.xlu1 %v13264_v52, %s6032_s11  ;;  %v4455_v13 = vunpack.i.h.bf16 %v13271_v33  ;;  %v4450_v6 = vunpack.i.h.bf16 %v13272_v21  ;;  %v8025_v43 = vsel %vm1963_vm5, %v7773_v57, %v4439_v59  ;;  %v13282_v59 = vld [vmem:[#allocation90_spill] sm:$0xff] }
 0x157   : > { %5107 = vrot.lane.b32.xlu0 %v13269_v2, %s6032_s11  ;;  %v4454_v2 = vunpack.i.l.bf16 %v13271_v33  ;;  %v13277_v33 = vld [vmem:[#allocation185_spill] sm:$0xff] }
 0x158   : > { %v7976_v52 = vpop.permute.xlu1 %4832  ;;  %v4465_v22 = vunpack.i.h.bf16 %v13277_v33  ;;  %v4464_v11 = vunpack.i.l.bf16 %v13277_v33  ;;  %v8032_v8 = vsel %vm1963_vm5, %v7823_v60, %v4455_v13  ;;  %v8048_v33 = vpack.i.bf16 %v8008_v19, %v8004_v31  ;;  %v13284_v13 = vld [vmem:[#allocation57_spill] sm:$0xff]  ;;  %v13287_v19 = vld [vmem:[#allocation91_spill] sm:$0xff] }
 0x159   : > { %13270 = vst [vmem:[#allocation247_spill] sm:$0xff] %v7976_v52  ;;  %v4449_v52 = vunpack.i.l.bf16 %v13272_v21  ;;  %v7994_v29 = vpop.permute.xlu0 %4827  ;;  %v8036_v39 = vsel %vm1963_vm5, %v7827_v30, %v4454_v2  ;;  %v8052_v60 = vsel %vm1963_vm5, %v7831_v35, %v4450_v6  ;;  %v4475_v30 = vunpack.i.h.bf16 %v13284_v13 }
 0x15a   : > { %13273 = vst [vmem:[#allocation246_spill] sm:$0xff] %v7994_v29  ;;  %5122 = vrot.lane.b32.xlu1 %v13274_v27, %s6032_s11  ;;  %v13280_v27 = vld [vmem:[#allocation186_spill] sm:$0xff]  ;;  %13283 = vst [vmem:[#allocation253_spill] sm:$0xff] %v8048_v33  ;;  %v4474_v2 = vunpack.i.l.bf16 %v13284_v13  ;;  %v8069_v6 = vsel %vm1963_vm5, %v7843_v25, %v4464_v11 }
 0x15b   : > { %5117 = vrot.lane.b32.xlu0 %v13278_v34, %s6032_s11  ;;  %v4460_v15 = vunpack.i.h.bf16 %v13280_v27  ;;  %v4459_v44 = vunpack.i.l.bf16 %v13280_v27  ;;  %v8040_v34 = vsel %vm1963_vm5, %v7835_v18, %v4449_v52  ;;  %v13285_v27 = vld [vmem:[#allocation62_spill] sm:$0xff]  ;;  %v8059_v52 = vsel %vm1963_vm5, %v7839_v40, %v4465_v22 }
 0x15c   : > { %v8021_v21 = vpop.permute.xlu1 %4842  ;;  %v4469_v18 = vunpack.i.l.bf16 %v13285_v27  ;;  %v4484_v22 = vunpack.i.l.bf16 %v13286_v46  ;;  %v8089_v25 = vsel %vm1963_vm5, %v7863_v62, %v4475_v30  ;;  %v13292_v62 = vld [vmem:[#allocation64_spill] sm:$0xff]  ;;  %v13293_v30 = vld [vmem:[#allocation195_spill] sm:$0xff] }
 0x15d   : > { %13279 = vst [vmem:[#allocation56_spill] sm:$0xff] %v8021_v21  ;;  %v8042_v57 = vpop.permute.xlu0 %4837  ;;  %v8073_v13 = vsel %vm1963_vm5, %v7859_v49, %v4459_v44  ;;  %v8077_v40 = vsel %vm1963_vm5, %v7852_v0, %v4460_v15  ;;  %v13290_v21 = vld [vmem:[#allocation72_spill] sm:$0xff]  ;;  %v8093_v0 = vsel %vm1963_vm5, %v7867_v5, %v4474_v2  ;;  %v4489_v44 = vunpack.i.l.bf16 %v13292_v62  ;;  %v13295_v2 = vld [vmem:[#allocation69_spill] sm:$0xff] }
 0x15e   : > { %13281 = vst [vmem:[#allocation79_spill] sm:$0xff] %v8042_v57  ;;  %5132 = vrot.lane.b32.xlu1 %v13282_v59, %s6032_s11  ;;  %v4470_v59 = vunpack.i.h.bf16 %v13285_v27  ;;  %v4485_v57 = vunpack.i.h.bf16 %v13286_v46  ;;  %v13289_v27 = vld [vmem:[#allocation59_spill] sm:$0xff]  ;;  %v8097_v49 = vsel %vm1963_vm5, %v7889_v61, %v4469_v18  ;;  %v4494_v46 = vunpack.i.l.bf16 %v13290_v21 }
 0x15f   : > { %5127 = vrot.lane.b32.xlu0 %v13287_v19, %s6032_s11  ;;  %v4480_v31 = vunpack.i.h.bf16 %v13289_v27  ;;  %v4479_v19 = vunpack.i.l.bf16 %v13289_v27  ;;  %v8115_v61 = vsel %vm1963_vm5, %v7897_v53, %v4484_v22  ;;  %v4504_v18 = vunpack.i.l.bf16 %v13295_v2  ;;  %v13297_v22 = vld [vmem:[#allocation94_spill] sm:$0xff] }
 0x160   : > { %v8065_v35 = vpop.permute.xlu1 %4852  ;;  %v8102_v11 = vsel %vm1963_vm5, %v7879_v48, %v4470_v59  ;;  %v8106_v15 = vsel %vm1963_vm5, %v7893_v63, %v4485_v57  ;;  %v4505_v48 = vunpack.i.h.bf16 %v13295_v2  ;;  %v8138_v27 = vsel %vm1963_vm5, %v7921_v7, %v4494_v46 }
 0x161   : > { %13288 = vst [vmem:[#allocation180_spill] sm:$0xff] %v8065_v35  ;;  %v4495_v35 = vunpack.i.h.bf16 %v13290_v21  ;;  %v8083_v29 = vpop.permute.xlu0 %4847  ;;  %v4490_v21 = vunpack.i.h.bf16 %v13292_v62  ;;  %v8122_v63 = vsel %vm1963_vm5, %v7913_v47, %v4479_v19  ;;  %v8126_v57 = vsel %vm1963_vm5, %v7909_v36, %v4480_v31  ;;  %v13298_v62 = vld [vmem:[#allocation187_spill] sm:$0xff] }
 0x162   : > { %13291 = vst [vmem:[#allocation252_spill] sm:$0xff] %v8083_v29  ;;  %5142 = vrot.lane.b32.xlu1 %v8048_v33, %s6032_s11  ;;  %v4500_v47 = vunpack.i.h.bf16 %v13298_v62  ;;  %v4499_v19 = vunpack.i.l.bf16 %v13298_v62  ;;  %v8145_v31 = vsel %vm1963_vm5, %v7929_v42, %v4489_v44  ;;  %v8159_v46 = vsel %vm1963_vm5, %v7941_v4, %v4505_v48  ;;  %v13303_v62 = vld [vmem:[#allocation193_spill] sm:$0xff] }
 0x163   : > { %5137 = vrot.lane.b32.xlu0 %v13293_v30, %s6032_s11  ;;  %v8130_v59 = vsel %vm1963_vm5, %v7917_v56, %v4495_v35  ;;  %v13299_v30 = vld [vmem:[#allocation189_spill] sm:$0xff]  ;;  %v13300_v35 = vld [vmem:[#allocation190_spill] sm:$0xff]  ;;  %v8155_v7 = vsel %vm1963_vm5, %v7925_v17, %v4490_v21  ;;  %v8163_v42 = vsel %vm1963_vm5, %v7948_v12, %v4504_v18 }
 0x164   : > { %v8111_v5 = vpop.permute.xlu1 %4862  ;;  %v4514_v36 = vunpack.i.l.bf16 %v13299_v30  ;;  %v4515_v56 = vunpack.i.h.bf16 %v13299_v30  ;;  %v4509_v2 = vunpack.i.l.bf16 %v13300_v35  ;;  %v4510_v44 = vunpack.i.h.bf16 %v13300_v35  ;;  %v13306_v17 = vld [vmem:[#allocation97_spill] sm:$0xff] }
 0x165   : > { %13294 = vst [vmem:[#allocation257_spill] sm:$0xff] %v8111_v5  ;;  %v8132_v53 = vpop.permute.xlu0 %4857  ;;  %v4525_v30 = vunpack.i.h.bf16 %v13303_v62  ;;  %v8175_v4 = vsel %vm1963_vm5, %v7956_v41, %v4499_v19  ;;  %v8179_v12 = vsel %vm1963_vm5, %v7952_v38, %v4500_v47  ;;  %v13307_v41 = vld [vmem:[#allocation196_spill] sm:$0xff]  ;;  %v13310_v47 = vld [vmem:[#allocation197_spill] sm:$0xff] }
 0x166   : > { %13296 = vst [vmem:[#allocation256_spill] sm:$0xff] %v8132_v53  ;;  %5152 = vrot.lane.b32.xlu1 %v13297_v22, %s6033_s12  ;;  %v13301_v22 = vld [vmem:[#allocation96_spill] sm:$0xff]  ;;  %v13304_v53 = vld [vmem:[#allocation194_spill] sm:$0xff]  ;;  %v8183_v21 = vsel %vm1996_vm6, %v7970_v3, %v4514_v36  ;;  %v8188_v18 = vsel %vm1996_vm6, %v7980_v54, %v4515_v56  ;;  %v8192_v35 = vsel %vm1996_vm6, %v7984_v37, %v4509_v2  ;;  %v4534_v19 = vunpack.i.l.bf16 %v13307_v41 }
 0x167   : > { %5147 = vrot.lane.b32.xlu0 %v13301_v22, %s6033_s12  ;;  %v4524_v22 = vunpack.i.l.bf16 %v13303_v62  ;;  %v4520_v48 = vunpack.i.h.bf16 %v13304_v53  ;;  %v13308_v62 = vld [vmem:[#allocation99_spill] sm:$0xff]  ;;  %v8201_v3 = vsel %vm1996_vm6, %v7988_v9, %v4510_v44  ;;  %v4530_v54 = vunpack.i.h.bf16 %v13310_v47  ;;  %v13314_v44 = vld [vmem:[#allocation101_spill] sm:$0xff] }
 0x168   : > { %v8151_v33 = vpop.permute.xlu1 %4872  ;;  %v4529_v36 = vunpack.i.l.bf16 %v13310_v47  ;;  %v8212_v56 = vsel %vm1996_vm6, %v8000_v1, %v4525_v30  ;;  %v8231_v30 = vsel %vm1996_vm6, %v8036_v39, %v4534_v19 }
 0x169   : > { %13302 = vst [vmem:[#allocation83_spill] sm:$0xff] %v8151_v33  ;;  %v4519_v33 = vunpack.i.l.bf16 %v13304_v53  ;;  %v8169_v5 = vpop.permute.xlu0 %4867  ;;  %v4535_v53 = vunpack.i.h.bf16 %v13307_v41  ;;  %v8208_v37 = vsel %vm1996_vm6, %v8012_v10, %v4524_v22  ;;  %13312 = vst [vmem:[#allocation86_spill] sm:$0xff] %v8212_v56  ;;  %v13315_v41 = vld [vmem:[#allocation198_spill] sm:$0xff]  ;;  %v8249_v39 = vsel %vm1996_vm6, %v8052_v60, %v4530_v54 }
 0x16a   : > { %13305 = vst [vmem:[#allocation181_spill] sm:$0xff] %v8169_v5  ;;  %5162 = vrot.lane.b32.xlu1 %v13306_v17, %s6033_s12  ;;  %13311 = vst [vmem:[#allocation182_spill] sm:$0xff] %v8208_v37  ;;  %v8224_v17 = vsel %vm1996_vm6, %v8016_v32, %v4520_v48  ;;  %v4545_v10 = vunpack.i.h.bf16 %v13315_v41  ;;  %v4544_v22 = vunpack.i.l.bf16 %v13315_v41  ;;  %v8245_v48 = vsel %vm1996_vm6, %v8040_v34, %v4529_v36  ;;  %v13324_v41 = vld [vmem:[#allocation200_spill] sm:$0xff] }
 0x16b   : > { %5157 = vrot.lane.b32.xlu0 %v13308_v62, %s6033_s12  ;;  %v8216_v2 = vsel %vm1996_vm6, %v8025_v43, %v4519_v33  ;;  %v13316_v62 = vld [vmem:[#allocation199_spill] sm:$0xff]  ;;  %13317 = vst [vmem:[#allocation184_spill] sm:$0xff] %v8231_v30  ;;  %v13318_v33 = vld [vmem:[#allocation92_spill] sm:$0xff]  ;;  %v8241_v32 = vsel %vm1996_vm6, %v8032_v8, %v4535_v53  ;;  %13322 = vst [vmem:[#allocation89_spill] sm:$0xff] %v8245_v48 }
 0x16c   : > { %v8197_v38 = vpop.permute.xlu1 %4882  ;;  %v4539_v1 = vunpack.i.l.bf16 %v13316_v62  ;;  %v4540_v43 = vunpack.i.h.bf16 %v13316_v62  ;;  %v4554_v47 = vunpack.i.l.bf16 %v13318_v33  ;;  %13321 = vst [vmem:[#allocation185_spill] sm:$0xff] %v8241_v32  ;;  %13323 = vst [vmem:[#allocation186_spill] sm:$0xff] %v8249_v39  ;;  %v4555_v19 = vunpack.i.h.bf16 %v13318_v33  ;;  %v13327_v8 = vld [vmem:[#allocation105_spill] sm:$0xff] }
 0x16d   : > { %13309 = vst [vmem:[#allocation254_spill] sm:$0xff] %v8197_v38  ;;  %v8218_v9 = vpop.permute.xlu0 %4877  ;;  %v4550_v62 = vunpack.i.h.bf16 %v13324_v41  ;;  %v13325_v38 = vld [vmem:[#allocation201_spill] sm:$0xff]  ;;  %v8261_v34 = vsel %vm1996_vm6, %v8069_v6, %v4544_v22  ;;  %v8265_v60 = vsel %vm1996_vm6, %v8059_v52, %v4545_v10  ;;  %v13333_v6 = vld [vmem:[#allocation202_spill] sm:$0xff]  ;;  %v13334_v52 = vld [vmem:[#allocation107_spill] sm:$0xff] }
 0x16e   : > { %13313 = vst [vmem:[#allocation183_spill] sm:$0xff] %v8218_v9  ;;  %5172 = vrot.lane.b32.xlu1 %v13314_v44, %s6033_s12  ;;  %v13319_v44 = vld [vmem:[#allocation103_spill] sm:$0xff]  ;;  %13328 = vst [vmem:[#allocation57_spill] sm:$0xff] %v8261_v34  ;;  %v8269_v53 = vsel %vm1996_vm6, %v8073_v13, %v4539_v1  ;;  %v4565_v54 = vunpack.i.h.bf16 %v13325_v38  ;;  %v8274_v36 = vsel %vm1996_vm6, %v8077_v40, %v4540_v43  ;;  %v4559_v22 = vunpack.i.l.bf16 %v13333_v6 }
 0x16f   : > { %5167 = vrot.lane.b32.xlu0 %v13319_v44, %s6033_s12  ;;  %v4549_v44 = vunpack.i.l.bf16 %v13324_v41  ;;  %13329 = vst [vmem:[#allocation62_spill] sm:$0xff] %v8265_v60  ;;  %13330 = vst [vmem:[#allocation65_spill] sm:$0xff] %v8269_v53  ;;  %v8278_v33 = vsel %vm1996_vm6, %v8093_v0, %v4554_v47  ;;  %v8287_v13 = vsel %vm1996_vm6, %v8089_v25, %v4555_v19  ;;  %v13337_v40 = vld [vmem:[#allocation203_spill] sm:$0xff]  ;;  %v13342_v19 = vld [vmem:[#allocation108_spill] sm:$0xff] }
 0x170   : > { %v8237_v9 = vpop.permute.xlu1 %4892  ;;  %13331 = vst [vmem:[#allocation91_spill] sm:$0xff] %v8274_v36  ;;  %13332 = vst [vmem:[#allocation59_spill] sm:$0xff] %v8278_v33  ;;  %v4575_v1 = vunpack.i.h.bf16 %v13337_v40  ;;  %v4574_v43 = vunpack.i.l.bf16 %v13337_v40  ;;  %v8298_v47 = vsel %vm1996_vm6, %v8102_v11, %v4550_v62  ;;  %v8315_v11 = vrot.slane %v7937_v16, 2 }
 0x171   : > { %13320 = vst [vmem:[#allocation88_spill] sm:$0xff] %v8237_v9  ;;  %v4564_v9 = vunpack.i.l.bf16 %v13325_v38  ;;  %v8255_v5 = vpop.permute.xlu0 %4887  ;;  %13336 = vst [vmem:[#allocation64_spill] sm:$0xff] %v8287_v13  ;;  %v4560_v38 = vunpack.i.h.bf16 %v13333_v6  ;;  %v8294_v0 = vsel %vm1996_vm6, %v8097_v49, %v4549_v44  ;;  %v1529_v49 = vrot.slane %v7706_v20, 2 }
 0x172   : > { %13326 = vst [vmem:[#allocation90_spill] sm:$0xff] %v8255_v5  ;;  %5182 = vrot.lane.b32.xlu1 %v13327_v8, %s6033_s12  ;;  %13338 = vst [vmem:[#allocation195_spill] sm:$0xff] %v8294_v0  ;;  %v8310_v8 = vsel %vm1996_vm6, %v8106_v15, %v4565_v54  ;;  %v1530_v44 = vrot.slane %v13266_v45, 2  ;;  %v8333_v40 = vsel %vm1996_vm6, %v8138_v27, %v4574_v43  ;;  %v13362_v5 = vld [vmem:[#allocation112_spill] sm:$0xff] }
 0x173   : > { %5177 = vrot.lane.b32.xlu0 %v13334_v52, %s6033_s12  ;;  %13339 = vst [vmem:[#allocation69_spill] sm:$0xff] %v8298_v47  ;;  %v8302_v41 = vsel %vm1996_vm6, %v8115_v61, %v4564_v9  ;;  %13343 = vst [vmem:[#allocation189_spill] sm:$0xff] %v8310_v8  ;;  %v8319_v61 = vsel %vm1996_vm6, %v8122_v63, %v4559_v22  ;;  %v13346_v9 = vld [vmem:[#allocation204_spill] sm:$0xff]  ;;  %v13347_v52 = vld [vmem:[#allocation109_spill] sm:$0xff]  ;;  %v8329_v54 = vsel %vm1996_vm6, %v8126_v57, %v4560_v38 }
 0x174   : > { %v8283_v10 = vpop.permute.xlu1 %4902  ;;  %13340 = vst [vmem:[#allocation94_spill] sm:$0xff] %v8302_v41  ;;  %13344 = vst [vmem:[#allocation190_spill] sm:$0xff] %v8315_v11  ;;  %v4570_v62 = vunpack.i.h.bf16 %v13346_v9  ;;  %v4569_v6 = vunpack.i.l.bf16 %v13346_v9  ;;  %v8337_v63 = vsel %vm1996_vm6, %v8130_v59, %v4575_v1  ;;  %v13352_v22 = vld [vmem:[#allocation205_spill] sm:$0xff]  ;;  %v13355_v57 = vld [vmem:[#allocation111_spill] sm:$0xff]  ;;  %v8350_v59 = vsel %vm359_vm1, %v1529_v49, %v1530_v44 }
 0x175   : > { %13335 = vst [vmem:[#allocation72_spill] sm:$0xff] %v8283_v10  ;;  %v8304_v25 = vpop.permute.xlu0 %4897  ;;  %13345 = vst [vmem:[#allocation96_spill] sm:$0xff] %v8319_v61  ;;  %v4585_v9 = vunpack.i.h.bf16 %v13352_v22  ;;  %v13356_v38 = vld [vmem:[#allocation208_spill] sm:$0xff]  ;;  %v8354_v1 = vsel %vm359_vm1, %v1530_v44, %v8315_v11 }
 0x176   : > { %13341 = vst [vmem:[#allocation187_spill] sm:$0xff] %v8304_v25  ;;  %5192 = vrot.lane.b32.xlu1 %v13342_v19, %s6033_s12  ;;  %13349 = vst [vmem:[#allocation194_spill] sm:$0xff] %v8329_v54  ;;  %v4584_v19 = vunpack.i.l.bf16 %v13352_v22  ;;  %v13353_v25 = vld [vmem:[#allocation206_spill] sm:$0xff]  ;;  %v4595_v27 = vunpack.i.h.bf16 %v13356_v38  ;;  %v4594_v43 = vunpack.i.l.bf16 %v13356_v38  ;;  %v8358_v22 = vsel %vm1996_vm6, %v8145_v31, %v4569_v6  ;;  %v13365_v11 = vld [vmem:[#allocation212_spill] sm:$0xff] }
 0x177   : > { %5187 = vrot.lane.b32.xlu0 %v13347_v52, %s6033_s12  ;;  %13350 = vst [vmem:[#allocation97_spill] sm:$0xff] %v8333_v40  ;;  %13351 = vst [vmem:[#allocation196_spill] sm:$0xff] %v8337_v63  ;;  %v4580_v52 = vunpack.i.h.bf16 %v13353_v25  ;;  %v4605_v31 = vunpack.i.h.bf16 %v13365_v11  ;;  %v4604_v6 = vunpack.i.l.bf16 %v13365_v11  ;;  %v8394_v11 = vpack.i.bf16 %v8354_v1, %v8350_v59 }
 0x178   : > { %v8325_v15 = vpop.permute.xlu1 %4912  ;;  %13357 = vst [vmem:[#allocation197_spill] sm:$0xff] %v8350_v59  ;;  %13358 = vst [vmem:[#allocation101_spill] sm:$0xff] %v8354_v1  ;;  %v8371_v49 = vsel %vm1996_vm6, %v8163_v42, %v4584_v19  ;;  %v13370_v19 = vld [vmem:[#allocation113_spill] sm:$0xff] }
 0x179   : > { %13348 = vst [vmem:[#allocation193_spill] sm:$0xff] %v8325_v15  ;;  %v4579_v15 = vunpack.i.l.bf16 %v13353_v25  ;;  %v8343_v10 = vpop.permute.xlu0 %4907  ;;  %13359 = vst [vmem:[#allocation198_spill] sm:$0xff] %v8358_v22  ;;  %v8362_v25 = vsel %vm1996_vm6, %v8155_v7, %v4570_v62  ;;  %v8378_v7 = vsel %vm1996_vm6, %v8159_v46, %v4585_v9  ;;  %v8398_v46 = vsel %vm2029_vm7, %v8183_v21, %v4594_v43 }
 0x17a   : > { %13354 = vst [vmem:[#allocation99_spill] sm:$0xff] %v8343_v10  ;;  %5202 = vrot.lane.b32.xlu1 %v13355_v57, %s6033_s12  ;;  %13360 = vst [vmem:[#allocation199_spill] sm:$0xff] %v8362_v25  ;;  %v13361_v57 = vld [vmem:[#allocation209_spill] sm:$0xff] }
 0x17b   : > { %v4589_v10 = vunpack.i.l.bf16 %v13361_v57  ;;  %5197 = vrot.lane.b32.xlu0 %v13362_v5, %s6033_s12  ;;  %13364 = vst [vmem:[#allocation103_spill] sm:$0xff] %v8371_v49  ;;  %v4590_v44 = vunpack.i.h.bf16 %v13361_v57  ;;  %13366 = vst [vmem:[#allocation200_spill] sm:$0xff] %v8378_v7  ;;  %v8382_v62 = vsel %vm1996_vm6, %v8175_v4, %v4579_v15  ;;  %v8386_v5 = vsel %vm1996_vm6, %v8179_v12, %v4580_v52  ;;  %v13372_v15 = vld [vmem:[#allocation213_spill] sm:$0xff]  ;;  %v13373_v57 = vld [vmem:[#allocation215_spill] sm:$0xff] }
 0x17c   : > { %v8367_v38 = vpop.permute.xlu1 %4922  ;;  %13367 = vst [vmem:[#allocation201_spill] sm:$0xff] %v8382_v62  ;;  %13368 = vst [vmem:[#allocation105_spill] sm:$0xff] %v8386_v5  ;;  %v8402_v4 = vsel %vm2029_vm7, %v8188_v18, %v4595_v27  ;;  %v4600_v12 = vunpack.i.h.bf16 %v13372_v15  ;;  %v4599_v9 = vunpack.i.l.bf16 %v13372_v15  ;;  %v4614_v5 = vunpack.i.l.bf16 %v13373_v57  ;;  %v13374_v62 = vld [vmem:[#allocation116_spill] sm:$0xff] }
 0x17d   : > { %13363 = vst [vmem:[#allocation92_spill] sm:$0xff] %v8367_v38  ;;  %v8388_v42 = vpop.permute.xlu0 %4917  ;;  %13371 = vst [vmem:[#allocation107_spill] sm:$0xff] %v8394_v11  ;;  %v8408_v52 = vsel %vm2029_vm7, %v8192_v35, %v4589_v10  ;;  %v8418_v18 = vsel %vm2029_vm7, %v8201_v3, %v4590_v44  ;;  %v8422_v27 = vsel %vm2029_vm7, %v8208_v37, %v4604_v6  ;;  %v13376_v10 = vld [vmem:[#allocation216_spill] sm:$0xff] }
 0x17e   : > { %13369 = vst [vmem:[#allocation202_spill] sm:$0xff] %v8388_v42  ;;  %5212 = vrot.lane.b32.xlu1 %v13370_v19, %s6033_s12  ;;  %v4615_v19 = vunpack.i.h.bf16 %v13373_v57  ;;  %v8426_v35 = vsel %vm2029_vm7, %v8212_v56, %v4605_v31  ;;  %v4609_v43 = vunpack.i.l.bf16 %v13376_v10  ;;  %v4610_v15 = vunpack.i.h.bf16 %v13376_v10  ;;  %v13377_v57 = vld [vmem:[#allocation217_spill] sm:$0xff]  ;;  %v13379_v31 = vld [vmem:[#allocation218_spill] sm:$0xff]  ;;  %v13554_v38 = vld [vmem:[#allocation16_spill] sm:$0xff] }
 0x17f   : > { %5207 = vrot.lane.b32.xlu0 %v13374_v62, %s6033_s12  ;;  %v4625_v62 = vunpack.i.h.bf16 %v13377_v57  ;;  %v4624_v1 = vunpack.i.l.bf16 %v13377_v57  ;;  %v8438_v3 = vsel %vm2029_vm7, %v8216_v2, %v4599_v9  ;;  %v8442_v44 = vsel %vm2029_vm7, %v8224_v17, %v4600_v12  ;;  %v13381_v2 = vld [vmem:[#allocation214_spill] sm:$0xff] }
 0x180   : > { %v8414_v21 = vpop.permute.xlu1 %4932  ;;  %v4620_v6 = vunpack.i.h.bf16 %v13379_v31  ;;  %v4619_v10 = vunpack.i.l.bf16 %v13379_v31  ;;  %v8448_v57 = vsel %vm2029_vm7, %v8231_v30, %v4614_v5  ;;  %v8452_v37 = vsel %vm2029_vm7, %v8241_v32, %v4615_v19  ;;  %v13383_v31 = vld [vmem:[#allocation220_spill] sm:$0xff] }
 0x181   : > { %13375 = vst [vmem:[#allocation203_spill] sm:$0xff] %v8414_v21  ;;  %v8432_v59 = vpop.permute.xlu0 %4927  ;;  %v8461_v17 = vsel %vm2029_vm7, %v8245_v48, %v4609_v43  ;;  %v4630_v5 = vunpack.i.h.bf16 %v13383_v31  ;;  %v4629_v30 = vunpack.i.l.bf16 %v13383_v31  ;;  %v8468_v19 = vsel %vm2029_vm7, %v8249_v39, %v4610_v15  ;;  %v13386_v39 = vld [vmem:[#allocation221_spill] sm:$0xff]  ;;  %v5950_v21 = vld [vmem:[%s6322_s10 + $0x190] sm:$0xf] }
 0x182   : > { %13378 = vst [vmem:[#allocation108_spill] sm:$0xff] %v8432_v59  ;;  %5222 = vrot.lane.b32.xlu1 %v8394_v11, %s6033_s12  ;;  %v13380_v11 = vld [vmem:[#allocation219_spill] sm:$0xff]  ;;  %v8472_v32 = vsel %vm2029_vm7, %v8261_v34, %v4624_v1  ;;  %v8484_v31 = vsel %vm2029_vm7, %v8269_v53, %v4619_v10  ;;  %v8488_v15 = vsel %vm2029_vm7, %v8274_v36, %v4620_v6  ;;  %v4644_v1 = vunpack.i.l.bf16 %v13386_v39 }
 0x183   : > { %v4634_v56 = vunpack.i.l.bf16 %v13380_v11  ;;  %5217 = vrot.lane.b32.xlu0 %v13381_v2, %s6033_s12  ;;  %v4635_v12 = vunpack.i.h.bf16 %v13380_v11  ;;  %v8476_v2 = vsel %vm2029_vm7, %v8265_v60, %v4625_v62  ;;  %v13385_v11 = vld [vmem:[#allocation125_spill] sm:$0xff]  ;;  %v4645_v62 = vunpack.i.h.bf16 %v13386_v39  ;;  %v13387_v60 = vld [vmem:[#allocation222_spill] sm:$0xff]  ;;  %v13390_v39 = vld [vmem:[#allocation223_spill] sm:$0xff] }
 0x184   : > { %v8457_v9 = vpop.permute.xlu1 %4942  ;;  %v4640_v48 = vunpack.i.h.bf16 %v13387_v60  ;;  %v8508_v36 = vsel %vm2029_vm7, %v8294_v0, %v4629_v30  ;;  %v13393_v30 = vld [vmem:[#allocation128_spill] sm:$0xff] }
 0x185   : > { %13382 = vst [vmem:[#allocation204_spill] sm:$0xff] %v8457_v9  ;;  %v8478_v43 = vpop.permute.xlu0 %4937  ;;  %v8493_v34 = vsel %vm2029_vm7, %v8278_v33, %v4634_v56  ;;  %v8504_v6 = vsel %vm2029_vm7, %v8287_v13, %v4635_v12  ;;  %v8512_v56 = vsel %vm2029_vm7, %v8298_v47, %v4630_v5  ;;  %v13391_v33 = vld [vmem:[#allocation224_spill] sm:$0xff]  ;;  %v8524_v5 = vsel %vm2029_vm7, %v8302_v41, %v4644_v1  ;;  %v13394_v47 = vld [vmem:[#allocation225_spill] sm:$0xff]  ;;  %v5948_v41 = vld [vmem:[%s6322_s10 + $0x180] sm:$0xff] }
 0x186   : > { %13384 = vst [vmem:[#allocation109_spill] sm:$0xff] %v8478_v43  ;;  %5232 = vrot.lane.b32.xlu1 %v13385_v11, %s6034_s13  ;;  %v4639_v11 = vunpack.i.l.bf16 %v13387_v60  ;;  %v13388_v43 = vld [vmem:[#allocation127_spill] sm:$0xff]  ;;  %v4655_v60 = vunpack.i.h.bf16 %v13390_v39  ;;  %v4650_v53 = vunpack.i.h.bf16 %v13391_v33  ;;  %v4649_v12 = vunpack.i.l.bf16 %v13391_v33 }
 0x187   : > { %5227 = vrot.lane.b32.xlu0 %v13388_v43, %s6034_s13  ;;  %v4654_v43 = vunpack.i.l.bf16 %v13390_v39  ;;  %v4665_v0 = vunpack.i.h.bf16 %v13394_v47  ;;  %v8530_v39 = vsel %vm2029_vm7, %v8310_v8, %v4645_v62  ;;  %v1191_v9 = vrot.slane %v5948_v41, 3  ;;  %v13404_v8 = vld [vmem:[#allocation228_spill] sm:$0xff] }
 0x188   : > { %v8500_v10 = vpop.permute.xlu1 %4952  ;;  %v8534_v33 = vsel %vm2029_vm7, %v8319_v61, %v4639_v11  ;;  %v8547_v62 = vrot.slane %v5950_v21, 3  ;;  %v8563_v41 = vsel %vm2029_vm7, %v8362_v25, %v4650_v53  ;;  %v13399_v21 = vld [vmem:[#allocation136_spill] sm:$0xff] }
 0x189   : > { %13389 = vst [vmem:[#allocation205_spill] sm:$0xff] %v8500_v10  ;;  %v8518_v13 = vpop.permute.xlu0 %4947  ;;  %v4664_v10 = vunpack.i.l.bf16 %v13394_v47  ;;  %v5949_v47 = vld [vmem:[%s6322_s10 + $0x188] sm:$0xff]  ;;  %v8551_v11 = vsel %vm2029_vm7, %v8333_v40, %v4654_v43  ;;  %v13409_v40 = vld [vmem:[#allocation229_spill] sm:$0xff] }
 0x18a   : > { %13392 = vst [vmem:[#allocation206_spill] sm:$0xff] %v8518_v13  ;;  %5242 = vrot.lane.b32.xlu1 %v13393_v30, %s6034_s13  ;;  %v8538_v13 = vsel %vm2029_vm7, %v8329_v54, %v4640_v48  ;;  %v13395_v30 = vld [vmem:[#allocation135_spill] sm:$0xff]  ;;  %v1192_v59 = vrot.slane %v5949_v47, 3  ;;  %13397 = vst [vmem:[#allocation208_spill] sm:$0xff] %v8547_v62  ;;  %v8555_v48 = vsel %vm2029_vm7, %v8337_v63, %v4655_v60  ;;  %v4669_v54 = vunpack.i.l.bf16 %v13404_v8 }
 0x18b   : > { %5237 = vrot.lane.b32.xlu0 %v13395_v30, %s6034_s13  ;;  %v8559_v30 = vsel %vm2029_vm7, %v8358_v22, %v4649_v12  ;;  %v8571_v43 = vsel %vm2029_vm7, %v8371_v49, %v4664_v10  ;;  %v8575_v60 = vsel %vm2029_vm7, %v8378_v7, %v4665_v0  ;;  %v13403_v22 = vld [vmem:[#allocation227_spill] sm:$0xff]  ;;  %v4670_v10 = vunpack.i.h.bf16 %v13404_v8 }
 0x18c   : > { %v8542_v1 = vpop.permute.xlu1 %4962  ;;  %13400 = vst [vmem:[#allocation112_spill] sm:$0xff] %v8571_v43  ;;  %13401 = vst [vmem:[#allocation212_spill] sm:$0xff] %v8575_v60  ;;  %v4675_v53 = vunpack.i.h.bf16 %v13403_v22  ;;  %v4674_v25 = vunpack.i.l.bf16 %v13403_v22  ;;  %v8588_v0 = vsel %vm536_vm2, %v1191_v9, %v1192_v59  ;;  %v8592_v12 = vsel %vm536_vm2, %v1192_v59, %v8547_v62  ;;  %v13411_v63 = vld [vmem:[#allocation147_spill] sm:$0xff] }
 0x18d   : > { %13396 = vst [vmem:[#allocation111_spill] sm:$0xff] %v8542_v1  ;;  %v8565_v47 = vpop.permute.xlu0 %4957  ;;  %13407 = vst [vmem:[#allocation213_spill] sm:$0xff] %v8588_v0  ;;  %v1630_v8 = vrot.slane %v7706_v20, 3  ;;  %v1631_v9 = vrot.slane %v13266_v45, 3  ;;  %v8604_v7 = vrot.slane %v7937_v16, 3  ;;  %v13414_v20 = vld [vmem:[#allocation149_spill] sm:$0xff]  ;;  %v8625_v62 = vsel %vm2062_vm8, %v8418_v18, %v4670_v10 }
 0x18e   : > { %13398 = vst [vmem:[#allocation209_spill] sm:$0xff] %v8565_v47  ;;  %5252 = vrot.lane.b32.xlu1 %v13399_v21, %s6034_s13  ;;  %v13405_v21 = vld [vmem:[#allocation143_spill] sm:$0xff]  ;;  %13408 = vst [vmem:[#allocation215_spill] sm:$0xff] %v8592_v12  ;;  %v8608_v59 = vsel %vm2062_vm8, %v8398_v46, %v4674_v25  ;;  %v8612_v60 = vsel %vm2062_vm8, %v8402_v4, %v4675_v53  ;;  %v13416_v25 = vld [vmem:[#allocation232_spill] sm:$0xff]  ;;  %v13417_v53 = vunpack.i.l.bf16 %v13409_v40  ;;  %v13421_v18 = vunpack.i.h.bf16 %v13409_v40 }
 0x18f   : > { %5247 = vrot.lane.b32.xlu0 %v13405_v21, %s6034_s13  ;;  %v13412_v21 = vld [vmem:[#allocation230_spill] sm:$0xff]  ;;  %13413 = vst [vmem:[#allocation216_spill] sm:$0xff] %v8604_v7  ;;  %v5296_v4 = vpack.i.bf16 %v8592_v12, %v8588_v0  ;;  %v13552_v1 = vld [vmem:[#allocation32_spill] sm:$0xff] }
 0x190   : > { %v8584_v61 = vpop.permute.xlu1 %4972  ;;  %v4679_v49 = vunpack.i.l.bf16 %v13412_v21  ;;  %v4680_v22 = vunpack.i.h.bf16 %v13412_v21  ;;  %v8645_v10 = vsel %vm2062_vm8, %v8426_v35, %v13421_v18  ;;  %v13424_v21 = vld [vmem:[#allocation234_spill] sm:$0xff]  ;;  %v13425_v18 = vld [vmem:[#allocation235_spill] sm:$0xff] }
 0x191   : > { %13406 = vst [vmem:[#allocation113_spill] sm:$0xff] %v8584_v61  ;;  %v8596_v43 = vpop.permute.xlu0 %4967 }
 0x192   : > { %13410 = vst [vmem:[#allocation116_spill] sm:$0xff] %v8596_v43  ;;  %5262 = vrot.lane.b32.xlu1 %v13411_v63, %s6034_s13  ;;  %v8616_v63 = vsel %vm2062_vm8, %v8408_v52, %v4669_v54  ;;  %v8633_v54 = vsel %vm2062_vm8, %v8422_v27, %v13417_v53  ;;  %v13418_v52 = vld [vmem:[#allocation233_spill] sm:$0xff]  ;;  %v8649_v46 = vsel %vm2062_vm8, %v8438_v3, %v4679_v49  ;;  %v13426_v49 = vld [vmem:[#allocation156_spill] sm:$0xff]  ;;  %v13457_v43 = vld [vmem:[#allocation2_spill] sm:$0xff] }
 0x193   : > { %5257 = vrot.lane.b32.xlu0 %v13414_v20, %s6034_s13  ;;  %v8652_v27 = vsel %vm536_vm2, %v1630_v8, %v1631_v9  ;;  %v8656_v53 = vsel %vm536_vm2, %v1631_v9, %v8604_v7  ;;  %v13428_v8 = vunpack.i.l.bf16 %v13416_v25  ;;  %v13434_v20 = vld [vmem:[#allocation159_spill] sm:$0xff]  ;;  %v13439_v7 = vunpack.i.l.bf16 %v13425_v18 }
 0x194   : > { %v8621_v45 = vpop.permute.xlu1 %4982  ;;  %13422 = vst [vmem:[#allocation219_spill] sm:$0xff] %v8652_v27  ;;  %13423 = vst [vmem:[#allocation214_spill] sm:$0xff] %v8656_v53 }
 0x195   : > { %13415 = vst [vmem:[#allocation217_spill] sm:$0xff] %v8621_v45  ;;  %v8637_v61 = vpop.permute.xlu0 %4977  ;;  %v13420_v45 = vld [vmem:[#allocation152_spill] sm:$0xff]  ;;  %v8673_v9 = vsel %vm2062_vm8, %v8448_v57, %v13428_v8  ;;  %v13431_v57 = vunpack.i.h.bf16 %v13418_v52 }
 0x196   : > { %13419 = vst [vmem:[#allocation218_spill] sm:$0xff] %v8637_v61  ;;  %5272 = vrot.lane.b32.xlu1 %v13420_v45, %s6034_s13  ;;  %v8660_v45 = vsel %vm2062_vm8, %v8442_v44, %v4680_v22  ;;  %v13429_v44 = vunpack.i.h.bf16 %v13416_v25  ;;  %v13432_v61 = vld [vmem:[#allocation236_spill] sm:$0xff]  ;;  %v8703_v25 = vpack.i.bf16 %v8656_v53, %v8652_v27 }
 0x197   : > { %5267 = vrot.lane.b32.xlu0 %v13426_v49, %s6034_s13  ;;  %v13430_v49 = vunpack.i.l.bf16 %v13418_v52  ;;  %v8694_v8 = vsel %vm2062_vm8, %v8468_v19, %v13431_v57  ;;  %v13437_v19 = vunpack.i.l.bf16 %v13424_v21  ;;  %v13440_v52 = vld [vmem:[#allocation162_spill] sm:$0xff] }
 0x198   : > { %v8667_v3 = vpop.permute.xlu1 %4992  ;;  %v8679_v22 = vsel %vm2062_vm8, %v8452_v37, %v13429_v44  ;;  %13435 = vst [vmem:[#allocation221_spill] sm:$0xff] %v8703_v25  ;;  %v13438_v37 = vunpack.i.h.bf16 %v13424_v21  ;;  %v13445_v21 = vld [vmem:[#allocation239_spill] sm:$0xff] }
 0x199   : > { %13427 = vst [vmem:[#allocation220_spill] sm:$0xff] %v8667_v3  ;;  %v8688_v35 = vsel %vm2062_vm8, %v8461_v17, %v13430_v49  ;;  %v8697_v44 = vpop.permute.xlu0 %4987  ;;  %v13436_v49 = vld [vmem:[#allocation237_spill] sm:$0xff]  ;;  %v8712_v57 = vsel %vm2062_vm8, %v8472_v32, %v13437_v19  ;;  %v8724_v17 = vsel %vm2062_vm8, %v8484_v31, %v13439_v7  ;;  %v13442_v32 = vunpack.i.h.bf16 %v13425_v18  ;;  %v13444_v7 = vld [vmem:[#allocation238_spill] sm:$0xff]  ;;  %v13450_v31 = vld [vmem:[#allocation240_spill] sm:$0xff] }
 0x19a   : > { %13433 = vst [vmem:[#allocation125_spill] sm:$0xff] %v8697_v44  ;;  %5282 = vrot.lane.b32.xlu1 %v13434_v20, %s6034_s13  ;;  %v8718_v20 = vsel %vm2062_vm8, %v8476_v2, %v13438_v37  ;;  %v13443_v37 = vunpack.i.l.bf16 %v13432_v61  ;;  %v13447_v18 = vld [vmem:[#allocation53_spill] sm:$0xff]  ;;  %v13456_v3 = vld [vmem:[#allocation3_spill] sm:$0xff]  ;;  %v13460_v12 = vunpack.i.h.bf16 %v13444_v7 }
 0x19b   : > { %5277 = vrot.lane.b32.xlu0 %v13440_v52, %s6034_s13  ;;  %v8734_v19 = vsel %vm2062_vm8, %v8488_v15, %v13442_v32  ;;  %v13448_v15 = vunpack.i.h.bf16 %v13432_v61  ;;  %v13452_v61 = vld [vmem:[#allocation165_spill] sm:$0xff] }
 0x19c   : > { %v8728_v40 = vpop.permute.xlu1 %5002  ;;  %v8741_v53 = vsel %vm2062_vm8, %v8493_v34, %v13443_v37  ;;  %v13449_v34 = vunpack.i.l.bf16 %v13436_v49 }
 0x19d   : > { %13441 = vst [vmem:[#allocation222_spill] sm:$0xff] %v8728_v40  ;;  %v8746_v0 = vpop.permute.xlu0 %4997  ;;  %v8754_v32 = vsel %vm2062_vm8, %v8504_v6, %v13448_v15  ;;  %v13454_v6 = vld [vmem:[#allocation19_spill] sm:$0xff]  ;;  %v13455_v15 = vld [vmem:[#allocation18_spill] sm:$0xff] }
 0x19e   : > { %13446 = vst [vmem:[#allocation127_spill] sm:$0xff] %v8746_v0  ;;  %5292 = vrot.lane.b32.xlu1 %v13447_v18, %s6034_s13  ;;  %v8760_v37 = vsel %vm2062_vm8, %v8508_v36, %v13449_v34  ;;  %v13451_v18 = vld [vmem:[#allocation241_spill] sm:$0xff]  ;;  %v4184_v44 = vcombine.low %v13455_v15, %v13454_v6  ;;  %v4176_v36 = vcombine.low %v13457_v43, %v13456_v3  ;;  %v13458_v34 = vunpack.i.h.bf16 %v13436_v49  ;;  %v13471_v15 = vld [vmem:[#allocation4_spill] sm:$0xff]  ;;  %v13479_v49 = vld [vmem:[#allocation167_spill] sm:$0xff] }
 0x19f   : > { %5287 = vrot.lane.b32.xlu0 %v13452_v61, %s6034_s13  ;;  %v13459_v0 = vunpack.i.l.bf16 %v13444_v7  ;;  %v8791_v6 = vsel %vm2062_vm8, %v8530_v39, %v13460_v12  ;;  %v13461_v43 = vunpack.i.l.bf16 %v13445_v21  ;;  %v13464_v12 = vunpack.i.l.bf16 %v13450_v31  ;;  %v5952_v7 = vld [vmem:[%s6322_s10 + $0x1a0] sm:$0xff] }
 0x1a0   : > { %v8768_v40 = vpop.permute.xlu1 %5012  ;;  %v8778_v52 = vsel %vm2062_vm8, %v8512_v56, %v13458_v34  ;;  %4218 = vmatprep.subr.bf16.mxu0 %v4184_v44  ;;  %v13466_v44 = vunpack.i.l.bf16 %v13451_v18  ;;  %v1732_v27 = vrot.slane %v5952_v7, 4 }
 0x1a1   : > { %13453 = vst [vmem:[#allocation223_spill] sm:$0xff] %v8768_v40  ;;  %v8785_v61 = vsel %vm2062_vm8, %v8524_v5, %v13459_v0  ;;  %v8797_v56 = vsel %vm2062_vm8, %v8534_v33, %v13461_v43  ;;  %v8799_v3 = vpop.permute.xlu0 %5007  ;;  %v13463_v5 = vunpack.i.h.bf16 %v13445_v21  ;;  %v8814_v33 = vsel %vm2062_vm8, %v8551_v11, %v13464_v12  ;;  %4219 = vmatpush3.bf16.msra.mxu0 %v4176_v36  ;;  %v13468_v11 = vld [vmem:[#allocation21_spill] sm:$0xff]  ;;  %v13475_v21 = vld [vmem:[#allocation251_spill] sm:$0xff] }
 0x1a2   : > { %13462 = vst [vmem:[#allocation224_spill] sm:$0xff] %v8799_v3  ;;  %5302 = vrot.lane.b32.xlu1 %v8703_v25, %s6034_s13  ;;  %v13465_v0 = vunpack.i.h.bf16 %v13450_v31  ;;  %v8826_v43 = vsel %vm2062_vm8, %v8559_v30, %v13466_v44  ;;  %v13470_v12 = vld [vmem:[#allocation5_spill] sm:$0xff]  ;;  %v13474_v44 = vld [vmem:[#allocation248_spill] sm:$0xff]  ;;  %v13481_v25 = vld [vmem:[#allocation23_spill] sm:$0xff] }
 0x1a3   : > { %v8808_v39 = vsel %vm2062_vm8, %v8538_v13, %v13463_v5  ;;  %5297 = vrot.lane.b32.xlu0 %v5296_v4, %s6034_s13  ;;  %v13469_v5 = vld [vmem:[#allocation20_spill] sm:$0xff]  ;;  %v4177_v2 = vcombine.low %v13471_v15, %v13470_v12  ;;  %v4755_v31 = vunpack.i.h.bf16 %v13474_v44  ;;  %v4754_v4 = vunpack.i.l.bf16 %v13474_v44  ;;  %v13477_v12 = vld [vmem:[#allocation166_spill] sm:$0xff]  ;;  %v13483_v3 = vld [vmem:[#allocation7_spill] sm:$0xff] }
 0x1a4   : > { %v8820_v34 = vsel %vm2062_vm8, %v8555_v48, %v13465_v0  ;;  %v8829_v13 = vpop.permute.xlu1 %5022  ;;  %v4185_v36 = vcombine.low %v13469_v5, %v13468_v11  ;;  %v13472_v48 = vunpack.i.h.bf16 %v13451_v18  ;;  %v4750_v11 = vunpack.i.h.bf16 %v13475_v21  ;;  %v5951_v18 = vld [vmem:[%s6322_s10 + $0x198] sm:$0xff]  ;;  %v13485_v40 = vld [vmem:[#allocation255_spill] sm:$0xff] }
 0x1a5   : > { %13467 = vst [vmem:[#allocation128_spill] sm:$0xff] %v8829_v13  ;;  %v4749_v5 = vunpack.i.l.bf16 %v13475_v21  ;;  %v8847_v15 = vpop.permute.xlu0 %5017  ;;  %v1731_v30 = vrot.slane %v5951_v18, 4  ;;  %v1734_v21 = vrot.slane %v7937_v16, 4  ;;  %v12711_v7 = vunpack.i.h.bf16 %v13485_v40  ;;  %v13486_v18 = vld [vmem:[#allocation258_spill] sm:$0xff] }
 0x1a6   : > { %v8839_v0 = vsel %vm2062_vm8, %v8563_v41, %v13472_v48  ;;  %13476 = vst [vmem:[#allocation225_spill] sm:$0xff] %v8847_v15  ;;  %5312 = vrot.lane.b32.xlu1 %v13477_v12, %s6035_s14  ;;  %4220 = vmatprep.subr.bf16.mxu0 %v4185_v36  ;;  %v13482_v15 = vld [vmem:[#allocation22_spill] sm:$0xff]  ;;  %v12710_v48 = vunpack.i.l.bf16 %v13485_v40  ;;  %v4759_v16 = vunpack.i.l.bf16 %v13486_v18 }
 0x1a7   : > { %4221 = vmatpush3.bf16.msra.mxu0 %v4177_v2  ;;  %5307 = vrot.lane.b32.xlu0 %v13479_v49, %s6035_s14  ;;  %v4186_v13 = vcombine.low %v13482_v15, %v13481_v25  ;;  %v13484_v12 = vld [vmem:[#allocation6_spill] sm:$0xff]  ;;  %v8866_v2 = vsel %vm2095_vm9, %v8608_v59, %v4754_v4  ;;  %v8870_v49 = vsel %vm2095_vm9, %v8612_v60, %v4755_v31  ;;  %v13488_v25 = vld [vmem:[#allocation168_spill] sm:$0xff]  ;;  %v4760_v60 = vunpack.i.h.bf16 %v13486_v18  ;;  %v13489_v4 = vld [vmem:[#allocation169_spill] sm:$0xff] }
 0x1a8   : > { %v8855_v44 = vpop.permute.xlu1 %5032  ;;  %v4178_v36 = vcombine.low %v13484_v12, %v13483_v3  ;;  %v8880_v3 = vsel %vm2095_vm9, %v8616_v63, %v4749_v5  ;;  %v8884_v59 = vsel %vm2095_vm9, %v8625_v62, %v4750_v11  ;;  %v8896_v63 = vsel %vm713_vm3, %v1732_v27, %v1734_v21  ;;  %v13491_v5 = vld [vmem:[#allocation25_spill] sm:$0xff]  ;;  %v13492_v12 = vld [vmem:[#allocation24_spill] sm:$0xff]  ;;  %v13520_v40 = vld [vmem:[#allocation34_spill] sm:$0xff] }
 0x1a9   : > { %13480 = vst [vmem:[#allocation135_spill] sm:$0xff] %v8855_v44  ;;  %v8874_v44 = vpop.permute.xlu0 %5027  ;;  %4222 = vmatprep.subr.bf16.mxu0 %v4186_v13  ;;  %v8893_v13 = vsel %vm713_vm3, %v1731_v30, %v1732_v27  ;;  %v4187_v62 = vcombine.low %v13492_v12, %v13491_v5  ;;  %v13493_v11 = vld [vmem:[#allocation9_spill] sm:$0xff]  ;;  %v12714_v31 = vunpack.i.h.bf16 %v7740_v58  ;;  %v8909_v30 = vsel %vm2095_vm9, %v8633_v54, %v12710_v48  ;;  %v13496_v5 = vld [vmem:[#allocation170_spill] sm:$0xff]  ;;  %v13501_v48 = vld [vmem:[#allocation11_spill] sm:$0xff] }
 0x1aa   : > { %13487 = vst [vmem:[#allocation136_spill] sm:$0xff] %v8874_v44  ;;  %5322 = vrot.lane.b32.xlu1 %v13488_v25, %s6035_s14  ;;  %v13494_v25 = vld [vmem:[#allocation8_spill] sm:$0xff]  ;;  %v8918_v12 = vsel %vm2095_vm9, %v8649_v46, %v4759_v16  ;;  %v8932_v46 = vsel %vm2095_vm9, %v8660_v45, %v4760_v60  ;;  %v13503_v27 = vunpack.i.l.bf16 %v7740_v58  ;;  %v13507_v60 = vunpack.i.l.bf16 %v7783_v28  ;;  %v13533_v44 = vld [vmem:[#allocation37_spill] sm:$0xff] }
 0x1ab   : > { %4223 = vmatpush3.bf16.msra.mxu0 %v4178_v36  ;;  %5317 = vrot.lane.b32.xlu0 %v13489_v4, %s6035_s14  ;;  %v4179_v18 = vcombine.low %v13494_v25, %v13493_v11  ;;  %v12712_v36 = vunpack.i.h.bf16 %v7749_v24  ;;  %v12713_v4 = vunpack.i.l.bf16 %v7749_v24  ;;  %v8924_v11 = vsel %vm2095_vm9, %v8645_v10, %v12711_v7  ;;  %v13500_v7 = vld [vmem:[#allocation26_spill] sm:$0xff]  ;;  %v13514_v58 = vld [vmem:[#allocation12_spill] sm:$0xff] }
 0x1ac   : > { %v8890_v15 = vpop.permute.xlu1 %5042  ;;  %4224 = vmatprep.subr.bf16.mxu0 %v4187_v62  ;;  %v13497_v62 = vld [vmem:[#allocation171_spill] sm:$0xff]  ;;  %v13502_v25 = vld [vmem:[#allocation10_spill] sm:$0xff]  ;;  %v8947_v45 = vsel %vm2095_vm9, %v8673_v9, %v13503_v27  ;;  %v8966_v9 = vsel %vm2095_vm9, %v8679_v22, %v12714_v31  ;;  %v13506_v31 = vunpack.i.l.bf16 %v7762_v26  ;;  %v9001_v16 = vsel %vm2095_vm9, %v8724_v17, %v13507_v60 }
 0x1ad   : > { %13490 = vst [vmem:[#allocation227_spill] sm:$0xff] %v8890_v15  ;;  %v8912_v21 = vpop.permute.xlu0 %5037  ;;  %v13515_v17 = vunpack.i.h.bf16 %v7783_v28  ;;  %v13518_v28 = vld [vmem:[#allocation174_spill] sm:$0xff]  ;;  %v13531_v15 = vld [vmem:[#allocation15_spill] sm:$0xff] }
 0x1ae   : > { %13495 = vst [vmem:[#allocation228_spill] sm:$0xff] %v8912_v21  ;;  %5332 = vrot.lane.b32.xlu1 %v13496_v5, %s6035_s14  ;;  %v13499_v5 = vld [vmem:[#allocation27_spill] sm:$0xff] }
 0x1af   : > { %4225 = vmatpush3.bf16.msra.mxu0 %v4179_v18  ;;  %5327 = vrot.lane.b32.xlu0 %v13497_v62, %s6035_s14  ;;  %v4188_v54 = vcombine.low %v13500_v7, %v13499_v5  ;;  %v4180_v18 = vcombine.low %v13502_v25, %v13501_v48  ;;  %v8954_v62 = vsel %vm2095_vm9, %v8688_v35, %v12713_v4  ;;  %v13505_v25 = vld [vmem:[#allocation172_spill] sm:$0xff]  ;;  %v8974_v35 = vld [vmem:[%s6322_s10 + $0x60] sm:$0xff]  ;;  %v8977_v5 = vld [vmem:[%s6322_s10 + $0x68] sm:$0xff] }
 0x1b0   : > { %v8937_v10 = vpop.permute.xlu1 %5052  ;;  %v8960_v7 = vsel %vm2095_vm9, %v8694_v8, %v12712_v36  ;;  %v8982_v36 = vld [vmem:[%s6322_s10 + $0x48] sm:$0xff]  ;;  %v8985_v4 = vld [vmem:[%s6322_s10 + $0x50] sm:$0xff]  ;;  %v13511_v8 = vld [vmem:[#allocation29_spill] sm:$0xff]  ;;  %v9021_v60 = vsel %vm2095_vm9, %v8734_v19, %v13515_v17  ;;  %v13516_v19 = vunpack.i.l.bf16 %v7799_v51 }
 0x1b1   : > { %13498 = vst [vmem:[#allocation143_spill] sm:$0xff] %v8937_v10  ;;  %v8969_v27 = vpop.permute.xlu0 %5047  ;;  %4226 = vmatprep.subr.bf16.mxu0 %v4188_v54  ;;  %v13508_v54 = vunpack.i.h.bf16 %v7762_v26  ;;  %v13512_v48 = vld [vmem:[#allocation28_spill] sm:$0xff]  ;;  %v13513_v10 = vld [vmem:[#allocation13_spill] sm:$0xff] }
 0x1b2   : > { %13504 = vst [vmem:[#allocation147_spill] sm:$0xff] %v8969_v27  ;;  %5342 = vrot.lane.b32.xlu1 %v13505_v25, %s6035_s14  ;;  %v8993_v25 = vsel %vm2095_vm9, %v8712_v57, %v13506_v31  ;;  %v13509_v57 = vld [vmem:[#allocation173_spill] sm:$0xff]  ;;  %v4181_v24 = vcombine.low %v13514_v58, %v13513_v10  ;;  %v12727_v10 = vmov 0   ;;  %v13519_v58 = vld [vmem:[#allocation35_spill] sm:$0xff] }
 0x1b3   : > { %4227 = vmatpush3.bf16.msra.mxu0 %v4180_v18  ;;  %v9007_v22 = vsel %vm2095_vm9, %v8718_v20, %v13508_v54  ;;  %5337 = vrot.lane.b32.xlu0 %v13509_v57, %s6035_s14  ;;  %v4189_v18 = vcombine.low %v13512_v48, %v13511_v8  ;;  %v9025_v54 = vld [vmem:[%s6322_s10 + $0x90] sm:$0xff]  ;;  %v9028_v26 = vld [vmem:[%s6322_s10 + $0x98] sm:$0xff]  ;;  %v9036_v48 = vld [vmem:[%s6322_s10 + $0x80] sm:$0xff]  ;;  %v9045_v8 = vsel %vm2095_vm9, %v8741_v53, %v13516_v19 }
 0x1b4   : > { %v9011_v31 = vpop.permute.xlu1 %5062  ;;  %3967 = vmatprep.subr.bf16.mxu1 %v12727_v10  ;;  %v4192_v27 = vcombine.low %v13520_v40, %v13519_v58  ;;  %v13521_v10 = vunpack.i.h.bf16 %v7799_v51  ;;  %v13522_v19 = vld [vmem:[#allocation54_spill] sm:$0xff]  ;;  %v13524_v57 = vld [vmem:[#allocation61_spill] sm:$0xff]  ;;  %v9093_v58 = vld [vmem:[%s6322_s10 + $0xa8] sm:$0xff] }
 0x1b5   : > { %13510 = vst [vmem:[#allocation230_spill] sm:$0xff] %v9011_v31  ;;  %v9033_v31 = vld [vmem:[%s6322_s10 + $0x78] sm:$0xff]  ;;  %v9049_v20 = vpop.permute.xlu0 %5057  ;;  %4228 = vmatprep.subr.bf16.mxu0 %v4189_v18  ;;  %v13523_v17 = vrot.slane %v13522_v19, 1  ;;  %v13526_v18 = vunpack.i.h.bf16 %v7817_v14  ;;  %v13530_v53 = vld [vmem:[#allocation30_spill] sm:$0xff] }
 0x1b6   : > { %13517 = vst [vmem:[#allocation149_spill] sm:$0xff] %v9049_v20  ;;  %5352 = vrot.lane.b32.xlu1 %v13518_v28, %s6035_s14  ;;  %v9059_v21 = vsel %vm2095_vm9, %v8754_v32, %v13521_v10  ;;  %v13525_v28 = vunpack.i.l.bf16 %v7817_v14  ;;  %v13527_v10 = vld [vmem:[#allocation175_spill] sm:$0xff]  ;;  %3968 = vmatpush1.bf16.msra.mxu1 %v4192_v27  ;;  %v13534_v14 = vld [vmem:[#allocation36_spill] sm:$0xff]  ;;  %v13537_v27 = vunpack.i.l.bf16 %v7848_v55 }
 0x1b7   : > { %v9065_v20 = vpack.i.bf16 %v13524_v57, %v13523_v17  ;;  %4229 = vmatpush3.bf16.msra.mxu0 %v4181_v24  ;;  %v9077_v32 = vsel %vm2095_vm9, %v8778_v52, %v13526_v18  ;;  %5347 = vrot.lane.b32.xlu0 %v13527_v10, %s6035_s14  ;;  %v13529_v24 = vld [vmem:[#allocation31_spill] sm:$0xff]  ;;  %v4193_v47 = vcombine.low %v13534_v14, %v13533_v44  ;;  %v13535_v10 = vld [vmem:[#allocation93_spill] sm:$0xff]  ;;  %v13539_v14 = vld [vmem:[#allocation176_spill] sm:$0xff]  ;;  %v2603_v44 = vrot.slane %v8977_v5, 7 }
 0x1b8   : > { %v9071_v40 = vsel %vm2095_vm9, %v8760_v37, %v13525_v28  ;;  %v9082_v17 = vpop.permute.xlu1 %5072  ;;  %v4190_v51 = vcombine.low %v13530_v53, %v13529_v24  ;;  %v13532_v37 = vld [vmem:[#allocation14_spill] sm:$0xff]  ;;  %v9102_v53 = vsel %vm2095_vm9, %v8785_v61, %v13537_v27  ;;  %v2602_v24 = vrot.slane %v8974_v35, 7 }
 0x1b9   : > { %13528 = vst [vmem:[#allocation152_spill] sm:$0xff] %v9082_v17  ;;  %v4182_v28 = vcombine.low %v13532_v37, %v13531_v15  ;;  %v13536_v17 = vmov 0   ;;  %v9104_v15 = vpop.permute.xlu0 %5067  ;;  %v13540_v37 = vunpack.i.l.bf16 %v7869_v50  ;;  %v13542_v52 = vunpack.i.h.bf16 %v7848_v55  ;;  %v13549_v55 = vld [vmem:[#allocation177_spill] sm:$0xff] }
 0x1ba   : > { %3969 = vmatprep.subr.bf16.mxu1 %v13536_v17  ;;  %13538 = vst [vmem:[#allocation156_spill] sm:$0xff] %v9104_v15  ;;  %5362 = vrot.lane.b32.xlu1 %v13539_v14, %s6035_s14  ;;  %v13543_v27 = vrot.slane %v13522_v19, 3  ;;  %v13544_v14 = vld [vmem:[#allocation122_spill] sm:$0xff]  ;;  %v13545_v15 = vrot.slane %v13522_v19, 2  ;;  %v2605_v19 = vrot.slane %v9033_v31, 7 }
 0x1bb   : > { %4230 = vmatprep.subr.bf16.mxu0 %v4190_v51  ;;  %v9114_v41 = vsel %vm2095_vm9, %v8797_v56, %v13540_v37  ;;  %v9120_v61 = vsel %vm2095_vm9, %v8791_v6, %v13542_v52  ;;  %v13546_v56 = vunpack.i.h.bf16 %v7869_v50  ;;  %v13548_v6 = vld [vmem:[#allocation55_spill] sm:$0xff]  ;;  %5357 = vrot.lane.b32.xlu0 %v13549_v55, %s6035_s14  ;;  %v13556_v52 = vunpack.i.l.bf16 %v7885_v23 }
 0x1bc   : > { %13541 = vst [vmem:[#allocation159_spill] sm:$0xff] %v9114_v41  ;;  %v9125_v18 = vpack.i.bf16 %v13544_v14, %v13543_v27  ;;  %v9130_v51 = vpack.i.bf16 %v13535_v10, %v13545_v15  ;;  %4231 = vmatpush3.bf16.msra.mxu0 %v4182_v28  ;;  %v9141_v27 = vpop.permute.xlu1 %5082  ;;  %3970 = vmatpush1.bf16.msra.mxu1 %v4193_v47  ;;  %v13551_v15 = vld [vmem:[#allocation33_spill] sm:$0xff]  ;;  %v13558_v47 = vunpack.i.h.bf16 %v7885_v23 }
 0x1bd   : > { %v9136_v37 = vsel %vm2095_vm9, %v8808_v39, %v13546_v56  ;;  %13550 = vst [vmem:[#allocation53_spill] sm:$0xff] %v9141_v27  ;;  %v4191_v42 = vcombine.low %v13552_v1, %v13551_v15  ;;  %v13553_v28 = vld [vmem:[#allocation17_spill] sm:$0xff]  ;;  %3971 = vmatprep.subr.bf16.mxu1 %v13536_v17  ;;  %v9155_v55 = vsel %vm2095_vm9, %v8814_v33, %v13556_v52  ;;  %v13560_v15 = vld [vmem:[#allocation247_spill] sm:$0xff]  ;;  %v9165_v14 = vpop.permute.xlu0 %5077  ;;  %v13562_v56 = vld [vmem:[#allocation178_spill] sm:$0xff] }
 0x1be   : > { %13547 = vst [vmem:[#allocation162_spill] sm:$0xff] %v9136_v37  ;;  %v4183_v50 = vcombine.low %v13554_v38, %v13553_v28  ;;  %13557 = vst [vmem:[#allocation165_spill] sm:$0xff] %v9155_v55  ;;  %v9161_v1 = vsel %vm2095_vm9, %v8820_v34, %v13558_v47  ;;  %v4834_v28 = vunpack.i.l.bf16 %v13560_v15  ;;  %5372 = vrot.lane.b32.xlu1 %v13562_v56, %s6035_s14  ;;  %v13563_v33 = vld [vmem:[#allocation39_spill] sm:$0xff]  ;;  %v13564_v52 = vld [vmem:[#allocation38_spill] sm:$0xff]  ;;  %v4835_v23 = vunpack.i.h.bf16 %v13560_v15 }
 0x1bf   : > { %13559 = vst [vmem:[#allocation248_spill] sm:$0xff] %v9161_v1  ;;  %13561 = vst [vmem:[#allocation251_spill] sm:$0xff] %v9165_v14  ;;  %v2604_v27 = vsel %vm2601_vm11, %v2602_v24, %v2603_v44  ;;  %4232 = vmatprep.subr.bf16.mxu0 %v4191_v42  ;;  %v4194_v55 = vcombine.low %v13564_v52, %v13563_v33  ;;  %v13565_v37 = vld [vmem:[#allocation246_spill] sm:$0xff]  ;;  %v2606_v38 = vrot.slane %v9036_v48, 7  ;;  %v13566_v1 = vld [vmem:[#allocation56_spill] sm:$0xff]  ;;  %v13569_v15 = vunpack.i.l.bf16 %v13548_v6 }
 0x1c0   : > { %v4830_v34 = vunpack.i.h.bf16 %v13565_v37  ;;  %v4829_v47 = vunpack.i.l.bf16 %v13565_v37  ;;  %4233 = vmatpush3.bf16.msra.mxu0 %v4183_v50  ;;  %v13567_v56 = vld [vmem:[#allocation179_spill] sm:$0xff]  ;;  %v9180_v42 = vpop.permute.xlu1 %5092  ;;  %v9182_v41 = vpack.i.bf16 %v2605_v19, %v2603_v44  ;;  %v9192_v39 = vpack.i.bf16 %v2604_v27, %v2602_v24  ;;  %v13576_v24 = vld [vmem:[#allocation60_spill] sm:$0xff] }
 0x1c1   : > { %5367 = vrot.lane.b32.xlu0 %v13567_v56, %s6035_s14  ;;  %13568 = vst [vmem:[#allocation166_spill] sm:$0xff] %v9180_v42  ;;  %3972 = vmatpush1.bf16.msra.mxu1 %v4194_v55  ;;  %v9188_v37 = vsel %vm2095_vm9, %v8826_v43, %v13569_v15  ;;  %v13571_v33 = vld [vmem:[#allocation79_spill] sm:$0xff]  ;;  %v13572_v56 = vunpack.i.h.bf16 %v13548_v6  ;;  %v9202_v42 = vpop.permute.xlu0 %5087  ;;  %v13575_v43 = vpack.i.bf16 %v8896_v63, %v8893_v13  ;;  %v13577_v15 = vld [vmem:[#allocation41_spill] sm:$0xff]  ;;  %v9348_v55 = vld [vmem:[%s6322_s10 + $0xb0] sm:$0xff] }
 0x1c2   : > { %13570 = vst [vmem:[#allocation167_spill] sm:$0xff] %v9188_v37  ;;  %v4840_v50 = vunpack.i.h.bf16 %v13571_v33  ;;  %v4839_v52 = vunpack.i.l.bf16 %v13571_v33  ;;  %3973 = vmatprep.subr.bf16.mxu1 %v13536_v17  ;;  %13574 = vst [vmem:[#allocation258_spill] sm:$0xff] %v9202_v42  ;;  %v13578_v33 = vld [vmem:[#allocation40_spill] sm:$0xff]  ;;  %v9214_v6 = vsel %vm2128_vm10, %v8866_v2, %v4834_v28  ;;  %v9223_v13 = vsel %vm2128_vm10, %v8884_v59, %v4830_v34  ;;  %v13584_v2 = vld [vmem:[#allocation231_spill] sm:$0xff] }
 0x1c3   : > { %v9199_v44 = vsel %vm2095_vm9, %v8839_v0, %v13572_v56  ;;  %5382 = vrot.lane.b32.xlu1 %v13575_v43, %s6035_s14  ;;  %v4195_v37 = vcombine.low %v13578_v33, %v13577_v15  ;;  %13579 = vst [vmem:[#allocation168_spill] sm:$0xff] %v9214_v6  ;;  %v2607_v0 = vsel %vm2601_vm11, %v2605_v19, %v2606_v38  ;;  %13581 = vst [vmem:[#allocation170_spill] sm:$0xff] %v9223_v13  ;;  %v13583_v43 = vld [vmem:[#allocation180_spill] sm:$0xff]  ;;  %v13587_v28 = vld [vmem:[#allocation42_spill] sm:$0xff] }
 0x1c4   : > { %v9219_v56 = vsel %vm2128_vm10, %v8880_v3, %v4829_v47  ;;  %v9227_v63 = vsel %vm2128_vm10, %v8870_v49, %v4835_v23  ;;  %v9232_v19 = vpop.permute.xlu1 %5102  ;;  %v13586_v3 = vld [vmem:[#allocation43_spill] sm:$0xff]  ;;  %v13588_v59 = vunpack.i.l.bf16 %v13566_v1  ;;  %v13590_v23 = vunpack.i.h.bf16 %v13566_v1  ;;  %v13710_v1 = vld [vmem:[#allocation118_spill] sm:$0xff] }
 0x1c5   : > { %13580 = vst [vmem:[#allocation169_spill] sm:$0xff] %v9219_v56  ;;  %13582 = vst [vmem:[#allocation171_spill] sm:$0xff] %v9227_v63  ;;  %5377 = vrot.lane.b32.xlu0 %v13584_v2, %s6035_s14  ;;  %3974 = vmatpush1.bf16.msra.mxu1 %v4195_v37  ;;  %v4196_v47 = vcombine.low %v13587_v28, %v13586_v3  ;;  %v2608_v33 = vrot.slane %v9025_v54, 7  ;;  %v12755_v2 = vrot.slane %v9028_v26, 7  ;;  %v9260_v28 = vpop.permute.xlu0 %5097  ;;  %v13611_v15 = vunpack.i.h.bf16 %v13583_v43 }
 0x1c6   : > { %13585 = vst [vmem:[#allocation172_spill] sm:$0xff] %v9232_v19  ;;  %v9240_v34 = vsel %vm2128_vm10, %v8909_v30, %v13588_v59  ;;  %v9246_v49 = vsel %vm2128_vm10, %v8924_v11, %v13590_v23  ;;  %3975 = vmatprep.subr.bf16.mxu1 %v13536_v17  ;;  %v9253_v37 = vsel %vm2128_vm10, %v8918_v12, %v4839_v52  ;;  %13594 = vst [vmem:[#allocation175_spill] sm:$0xff] %v9260_v28  ;;  %v9267_v59 = vld [vmem:[%s6322_s10 + $0x88] sm:$0xf]  ;;  %v9270_v23 = vld [vmem:[%s6322_s10 + $0x70] sm:$0xf] }
 0x1c7   : > { %13589 = vst [vmem:[#allocation173_spill] sm:$0xff] %v9240_v34  ;;  %13591 = vst [vmem:[#allocation174_spill] sm:$0xff] %v9246_v49  ;;  %v9257_v30 = vsel %vm2128_vm10, %v8932_v46, %v4840_v50  ;;  %v13595_v11 = vpack.i.bf16 %v8977_v5, %v8974_v35  ;;  %v13596_v52 = vld [vmem:[#allocation58_spill] sm:$0xff]  ;;  %v13598_v46 = vld [vmem:[#allocation63_spill] sm:$0xff]  ;;  %v9280_v3 = vpack.i.bf16 %v2606_v38, %v2607_v0  ;;  %v13614_v34 = vunpack.i.l.bf16 %v8083_v29 }
 0x1c8   : > { %13592 = vst [vmem:[#allocation54_spill] sm:$0xff] %v9253_v37  ;;  %13593 = vst [vmem:[#allocation61_spill] sm:$0xff] %v9257_v30  ;;  %v13597_v14 = vrot.slane %v13596_v52, 2  ;;  %v13599_v50 = vrot.slane %v13598_v46, 2  ;;  %v13600_v52 = vpack.i.bf16 %v8985_v4, %v8982_v36  ;;  %v9292_v46 = vpop.permute.xlu1 %5112  ;;  %v2610_v36 = vsel %vm2601_vm11, %v2608_v33, %v12755_v2  ;;  %v13609_v2 = vld [vmem:[#allocation45_spill] sm:$0xff]  ;;  %v13610_v35 = vld [vmem:[#allocation44_spill] sm:$0xff] }
 0x1c9   : > { %5392 = vrot.lane.b32.xlu1 %v13595_v11, %s6036_s15  ;;  %13601 = vst [vmem:[#allocation93_spill] sm:$0xff] %v9292_v46  ;;  %3976 = vmatpush1.bf16.msra.mxu1 %v4196_v47  ;;  %v13603_v11 = vld [vmem:[#allocation257_spill] sm:$0xff]  ;;  %v13604_v4 = vunpack.i.l.bf16 %v13583_v43  ;;  %v9314_v38 = vpop.permute.xlu0 %5107  ;;  %v13608_v12 = vpack.i.bf16 %v9028_v26, %v9025_v54  ;;  %v4197_v5 = vcombine.low %v13610_v35, %v13609_v2  ;;  %v13621_v2 = vunpack.i.h.bf16 %v8083_v29  ;;  %v13626_v43 = vld [vmem:[#allocation47_spill] sm:$0xff]  ;;  %v13627_v35 = vld [vmem:[#allocation46_spill] sm:$0xff] }
 0x1ca   : > { %v9278_v27 = vpack.i.bf16 %v13599_v50, %v13597_v14  ;;  %5387 = vrot.lane.b32.xlu0 %v13600_v52, %s6036_s15  ;;  %v13602_v14 = vld [vmem:[#allocation67_spill] sm:$0xff]  ;;  %3977 = vmatprep.subr.bf16.mxu1 %v13536_v17  ;;  %v13606_v50 = vld [vmem:[#allocation256_spill] sm:$0xff]  ;;  %13607 = vst [vmem:[#allocation177_spill] sm:$0xff] %v9314_v38  ;;  %v9335_v54 = vsel %vm2128_vm10, %v8954_v62, %v13614_v34  ;;  %v13619_v62 = vld [vmem:[#allocation117_spill] sm:$0xff] }
 0x1cb   : > { %v9310_v47 = vsel %vm2128_vm10, %v8947_v45, %v13604_v4  ;;  %v9326_v45 = vsel %vm2128_vm10, %v8966_v9, %v13611_v15  ;;  %v13613_v52 = vld [vmem:[#allocation83_spill] sm:$0xff]  ;;  %13615 = vst [vmem:[#allocation178_spill] sm:$0xff] %v9335_v54  ;;  %v13617_v9 = vpack.i.bf16 %v9036_v48, %v9033_v31  ;;  %v9345_v0 = vpack.i.bf16 %v2610_v36, %v2608_v33  ;;  %v13620_v34 = vld [vmem:[#allocation132_spill] sm:$0xff]  ;;  %v13734_v28 = vld [vmem:[#allocation209_spill] sm:$0xff] }
 0x1cc   : > { %13605 = vst [vmem:[#allocation176_spill] sm:$0xff] %v9310_v47  ;;  %13612 = vst [vmem:[#allocation247_spill] sm:$0xff] %v9326_v45  ;;  %v9343_v15 = vpop.permute.xlu1 %5122  ;;  %v2612_v4 = vrot.slane %v9348_v55, 7  ;;  %v9358_v31 = vsel %vm2128_vm10, %v8960_v7, %v13621_v2  ;;  %v13623_v33 = vunpack.i.l.bf16 %v13603_v11  ;;  %v4198_v7 = vcombine.low %v13627_v35, %v13626_v43  ;;  %v13668_v54 = vld [vmem:[#allocation51_spill] sm:$0xff] }
 0x1cd   : > { %5402 = vrot.lane.b32.xlu1 %v13608_v12, %s6036_s15  ;;  %v13616_v12 = vld [vmem:[#allocation181_spill] sm:$0xff]  ;;  %13618 = vst [vmem:[#allocation246_spill] sm:$0xff] %v9343_v15  ;;  %3978 = vmatpush1.bf16.msra.mxu1 %v4197_v5  ;;  %13622 = vst [vmem:[#allocation179_spill] sm:$0xff] %v9358_v31  ;;  %v9368_v5 = vpop.permute.xlu0 %5117  ;;  %v13628_v2 = vunpack.i.l.bf16 %v13606_v50  ;;  %v13633_v45 = vunpack.i.h.bf16 %v13606_v50  ;;  %v13635_v35 = vunpack.i.l.bf16 %v13613_v52  ;;  %v13639_v47 = vpack.i.bf16 %v13535_v10, %v9093_v58  ;;  %v13649_v10 = vld [vmem:[#allocation48_spill] sm:$0xff] }
 0x1ce   : > { %5397 = vrot.lane.b32.xlu0 %v13617_v9, %s6036_s15  ;;  %3979 = vmatprep.subr.bf16.mxu1 %v13536_v17  ;;  %v9366_v36 = vsel %vm2128_vm10, %v8993_v25, %v13623_v33  ;;  %13625 = vst [vmem:[#allocation60_spill] sm:$0xff] %v9368_v5  ;;  %v2611_v9 = vrot.slane %v9093_v58, 7  ;;  %v13630_v25 = vunpack.i.h.bf16 %v13603_v11  ;;  %v13648_v58 = vld [vmem:[#allocation49_spill] sm:$0xff]  ;;  %v13678_v31 = vld [vmem:[#allocation167_spill] sm:$0xff] }
 0x1cf   : > { %13624 = vst [vmem:[#allocation79_spill] sm:$0xff] %v9366_v36  ;;  %v9379_v48 = vsel %vm2128_vm10, %v9001_v16, %v13628_v2  ;;  %v9392_v43 = vsel %vm2128_vm10, %v9021_v60, %v13633_v45  ;;  %v9398_v16 = vsel %vm2128_vm10, %v9045_v8, %v13635_v35  ;;  %v13637_v2 = vunpack.i.h.bf16 %v13613_v52  ;;  %v13681_v36 = vld [vmem:[#allocation165_spill] sm:$0xff]  ;;  %v13731_v46 = vld [vmem:[#allocation131_spill] sm:$0xff] }
 0x1d0   : > { %13629 = vst [vmem:[#allocation231_spill] sm:$0xff] %v9379_v48  ;;  %v9385_v33 = vsel %vm2128_vm10, %v9007_v22, %v13630_v25  ;;  %13634 = vst [vmem:[#allocation63_spill] sm:$0xff] %v9392_v43  ;;  %v9411_v60 = vpop.permute.xlu1 %5132  ;;  %v2613_v45 = vsel %vm2601_vm11, %v2611_v9, %v2612_v4  ;;  %v13641_v8 = vunpack.i.l.bf16 %v13616_v12  ;;  %v13645_v25 = vld [vmem:[#allocation183_spill] sm:$0xff]  ;;  %v4199_v52 = vcombine.low %v13649_v10, %v13648_v58  ;;  %v13652_v58 = vld [vmem:[#allocation129_spill] sm:$0xff] }
 0x1d1   : > { %5412 = vrot.lane.b32.xlu1 %v9065_v20, %s6030_s1  ;;  %13631 = vst [vmem:[#allocation58_spill] sm:$0xff] %v9385_v33  ;;  %v13632_v20 = vld [vmem:[#allocation254_spill] sm:$0xff]  ;;  %13636 = vst [vmem:[#allocation67_spill] sm:$0xff] %v9398_v16  ;;  %v9404_v22 = vsel %vm2128_vm10, %v9059_v21, %v13637_v2  ;;  %3980 = vmatpush1.bf16.msra.mxu1 %v4198_v7  ;;  %v13643_v21 = vunpack.i.h.bf16 %v13616_v12  ;;  %v9453_v11 = vpack.i.bf16 %v2612_v4, %v2613_v45  ;;  %v13661_v16 = vld [vmem:[#allocation159_spill] sm:$0xff] }
 0x1d2   : > { %13638 = vst [vmem:[#allocation268_spill] sm:$0xff] %v9404_v22  ;;  %5407 = vrot.lane.b32.xlu0 %v13639_v47, %s6036_s15  ;;  %13640 = vst [vmem:[#allocation269_spill] sm:$0xff] %v9411_v60  ;;  %v9418_v35 = vsel %vm2128_vm10, %v9071_v40, %v13641_v8  ;;  %v9429_v47 = vld [vmem:[%s6322_s10 + $0xb8] sm:$0xf]  ;;  %v9432_v60 = vld [vmem:[%s6322_s10 + $0xa0] sm:$0xf]  ;;  %3981 = vmatprep.subr.bf16.mxu1 %v13536_v17  ;;  %v9439_v8 = vpop.permute.xlu0 %5127  ;;  %v13654_v45 = vunpack.i.l.bf16 %v13632_v20 }
 0x1d3   : > { %13642 = vst [vmem:[#allocation270_spill] sm:$0xff] %v9418_v35  ;;  %v9424_v2 = vsel %vm2128_vm10, %v9077_v32, %v13643_v21  ;;  %13646 = vst [vmem:[#allocation272_spill] sm:$0xff] %v9439_v8  ;;  %v13647_v32 = vrot.slane %v9028_v26, 7  ;;  %v13650_v40 = vld [vmem:[#allocation66_spill] sm:$0xff]  ;;  %v3317_v10 = vrot.slane %v13652_v58, 1  ;;  %v13658_v26 = vld [vmem:[#allocation88_spill] sm:$0xff] }
 0x1d4   : > { %13644 = vst [vmem:[#allocation271_spill] sm:$0xff] %v9424_v2  ;;  %v9471_v12 = vsel %vm2128_vm10, %v9102_v53, %v13654_v45  ;;  %v13659_v7 = vld [vmem:[#allocation90_spill] sm:$0xff]  ;;  %v13663_v53 = vunpack.i.h.bf16 %v13645_v25  ;;  %v13680_v50 = vunpack.i.l.bf16 %v13658_v26  ;;  %v13730_v15 = vld [vmem:[#allocation133_spill] sm:$0xff]  ;;  %v13753_v19 = vld [vmem:[#allocation71_spill] sm:$0xff] }
 0x1d5   : > { %5422 = vrot.lane.b32.xlu1 %v9125_v18, %s6032_s11  ;;  %v9445_v21 = vpack.i.bf16 %v2611_v9, %v13647_v32  ;;  %v9463_v9 = vpop.permute.xlu1 %5142  ;;  %3982 = vmatpush1.bf16.msra.mxu1 %v4199_v52  ;;  %v13653_v32 = vld [vmem:[#allocation130_spill] sm:$0xff]  ;;  %13655 = vst [vmem:[#allocation129_spill] sm:$0xff] %v9471_v12  ;;  %v13656_v18 = vunpack.i.h.bf16 %v13632_v20  ;;  %v13677_v43 = vunpack.i.l.bf16 %v13659_v7  ;;  %v13688_v12 = vld [vmem:[#allocation139_spill] sm:$0xff] }
 0x1d6   : > { %5417 = vrot.lane.b32.xlu0 %v9130_v51, %s6031_s2  ;;  %13651 = vst [vmem:[#allocation66_spill] sm:$0xff] %v9463_v9  ;;  %v3318_v4 = vrot.slane %v13653_v32, 1  ;;  %3983 = vmatprep.subr.bf16.mxu1 %v13536_v17  ;;  %v13660_v9 = vunpack.i.l.bf16 %v13645_v25  ;;  %v13664_v45 = vld [vmem:[#allocation162_spill] sm:$0xff] }
 0x1d7   : > { %v9477_v51 = vsel %vm2128_vm10, %v9120_v61, %v13656_v18  ;;  %v9492_v20 = vsel %vm2128_vm10, %v13664_v45, %v13663_v53  ;;  %v9495_v18 = vpop.permute.xlu0 %5137  ;;  %v13667_v17 = vld [vmem:[#allocation70_spill] sm:$0xff]  ;;  %v9506_v53 = vld [vmem:[%s6322_s10 + $0xc8] sm:$0xff] }
 0x1d8   : > { %13657 = vst [vmem:[#allocation130_spill] sm:$0xff] %v9477_v51  ;;  %v9486_v22 = vsel %vm2128_vm10, %v13661_v16, %v13660_v9  ;;  %13665 = vst [vmem:[#allocation162_spill] sm:$0xff] %v9492_v20  ;;  %v13669_v16 = vld [vmem:[#allocation50_spill] sm:$0xff]  ;;  %v2615_v45 = vrot.slane %v9506_v53, 7 }
 0x1d9   : > { %13662 = vst [vmem:[#allocation159_spill] sm:$0xff] %v9486_v22  ;;  %13666 = vst [vmem:[#allocation273_spill] sm:$0xff] %v9495_v18  ;;  %5432 = vrot.lane.b32.xlu1 %v9182_v41, %s6033_s12  ;;  %v4200_v9 = vcombine.low %v13669_v16, %v13668_v54  ;;  %v13670_v35 = vld [vmem:[#allocation122_spill] sm:$0xff]  ;;  %v3319_v41 = vsel %vm182_vm0, %v3317_v10, %v3318_v4  ;;  %v9516_v52 = vpop.permute.xlu1 %5152  ;;  %v13674_v54 = vld [vmem:[#allocation95_spill] sm:$0xff] }
 0x1da   : > { %v3322_v2 = vrot.slane %v13670_v35, 1  ;;  %13671 = vst [vmem:[#allocation70_spill] sm:$0xff] %v9506_v53  ;;  %v9510_v61 = vld [vmem:[%s6322_s10 + $0xc0] sm:$0xff]  ;;  %5427 = vrot.lane.b32.xlu0 %v9192_v39, %s6033_s12  ;;  %13673 = vst [vmem:[#allocation274_spill] sm:$0xff] %v9516_v52  ;;  %v9521_v16 = vld [vmem:[%s6322_s10 + $0xd8] sm:$0xff]  ;;  %v9534_v35 = vsel %vm2128_vm10, %v13678_v31, %v13677_v43  ;;  %v13686_v39 = vpack.i.bf16 %v13576_v24, %v13524_v57 }
 0x1db   : > { %13672 = vst [vmem:[#allocation122_spill] sm:$0xff] %v9510_v61  ;;  %v2614_v18 = vrot.slane %v9510_v61, 7  ;;  %13675 = vst [vmem:[#allocation95_spill] sm:$0xff] %v9521_v16  ;;  %3984 = vmatpush1.bf16.msra.mxu1 %v4200_v9  ;;  %v9540_v9 = vsel %vm2128_vm10, %v13681_v36, %v13680_v50  ;;  %v13684_v10 = vld [vmem:[#allocation99_spill] sm:$0xff]  ;;  %v9545_v22 = vpop.permute.xlu0 %5147  ;;  %v13692_v57 = vpack.i.bf16 %v9267_v59, %v9270_v23  ;;  %v13697_v26 = vld [vmem:[#allocation202_spill] sm:$0xff] }
 0x1dc   : > { %v3323_v33 = vsel %vm182_vm0, %v3318_v4, %v3322_v2  ;;  %13679 = vst [vmem:[#allocation167_spill] sm:$0xff] %v9534_v35  ;;  %13682 = vst [vmem:[#allocation165_spill] sm:$0xff] %v9540_v9  ;;  %v13683_v2 = vld [vmem:[#allocation193_spill] sm:$0xff]  ;;  %v4910_v48 = vunpack.i.h.bf16 %v13684_v10  ;;  %v4909_v43 = vunpack.i.l.bf16 %v13684_v10  ;;  %v13687_v35 = vld [vmem:[#allocation126_spill] sm:$0xff]  ;;  %v13689_v9 = vunpack.i.h.bf16 %v13659_v7 }
 0x1dd   : > { %v4915_v4 = vunpack.i.h.bf16 %v13683_v2  ;;  %v4914_v25 = vunpack.i.l.bf16 %v13683_v2  ;;  %13685 = vst [vmem:[#allocation193_spill] sm:$0xff] %v9545_v22  ;;  %5442 = vrot.lane.b32.xlu1 %v13686_v39, %s6035_s14  ;;  %v3541_v31 = vpack.c.bf16 %v3323_v33, %v3319_v41  ;;  %v2616_v36 = vsel %vm2601_vm11, %v2614_v18, %v2615_v45  ;;  %v9567_v33 = vpop.permute.xlu1 %5162  ;;  %v13694_v41 = vld [vmem:[#allocation100_spill] sm:$0xff]  ;;  %v13698_v23 = vld [vmem:[#allocation121_spill] sm:$0xff]  ;;  %v13702_v51 = vld [vmem:[#allocation114_spill] sm:$0xff] }
 0x1de   : > { %v9559_v2 = vsel %vm2128_vm10, %v9199_v44, %v13689_v9  ;;  %5437 = vrot.lane.b32.xlu0 %v13692_v57, %s6034_s13  ;;  %13693 = vst [vmem:[#allocation126_spill] sm:$0xff] %v9567_v33  ;;  %v13695_v39 = vrot.slane %v9521_v16, 7  ;;  %v13696_v44 = vld [vmem:[#allocation92_spill] sm:$0xff]  ;;  %v4919_v59 = vunpack.i.l.bf16 %v13697_v26  ;;  %v9686_v22 = vld [vmem:[%s6322_s10 + $0xf8] sm:$0xff]  ;;  %v13760_v53 = vld [vmem:[#allocation222_spill] sm:$0xff] }
 0x1df   : > { %13690 = vst [vmem:[#allocation99_spill] sm:$0xff] %v9559_v2  ;;  %4201 = vmatprep.mubr.msk.bf16.mxu1 %vm1930_vm4, %v3541_v31  ;;  %v4925_v9 = vunpack.i.h.bf16 %v13696_v44  ;;  %v4924_v20 = vunpack.i.l.bf16 %v13696_v44  ;;  %v4920_v2 = vunpack.i.h.bf16 %v13697_v26  ;;  %v9582_v57 = vsel %vm1930_vm4, %v13698_v23, %v4915_v4  ;;  %v13699_v10 = vld [vmem:[#allocation120_spill] sm:$0xff]  ;;  %v9592_v44 = vpop.permute.xlu0 %5157  ;;  %v13703_v23 = vld [vmem:[#allocation203_spill] sm:$0xff] }
 0x1e0   : > { %v9573_v50 = vpack.i.bf16 %v13695_v39, %v2615_v45  ;;  %v9586_v45 = vsel %vm1930_vm4, %v13699_v10, %v4914_v25  ;;  %v13700_v39 = vld [vmem:[#allocation115_spill] sm:$0xff]  ;;  %13701 = vst [vmem:[#allocation100_spill] sm:$0xff] %v9592_v44  ;;  %v9596_v26 = vpack.i.bf16 %v2616_v36, %v2614_v18  ;;  %v9600_v4 = vsel %vm1930_vm4, %v13702_v51, %v4909_v43  ;;  %v13704_v10 = vld [vmem:[#allocation68_spill] sm:$0xff] }
 0x1e1   : > { %v9590_v31 = vsel %vm1930_vm4, %v13700_v39, %v4910_v48  ;;  %5452 = vrot.lane.b32.xlu1 %v9278_v27, %s6036_s15  ;;  %v4935_v7 = vunpack.i.h.bf16 %v13703_v23  ;;  %v4934_v25 = vunpack.i.l.bf16 %v13703_v23  ;;  %v13705_v48 = vld [vmem:[#allocation108_spill] sm:$0xff]  ;;  %v9610_v18 = vpop.permute.xlu1 %5172  ;;  %v9613_v36 = vld [vmem:[%s6322_s10 + $0xe8] sm:$0xf]  ;;  %v9621_v23 = vld [vmem:[%s6322_s10 + $0xe0] sm:$0xff]  ;;  %v9626_v37 = vsel %vm1930_vm4, %v13653_v32, %v4925_v9  ;;  %13725 = vst [vmem:[#allocation203_spill] sm:$0xff] %v9686_v22 }
 0x1e2   : > { %v4930_v39 = vunpack.i.h.bf16 %v13705_v48  ;;  %v4929_v29 = vunpack.i.l.bf16 %v13705_v48  ;;  %5447 = vrot.lane.b32.xlu0 %v9280_v3, %s6033_s12  ;;  %13706 = vst [vmem:[#allocation92_spill] sm:$0xff] %v9610_v18  ;;  %v9616_v51 = vld [vmem:[%s6322_s10 + $0xd0] sm:$0xf]  ;;  %13708 = vst [vmem:[#allocation121_spill] sm:$0xff] %v9621_v23  ;;  %v2618_v49 = vrot.slane %v9621_v23, 7  ;;  %v9630_v3 = vsel %vm1930_vm4, %v13652_v58, %v4924_v20  ;;  %v13709_v48 = vld [vmem:[#allocation119_spill] sm:$0xff] }
 0x1e3   : > { %13707 = vst [vmem:[#allocation202_spill] sm:$0xff] %v9616_v51  ;;  %v9634_v30 = vsel %vm1930_vm4, %v13709_v48, %v4920_v2  ;;  %v9638_v6 = vsel %vm1930_vm4, %v13710_v1, %v4919_v59  ;;  %v13711_v43 = vld [vmem:[#allocation204_spill] sm:$0xff]  ;;  %v9642_v13 = vpop.permute.xlu0 %5167  ;;  %v13714_v2 = vld [vmem:[#allocation138_spill] sm:$0xff]  ;;  %v13715_v9 = vld [vmem:[#allocation137_spill] sm:$0xff] }
 0x1e4   : > { %v4945_v63 = vunpack.i.h.bf16 %v13711_v43  ;;  %v4944_v56 = vunpack.i.l.bf16 %v13711_v43  ;;  %13712 = vst [vmem:[#allocation120_spill] sm:$0xff] %v9642_v13  ;;  %v9652_v1 = vsel %vm1930_vm4, %v13714_v2, %v4935_v7  ;;  %v9656_v59 = vsel %vm1930_vm4, %v13715_v9, %v4934_v25  ;;  %v13716_v43 = vld [vmem:[#allocation109_spill] sm:$0xff]  ;;  %v13718_v58 = vld [vmem:[#allocation123_spill] sm:$0xff]  ;;  %v13727_v9 = vld [vmem:[#allocation144_spill] sm:$0xff] }
 0x1e5   : > { %5462 = vrot.lane.b32.xlu1 %v9278_v27, %s6031_s2  ;;  %v4940_v48 = vunpack.i.h.bf16 %v13716_v43  ;;  %v4939_v13 = vunpack.i.l.bf16 %v13716_v43  ;;  %v13717_v27 = vld [vmem:[#allocation124_spill] sm:$0xff]  ;;  %v9666_v44 = vsel %vm1930_vm4, %v13718_v58, %v4929_v29  ;;  %v13719_v7 = vpack.i.bf16 %v13602_v14, %v13576_v24  ;;  %v9672_v32 = vpop.permute.xlu1 %5182  ;;  %v13721_v25 = vld [vmem:[#allocation75_spill] sm:$0xff] }
 0x1e6   : > { %v9662_v18 = vsel %vm1930_vm4, %v13717_v27, %v4930_v39  ;;  %13720 = vst [vmem:[#allocation115_spill] sm:$0xff] %v9672_v32  ;;  %v13722_v43 = vrot.slane %v9521_v16, 7  ;;  %v13723_v39 = vld [vmem:[#allocation205_spill] sm:$0xff]  ;;  %v9682_v29 = vld [vmem:[%s6322_s10 + $0xf0] sm:$0xff]  ;;  %v2621_v24 = vrot.slane %v9686_v22, 7  ;;  %v9695_v52 = vsel %vm1930_vm4, %v13727_v9, %v4944_v56  ;;  %v9876_v22 = vld [vmem:[%s6322_s10 + $0x120] sm:$0xff] }
 0x1e7   : > { %5457 = vrot.lane.b32.xlu0 %v13719_v7, %s6030_s1  ;;  %v4955_v27 = vunpack.i.h.bf16 %v13723_v39  ;;  %v4954_v33 = vunpack.i.l.bf16 %v13723_v39  ;;  %13724 = vst [vmem:[#allocation114_spill] sm:$0xff] %v9682_v29  ;;  %v2620_v58 = vrot.slane %v9682_v29, 7  ;;  %v13726_v7 = vld [vmem:[#allocation145_spill] sm:$0xff]  ;;  %v9699_v5 = vpop.permute.xlu0 %5177  ;;  %v9705_v38 = vsel %vm1930_vm4, %v13730_v15, %v4940_v48 }
 0x1e8   : > { %v2619_v2 = vsel %vm2601_vm11, %v13722_v43, %v2618_v49  ;;  %v9691_v32 = vsel %vm1930_vm4, %v13726_v7, %v4945_v63  ;;  %v13728_v43 = vld [vmem:[#allocation206_spill] sm:$0xff]  ;;  %13729 = vst [vmem:[#allocation68_spill] sm:$0xff] %v9699_v5  ;;  %v9709_v63 = vsel %vm1930_vm4, %v13731_v46, %v4939_v13  ;;  %v13732_v7 = vld [vmem:[#allocation111_spill] sm:$0xff]  ;;  %v4960_v5 = vunpack.i.h.bf16 %v13734_v28  ;;  %v13739_v46 = vld [vmem:[#allocation104_spill] sm:$0xff] }
 0x1e9   : > { %v4950_v8 = vunpack.i.h.bf16 %v13728_v43  ;;  %v4949_v39 = vunpack.i.l.bf16 %v13728_v43  ;;  %5472 = vrot.lane.b32.xlu1 %v9345_v0, %s6033_s12  ;;  %v4965_v56 = vunpack.i.h.bf16 %v13732_v7  ;;  %v9712_v9 = vpack.i.bf16 %v2618_v49, %v2619_v2  ;;  %v9720_v48 = vpop.permute.xlu1 %5192  ;;  %v13740_v2 = vld [vmem:[#allocation151_spill] sm:$0xff]  ;;  %v13743_v13 = vld [vmem:[#allocation140_spill] sm:$0xff]  ;;  %v13780_v29 = vld [vmem:[#allocation225_spill] sm:$0xff] }
 0x1ea   : > { %v4964_v43 = vunpack.i.l.bf16 %v13732_v7  ;;  %v13735_v0 = vpack.i.bf16 %v13620_v34, %v13619_v62  ;;  %13736 = vst [vmem:[#allocation119_spill] sm:$0xff] %v9720_v48  ;;  %v13741_v7 = vld [vmem:[#allocation150_spill] sm:$0xff]  ;;  %v4959_v34 = vunpack.i.l.bf16 %v13734_v28  ;;  %v13742_v48 = vld [vmem:[#allocation141_spill] sm:$0xff] }
 0x1eb   : > { %13733 = vst [vmem:[#allocation108_spill] sm:$0xff] %v9712_v9  ;;  %v9728_v9 = vsel %vm1930_vm4, %v13740_v2, %v4955_v27  ;;  %v9732_v42 = vsel %vm1930_vm4, %v13741_v7, %v4954_v33  ;;  %v9738_v62 = vsel %vm1930_vm4, %v13742_v48, %v4950_v8  ;;  %v9742_v15 = vsel %vm1930_vm4, %v13743_v13, %v4949_v39  ;;  %v9744_v49 = vpop.permute.xlu0 %5187  ;;  %v9753_v33 = vld [vmem:[%s6322_s10 + $0x110] sm:$0xff]  ;;  %v13746_v8 = vld [vmem:[#allocation158_spill] sm:$0xff] }
 0x1ec   : > { %5467 = vrot.lane.b32.xlu0 %v13735_v0, %s6032_s11  ;;  %v2622_v0 = vsel %vm2601_vm11, %v2620_v58, %v2621_v24  ;;  %13744 = vst [vmem:[#allocation118_spill] sm:$0xff] %v9744_v49  ;;  %v13745_v27 = vpack.i.bf16 %v9429_v47, %v9432_v60  ;;  %v2624_v7 = vrot.slane %v9753_v33, 7  ;;  %v9758_v2 = vsel %vm1930_vm4, %v13746_v8, %v4965_v56  ;;  %v13747_v39 = vld [vmem:[#allocation116_spill] sm:$0xff]  ;;  %v9763_v49 = vld [vmem:[%s6322_s10 + $0x108] sm:$0xff]  ;;  %v13748_v47 = vld [vmem:[#allocation157_spill] sm:$0xff] }
 0x1ed   : > { %v4970_v13 = vunpack.i.h.bf16 %v13747_v39  ;;  %v4969_v48 = vunpack.i.l.bf16 %v13747_v39  ;;  %v2623_v60 = vrot.slane %v9763_v49, 7  ;;  %v13749_v28 = vld [vmem:[#allocation74_spill] sm:$0xff]  ;;  %v13751_v56 = vld [vmem:[#allocation220_spill] sm:$0xff]  ;;  %v9777_v39 = vpop.permute.xlu1 %5202  ;;  %v9779_v23 = vpack.i.bf16 %v2622_v0, %v2620_v58 }
 0x1ee   : > { %5482 = vrot.lane.b32.xlu1 %v13745_v27, %s6034_s13  ;;  %v9768_v27 = vsel %vm1930_vm4, %v13748_v47, %v4964_v43  ;;  %v9772_v16 = vsel %vm1930_vm4, %v13749_v28, %v4960_v5  ;;  %v4994_v8 = vunpack.i.l.bf16 %v13751_v56  ;;  %13752 = vst [vmem:[#allocation109_spill] sm:$0xff] %v9777_v39  ;;  %v9783_v61 = vsel %vm1930_vm4, %v13753_v19, %v4959_v34  ;;  %v13755_v28 = vld [vmem:[#allocation125_spill] sm:$0xff]  ;;  %v9798_v58 = vld [vmem:[%s6322_s10 + $0x100] sm:$0xf] }
 0x1ef   : > { %13750 = vst [vmem:[#allocation204_spill] sm:$0xff] %v9772_v16  ;;  %v4995_v5 = vunpack.i.h.bf16 %v13751_v56  ;;  %v4990_v20 = vunpack.i.h.bf16 %v13755_v28  ;;  %v4989_v16 = vunpack.i.l.bf16 %v13755_v28  ;;  %v9790_v51 = vpop.permute.xlu0 %5197  ;;  %13757 = vst [vmem:[#allocation205_spill] sm:$0xff] %v9798_v58  ;;  %v2625_v0 = vsel %vm2601_vm11, %v2623_v60, %v2624_v7  ;;  %v13758_v43 = vld [vmem:[#allocation154_spill] sm:$0xff]  ;;  %v13759_v47 = vld [vmem:[#allocation153_spill] sm:$0xff] }
 0x1f0   : > { %5477 = vrot.lane.b32.xlu0 %v9445_v21, %s6033_s12  ;;  %13756 = vst [vmem:[#allocation75_spill] sm:$0xff] %v9790_v51  ;;  %v9795_v21 = vld [vmem:[%s6322_s10 + $0x118] sm:$0xf]  ;;  %v9805_v56 = vsel %vm1930_vm4, %v13758_v43, %v4970_v13  ;;  %v9809_v28 = vsel %vm1930_vm4, %v13759_v47, %v4969_v48  ;;  %v5004_v19 = vunpack.i.l.bf16 %v13760_v53  ;;  %v9816_v51 = vsel %vm1963_vm5, %v9586_v45, %v4994_v8  ;;  %v13766_v43 = vld [vmem:[#allocation127_spill] sm:$0xff] }
 0x1f1   : > { %v13762_v34 = vpack.i.bf16 %v13650_v40, %v13602_v14  ;;  %v9822_v39 = vpop.permute.xlu1 %5212  ;;  %v9832_v45 = vsel %vm1963_vm5, %v9582_v57, %v4995_v5  ;;  %v5005_v8 = vunpack.i.h.bf16 %v13760_v53  ;;  %v4999_v14 = vunpack.i.l.bf16 %v13766_v43  ;;  %13777 = vst [vmem:[#allocation125_spill] sm:$0xff] %v9876_v22 }
 0x1f2   : > { %5492 = vrot.lane.b32.xlu1 %v9453_v11, %s6033_s12  ;;  %v9812_v11 = vpack.i.bf16 %v2623_v60, %v2621_v24  ;;  %13763 = vst [vmem:[#allocation111_spill] sm:$0xff] %v9822_v39  ;;  %v9840_v13 = vsel %vm1963_vm5, %v9600_v4, %v4989_v16  ;;  %v9844_v47 = vsel %vm1963_vm5, %v9590_v31, %v4990_v20  ;;  %v5000_v60 = vunpack.i.h.bf16 %v13766_v43  ;;  %v13771_v4 = vld [vmem:[#allocation223_spill] sm:$0xff]  ;;  %v13772_v43 = vld [vmem:[#allocation82_spill] sm:$0xff]  ;;  %v13773_v39 = vld [vmem:[#allocation224_spill] sm:$0xff] }
 0x1f3   : > { %v9847_v57 = vpop.permute.xlu0 %5207  ;;  %v13769_v53 = vpack.i.bf16 %v13667_v17, %v13650_v40  ;;  %v9857_v16 = vsel %vm1963_vm5, %v9630_v3, %v5004_v19  ;;  %v5015_v31 = vunpack.i.h.bf16 %v13771_v4  ;;  %v5014_v20 = vunpack.i.l.bf16 %v13771_v4  ;;  %v9872_v19 = vld [vmem:[%s6322_s10 + $0x128] sm:$0xff]  ;;  %v9889_v24 = vld [vmem:[%s6322_s10 + $0x138] sm:$0xff] }
 0x1f4   : > { %13761 = vst [vmem:[#allocation206_spill] sm:$0xff] %v9812_v11  ;;  %5487 = vrot.lane.b32.xlu0 %v13762_v34, %s6035_s14  ;;  %v9836_v34 = vpack.i.bf16 %v2624_v7, %v2625_v0  ;;  %13768 = vst [vmem:[#allocation104_spill] sm:$0xff] %v9847_v57  ;;  %v13770_v7 = vld [vmem:[#allocation78_spill] sm:$0xff]  ;;  %v5010_v57 = vunpack.i.h.bf16 %v13773_v39  ;;  %v5009_v40 = vunpack.i.l.bf16 %v13773_v39  ;;  %v2627_v3 = vrot.slane %v9872_v19, 7 }
 0x1f5   : > { %v9869_v5 = vpop.permute.xlu1 %5222  ;;  %13776 = vst [vmem:[#allocation220_spill] sm:$0xff] %v9872_v19  ;;  %v2626_v4 = vrot.slane %v9876_v22, 7  ;;  %v9881_v0 = vsel %vm1963_vm5, %v9626_v37, %v5005_v8  ;;  %v9885_v39 = vsel %vm1963_vm5, %v9638_v6, %v4999_v14  ;;  %13779 = vst [vmem:[#allocation222_spill] sm:$0xff] %v9889_v24  ;;  %v5019_v11 = vunpack.i.l.bf16 %v13780_v29 }
 0x1f6   : > { %13767 = vst [vmem:[#allocation209_spill] sm:$0xff] %v9836_v34  ;;  %5502 = vrot.lane.b32.xlu1 %v13769_v53, %s6030_s1  ;;  %v13774_v53 = vpack.i.bf16 %v9348_v55, %v13674_v54  ;;  %13775 = vst [vmem:[#allocation116_spill] sm:$0xff] %v9869_v5  ;;  %v13778_v55 = vld [vmem:[#allocation128_spill] sm:$0xff]  ;;  %v2629_v5 = vrot.slane %v9889_v24, 7  ;;  %v9894_v34 = vsel %vm1963_vm5, %v9634_v30, %v5000_v60  ;;  %v5020_v60 = vunpack.i.h.bf16 %v13780_v29 }
 0x1f7   : > { %v5025_v48 = vunpack.i.h.bf16 %v13778_v55  ;;  %v9898_v37 = vpop.permute.xlu0 %5217  ;;  %v13782_v6 = vpack.i.bf16 %v13688_v12, %v13687_v35  ;;  %v9908_v14 = vsel %vm1963_vm5, %v9656_v59, %v5014_v20  ;;  %v9912_v30 = vsel %vm1963_vm5, %v9652_v1, %v5015_v31  ;;  %v13785_v59 = vld [vmem:[#allocation135_spill] sm:$0xff]  ;;  %v13809_v19 = vld [vmem:[#allocation204_spill] sm:$0xff] }
 0x1f8   : > { %5497 = vrot.lane.b32.xlu0 %v13774_v53, %s6036_s15  ;;  %v5024_v53 = vunpack.i.l.bf16 %v13778_v55  ;;  %13781 = vst [vmem:[#allocation127_spill] sm:$0xff] %v9898_v37  ;;  %v13784_v37 = vld [vmem:[#allocation76_spill] sm:$0xff]  ;;  %v9923_v8 = vsel %vm1963_vm5, %v9662_v18, %v5010_v57  ;;  %v5034_v20 = vunpack.i.l.bf16 %v13785_v59  ;;  %v13786_v1 = vpack.i.bf16 %v13694_v41, %v13674_v54 }
 0x1f9   : > { %v9930_v29 = vpop.permute.xlu1 %5232  ;;  %v2628_v31 = vsel %vm2601_vm11, %v2626_v4, %v2627_v3  ;;  %v9939_v57 = vpack.i.bf16 %v2629_v5, %v2627_v3  ;;  %v9943_v12 = vsel %vm1963_vm5, %v9691_v32, %v5025_v48  ;;  %v9947_v54 = vsel %vm1963_vm5, %v9709_v63, %v5019_v11  ;;  %v13792_v48 = vld [vmem:[#allocation227_spill] sm:$0xff]  ;;  %v10094_v11 = vld [vmem:[%s6322_s10 + $0x170] sm:$0xff] }
 0x1fa   : > { %5512 = vrot.lane.b32.xlu1 %v13782_v6, %s6032_s11  ;;  %v9919_v6 = vsel %vm1963_vm5, %v9666_v44, %v5009_v40  ;;  %13787 = vst [vmem:[#allocation78_spill] sm:$0xff] %v9930_v29  ;;  %v9935_v58 = vsel %vm1963_vm5, %v9695_v52, %v5024_v53  ;;  %v5035_v44 = vunpack.i.h.bf16 %v13785_v59  ;;  %v13788_v40 = vld [vmem:[#allocation136_spill] sm:$0xff]  ;;  %v9955_v53 = vld [vmem:[%s6322_s10 + $0x140] sm:$0xff]  ;;  %v9960_v32 = vsel %vm1963_vm5, %v9705_v38, %v5020_v60  ;;  %v9978_v60 = vld [vmem:[%s6322_s10 + $0x148] sm:$0xf] }
 0x1fb   : > { %v5029_v18 = vunpack.i.l.bf16 %v13788_v40  ;;  %13789 = vst [vmem:[#allocation223_spill] sm:$0xff] %v9939_v57  ;;  %v9950_v52 = vpop.permute.xlu0 %5227  ;;  %13791 = vst [vmem:[#allocation224_spill] sm:$0xff] %v9955_v53  ;;  %v2630_v3 = vrot.slane %v9955_v53, 7  ;;  %v5044_v59 = vunpack.i.l.bf16 %v13792_v48  ;;  %v9963_v63 = vpack.i.bf16 %v2628_v31, %v2626_v4  ;;  %v13795_v29 = vld [vmem:[#allocation228_spill] sm:$0xff]  ;;  %v10020_v31 = vld [vmem:[%s6322_s10 + $0x158] sm:$0xff] }
 0x1fc   : > { %5507 = vrot.lane.b32.xlu0 %v13786_v1, %s6031_s2  ;;  %v5030_v1 = vunpack.i.h.bf16 %v13788_v40  ;;  %13790 = vst [vmem:[#allocation82_spill] sm:$0xff] %v9950_v52  ;;  %v9969_v52 = vsel %vm1963_vm5, %v9732_v42, %v5034_v20  ;;  %v5039_v57 = vunpack.i.l.bf16 %v13795_v29  ;;  %13797 = vst [vmem:[#allocation135_spill] sm:$0xff] %v9978_v60  ;;  %v9981_v4 = vld [vmem:[%s6322_s10 + $0x130] sm:$0xf]  ;;  %v9987_v42 = vsel %vm1963_vm5, %v9728_v9, %v5035_v44  ;;  %v13806_v44 = vld [vmem:[#allocation202_spill] sm:$0xff] }
 0x1fd   : > { %13793 = vst [vmem:[#allocation128_spill] sm:$0xff] %v9963_v63  ;;  %v9975_v38 = vpop.permute.xlu1 %5242  ;;  %13798 = vst [vmem:[#allocation136_spill] sm:$0xff] %v9981_v4  ;;  %v9991_v20 = vsel %vm1963_vm5, %v9742_v15, %v5029_v18  ;;  %v13801_v9 = vpack.i.bf16 %v13704_v10, %v13667_v17  ;;  %v10011_v18 = vsel %vm1963_vm5, %v9768_v27, %v5044_v59  ;;  %v2633_v17 = vrot.slane %v10020_v31, 7  ;;  %v13805_v27 = vld [vmem:[#allocation152_spill] sm:$0xff]  ;;  %v10087_v60 = vld [vmem:[%s6322_s10 + $0x168] sm:$0xff] }
 0x1fe   : > { %5522 = vrot.lane.b32.xlu1 %v9573_v50, %s6033_s12  ;;  %v5045_v50 = vunpack.i.h.bf16 %v13792_v48  ;;  %13796 = vst [vmem:[#allocation225_spill] sm:$0xff] %v9975_v38  ;;  %v13799_v48 = vld [vmem:[#allocation147_spill] sm:$0xff]  ;;  %v9997_v38 = vsel %vm1963_vm5, %v9738_v62, %v5030_v1  ;;  %v10016_v1 = vld [vmem:[%s6322_s10 + $0x150] sm:$0xff]  ;;  %v5075_v59 = vunpack.i.h.bf16 %v13805_v27  ;;  %v5074_v62 = vunpack.i.l.bf16 %v13805_v27 }
 0x1ff   : > { %v5049_v40 = vunpack.i.l.bf16 %v13799_v48  ;;  %v5050_v63 = vunpack.i.h.bf16 %v13799_v48  ;;  %v10000_v55 = vpop.permute.xlu0 %5237  ;;  %13803 = vst [vmem:[#allocation228_spill] sm:$0xff] %v10016_v1  ;;  %v2632_v48 = vrot.slane %v10016_v1, 7  ;;  %13804 = vst [vmem:[#allocation147_spill] sm:$0xff] %v10020_v31  ;;  %v13807_v22 = vpack.i.bf16 %v9613_v36, %v13806_v44 }
 0x200   : > { %5517 = vrot.lane.b32.xlu0 %v9596_v26, %s6033_s12  ;;  %v5040_v26 = vunpack.i.h.bf16 %v13795_v29  ;;  %13800 = vst [vmem:[#allocation227_spill] sm:$0xff] %v10000_v55  ;;  %v2631_v29 = vsel %vm2601_vm11, %v2629_v5, %v2630_v3  ;;  %v10029_v5 = vsel %vm1963_vm5, %v9783_v61, %v5039_v57  ;;  %v13810_v61 = vld [vmem:[#allocation87_spill] sm:$0xff] }
 0x201   : > { %v10037_v55 = vpop.permute.xlu1 %5252  ;;  %v10053_v36 = vsel %vm1963_vm5, %v9805_v56, %v5050_v63 }
 0x202   : > { %5532 = vrot.lane.b32.xlu1 %v13801_v9, %s6035_s14  ;;  %v10025_v9 = vsel %vm1963_vm5, %v9758_v2, %v5045_v50  ;;  %13808 = vst [vmem:[#allocation152_spill] sm:$0xff] %v10037_v55  ;;  %v10041_v4 = vsel %vm1963_vm5, %v13809_v19, %v5040_v26  ;;  %v10045_v2 = vsel %vm1963_vm5, %v9809_v28, %v5049_v40  ;;  %v13814_v26 = vld [vmem:[#allocation98_spill] sm:$0xff] }
 0x203   : > { %v10049_v50 = vpack.i.bf16 %v2630_v3, %v2631_v29  ;;  %v10057_v19 = vpop.permute.xlu0 %5247  ;;  %v13815_v28 = vld [vmem:[#allocation70_spill] sm:$0xff]  ;;  %v13819_v29 = vld [vmem:[#allocation53_spill] sm:$0xff]  ;;  %13827 = vst [vmem:[#allocation98_spill] sm:$0xff] %v10094_v11 }
 0x204   : > { %5527 = vrot.lane.b32.xlu0 %v13807_v22, %s6034_s13  ;;  %v13812_v22 = vld [vmem:[#allocation156_spill] sm:$0xff]  ;;  %13813 = vst [vmem:[#allocation204_spill] sm:$0xff] %v10057_v19  ;;  %v13816_v40 = vpack.i.bf16 %v13814_v26, %v13815_v28  ;;  %v5084_v56 = vunpack.i.l.bf16 %v13819_v29  ;;  %v10072_v19 = vsel %vm1996_vm6, %v9816_v51, %v5074_v62  ;;  %v10076_v28 = vsel %vm1996_vm6, %v9832_v45, %v5075_v59  ;;  %v13825_v62 = vld [vmem:[#allocation251_spill] sm:$0xff]  ;;  %v13826_v59 = vld [vmem:[#allocation166_spill] sm:$0xff] }
 0x205   : > { %13811 = vst [vmem:[#allocation202_spill] sm:$0xff] %v10049_v50  ;;  %v5070_v44 = vunpack.i.h.bf16 %v13812_v22  ;;  %v5069_v27 = vunpack.i.l.bf16 %v13812_v22  ;;  %v5085_v50 = vunpack.i.h.bf16 %v13819_v29  ;;  %v2634_v22 = vsel %vm2601_vm11, %v2632_v48, %v2633_v17  ;;  %v10082_v55 = vpop.permute.xlu1 %5262  ;;  %13824 = vst [vmem:[#allocation156_spill] sm:$0xff] %v10087_v60 }
 0x206   : > { %5542 = vrot.lane.b32.xlu1 %v13816_v40, %s6036_s15  ;;  %v13821_v40 = vld [vmem:[#allocation122_spill] sm:$0xff]  ;;  %13823 = vst [vmem:[#allocation87_spill] sm:$0xff] %v10082_v55  ;;  %v2635_v51 = vrot.slane %v10087_v60, 7  ;;  %v5080_v57 = vunpack.i.h.bf16 %v13825_v62  ;;  %v5079_v45 = vunpack.i.l.bf16 %v13825_v62  ;;  %v5094_v15 = vunpack.i.l.bf16 %v13826_v59 }
 0x207   : > { %v13822_v3 = vpack.i.bf16 %v13821_v40, %v13694_v41  ;;  %v2636_v41 = vrot.slane %v10094_v11, 7  ;;  %v10103_v40 = vsel %vm1996_vm6, %v9844_v47, %v5070_v44  ;;  %v5095_v29 = vunpack.i.h.bf16 %v13826_v59  ;;  %v10106_v24 = vpop.permute.xlu0 %5257  ;;  %v13831_v47 = vld [vmem:[#allocation258_spill] sm:$0xff] }
 0x208   : > { %13828 = vst [vmem:[#allocation70_spill] sm:$0xff] %v10106_v24  ;;  %v13829_v62 = vpack.i.bf16 %v13721_v25, %v13704_v10  ;;  %v10112_v53 = vpack.i.bf16 %v2634_v22, %v2632_v48  ;;  %v10116_v55 = vsel %vm1996_vm6, %v9857_v16, %v5084_v56  ;;  %v5089_v44 = vunpack.i.l.bf16 %v13831_v47  ;;  %v10127_v59 = vld [vmem:[%s6322_s10 + $0x160] sm:$0xf]  ;;  %v13834_v22 = vld [vmem:[#allocation172_spill] sm:$0xff]  ;;  %v10242_v24 = vld [vmem:[%s6322_s10 + $0x198] sm:$0xff] }
 0x209   : > { %5537 = vrot.lane.b32.xlu0 %v13822_v3, %s6036_s15  ;;  %v10099_v3 = vsel %vm1996_vm6, %v9840_v13, %v5069_v27  ;;  %v10120_v13 = vsel %vm1996_vm6, %v9881_v0, %v5085_v50  ;;  %v10124_v27 = vld [vmem:[%s6322_s10 + $0x178] sm:$0xf]  ;;  %13833 = vst [vmem:[#allocation251_spill] sm:$0xff] %v10127_v59  ;;  %v5090_v48 = vunpack.i.h.bf16 %v13831_v47  ;;  %v5104_v16 = vunpack.i.l.bf16 %v13834_v22  ;;  %v13835_v56 = vld [vmem:[#allocation108_spill] sm:$0xff]  ;;  %v10136_v0 = vpop.permute.xlu1 %5272 }
 0x20a   : > { %5552 = vrot.lane.b32.xlu1 %v13829_v62, %s6030_s1  ;;  %13830 = vst [vmem:[#allocation53_spill] sm:$0xff] %v10112_v53  ;;  %13832 = vst [vmem:[#allocation122_spill] sm:$0xff] %v10124_v27  ;;  %v5105_v62 = vunpack.i.h.bf16 %v13834_v22  ;;  %v10138_v50 = vpack.i.bf16 %v2635_v51, %v2633_v17  ;;  %v10142_v53 = vsel %vm1996_vm6, %v9885_v39, %v5079_v45  ;;  %v13838_v17 = vld [vmem:[#allocation175_spill] sm:$0xff]  ;;  %v13840_v39 = vld [vmem:[#allocation146_spill] sm:$0xff] }
 0x20b   : > { %13836 = vst [vmem:[#allocation166_spill] sm:$0xff] %v10136_v0  ;;  %v10146_v10 = vsel %vm1996_vm6, %v9894_v34, %v5080_v57  ;;  %v10150_v47 = vsel %vm1996_vm6, %v9908_v14, %v5094_v15  ;;  %v2637_v22 = vsel %vm2601_vm11, %v2635_v51, %v2636_v41  ;;  %v10158_v59 = vpop.permute.xlu0 %5267  ;;  %v13841_v45 = vld [vmem:[#allocation134_spill] sm:$0xff]  ;;  %v13843_v14 = vld [vmem:[#allocation85_spill] sm:$0xff]  ;;  %v5100_v57 = vunpack.i.h.bf16 %v13838_v17 }
 0x20c   : > { %13837 = vst [vmem:[#allocation258_spill] sm:$0xff] %v10138_v50  ;;  %v5099_v50 = vunpack.i.l.bf16 %v13838_v17  ;;  %13839 = vst [vmem:[#allocation172_spill] sm:$0xff] %v10158_v59  ;;  %v13842_v27 = vpack.i.bf16 %v13840_v39, %v13841_v45  ;;  %v10181_v34 = vsel %vm1996_vm6, %v9935_v58, %v5104_v16  ;;  %v10185_v15 = vsel %vm1996_vm6, %v9943_v12, %v5105_v62  ;;  %v10199_v58 = vld [vmem:[%s6322_s10 + $0x188] sm:$0xff]  ;;  %v10203_v12 = vld [vmem:[%s6322_s10 + $0x180] sm:$0xff] }
 0x20d   : > { %5547 = vrot.lane.b32.xlu0 %v13835_v56, %s6033_s12  ;;  %v10155_v56 = vsel %vm1996_vm6, %v9912_v30, %v5095_v29  ;;  %v10170_v30 = vsel %vm1996_vm6, %v9919_v6, %v5089_v44  ;;  %v13844_v29 = vld [vmem:[#allocation93_spill] sm:$0xff]  ;;  %v13845_v6 = vpack.i.bf16 %v13739_v46, %v13814_v26  ;;  %v10191_v44 = vpop.permute.xlu1 %5282  ;;  %v10193_v17 = vpack.i.bf16 %v2636_v41, %v2637_v22  ;;  %v13852_v22 = vld [vmem:[#allocation246_spill] sm:$0xff] }
 0x20e   : > { %5562 = vrot.lane.b32.xlu1 %v13842_v27, %s6032_s11  ;;  %v5115_v51 = vunpack.i.h.bf16 %v13844_v29  ;;  %v5114_v59 = vunpack.i.l.bf16 %v13844_v29  ;;  %v10177_v27 = vsel %vm1996_vm6, %v9923_v8, %v5090_v48  ;;  %13846 = vst [vmem:[#allocation108_spill] sm:$0xff] %v10191_v44  ;;  %v13848_v29 = vld [vmem:[#allocation177_spill] sm:$0xff]  ;;  %13850 = vst [vmem:[#allocation134_spill] sm:$0xff] %v10199_v58  ;;  %v2639_v16 = vrot.slane %v10199_v58, 7  ;;  %v13856_v44 = vld [vmem:[#allocation95_spill] sm:$0xff] }
 0x20f   : > { %13847 = vst [vmem:[#allocation175_spill] sm:$0xff] %v10193_v17  ;;  %v5109_v8 = vunpack.i.l.bf16 %v13848_v29  ;;  %13851 = vst [vmem:[#allocation85_spill] sm:$0xff] %v10203_v12  ;;  %v2638_v62 = vrot.slane %v10203_v12, 7  ;;  %v10208_v26 = vsel %vm1996_vm6, %v9947_v54, %v5099_v50  ;;  %v5110_v41 = vunpack.i.h.bf16 %v13848_v29  ;;  %v10213_v39 = vpop.permute.xlu0 %5277  ;;  %v13854_v50 = vld [vmem:[#allocation60_spill] sm:$0xff]  ;;  %v10352_v12 = vld [vmem:[%s6322_s10 + $0x1a0] sm:$0xff] }
 0x210   : > { %v5124_v17 = vunpack.i.l.bf16 %v13852_v22  ;;  %13853 = vst [vmem:[#allocation93_spill] sm:$0xff] %v10213_v39  ;;  %v10219_v31 = vsel %vm1996_vm6, %v9960_v32, %v5100_v57  ;;  %v10223_v1 = vsel %vm1996_vm6, %v9969_v52, %v5114_v59  ;;  %v10227_v54 = vsel %vm1996_vm6, %v9987_v42, %v5115_v51  ;;  %v13855_v39 = vld [vmem:[#allocation121_spill] sm:$0xff]  ;;  %v13901_v52 = vld [vmem:[#allocation115_spill] sm:$0xff] }
 0x211   : > { %5557 = vrot.lane.b32.xlu0 %v13845_v6, %s6031_s2  ;;  %v5125_v6 = vunpack.i.h.bf16 %v13852_v22  ;;  %v5119_v29 = vunpack.i.l.bf16 %v13854_v50  ;;  %v5120_v22 = vunpack.i.h.bf16 %v13854_v50  ;;  %v10235_v0 = vpop.permute.xlu1 %5292  ;;  %v10247_v51 = vsel %vm1996_vm6, %v9991_v20, %v5109_v8  ;;  %v13861_v50 = vld [vmem:[#allocation272_spill] sm:$0xff]  ;;  %v13863_v8 = vld [vmem:[#allocation205_spill] sm:$0xff] }
 0x212   : > { %5572 = vrot.lane.b32.xlu1 %v9779_v23, %s6033_s12  ;;  %v13857_v23 = vpack.i.bf16 %v13855_v39, %v13856_v44  ;;  %13858 = vst [vmem:[#allocation177_spill] sm:$0xff] %v10235_v0  ;;  %v5130_v63 = vunpack.i.h.bf16 %v13861_v50  ;;  %v5129_v39 = vunpack.i.l.bf16 %v13861_v50  ;;  %v2640_v44 = vsel %vm2601_vm11, %v2638_v62, %v2639_v16 }
 0x213   : > { %v10258_v59 = vsel %vm1996_vm6, %v10011_v18, %v5124_v17  ;;  %v10262_v57 = vsel %vm1996_vm6, %v10025_v9, %v5125_v6  ;;  %v10264_v20 = vpop.permute.xlu0 %5287  ;;  %v13864_v50 = vpack.i.bf16 %v9795_v21, %v13863_v8  ;;  %v13865_v18 = vld [vmem:[#allocation274_spill] sm:$0xff] }
 0x214   : > { %13862 = vst [vmem:[#allocation246_spill] sm:$0xff] %v10264_v20  ;;  %v5155_v17 = vunpack.i.h.bf16 %v13865_v18  ;;  %v10282_v20 = vsel %vm1996_vm6, %v10041_v4, %v5120_v22  ;;  %v13868_v21 = vld [vmem:[#allocation206_spill] sm:$0xff]  ;;  %v10297_v0 = vsel %vm1996_vm6, %v10045_v2, %v5129_v39  ;;  %v10301_v4 = vsel %vm1996_vm6, %v10053_v36, %v5130_v63  ;;  %v13874_v22 = vld [vmem:[#allocation193_spill] sm:$0xff]  ;;  %v10316_v36 = vld [vmem:[%s6322_s10 + $0x190] sm:$0xf] }
 0x215   : > { %5567 = vrot.lane.b32.xlu0 %v13857_v23, %s6036_s15  ;;  %v10254_v23 = vsel %vm1996_vm6, %v9997_v38, %v5110_v41  ;;  %v10274_v38 = vsel %vm1996_vm6, %v10029_v5, %v5119_v29  ;;  %v5154_v41 = vunpack.i.l.bf16 %v13865_v18  ;;  %v10286_v8 = vpop.permute.xlu1 %5302  ;;  %v13870_v5 = vrot.slane %v10242_v24, 7  ;;  %v13873_v18 = vld [vmem:[#allocation117_spill] sm:$0xff]  ;;  %v13879_v2 = vld [vmem:[#allocation114_spill] sm:$0xff]  ;;  %13881 = vst [vmem:[#allocation205_spill] sm:$0xff] %v10316_v36 }
 0x216   : > { %5582 = vrot.lane.b32.xlu1 %v13864_v50, %s6034_s13  ;;  %13869 = vst [vmem:[#allocation60_spill] sm:$0xff] %v10286_v8  ;;  %v10292_v50 = vpack.i.bf16 %v2640_v44, %v2638_v62  ;;  %v3332_v42 = vrot.slane %v13873_v18, 1  ;;  %v13880_v39 = vpack.i.bf16 %v13879_v2, %v13739_v46  ;;  %v10326_v6 = vsel %vm2029_vm7, %v10076_v28, %v5155_v17  ;;  %v13884_v2 = vld [vmem:[#allocation100_spill] sm:$0xff] }
 0x217   : > { %v10290_v29 = vpack.i.bf16 %v13870_v5, %v2639_v16  ;;  %v5150_v16 = vunpack.i.h.bf16 %v13874_v22  ;;  %v13877_v5 = vld [vmem:[#allocation126_spill] sm:$0xff]  ;;  %v10309_v18 = vpop.permute.xlu0 %5297  ;;  %13894 = vst [vmem:[#allocation117_spill] sm:$0xff] %v10352_v12 }
 0x218   : > { %13872 = vst [vmem:[#allocation95_spill] sm:$0xff] %v10292_v50  ;;  %v5165_v62 = vunpack.i.h.bf16 %v13877_v5  ;;  %v5164_v44 = vunpack.i.l.bf16 %v13877_v5  ;;  %13878 = vst [vmem:[#allocation272_spill] sm:$0xff] %v10309_v18  ;;  %v13885_v50 = vld [vmem:[#allocation73_spill] sm:$0xff]  ;;  %v2642_v5 = vrot.slane %v10352_v12, 7 }
 0x219   : > { %5577 = vrot.lane.b32.xlu0 %v13868_v21, %s6033_s12  ;;  %13871 = vst [vmem:[#allocation121_spill] sm:$0xff] %v10290_v29  ;;  %v5149_v21 = vunpack.i.l.bf16 %v13874_v22  ;;  %v10322_v22 = vsel %vm2029_vm7, %v10072_v19, %v5154_v41  ;;  %v13886_v63 = vpack.i.bf16 %v13885_v50, %v13721_v25  ;;  %v10337_v36 = vpop.permute.xlu1 %5312  ;;  %v13887_v19 = vld [vmem:[#allocation124_spill] sm:$0xff]  ;;  %v13889_v29 = vld [vmem:[#allocation123_spill] sm:$0xff]  ;;  %v5160_v25 = vunpack.i.h.bf16 %v13884_v2 }
 0x21a   : > { %5592 = vrot.lane.b32.xlu1 %v13880_v39, %s6036_s15  ;;  %v5159_v39 = vunpack.i.l.bf16 %v13884_v2  ;;  %v13888_v41 = vrot.slane %v13887_v19, 1  ;;  %v13890_v28 = vrot.slane %v13889_v29, 1  ;;  %v10364_v19 = vsel %vm2029_vm7, %v10116_v55, %v5164_v44  ;;  %v13896_v2 = vld [vmem:[#allocation209_spill] sm:$0xff]  ;;  %v13907_v44 = vld [vmem:[#allocation68_spill] sm:$0xff] }
 0x21b   : > { %v10360_v29 = vsel %vm2029_vm7, %v10099_v3, %v5149_v21  ;;  %v13902_v21 = vld [vmem:[#allocation102_spill] sm:$0xff]  ;;  %v5180_v8 = vunpack.i.h.bf16 %v13907_v44 }
 0x21c   : > { %v10344_v17 = vsel %vm182_vm0, %v13890_v28, %v13888_v41  ;;  %v13892_v18 = vmov %v13888_v41  ;;  %v10376_v41 = vsel %vm2029_vm7, %v10103_v40, %v5150_v16  ;;  %v5185_v40 = vunpack.i.h.bf16 %v13901_v52  ;;  %v13903_v28 = vld [vmem:[#allocation203_spill] sm:$0xff] }
 0x21d   : > { %5587 = vrot.lane.b32.xlu0 %v13886_v63, %s6035_s14  ;;  %13891 = vst [vmem:[#allocation274_spill] sm:$0xff] %v10344_v17  ;;  %v10349_v46 = vsel %vm182_vm0, %v13892_v18, %v3332_v42  ;;  %v13895_v63 = vld [vmem:[#allocation92_spill] sm:$0xff]  ;;  %v10368_v42 = vsel %vm2029_vm7, %v10120_v13, %v5165_v62  ;;  %v10370_v18 = vpop.permute.xlu0 %5307  ;;  %v5184_v16 = vunpack.i.l.bf16 %v13901_v52  ;;  %v10396_v3 = vpop.permute.xlu1 %5322  ;;  %v13905_v13 = vrot.slane %v10242_v24, 7 }
 0x21e   : > { %13893 = vst [vmem:[#allocation206_spill] sm:$0xff] %v10349_v46  ;;  %v5175_v9 = vunpack.i.h.bf16 %v13895_v63  ;;  %v5174_v60 = vunpack.i.l.bf16 %v13895_v63  ;;  %5602 = vrot.lane.b32.xlu1 %v13896_v2, %s6033_s12  ;;  %v13899_v63 = vld [vmem:[#allocation120_spill] sm:$0xff]  ;;  %v10388_v2 = vsel %vm2029_vm7, %v10142_v53, %v5159_v39  ;;  %v10403_v53 = vsel %vm2029_vm7, %v10146_v10, %v5160_v25  ;;  %v13908_v46 = vld [vmem:[#allocation119_spill] sm:$0xff] }
 0x21f   : > { %v5170_v11 = vunpack.i.h.bf16 %v13899_v63  ;;  %v5169_v55 = vunpack.i.l.bf16 %v13899_v63  ;;  %v13904_v63 = vpack.i.bf16 %v13902_v21, %v13903_v28  ;;  %v2643_v62 = vsel %vm2601_vm11, %v13905_v13, %v2642_v5  ;;  %v13906_v28 = vld [vmem:[#allocation132_spill] sm:$0xff] }
 0x220   : > { %v10407_v39 = vsel %vm2029_vm7, %v10150_v47, %v5174_v60  ;;  %v10411_v52 = vsel %vm2029_vm7, %v10155_v56, %v5175_v9  ;;  %v5179_v17 = vunpack.i.l.bf16 %v13907_v44  ;;  %v5194_v13 = vunpack.i.l.bf16 %v13908_v46  ;;  %v10426_v56 = vld [vmem:[%s6322_s10 + $0x1b0] sm:$0xff]  ;;  %v10429_v9 = vld [vmem:[%s6322_s10 + $0x1b8] sm:$0xff] }
 0x221   : > { %5597 = vrot.lane.b32.xlu0 %v13904_v63, %s6036_s15  ;;  %v3342_v63 = vrot.slane %v13906_v28, 1  ;;  %v10417_v32 = vpop.permute.xlu0 %5317  ;;  %v13909_v10 = vpack.i.bf16 %v13770_v7, %v13902_v21  ;;  %v10433_v25 = vsel %vm2029_vm7, %v10170_v30, %v5169_v55  ;;  %v10437_v44 = vsel %vm2029_vm7, %v10177_v27, %v5170_v11  ;;  %v10454_v11 = vpop.permute.xlu1 %5332  ;;  %v13916_v55 = vld [vmem:[#allocation138_spill] sm:$0xff]  ;;  %v13918_v47 = vld [vmem:[#allocation137_spill] sm:$0xff]  ;;  %v13932_v27 = vld [vmem:[#allocation131_spill] sm:$0xff] }
 0x222   : > { %v5195_v28 = vunpack.i.h.bf16 %v13908_v46  ;;  %v10440_v48 = vpack.i.bf16 %v2642_v5, %v2643_v62  ;;  %v10444_v21 = vsel %vm2029_vm7, %v10181_v34, %v5184_v16  ;;  %v13912_v30 = vpack.i.bf16 %v13772_v43, %v13885_v50  ;;  %13913 = vst [vmem:[#allocation126_spill] sm:$0xff] %v10454_v11  ;;  %v13925_v16 = vld [vmem:[#allocation75_spill] sm:$0xff] }
 0x223   : > { %5612 = vrot.lane.b32.xlu1 %v13909_v10, %s6031_s2  ;;  %v10448_v10 = vsel %vm2029_vm7, %v10185_v15, %v5185_v40  ;;  %v13917_v62 = vrot.slane %v13916_v55, 1  ;;  %v13919_v58 = vrot.slane %v13918_v47, 1  ;;  %v2386_v50 = vrot.slane %v10426_v56, 1 }
 0x224   : > { %13911 = vst [vmem:[#allocation193_spill] sm:$0xff] %v10440_v48  ;;  %v10475_v5 = vsel %vm2029_vm7, %v10208_v26, %v5179_v17  ;;  %v10479_v47 = vsel %vm2029_vm7, %v10219_v31, %v5180_v8  ;;  %v13921_v55 = vpack.i.bf16 %v9753_v33, %v9763_v49  ;;  %v10498_v31 = vsel %vm2029_vm7, %v10227_v54, %v5195_v28  ;;  %v13923_v8 = vld [vmem:[#allocation118_spill] sm:$0xff] }
 0x225   : > { %5607 = vrot.lane.b32.xlu0 %v13912_v30, %s6030_s1  ;;  %v10463_v34 = vsel %vm182_vm0, %v13919_v58, %v13917_v62  ;;  %v13920_v15 = vmov %v13917_v62  ;;  %v3352_v30 = vrot.slane %v13687_v35, 1  ;;  %v10483_v58 = vsel %vm2029_vm7, %v10223_v1, %v5194_v13  ;;  %v10492_v35 = vld [vmem:[%s6322_s10 + $0x1a8] sm:$0xf]  ;;  %v13924_v13 = vld [vmem:[#allocation109_spill] sm:$0xff]  ;;  %v13926_v33 = vld [vmem:[#allocation142_spill] sm:$0xff]  ;;  %v10509_v26 = vpop.permute.xlu1 %5342 }
 0x226   : > { %v10468_v40 = vsel %vm182_vm0, %v13920_v15, %v3342_v63  ;;  %v10485_v63 = vpop.permute.xlu0 %5327  ;;  %13922 = vst [vmem:[#allocation114_spill] sm:$0xff] %v10492_v35  ;;  %v5190_v17 = vunpack.i.h.bf16 %v13923_v8  ;;  %v5189_v1 = vunpack.i.l.bf16 %v13923_v8  ;;  %v5204_v62 = vunpack.i.l.bf16 %v13924_v13  ;;  %13928 = vst [vmem:[#allocation100_spill] sm:$0xff] %v10509_v26 }
 0x227   : > { %5622 = vrot.lane.b32.xlu1 %v13921_v55, %s6036_s15  ;;  %v5205_v15 = vunpack.i.h.bf16 %v13924_v13  ;;  %v5200_v49 = vunpack.i.h.bf16 %v13925_v16  ;;  %v13927_v55 = vpack.i.bf16 %v13784_v37, %v13926_v33  ;;  %v5199_v28 = vunpack.i.l.bf16 %v13925_v16  ;;  %v13930_v13 = vld [vmem:[#allocation133_spill] sm:$0xff]  ;;  %v13938_v16 = vld [vmem:[#allocation223_spill] sm:$0xff] }
 0x228   : > { %v13929_v8 = vrot.slane %v10429_v9, 1  ;;  %v13931_v35 = vrot.slane %v13930_v13, 1  ;;  %v13933_v60 = vrot.slane %v13932_v27, 1  ;;  %v2528_v27 = vrot.slane %v10426_v56, 3  ;;  %v13958_v33 = vld [vmem:[#allocation225_spill] sm:$0xff] }
 0x229   : > { %5617 = vrot.lane.b32.xlu0 %v13927_v55, %s6032_s11  ;;  %v10549_v13 = vsel %vm2029_vm7, %v10258_v59, %v5204_v62  ;;  %v10568_v59 = vsel %vm2029_vm7, %v10274_v38, %v5199_v28  ;;  %v10572_v62 = vsel %vm2029_vm7, %v10282_v20, %v5200_v49  ;;  %v13948_v20 = vrot.slane %v10429_v9, 2 }
 0x22a   : > { %v10517_v11 = vsel %vm182_vm0, %v2386_v50, %v13929_v8  ;;  %v10524_v48 = vsel %vm182_vm0, %v13933_v60, %v13931_v35  ;;  %v13935_v55 = vmov %v13931_v35  ;;  %v10531_v54 = vpop.permute.xlu0 %5337  ;;  %v2457_v50 = vrot.slane %v10426_v56, 2  ;;  %v13941_v60 = vld [vmem:[#allocation104_spill] sm:$0xff] }
 0x22b   : > { %13934 = vst [vmem:[#allocation73_spill] sm:$0xff] %v10524_v48  ;;  %v10529_v37 = vsel %vm182_vm0, %v13935_v55, %v3352_v30  ;;  %13937 = vst [vmem:[#allocation123_spill] sm:$0xff] %v10531_v54  ;;  %5632 = vrot.lane.b32.xlu1 %v13938_v16, %s6033_s12  ;;  %v10541_v35 = vsel %vm2029_vm7, %v10247_v51, %v5189_v1  ;;  %v10545_v30 = vsel %vm2029_vm7, %v10254_v23, %v5190_v17  ;;  %v13942_v1 = vld [vmem:[#allocation128_spill] sm:$0xff]  ;;  %v10561_v23 = vpop.permute.xlu1 %5352  ;;  %v10564_v17 = vld [vmem:[%s6322_s10 + $0x1c8] sm:$0xff] }
 0x22c   : > { %13936 = vst [vmem:[#allocation124_spill] sm:$0xff] %v10529_v37  ;;  %v10555_v8 = vsel %vm2029_vm7, %v10262_v57, %v5205_v15  ;;  %v5210_v26 = vunpack.i.h.bf16 %v13941_v60  ;;  %v5209_v51 = vunpack.i.l.bf16 %v13941_v60  ;;  %13943 = vst [vmem:[#allocation92_spill] sm:$0xff] %v10561_v23  ;;  %v13944_v60 = vld [vmem:[#allocation78_spill] sm:$0xff]  ;;  %v13946_v55 = vld [vmem:[#allocation80_spill] sm:$0xff]  ;;  %v10589_v49 = vsel %vm359_vm1, %v2457_v50, %v13948_v20 }
 0x22d   : > { %5627 = vrot.lane.b32.xlu0 %v13942_v1, %s6033_s12  ;;  %v5235_v1 = vunpack.i.h.bf16 %v13944_v60  ;;  %v5234_v54 = vunpack.i.l.bf16 %v13944_v60  ;;  %v13947_v38 = vpack.i.bf16 %v13946_v55, %v13772_v43  ;;  %v13949_v28 = vrot.slane %v10429_v9, 3  ;;  %v13951_v15 = vld [vmem:[#allocation82_spill] sm:$0xff]  ;;  %v13954_v20 = vld [vmem:[#allocation135_spill] sm:$0xff] }
 0x22e   : > { %v10580_v23 = vpop.permute.xlu0 %5347  ;;  %v5230_v60 = vunpack.i.h.bf16 %v13951_v15  ;;  %v2645_v48 = vrot.slane %v10429_v9, 7  ;;  %v10606_v50 = vsel %vm2029_vm7, %v10301_v4, %v5210_v26  ;;  %v5245_v46 = vunpack.i.h.bf16 %v13958_v33  ;;  %v10621_v4 = vld [vmem:[%s6322_s10 + $0x1c0] sm:$0xf] }
 0x22f   : > { %13945 = vst [vmem:[#allocation209_spill] sm:$0xff] %v10580_v23  ;;  %5642 = vrot.lane.b32.xlu1 %v13947_v38, %s6035_s14  ;;  %v10594_v57 = vsel %vm536_vm2, %v2528_v27, %v13949_v28  ;;  %v5229_v23 = vunpack.i.l.bf16 %v13951_v15  ;;  %v10602_v38 = vsel %vm2029_vm7, %v10297_v0, %v5209_v51  ;;  %13953 = vst [vmem:[#allocation102_spill] sm:$0xff] %v10606_v50  ;;  %v13955_v27 = vld [vmem:[#allocation136_spill] sm:$0xff]  ;;  %v10612_v37 = vpop.permute.xlu1 %5362  ;;  %v2644_v15 = vrot.slane %v10426_v56, 7  ;;  %v13959_v51 = vld [vmem:[#allocation139_spill] sm:$0xff] }
 0x230   : > { %13950 = vst [vmem:[#allocation120_spill] sm:$0xff] %v10594_v57  ;;  %13952 = vst [vmem:[#allocation115_spill] sm:$0xff] %v10602_v38  ;;  %v13956_v28 = vpack.i.bf16 %v13954_v20, %v13955_v27  ;;  %v5244_v43 = vunpack.i.l.bf16 %v13958_v33  ;;  %v3362_v38 = vrot.slane %v13959_v51, 1  ;;  %v10625_v26 = vsel %vm2062_vm8, %v10322_v22, %v5234_v54  ;;  %v13961_v27 = vld [vmem:[#allocation106_spill] sm:$0xff]  ;;  %v13967_v0 = vld [vmem:[#allocation227_spill] sm:$0xff] }
 0x231   : > { %13957 = vst [vmem:[#allocation203_spill] sm:$0xff] %v10612_v37  ;;  %v10640_v16 = vsel %vm2062_vm8, %v10326_v6, %v5235_v1  ;;  %v10644_v22 = vsel %vm2062_vm8, %v10360_v29, %v5229_v23  ;;  %v10648_v54 = vsel %vm2062_vm8, %v10376_v41, %v5230_v60  ;;  %v5240_v33 = vunpack.i.h.bf16 %v13967_v0  ;;  %v10664_v23 = vld [vmem:[%s6322_s10 + $0x1d0] sm:$0xff] }
 0x232   : > { %5637 = vrot.lane.b32.xlu0 %v13956_v28, %s6034_s13  ;;  %v10627_v20 = vpop.permute.xlu0 %5357  ;;  %v13962_v28 = vld [vmem:[#allocation220_spill] sm:$0xff]  ;;  %v5239_v37 = vunpack.i.l.bf16 %v13967_v0  ;;  %v2646_v29 = vsel %vm2601_vm11, %v2644_v15, %v2645_v48  ;;  %v10667_v41 = vrot.slane %v10621_v4, 1  ;;  %v10671_v60 = vsel %vm2062_vm8, %v10364_v19, %v5244_v43 }
 0x233   : > { %13960 = vst [vmem:[#allocation132_spill] sm:$0xff] %v10627_v20  ;;  %v13963_v50 = vpack.i.bf16 %v13961_v27, %v13962_v28  ;;  %v13968_v20 = vld [vmem:[#allocation125_spill] sm:$0xff]  ;;  %v10660_v1 = vpop.permute.xlu1 %5372  ;;  %v10675_v0 = vsel %vm2062_vm8, %v10368_v42, %v5245_v46  ;;  %v13978_v51 = vld [vmem:[#allocation152_spill] sm:$0xff] }
 0x234   : > { %v13969_v6 = vpack.i.bf16 %v13968_v20, %v13770_v7  ;;  %13970 = vst [vmem:[#allocation119_spill] sm:$0xff] %v10660_v1  ;;  %v13973_v20 = vld [vmem:[#allocation144_spill] sm:$0xff]  ;;  %v5255_v57 = vunpack.i.h.bf16 %v13978_v51  ;;  %v5254_v19 = vunpack.i.l.bf16 %v13978_v51  ;;  %v10706_v51 = vsel %vm2062_vm8, %v10388_v2, %v5239_v37  ;;  %v13986_v37 = vld [vmem:[#allocation87_spill] sm:$0xff] }
 0x235   : > { %5652 = vrot.lane.b32.xlu1 %v13963_v50, %s6036_s15  ;;  %v13965_v50 = vrot.slane %v10564_v17, 7  ;;  %v13979_v43 = vld [vmem:[#allocation204_spill] sm:$0xff]  ;;  %v5265_v2 = vunpack.i.h.bf16 %v13986_v37 }
 0x236   : > { %5647 = vrot.lane.b32.xlu0 %v13969_v6, %s6036_s15  ;;  %v13974_v6 = vrot.slane %v13973_v20, 1  ;;  %v5250_v12 = vunpack.i.h.bf16 %v13979_v43  ;;  %v5249_v42 = vunpack.i.l.bf16 %v13979_v43  ;;  %v10693_v46 = vpop.permute.xlu0 %5367  ;;  %v10699_v20 = vpack.i.bf16 %v2646_v29, %v2644_v15  ;;  %v13983_v43 = vld [vmem:[#allocation202_spill] sm:$0xff] }
 0x237   : > { %v10652_v28 = vpack.i.bf16 %v13965_v50, %v2645_v48  ;;  %v13971_v50 = vld [vmem:[#allocation145_spill] sm:$0xff]  ;;  %13980 = vst [vmem:[#allocation118_spill] sm:$0xff] %v10693_v46  ;;  %v13985_v29 = vrot.slane %v10429_v9, 1  ;;  %v10736_v15 = vsel %vm2062_vm8, %v10411_v52, %v5255_v57 }
 0x238   : > { %v13972_v7 = vrot.slane %v13971_v50, 1  ;;  %13982 = vst [vmem:[#allocation109_spill] sm:$0xff] %v10699_v20  ;;  %13988 = vst [vmem:[#allocation131_spill] sm:$0xff] %v10736_v15  ;;  %v13991_v50 = vld [vmem:[#allocation148_spill] sm:$0xff]  ;;  %v13995_v57 = vld [vmem:[#allocation141_spill] sm:$0xff] }
 0x239   : > { %13966 = vst [vmem:[#allocation68_spill] sm:$0xff] %v10652_v28 }
 0x23a   : > { %v10682_v1 = vsel %vm182_vm0, %v13974_v6, %v13972_v7  ;;  %v13976_v48 = vmov %v13972_v7  ;;  %v13981_v7 = vpack.i.bf16 %v13810_v61, %v13946_v55  ;;  %v3372_v6 = vrot.slane %v13841_v45, 1  ;;  %5657 = vrot.lane.b32.xlu0 %v13983_v43, %s6033_s12  ;;  %v10714_v55 = vpop.permute.xlu1 %5382 }
 0x23b   : > { %13975 = vst [vmem:[#allocation138_spill] sm:$0xff] %v10682_v1  ;;  %v10687_v28 = vsel %vm182_vm0, %v13976_v48, %v3362_v38  ;;  %v2861_v38 = vrot.slane %v10564_v17, 1  ;;  %v10710_v48 = vsel %vm2062_vm8, %v10403_v53, %v5240_v33  ;;  %13984 = vst [vmem:[#allocation75_spill] sm:$0xff] %v10714_v55  ;;  %v10722_v45 = vsel %vm182_vm0, %v13985_v29, %v10667_v41  ;;  %v10746_v53 = vpop.permute.xlu0 %5377  ;;  %v13990_v33 = vld [vmem:[#allocation84_spill] sm:$0xff]  ;;  %v14005_v1 = vld [vmem:[#allocation53_spill] sm:$0xff] }
 0x23c   : > { %13977 = vst [vmem:[#allocation137_spill] sm:$0xff] %v10687_v28  ;;  %5662 = vrot.lane.b32.xlu1 %v13981_v7, %s6030_s1  ;;  %v5264_v7 = vunpack.i.l.bf16 %v13986_v37  ;;  %v10732_v43 = vsel %vm2062_vm8, %v10407_v39, %v5254_v19  ;;  %v10740_v29 = vsel %vm2062_vm8, %v10433_v25, %v5249_v42  ;;  %v10744_v37 = vsel %vm2062_vm8, %v10437_v44, %v5250_v12  ;;  %v13997_v42 = vld [vmem:[#allocation140_spill] sm:$0xff] }
 0x23d   : > { %13987 = vst [vmem:[#allocation133_spill] sm:$0xff] %v10732_v43  ;;  %13989 = vst [vmem:[#allocation223_spill] sm:$0xff] %v10746_v53  ;;  %v13992_v55 = vpack.i.bf16 %v13990_v33, %v13991_v50  ;;  %v13993_v39 = vrot.slane %v10664_v23, 1  ;;  %v13996_v19 = vrot.slane %v13995_v57, 1  ;;  %v13998_v12 = vrot.slane %v13997_v42, 1  ;;  %v14000_v33 = vld [vmem:[#allocation110_spill] sm:$0xff] }
 0x23e   : > { %v5309_v25 = vunpack.i.l.bf16 %v10370_v18  ;;  %v14001_v42 = vpack.i.bf16 %v14000_v33, %v13961_v27  ;;  %v10781_v57 = vsel %vm2062_vm8, %v10444_v21, %v5264_v7  ;;  %v10794_v21 = vrot.slane %v10621_v4, 2  ;;  %v14006_v7 = vld [vmem:[#allocation166_spill] sm:$0xff] }
 0x23f   : > { %v10755_v52 = vsel %vm182_vm0, %v2861_v38, %v13993_v39  ;;  %v10764_v44 = vsel %vm182_vm0, %v13998_v12, %v13996_v19  ;;  %v13999_v53 = vmov %v13996_v19  ;;  %v5314_v38 = vunpack.i.l.bf16 %v10337_v36  ;;  %v5393_v19 = vpop.permute.xlu1 %5392  ;;  %14002 = vst [vmem:[#allocation128_spill] sm:$0xff] %v10781_v57  ;;  %v14004_v12 = vld [vmem:[#allocation70_spill] sm:$0xff]  ;;  %v5388_v20 = vpop.permute.xlu0 %5387 }
 0x240   : > { %5672 = vrot.lane.b32.xlu1 %v13992_v55, %s6032_s11  ;;  %13994 = vst [vmem:[#allocation104_spill] sm:$0xff] %v10755_v52  ;;  %v10769_v46 = vsel %vm182_vm0, %v13999_v53, %v3372_v6  ;;  %v5315_v55 = vunpack.i.h.bf16 %v10337_v36  ;;  %v5310_v39 = vunpack.i.h.bf16 %v10370_v18  ;;  %5667 = vrot.lane.b32.xlu0 %v14001_v42, %s6031_s2  ;;  %v10785_v6 = vsel %vm2062_vm8, %v10448_v10, %v5265_v2  ;;  %v14008_v57 = vld [vmem:[#allocation222_spill] sm:$0xff] }
 0x241   : > { %14003 = vst [vmem:[#allocation78_spill] sm:$0xff] %v10785_v6  ;;  %v5395_v53 = vunpack.i.h.bf16 %v5393_v19  ;;  %v5394_v36 = vunpack.i.l.bf16 %v5393_v19  ;;  %v5260_v50 = vunpack.i.h.bf16 %v14004_v12  ;;  %v5259_v18 = vunpack.i.l.bf16 %v14004_v12  ;;  %v14007_v6 = vld [vmem:[#allocation224_spill] sm:$0xff] }
 0x242   : > { %v5275_v42 = vunpack.i.h.bf16 %v14006_v7  ;;  %v5274_v10 = vunpack.i.l.bf16 %v14006_v7  ;;  %v5390_v2 = vunpack.i.h.bf16 %v5388_v20  ;;  %v5389_v19 = vunpack.i.l.bf16 %v5388_v20 }
 0x243   : > { %v14009_v12 = vpack.i.bf16 %v14007_v6, %v14008_v57  ;;  %v10802_v28 = vpop.permute.xlu1 %5402  ;;  %v2322_v27 = vsel %vm2095_vm9, %v10648_v54, %v5310_v39  ;;  %v2323_v52 = vsel %vm2095_vm9, %v10625_v26, %v5314_v38  ;;  %v2324_v7 = vsel %vm2095_vm9, %v10640_v16, %v5315_v55  ;;  %v14011_v54 = vld [vmem:[#allocation122_spill] sm:$0xff]  ;;  %v14012_v39 = vld [vmem:[#allocation251_spill] sm:$0xff] }
 0x244   : > { %5682 = vrot.lane.b32.xlu1 %v14005_v1, %s6033_s12  ;;  %v2321_v1 = vsel %vm2095_vm9, %v10644_v22, %v5309_v25  ;;  %v2354_v15 = vsel %vm2128_vm10, %v2322_v27, %v5390_v2  ;;  %v2355_v57 = vsel %vm2128_vm10, %v2323_v52, %v5394_v36  ;;  %v2356_v6 = vsel %vm2128_vm10, %v2324_v7, %v5395_v53  ;;  %v5398_v25 = vpop.permute.xlu0 %5397 }
 0x245   : > { %5677 = vrot.lane.b32.xlu0 %v14009_v12, %s6036_s15  ;;  %v2353_v20 = vsel %vm2128_vm10, %v2321_v1, %v5389_v19  ;;  %v14010_v12 = vld [vmem:[#allocation172_spill] sm:$0xff]  ;;  %v14013_v26 = vpack.i.bf16 %v14011_v54, %v14012_v39  ;;  %v14014_v16 = vrot.slane %v10429_v9, 2  ;;  %v10830_v52 = vsel %vm2062_vm8, %v10475_v5, %v5259_v18  ;;  %v14015_v5 = vld [vmem:[#allocation258_spill] sm:$0xff] }
 0x246   : > { %v5270_v43 = vunpack.i.h.bf16 %v14010_v12  ;;  %v5269_v22 = vunpack.i.l.bf16 %v14010_v12  ;;  %v3539_v38 = vpack.c.bf16 %v2354_v15, %v2353_v20  ;;  %v10834_v53 = vsel %vm2062_vm8, %v10479_v47, %v5260_v50  ;;  %v14016_v20 = vld [vmem:[#allocation170_spill] sm:$0xff]  ;;  %v14020_v54 = vld [vmem:[#allocation228_spill] sm:$0xff] }
 0x247   : > { %v10826_v55 = vsel %vm359_vm1, %v14014_v16, %v10794_v21  ;;  %v10842_v27 = vsel %vm2062_vm8, %v10483_v58, %v5274_v10  ;;  %v5320_v2 = vunpack.i.h.bf16 %v10417_v32  ;;  %v5319_v19 = vunpack.i.l.bf16 %v10417_v32  ;;  %v10848_v47 = vpop.permute.xlu1 %5412  ;;  %v14017_v58 = vld [vmem:[#allocation169_spill] sm:$0xff] }
 0x248   : > { %5692 = vrot.lane.b32.xlu1 %v14013_v26, %s6034_s13  ;;  %3838 = vmatprep.mubr.bf16.mxu0 %v3539_v38  ;;  %v3543_v50 = vpack.c.bf16 %v2356_v6, %v2355_v57  ;;  %v10852_v18 = vsel %vm2062_vm8, %v10498_v31, %v5275_v42  ;;  %v5400_v1 = vunpack.i.h.bf16 %v5398_v25  ;;  %v5399_v7 = vunpack.i.l.bf16 %v5398_v25  ;;  %v14019_v6 = vld [vmem:[#allocation108_spill] sm:$0xff]  ;;  %v10869_v25 = vpop.permute.xlu0 %5407  ;;  %v14022_v26 = vld [vmem:[#allocation93_spill] sm:$0xff] }
 0x249   : > { %5687 = vrot.lane.b32.xlu0 %v14015_v5, %s6033_s12  ;;  %v14018_v10 = vpack.c.bf16 %v14016_v20, %v14017_v58  ;;  %v10861_v12 = vsel %vm2062_vm8, %v10541_v35, %v5269_v22  ;;  %v10865_v57 = vsel %vm2062_vm8, %v10545_v30, %v5270_v43  ;;  %v5285_v31 = vunpack.i.h.bf16 %v14019_v6 }
 0x24a   : > { %v5284_v42 = vunpack.i.l.bf16 %v14019_v6  ;;  %v14021_v39 = vpack.i.bf16 %v14020_v54, %v14000_v33  ;;  %v5279_v38 = vunpack.i.l.bf16 %v14022_v26  ;;  %v2932_v30 = vrot.slane %v10564_v17, 2 }
 0x24b   : > { %3839 = vmatmul.mubr.bf16.vlgmr.msra.gmra.mrb[0].mxu0 %v14018_v10  ;;  %v12899_v43 = vrot.slane %v10664_v23, 2  ;;  %v5325_v22 = vunpack.i.h.bf16 %v10396_v3  ;;  %v5324_v16 = vunpack.i.l.bf16 %v10396_v3  ;;  %v14023_v5 = vpack.i.bf16 %v13843_v14, %v13810_v61  ;;  %v10886_v33 = vpop.permute.xlu1 %5422 }
 0x24c   : > { %3846 = vmatprep.mubr.bf16.mxu0 %v3543_v50  ;;  %5702 = vrot.lane.b32.xlu1 %v14021_v39, %s6036_s15  ;;  %v2325_v50 = vsel %vm2095_vm9, %v10706_v51, %v5319_v19  ;;  %v2326_v20 = vsel %vm2095_vm9, %v10710_v48, %v5320_v2  ;;  %v5405_v58 = vunpack.i.h.bf16 %v10802_v28  ;;  %v5404_v10 = vunpack.i.l.bf16 %v10802_v28  ;;  %v5418_v51 = vpop.permute.xlu0 %5417  ;;  %v14025_v19 = vld [vmem:[#allocation175_spill] sm:$0xff]  ;;  %v14032_v48 = vld [vmem:[#allocation168_spill] sm:$0xff] }
 0x24d   : > { %5697 = vrot.lane.b32.xlu0 %v14023_v5, %s6035_s14  ;;  %v2357_v6 = vsel %vm2128_vm10, %v2325_v50, %v5399_v7  ;;  %v2358_v3 = vsel %vm2128_vm10, %v2326_v20, %v5400_v1  ;;  %v10898_v61 = vsel %vm2062_vm8, %v10549_v13, %v5284_v42  ;;  %v5280_v54 = vunpack.i.h.bf16 %v14022_v26  ;;  %v14028_v42 = vld [vmem:[#allocation81_spill] sm:$0xff]  ;;  %v14029_v26 = vld [vmem:[#allocation147_spill] sm:$0xff] }
 0x24e   : > { %14024 = vst [vmem:[#allocation80_spill] sm:$0xff] %v10898_v61  ;;  %v5414_v39 = vunpack.i.l.bf16 %v10848_v47  ;;  %v10908_v28 = vsel %vm2062_vm8, %v10555_v8, %v5285_v31  ;;  %v5419_v2 = vunpack.i.l.bf16 %v5418_v51  ;;  %v10913_v13 = vsel %vm359_vm1, %v2932_v30, %v12899_v43  ;;  %v14064_v43 = vld [vmem:[#allocation260_spill] sm:$0xff] }
 0x24f   : > { %14026 = vst [vmem:[#allocation82_spill] sm:$0xff] %v10908_v28  ;;  %v10916_v1 = vrot.slane %v10621_v4, 3  ;;  %v10920_v7 = vsel %vm2062_vm8, %v10568_v59, %v5279_v38  ;;  %v14030_v5 = vpack.i.bf16 %v14028_v42, %v14029_v26  ;;  %v5433_v8 = vpop.permute.xlu1 %5432  ;;  %v3547_v31 = vpack.c.bf16 %v2358_v3, %v2357_v6  ;;  %v5997_v3 = vld [vmem:[%s6322_s10 + $0x58] sm:$0xf]  ;;  %v14190_v61 = vld [vmem:[#allocation128_spill] sm:$0xff] }
 0x250   : > { %5712 = vrot.lane.b32.xlu1 %v14025_v19, %s6033_s12  ;;  %14027 = vst [vmem:[#allocation135_spill] sm:$0xff] %v10920_v7  ;;  %v2327_v50 = vsel %vm2095_vm9, %v10671_v60, %v5324_v16  ;;  %v2328_v30 = vsel %vm2095_vm9, %v10675_v0, %v5325_v22  ;;  %v5415_v20 = vunpack.i.h.bf16 %v10848_v47  ;;  %v14031_v19 = vld [vmem:[#allocation171_spill] sm:$0xff]  ;;  %v5435_v59 = vunpack.i.h.bf16 %v5433_v8  ;;  %v5428_v47 = vpop.permute.xlu0 %5427  ;;  %v14035_v22 = vld [vmem:[#allocation210_spill] sm:$0xff] }
 0x251   : > { %5707 = vrot.lane.b32.xlu0 %v14030_v5, %s6036_s15  ;;  %v14033_v35 = vpack.c.bf16 %v14031_v19, %v14032_v48  ;;  %v2359_v38 = vsel %vm2128_vm10, %v2327_v50, %v5404_v10  ;;  %v2360_v26 = vsel %vm2128_vm10, %v2328_v30, %v5405_v58  ;;  %v10938_v6 = vsel %vm2062_vm8, %v10572_v62, %v5280_v54  ;;  %v14038_v5 = vld [vmem:[#allocation89_spill] sm:$0xff] }
 0x252   : > { %14034 = vst [vmem:[#allocation136_spill] sm:$0xff] %v10938_v6  ;;  %v3008_v60 = vsel %vm1930_vm4, %v5997_v3, %v5414_v39  ;;  %v5424_v0 = vunpack.i.l.bf16 %v10886_v33  ;;  %v5430_v62 = vunpack.i.h.bf16 %v5428_v47  ;;  %v5429_v10 = vunpack.i.l.bf16 %v5428_v47 }
 0x253   : > { %3847 = vmatmul.mubr.bf16.gmra.mrb[4].mxu0 %v14033_v35  ;;  %v14036_v35 = vpack.i.bf16 %v14035_v22, %v14028_v42  ;;  %v3030_v58 = vsel %vm1963_vm5, %v3008_v60, %v5419_v2  ;;  %v14037_v54 = vrot.slane %v10429_v9, 3  ;;  %v5434_v48 = vunpack.i.l.bf16 %v5433_v8  ;;  %v14039_v42 = vld [vmem:[#allocation191_spill] sm:$0xff]  ;;  %v5443_v30 = vpop.permute.xlu1 %5442  ;;  %v14041_v2 = vld [vmem:[#allocation146_spill] sm:$0xff]  ;;  %v5998_v60 = vld [vmem:[%s6322_s10 + $0x70] sm:$0xf] }
 0x254   : > { %3854 = vmatprep.mubr.bf16.mxu0 %v3547_v31  ;;  %v3077_v31 = vsel %vm2029_vm7, %v14038_v5, %v5435_v59  ;;  %v14040_v50 = vpack.i.bf16 %v14039_v42, %v13843_v14  ;;  %v3551_v19 = vpack.c.bf16 %v2360_v26, %v2359_v38  ;;  %v3009_v47 = vsel %vm1930_vm4, %v5998_v60, %v5415_v20  ;;  %v14043_v8 = vld [vmem:[#allocation182_spill] sm:$0xff]  ;;  %v14044_v5 = vld [vmem:[#allocation229_spill] sm:$0xff]  ;;  %v14048_v20 = vld [vmem:[#allocation156_spill] sm:$0xff] }
 0x255   : > { %5722 = vrot.lane.b32.xlu1 %v14036_v35, %s6031_s2  ;;  %v10954_v39 = vsel %vm536_vm2, %v14037_v54, %v10916_v1  ;;  %v5420_v22 = vunpack.i.h.bf16 %v5418_v51  ;;  %v14042_v35 = vld [vmem:[#allocation86_spill] sm:$0xff]  ;;  %v3074_v16 = vsel %vm2029_vm7, %v14043_v8, %v5429_v10  ;;  %v3052_v59 = vsel %vm1996_vm6, %v3030_v58, %v5424_v0  ;;  %v14052_v0 = vld [vmem:[#allocation255_spill] sm:$0xff] }
 0x256   : > { %5717 = vrot.lane.b32.xlu0 %v14040_v50, %s6030_s1  ;;  %v3075_v54 = vsel %vm2029_vm7, %v14042_v35, %v5430_v62  ;;  %v14045_v32 = vunpack.i.h.bf16 %v14044_v5  ;;  %v14046_v38 = vunpack.i.l.bf16 %v14044_v5  ;;  %v5444_v42 = vunpack.i.l.bf16 %v5443_v30  ;;  %v5438_v50 = vpop.permute.xlu0 %5437  ;;  %v14047_v51 = vld [vmem:[#allocation98_spill] sm:$0xff]  ;;  %v14050_v62 = vld [vmem:[#allocation233_spill] sm:$0xff] }
 0x257   : > { %v14049_v60 = vpack.i.bf16 %v14047_v51, %v14048_v20  ;;  %v14051_v35 = vunpack.i.l.bf16 %v14050_v62  ;;  %v14053_v58 = vunpack.i.h.bf16 %v14052_v0  ;;  %v5425_v5 = vunpack.i.h.bf16 %v10886_v33  ;;  %v14055_v51 = vld [vmem:[#allocation213_spill] sm:$0xff]  ;;  %v14056_v20 = vld [vmem:[#allocation155_spill] sm:$0xff]  ;;  %v10995_v15 = vpop.permute.xlu1 %5452 }
 0x258   : > { %v3123_v14 = vsel %vm2062_vm8, %v3075_v54, %v14045_v32  ;;  %v3122_v26 = vsel %vm2062_vm8, %v3074_v16, %v14046_v38  ;;  %v14054_v32 = vunpack.i.l.bf16 %v14052_v0  ;;  %v5439_v16 = vunpack.i.l.bf16 %v5438_v50 }
 0x259   : > { %5732 = vrot.lane.b32.xlu1 %v14049_v60, %s6036_s15  ;;  %v3125_v10 = vsel %vm2062_vm8, %v3077_v31, %v14051_v35  ;;  %v3171_v8 = vsel %vm2095_vm9, %v3123_v14, %v14053_v58  ;;  %v3076_v38 = vsel %vm2029_vm7, %v3052_v59, %v5434_v48  ;;  %v14057_v60 = vpack.i.bf16 %v14055_v51, %v14056_v20  ;;  %v14058_v31 = vld [vmem:[#allocation56_spill] sm:$0xff]  ;;  %v14061_v59 = vld [vmem:[#allocation61_spill] sm:$0xff] }
 0x25a   : > { %v3170_v54 = vsel %vm2095_vm9, %v3122_v26, %v14054_v32  ;;  %v14059_v35 = vunpack.i.l.bf16 %v14058_v31  ;;  %v14060_v0 = vunpack.i.h.bf16 %v14058_v31  ;;  %v5410_v58 = vunpack.i.h.bf16 %v10869_v25  ;;  %v14062_v32 = vld [vmem:[#allocation54_spill] sm:$0xff] }
 0x25b   : > { %5727 = vrot.lane.b32.xlu0 %v14057_v60, %s6032_s11  ;;  %v3031_v33 = vsel %vm1963_vm5, %v3009_v47, %v5420_v22  ;;  %v3124_v48 = vsel %vm2062_vm8, %v3076_v38, %v5439_v16  ;;  %v14063_v36 = vpack.c.bf16 %v14061_v59, %v14062_v32  ;;  %v14065_v3 = vunpack.i.l.bf16 %v14064_v43 }
 0x25c   : > { %v3218_v14 = vsel %vm2128_vm10, %v3170_v54, %v14059_v35  ;;  %v3219_v26 = vsel %vm2128_vm10, %v3171_v8, %v14060_v0  ;;  %v3172_v31 = vsel %vm2095_vm9, %v3124_v48, %v5444_v42  ;;  %v5448_v35 = vpop.permute.xlu0 %5447  ;;  %v14066_v8 = vld [vmem:[#allocation121_spill] sm:$0xff]  ;;  %v5445_v59 = vunpack.i.h.bf16 %v5443_v30  ;;  %v14067_v42 = vld [vmem:[#allocation95_spill] sm:$0xff] }
 0x25d   : > { %3855 = vmatmul.mubr.bf16.gmra.mrb[8].mxu0 %v14063_v36  ;;  %v3173_v54 = vsel %vm2095_vm9, %v3125_v10, %v14065_v3  ;;  %5742 = vrot.lane.b32.xlu1 %v14066_v8, %s6033_s12  ;;  %v3314_v47 = vrot.slane %v3218_v14, 1  ;;  %v3315_v22 = vrot.slane %v3219_v26, 1  ;;  %v5450_v16 = vunpack.i.h.bf16 %v5448_v35  ;;  %v14068_v14 = vld [vmem:[#allocation186_spill] sm:$0xff] }
 0x25e   : > { %3862 = vmatprep.mubr.bf16.mxu0 %v3551_v19  ;;  %v5449_v38 = vunpack.i.l.bf16 %v5448_v35  ;;  %v3220_v0 = vsel %vm2128_vm10, %v3172_v31, %v5410_v58  ;;  %v5440_v32 = vunpack.i.h.bf16 %v5438_v50  ;;  %v3053_v3 = vsel %vm1996_vm6, %v3031_v33, %v5425_v5  ;;  %v5463_v19 = vpop.permute.xlu1 %5462  ;;  %v14069_v58 = vld [vmem:[#allocation252_spill] sm:$0xff] }
 0x25f   : > { %5737 = vrot.lane.b32.xlu0 %v14067_v42, %s6033_s12  ;;  %v3320_v10 = vrot.slane %v3220_v0, 1  ;;  %v5454_v48 = vunpack.i.l.bf16 %v10995_v15  ;;  %v3079_v35 = vsel %vm2029_vm7, %v3053_v3, %v5450_v16  ;;  %v14070_v31 = vunpack.i.l.bf16 %v14069_v58  ;;  %v14072_v0 = vld [vmem:[#allocation250_spill] sm:$0xff]  ;;  %v14073_v42 = vld [vmem:[#allocation188_spill] sm:$0xff] }
 0x260   : > { %v3078_v26 = vsel %vm2029_vm7, %v14068_v14, %v5449_v38  ;;  %v14071_v30 = vunpack.i.h.bf16 %v14050_v62  ;;  %v3127_v5 = vsel %vm2062_vm8, %v3079_v35, %v5440_v32  ;;  %v5458_v33 = vpop.permute.xlu0 %5457  ;;  %v14074_v36 = vpack.i.bf16 %v14072_v0, %v14073_v42  ;;  %v14076_v32 = vld [vmem:[#allocation205_spill] sm:$0xff] }
 0x261   : > { %v3221_v8 = vsel %vm2128_vm10, %v3173_v54, %v14070_v31  ;;  %v3316_v38 = vsel %vm182_vm0, %v3314_v47, %v3315_v22  ;;  %v3321_v16 = vsel %vm182_vm0, %v3315_v22, %v3320_v10  ;;  %v14075_v3 = vunpack.i.h.bf16 %v14064_v43  ;;  %v14079_v22 = vld [vmem:[#allocation151_spill] sm:$0xff]  ;;  %v14084_v0 = vld [vmem:[#allocation173_spill] sm:$0xff] }
 0x262   : > { %v3126_v50 = vsel %vm2062_vm8, %v3078_v26, %v14071_v30  ;;  %5752 = vrot.lane.b32.xlu1 %v14074_v36, %s6035_s14  ;;  %v3175_v62 = vsel %vm2095_vm9, %v3127_v5, %v5445_v59  ;;  %v5460_v14 = vunpack.i.h.bf16 %v5458_v33  ;;  %v5459_v26 = vunpack.i.l.bf16 %v5458_v33  ;;  %v5473_v30 = vpop.permute.xlu1 %5472  ;;  %v14083_v33 = vld [vmem:[#allocation174_spill] sm:$0xff] }
 0x263   : > { %v3174_v54 = vsel %vm2095_vm9, %v3126_v50, %v14075_v3  ;;  %v14077_v35 = vpack.i.bf16 %v10242_v24, %v14076_v32  ;;  %v3540_v31 = vpack.c.bf16 %v3321_v16, %v3316_v38  ;;  %v14078_v36 = vunpack.i.h.bf16 %v14069_v58  ;;  %v14081_v50 = vld [vmem:[#allocation150_spill] sm:$0xff] }
 0x264   : > { %v3223_v43 = vsel %vm2128_vm10, %v3175_v62, %v5454_v48  ;;  %v14080_v10 = vrot.slane %v14079_v22, 1  ;;  %v14082_v59 = vrot.slane %v14081_v50, 1  ;;  %v14085_v3 = vpack.c.bf16 %v14083_v33, %v14084_v0  ;;  %v6000_v33 = vld [vmem:[%s6322_s10 + $0x88] sm:$0xf]  ;;  %v14090_v0 = vld [vmem:[#allocation184_spill] sm:$0xff] }
 0x265   : > { %5747 = vrot.lane.b32.xlu0 %v14077_v35, %s6034_s13  ;;  %v3222_v47 = vsel %vm2128_vm10, %v3174_v54, %v14078_v36  ;;  %v5475_v38 = vunpack.i.h.bf16 %v5473_v30  ;;  %v5474_v16 = vunpack.i.l.bf16 %v5473_v30  ;;  %v3324_v58 = vrot.slane %v3221_v8, 1  ;;  %4000 = vmatmul.mubr.bf16.vlgmr.msra.gmra.mrb[0].mxu1 %v3540_v31  ;;  %v5468_v36 = vpop.permute.xlu0 %5467  ;;  %v5999_v8 = vld [vmem:[%s6322_s10 + $0xa0] sm:$0xf] }
 0x266   : > { %v11056_v5 = vsel %vm182_vm0, %v14082_v59, %v14080_v10  ;;  %3863 = vmatmul.mubr.bf16.gmra.mrb[12].mxu0 %v14085_v3  ;;  %v14086_v32 = vrot.slane %v14041_v2, 1  ;;  %v14087_v54 = vmov %v14080_v10  ;;  %v5465_v62 = vunpack.i.h.bf16 %v5463_v19  ;;  %v14088_v10 = vld [vmem:[#allocation192_spill] sm:$0xff]  ;;  %v14092_v31 = vld [vmem:[#allocation206_spill] sm:$0xff] }
 0x267   : > { %v5464_v35 = vunpack.i.l.bf16 %v5463_v19  ;;  %v14089_v50 = vpack.i.bf16 %v14073_v42, %v14088_v10  ;;  %v3325_v59 = vrot.slane %v3222_v47, 1  ;;  %v3330_v30 = vrot.slane %v3223_v43, 1  ;;  %v11085_v42 = vld [vmem:[%s6322_s10 + $0x1d8] sm:$0xf]  ;;  %v14095_v47 = vld [vmem:[#allocation232_spill] sm:$0xff] }
 0x268   : > { %v11066_v48 = vsel %vm182_vm0, %v14087_v54, %v14086_v32  ;;  %v3011_v2 = vsel %vm1930_vm4, %v5999_v8, %v5460_v14  ;;  %v3010_v22 = vsel %vm1930_vm4, %v6000_v33, %v5459_v26  ;;  %v3080_v3 = vsel %vm2029_vm7, %v14090_v0, %v5474_v16  ;;  %v14091_v32 = vld [vmem:[#allocation185_spill] sm:$0xff]  ;;  %v14093_v54 = vld [vmem:[#allocation274_spill] sm:$0xff]  ;;  %v5483_v0 = vpop.permute.xlu1 %5482 }
 0x269   : > { %5762 = vrot.lane.b32.xlu1 %v14089_v50, %s6030_s1  ;;  %v3081_v19 = vsel %vm2029_vm7, %v14091_v32, %v5475_v38  ;;  %v14094_v60 = vpack.c.bf16 %v14092_v31, %v14093_v54  ;;  %v14096_v43 = vunpack.i.l.bf16 %v14095_v47  ;;  %v14097_v10 = vunpack.i.h.bf16 %v14095_v47  ;;  %v14098_v8 = vld [vmem:[#allocation85_spill] sm:$0xff]  ;;  %v14099_v38 = vld [vmem:[#allocation207_spill] sm:$0xff] }
 0x26a   : > { %v5470_v50 = vunpack.i.h.bf16 %v5468_v36  ;;  %v5469_v16 = vunpack.i.l.bf16 %v5468_v36  ;;  %v14100_v33 = vpack.i.bf16 %v14098_v8, %v14099_v38  ;;  %v3331_v32 = vsel %vm182_vm0, %v3325_v59, %v3330_v30  ;;  %v14103_v47 = vld [vmem:[#allocation259_spill] sm:$0xff]  ;;  %v5478_v8 = vpop.permute.xlu0 %5477 }
 0x26b   : > { %4202 = vmatprep.mubr.msk.bf16.mxu1 %vm1930_vm4, %v14094_v60  ;;  %v3128_v14 = vsel %vm2062_vm8, %v3080_v3, %v14096_v43  ;;  %v3129_v26 = vsel %vm2062_vm8, %v3081_v19, %v14097_v10  ;;  %v3326_v60 = vsel %vm182_vm0, %v3324_v58, %v3325_v59  ;;  %v14101_v3 = vrot.slane %v10664_v23, 7  ;;  %v14105_v59 = vld [vmem:[#allocation208_spill] sm:$0xff]  ;;  %v14106_v30 = vld [vmem:[#allocation215_spill] sm:$0xff] }
 0x26c   : > { %5757 = vrot.lane.b32.xlu0 %v14100_v33, %s6036_s15  ;;  %v14102_v54 = vrot.slane %v10564_v17, 7  ;;  %v5330_v36 = vunpack.i.h.bf16 %v10485_v63  ;;  %v14104_v43 = vunpack.i.l.bf16 %v14103_v47  ;;  %v3032_v58 = vsel %vm1963_vm5, %v3010_v22, %v5464_v35 }
 0x26d   : > { %v14107_v33 = vpack.i.bf16 %v14105_v59, %v14106_v30  ;;  %v14108_v51 = vunpack.i.h.bf16 %v14103_v47  ;;  %v5480_v20 = vunpack.i.h.bf16 %v5478_v8  ;;  %v5479_v6 = vunpack.i.l.bf16 %v5478_v8  ;;  %v5493_v59 = vpop.permute.xlu1 %5492 }
 0x26e   : > { %v11106_v19 = vsel %vm2601_vm11, %v14102_v54, %v14101_v3  ;;  %v3176_v10 = vsel %vm2095_vm9, %v3128_v14, %v14104_v43  ;;  %v3033_v54 = vsel %vm1963_vm5, %v3011_v2, %v5465_v62  ;;  %v5329_v14 = vunpack.i.l.bf16 %v10485_v63  ;;  %v14109_v43 = vld [vmem:[#allocation211_spill] sm:$0xff] }
 0x26f   : > { %5772 = vrot.lane.b32.xlu1 %v14107_v33, %s6032_s11  ;;  %v3177_v3 = vsel %vm2095_vm9, %v3129_v26, %v14108_v51  ;;  %v3054_v35 = vsel %vm1996_vm6, %v3032_v58, %v5469_v16  ;;  %v3055_v22 = vsel %vm1996_vm6, %v3033_v54, %v5470_v50  ;;  %v14110_v33 = vpack.i.bf16 %v14099_v38, %v14109_v43  ;;  %v14111_v26 = vld [vmem:[#allocation180_spill] sm:$0xff]  ;;  %v14113_v16 = vld [vmem:[#allocation65_spill] sm:$0xff]  ;;  %v5488_v58 = vpop.permute.xlu0 %5487 }
 0x270   : > { %v3544_v31 = vpack.c.bf16 %v3331_v32, %v3326_v60  ;;  %v5484_v47 = vunpack.i.l.bf16 %v5483_v0  ;;  %v5495_v30 = vunpack.i.h.bf16 %v5493_v59  ;;  %v5494_v51 = vunpack.i.l.bf16 %v5493_v59  ;;  %v14114_v38 = vld [vmem:[#allocation193_spill] sm:$0xff] }
 0x271   : > { %5767 = vrot.lane.b32.xlu0 %v14110_v33, %s6031_s2  ;;  %v14112_v62 = vunpack.i.l.bf16 %v14111_v26  ;;  %v5485_v8 = vunpack.i.h.bf16 %v5483_v0  ;;  %v3082_v63 = vsel %vm2029_vm7, %v3054_v35, %v5479_v6  ;;  %v3083_v50 = vsel %vm2029_vm7, %v14113_v16, %v5480_v20 }
 0x272   : > { %4008 = vmatmul.mubr.bf16.gmra.mrb[4].mxu1 %v3544_v31  ;;  %v14115_v60 = vunpack.i.h.bf16 %v14111_v26  ;;  %v5409_v59 = vunpack.i.l.bf16 %v10869_v25  ;;  %v5455_v54 = vunpack.i.h.bf16 %v10995_v15  ;;  %v3085_v6 = vsel %vm2029_vm7, %v3055_v22, %v5495_v30  ;;  %v14118_v31 = vld [vmem:[#allocation235_spill] sm:$0xff]  ;;  %v14120_v25 = vld [vmem:[#allocation197_spill] sm:$0xff]  ;;  %v14121_v15 = vld [vmem:[#allocation134_spill] sm:$0xff] }
 0x273   : > { %v3224_v2 = vsel %vm2128_vm10, %v3176_v10, %v14112_v62  ;;  %5782 = vrot.lane.b32.xlu1 %v14114_v38, %s6033_s12  ;;  %v14116_v10 = vld [vmem:[#allocation91_spill] sm:$0xff]  ;;  %v14117_v20 = vpack.c.bf16 %v10468_v40, %v10463_v34  ;;  %v14119_v35 = vunpack.i.h.bf16 %v14118_v31  ;;  %v5489_v33 = vunpack.i.l.bf16 %v5488_v58  ;;  %v14124_v38 = vld [vmem:[#allocation262_spill] sm:$0xff] }
 0x274   : > { %v3225_v32 = vsel %vm2128_vm10, %v3177_v3, %v14115_v60  ;;  %v3084_v0 = vsel %vm2029_vm7, %v14116_v10, %v5494_v51  ;;  %v3133_v3 = vsel %vm2062_vm8, %v3085_v6, %v5485_v8  ;;  %v14122_v26 = vpack.i.bf16 %v14120_v25, %v14121_v15  ;;  %v11157_v51 = vpop.permute.xlu1 %5502  ;;  %v14126_v6 = vld [vmem:[#allocation243_spill] sm:$0xff] }
 0x275   : > { %4203 = vmatprep.mubr.msk.bf16.mxu1 %vm1930_vm4, %v14117_v20  ;;  %v3132_v43 = vsel %vm2062_vm8, %v3084_v0, %v14119_v35  ;;  %v3334_v30 = vrot.slane %v3224_v2, 1  ;;  %v14123_v22 = vunpack.i.l.bf16 %v14118_v31  ;;  %v5490_v40 = vunpack.i.h.bf16 %v5488_v58  ;;  %v5498_v0 = vpop.permute.xlu0 %5497  ;;  %v14127_v20 = vld [vmem:[#allocation249_spill] sm:$0xff] }
 0x276   : > { %5777 = vrot.lane.b32.xlu0 %v14122_v26, %s6036_s15  ;;  %v3130_v62 = vsel %vm2062_vm8, %v3082_v63, %v5484_v47  ;;  %v3335_v16 = vrot.slane %v3225_v32, 1  ;;  %v14125_v60 = vunpack.i.h.bf16 %v14124_v38  ;;  %v14128_v35 = vpack.i.bf16 %v14126_v6, %v14127_v20 }
 0x277   : > { %v3131_v34 = vsel %vm2062_vm8, %v3083_v50, %v14123_v22  ;;  %v3178_v10 = vsel %vm2095_vm9, %v3130_v62, %v5489_v33  ;;  %v14129_v2 = vrot.slane %v11085_v42, 1  ;;  %v14130_v50 = vrot.slane %v10664_v23, 1  ;;  %v14132_v22 = vld [vmem:[#allocation114_spill] sm:$0xff]  ;;  %v14133_v62 = vld [vmem:[#allocation117_spill] sm:$0xff] }
 0x278   : > { %v3180_v8 = vsel %vm2095_vm9, %v3132_v43, %v14125_v60  ;;  %5792 = vrot.lane.b32.xlu1 %v14128_v35, %s6035_s14  ;;  %v12900_v47 = vrot.slane %v11085_v42, 2  ;;  %v3181_v63 = vsel %vm2095_vm9, %v3133_v3, %v5490_v40  ;;  %v3226_v32 = vsel %vm2128_vm10, %v3178_v10, %v5455_v54  ;;  %v11188_v20 = vpop.permute.xlu1 %5512  ;;  %v14135_v40 = vld [vmem:[#allocation256_spill] sm:$0xff] }
 0x279   : > { %v2865_v58 = vsel %vm182_vm0, %v14130_v50, %v14129_v2  ;;  %v5500_v31 = vunpack.i.h.bf16 %v5498_v0  ;;  %v2329_v43 = vsel %vm2095_vm9, %v10740_v29, %v5329_v14  ;;  %v14131_v33 = vunpack.i.l.bf16 %v14124_v38  ;;  %v11200_v35 = vpop.permute.xlu0 %5507  ;;  %v14137_v2 = vld [vmem:[#allocation253_spill] sm:$0xff] }
 0x27a   : > { %v3340_v15 = vrot.slane %v3226_v32, 1  ;;  %v5499_v26 = vunpack.i.l.bf16 %v5498_v0  ;;  %v14134_v60 = vpack.i.bf16 %v14132_v22, %v14133_v62  ;;  %v2330_v54 = vsel %vm2095_vm9, %v10744_v37, %v5330_v36  ;;  %v14139_v32 = vld [vmem:[#allocation142_spill] sm:$0xff] }
 0x27b   : > { %v3179_v25 = vsel %vm2095_vm9, %v3131_v34, %v14131_v33  ;;  %v2361_v3 = vsel %vm2128_vm10, %v2329_v43, %v5409_v59  ;;  %v2362_v29 = vsel %vm2128_vm10, %v2330_v54, %v5500_v31  ;;  %v3336_v14 = vsel %vm182_vm0, %v3334_v30, %v3335_v16  ;;  %v14141_v33 = vld [vmem:[#allocation101_spill] sm:$0xff] }
 0x27c   : > { %5787 = vrot.lane.b32.xlu0 %v14134_v60, %s6034_s13  ;;  %v14136_v34 = vunpack.i.h.bf16 %v14135_v40  ;;  %v5504_v10 = vunpack.i.l.bf16 %v11157_v51  ;;  %v3229_v0 = vsel %vm2128_vm10, %v3181_v63, %v5499_v26  ;;  %5802 = vrot.lane.b32.xlu1 %v14137_v2, %s6030_s1  ;;  %v3555_v37 = vpack.c.bf16 %v2362_v29, %v2361_v3  ;;  %v14140_v63 = vld [vmem:[#allocation190_spill] sm:$0xff]  ;;  %v5523_v22 = vpop.permute.xlu1 %5522 }
 0x27d   : > { %v3341_v36 = vsel %vm182_vm0, %v3335_v16, %v3340_v15  ;;  %v5509_v59 = vunpack.i.l.bf16 %v11200_v35  ;;  %v14138_v30 = vunpack.i.l.bf16 %v14135_v40  ;;  %v3392_v31 = vrot.slane %v14139_v32, 1  ;;  %v14145_v3 = vld [vmem:[#allocation178_spill] sm:$0xff] }
 0x27e   : > { %v3228_v38 = vsel %vm2128_vm10, %v3180_v8, %v14136_v34  ;;  %v3548_v50 = vpack.c.bf16 %v3341_v36, %v3336_v14  ;;  %v3350_v43 = vrot.slane %v3229_v0, 1  ;;  %v14142_v26 = vpack.i.bf16 %v14140_v63, %v14141_v33  ;;  %3870 = vmatprep.mubr.bf16.mxu0 %v3555_v37  ;;  %v14149_v0 = vld [vmem:[#allocation74_spill] sm:$0xff]  ;;  %v14151_v37 = vld [vmem:[#allocation71_spill] sm:$0xff] }
 0x27f   : > { %v3227_v8 = vsel %vm2128_vm10, %v3179_v25, %v14138_v30  ;;  %v3345_v60 = vrot.slane %v3228_v38, 1  ;;  %v14143_v16 = vrot.slane %v10664_v23, 7  ;;  %v14144_v25 = vld [vmem:[#allocation179_spill] sm:$0xff]  ;;  %v14147_v40 = vrot.slane %v11085_v42, 1  ;;  %v6001_v30 = vld [vmem:[%s6322_s10 + $0xb8] sm:$0xf] }
 0x280   : > { %5797 = vrot.lane.b32.xlu0 %v14142_v26, %s6036_s15  ;;  %4016 = vmatmul.mubr.bf16.gmra.mrb[8].mxu1 %v3548_v50  ;;  %v14146_v29 = vpack.c.bf16 %v14144_v25, %v14145_v3  ;;  %v14148_v38 = vrot.slane %v10664_v23, 2  ;;  %v14150_v2 = vrot.slane %v14149_v0, 1  ;;  %v14152_v36 = vrot.slane %v14151_v37, 1  ;;  %v5518_v26 = vpop.permute.xlu0 %5517  ;;  %v14154_v25 = vld [vmem:[#allocation124_spill] sm:$0xff]  ;;  %v14155_v3 = vld [vmem:[#allocation73_spill] sm:$0xff] }
 0x281   : > { %v11217_v15 = vpack.i.bf16 %v14143_v16, %v11106_v19  ;;  %v11227_v34 = vpack.i.bf16 %v14147_v40, %v2865_v58  ;;  %v3012_v32 = vsel %vm1930_vm4, %v6001_v30, %v5504_v10  ;;  %v5514_v58 = vunpack.i.l.bf16 %v11188_v20  ;;  %v14153_v16 = vld [vmem:[#allocation107_spill] sm:$0xff]  ;;  %v14158_v30 = vld [vmem:[#allocation126_spill] sm:$0xff] }
 0x282   : > { %3871 = vmatmul.mubr.bf16.gmra.mrb[16].mxu0 %v14146_v29  ;;  %v11234_v19 = vsel %vm359_vm1, %v14148_v38, %v12900_v47  ;;  %v11241_v50 = vsel %vm182_vm0, %v14152_v36, %v14150_v2  ;;  %v5525_v33 = vunpack.i.h.bf16 %v5523_v22  ;;  %5812 = vrot.lane.b32.xlu1 %v14153_v16, %s6031_s2  ;;  %v14156_v29 = vpack.c.bf16 %v14154_v25, %v14155_v3  ;;  %v11263_v25 = vpop.permute.xlu1 %5532  ;;  %v14161_v3 = vld [vmem:[#allocation57_spill] sm:$0xff] }
 0x283   : > { %v3344_v40 = vrot.slane %v3227_v8, 1  ;;  %v3034_v38 = vsel %vm1963_vm5, %v3012_v32, %v5509_v59  ;;  %v5520_v2 = vunpack.i.h.bf16 %v5518_v26  ;;  %v5519_v37 = vunpack.i.l.bf16 %v5518_v26 }
 0x284   : > { %4204 = vmatprep.mubr.msk.bf16.mxu1 %vm1930_vm4, %v14156_v29  ;;  %v14157_v36 = vrot.slane %v14149_v0, 1  ;;  %v5334_v47 = vunpack.i.l.bf16 %v14158_v30  ;;  %v5524_v54 = vunpack.i.l.bf16 %v5523_v22  ;;  %v14159_v16 = vpack.i.bf16 %v10517_v11, %v14126_v6  ;;  %v14162_v6 = vld [vmem:[#allocation195_spill] sm:$0xff] }
 0x285   : > { %v3346_v8 = vsel %vm182_vm0, %v3344_v40, %v3345_v60  ;;  %v3351_v59 = vsel %vm182_vm0, %v3345_v60, %v3350_v43  ;;  %v5335_v32 = vunpack.i.h.bf16 %v14158_v30  ;;  %v5505_v0 = vunpack.i.h.bf16 %v11157_v51  ;;  %v11282_v51 = vpop.permute.xlu0 %5527  ;;  %v14167_v30 = vld [vmem:[#allocation261_spill] sm:$0xff] }
 0x286   : > { %v11256_v10 = vsel %vm182_vm0, %v14157_v36, %v3392_v31  ;;  %5807 = vrot.lane.b32.xlu0 %v14159_v16, %s6030_s1  ;;  %v14160_v31 = vld [vmem:[#allocation62_spill] sm:$0xff]  ;;  %v3086_v22 = vsel %vm2029_vm7, %v14161_v3, %v5519_v37  ;;  %v3056_v29 = vsel %vm1996_vm6, %v3034_v38, %v5514_v58  ;;  %v3089_v36 = vsel %vm2029_vm7, %v14162_v6, %v5525_v33 }
 0x287   : > { %v3087_v26 = vsel %vm2029_vm7, %v14160_v31, %v5520_v2  ;;  %v14163_v16 = vld [vmem:[#allocation234_spill] sm:$0xff]  ;;  %v14166_v2 = vld [vmem:[#allocation221_spill] sm:$0xff]  ;;  %v14168_v37 = vunpack.i.h.bf16 %v14167_v30  ;;  %v14169_v38 = vunpack.i.l.bf16 %v14167_v30  ;;  %v3552_v31 = vpack.c.bf16 %v3351_v59, %v3346_v8  ;;  %v14174_v59 = vld [vmem:[#allocation131_spill] sm:$0xff] }
 0x288   : > { %v14164_v14 = vunpack.i.h.bf16 %v14163_v16  ;;  %v14165_v43 = vunpack.i.l.bf16 %v14163_v16  ;;  %5822 = vrot.lane.b32.xlu1 %v14166_v2, %s6032_s11  ;;  %v3088_v3 = vsel %vm2029_vm7, %v3056_v29, %v5524_v54  ;;  %v14170_v6 = vpack.i.bf16 %v10589_v49, %v14140_v63  ;;  %v11300_v16 = vpop.permute.xlu1 %5542  ;;  %v14175_v30 = vld [vmem:[#allocation100_spill] sm:$0xff] }
 0x289   : > { %4024 = vmatmul.mubr.bf16.gmra.mrb[12].mxu1 %v3552_v31  ;;  %v5544_v54 = vunpack.i.l.bf16 %v11300_v16  ;;  %v2332_v29 = vsel %vm2095_vm9, %v14174_v59, %v5335_v32  ;;  %v5344_v63 = vunpack.i.l.bf16 %v14175_v30  ;;  %v14180_v31 = vld [vmem:[#allocation257_spill] sm:$0xff] }
 0x28a   : > { %v3135_v40 = vsel %vm2062_vm8, %v3087_v26, %v14164_v14  ;;  %v3134_v60 = vsel %vm2062_vm8, %v3086_v22, %v14165_v43  ;;  %v5529_v14 = vunpack.i.l.bf16 %v11282_v51  ;;  %v5510_v26 = vunpack.i.h.bf16 %v11200_v35  ;;  %5817 = vrot.lane.b32.xlu0 %v14170_v6, %s6031_s2  ;;  %v5538_v6 = vpop.permute.xlu0 %5537 }
 0x28b   : > { %v3183_v58 = vsel %vm2095_vm9, %v3135_v40, %v14168_v37  ;;  %v3182_v33 = vsel %vm2095_vm9, %v3134_v60, %v14169_v38  ;;  %v5534_v22 = vunpack.i.l.bf16 %v11263_v25  ;;  %v14171_v40 = vld [vmem:[#allocation133_spill] sm:$0xff]  ;;  %v6002_v37 = vld [vmem:[%s6322_s10 + $0xd0] sm:$0xf]  ;;  %v5539_v7 = vunpack.i.l.bf16 %v5538_v6 }
 0x28c   : > { %v2331_v43 = vsel %vm2095_vm9, %v14171_v40, %v5334_v47  ;;  %v14172_v60 = vld [vmem:[#allocation237_spill] sm:$0xff]  ;;  %v3136_v35 = vsel %vm2062_vm8, %v3088_v3, %v5529_v14  ;;  %v3013_v38 = vsel %vm1930_vm4, %v6002_v37, %v5505_v0  ;;  %v14176_v47 = vpack.i.bf16 %v14133_v62, %v10242_v24  ;;  %v14178_v40 = vld [vmem:[#allocation138_spill] sm:$0xff] }
 0x28d   : > { %v14173_v2 = vunpack.i.l.bf16 %v14172_v60  ;;  %v14181_v3 = vunpack.i.l.bf16 %v14180_v31  ;;  %v5515_v0 = vunpack.i.h.bf16 %v11188_v20  ;;  %v5540_v37 = vunpack.i.h.bf16 %v5538_v6  ;;  %v11340_v20 = vpop.permute.xlu1 %5552 }
 0x28e   : > { %5832 = vrot.lane.b32.xlu1 %v14176_v47, %s6036_s15  ;;  %v2364_v24 = vsel %vm2128_vm10, %v2332_v29, %v5544_v54  ;;  %v5345_v62 = vunpack.i.h.bf16 %v14175_v30  ;;  %v3035_v47 = vsel %vm1963_vm5, %v3013_v38, %v5510_v26  ;;  %v14188_v26 = vld [vmem:[#allocation123_spill] sm:$0xff] }
 0x28f   : > { %v3137_v8 = vsel %vm2062_vm8, %v3089_v36, %v14173_v2  ;;  %v14177_v36 = vld [vmem:[#allocation137_spill] sm:$0xff]  ;;  %v3230_v32 = vsel %vm2128_vm10, %v3182_v33, %v14181_v3  ;;  %v14182_v2 = vunpack.i.h.bf16 %v14180_v31  ;;  %v3184_v33 = vsel %vm2095_vm9, %v3136_v35, %v5534_v22  ;;  %v14185_v31 = vld [vmem:[#allocation120_spill] sm:$0xff] }
 0x290   : > { %v14179_v14 = vpack.c.bf16 %v14177_v36, %v14178_v40  ;;  %v14183_v36 = vld [vmem:[#allocation264_spill] sm:$0xff]  ;;  %v3232_v6 = vsel %vm2128_vm10, %v3184_v33, %v5539_v7  ;;  %v2363_v54 = vsel %vm2128_vm10, %v2331_v43, %v5540_v37  ;;  %v3354_v29 = vrot.slane %v3230_v32, 1  ;;  %v14192_v33 = vld [vmem:[#allocation181_spill] sm:$0xff] }
 0x291   : > { %v3231_v59 = vsel %vm2128_vm10, %v3183_v58, %v14182_v2  ;;  %v14184_v40 = vunpack.i.l.bf16 %v14183_v36  ;;  %v14186_v3 = vld [vmem:[#allocation216_spill] sm:$0xff]  ;;  %v5340_v38 = vunpack.i.h.bf16 %v14188_v26  ;;  %v5339_v2 = vunpack.i.l.bf16 %v14188_v26  ;;  %v11357_v37 = vpop.permute.xlu1 %5562 }
 0x292   : > { %4205 = vmatprep.mubr.msk.bf16.mxu1 %vm1930_vm4, %v14179_v14  ;;  %v14187_v58 = vpack.i.bf16 %v14185_v31, %v14186_v3  ;;  %v3355_v30 = vrot.slane %v3231_v59, 1  ;;  %v14189_v22 = vld [vmem:[#allocation68_spill] sm:$0xff]  ;;  %v3559_v35 = vpack.c.bf16 %v2364_v24, %v2363_v54  ;;  %v3057_v28 = vsel %vm1996_vm6, %v3035_v47, %v5515_v0  ;;  %v14191_v59 = vld [vmem:[#allocation109_spill] sm:$0xff] }
 0x293   : > { %v3185_v14 = vsel %vm2095_vm9, %v3137_v8, %v14184_v40  ;;  %v3360_v8 = vrot.slane %v3232_v6, 1  ;;  %v5548_v40 = vpop.permute.xlu0 %5547  ;;  %5842 = vrot.lane.b32.xlu1 %v14189_v22, %s6033_s12  ;;  %v11351_v7 = vsel %vm2095_vm9, %v14190_v61, %v5344_v63  ;;  %v5535_v43 = vunpack.i.h.bf16 %v11263_v25  ;;  %v14194_v61 = vld [vmem:[#allocation69_spill] sm:$0xff]  ;;  %v14196_v54 = vld [vmem:[#allocation176_spill] sm:$0xff] }
 0x294   : > { %5827 = vrot.lane.b32.xlu0 %v14187_v58, %s6032_s11  ;;  %v5550_v3 = vunpack.i.h.bf16 %v5548_v40  ;;  %v5549_v58 = vunpack.i.l.bf16 %v5548_v40  ;;  %v5530_v32 = vunpack.i.h.bf16 %v11282_v51  ;;  %3878 = vmatprep.mubr.bf16.mxu0 %v3559_v35  ;;  %v14193_v6 = vunpack.i.l.bf16 %v14192_v33  ;;  %v14195_v51 = vld [vmem:[#allocation247_spill] sm:$0xff] }
 0x295   : > { %v3361_v24 = vsel %vm182_vm0, %v3355_v30, %v3360_v8  ;;  %v5545_v47 = vunpack.i.h.bf16 %v11300_v16  ;;  %v14197_v26 = vpack.c.bf16 %v14195_v51, %v14196_v54  ;;  %v3356_v40 = vsel %vm182_vm0, %v3354_v29, %v3355_v30  ;;  %v14201_v30 = vld [vmem:[#allocation78_spill] sm:$0xff] }
 0x296   : > { %v3233_v0 = vsel %vm2128_vm10, %v3185_v14, %v14193_v6  ;;  %v3090_v63 = vsel %vm2029_vm7, %v14194_v61, %v5549_v58  ;;  %v3091_v25 = vsel %vm2029_vm7, %v3057_v28, %v5550_v3  ;;  %v5554_v22 = vunpack.i.l.bf16 %v11340_v20 }
 0x297   : > { %3879 = vmatmul.mubr.bf16.gmra.mrb[20].mxu0 %v14197_v26  ;;  %v14198_v8 = vunpack.i.h.bf16 %v14172_v60  ;;  %v3139_v14 = vsel %vm2062_vm8, %v3091_v25, %v5530_v32  ;;  %v5558_v16 = vpop.permute.xlu0 %5557  ;;  %v14199_v28 = vpack.i.bf16 %v10564_v17, %v10621_v4  ;;  %v14200_v3 = vunpack.i.h.bf16 %v14183_v36  ;;  %v5573_v4 = vpop.permute.xlu1 %5572  ;;  %v6003_v25 = vld [vmem:[%s6322_s10 + $0xe8] sm:$0xf] }
 0x298   : > { %5837 = vrot.lane.b32.xlu0 %v14191_v59, %s6033_s12  ;;  %v3556_v59 = vpack.c.bf16 %v3361_v24, %v3356_v40  ;;  %v3187_v29 = vsel %vm2095_vm9, %v3139_v14, %v5535_v43  ;;  %v2333_v60 = vsel %vm2095_vm9, %v10830_v52, %v5339_v2  ;;  %v11388_v32 = vsel %vm2095_vm9, %v14201_v30, %v5345_v62  ;;  %v6004_v14 = vld [vmem:[%s6322_s10 + $0x100] sm:$0xf] }
 0x299   : > { %v3138_v35 = vsel %vm2062_vm8, %v3090_v63, %v14198_v8  ;;  %5852 = vrot.lane.b32.xlu1 %v14199_v28, %s6034_s13  ;;  %v5555_v24 = vunpack.i.h.bf16 %v11340_v20  ;;  %v5559_v6 = vunpack.i.l.bf16 %v5558_v16  ;;  %v14202_v17 = vpack.i.bf16 %v10429_v9, %v10426_v56 }
 0x29a   : > { %v3186_v58 = vsel %vm2095_vm9, %v3138_v35, %v14200_v3  ;;  %4032 = vmatmul.mubr.bf16.gmra.mrb[16].mxu1 %v3556_v59  ;;  %v14203_v36 = vunpack.i.h.bf16 %v14192_v33  ;;  %v3235_v52 = vsel %vm2128_vm10, %v3187_v29, %v5545_v47  ;;  %v5575_v2 = vunpack.i.h.bf16 %v5573_v4  ;;  %v14205_v47 = vld [vmem:[#allocation104_spill] sm:$0xff] }
 0x29b   : > { %v5574_v62 = vunpack.i.l.bf16 %v5573_v4  ;;  %v14204_v20 = vpack.c.bf16 %v10769_v46, %v10764_v44  ;;  %v3364_v61 = vrot.slane %v3233_v0, 1  ;;  %v2334_v63 = vsel %vm2095_vm9, %v10834_v53, %v5340_v38  ;;  %v5568_v54 = vpop.permute.xlu0 %5567  ;;  %v14207_v46 = vld [vmem:[#allocation59_spill] sm:$0xff]  ;;  %v14208_v0 = vld [vmem:[#allocation64_spill] sm:$0xff]  ;;  %v11423_v3 = vpop.permute.xlu1 %5582 }
 0x29c   : > { %5847 = vrot.lane.b32.xlu0 %v14202_v17, %s6034_s13  ;;  %v3234_v43 = vsel %vm2128_vm10, %v3186_v58, %v14203_v36  ;;  %v3014_v51 = vsel %vm1930_vm4, %v6003_v25, %v5554_v22  ;;  %v5564_v33 = vunpack.i.l.bf16 %v11357_v37  ;;  %v14206_v26 = vpack.i.bf16 %v14205_v47, %v10667_v41  ;;  %v14210_v17 = vld [vmem:[#allocation236_spill] sm:$0xff]  ;;  %v14214_v47 = vld [vmem:[#allocation263_spill] sm:$0xff] }
 0x29d   : > { %4206 = vmatprep.mubr.msk.bf16.mxu1 %vm1930_vm4, %v14204_v20  ;;  %v3365_v40 = vrot.slane %v3234_v43, 1  ;;  %v3370_v8 = vrot.slane %v3235_v52, 1  ;;  %v3092_v44 = vsel %vm2029_vm7, %v14207_v46, %v5574_v62  ;;  %v3093_v35 = vsel %vm2029_vm7, %v14208_v0, %v5575_v2  ;;  %v14220_v0 = vld [vmem:[#allocation246_spill] sm:$0xff] }
 0x29e   : > { %5862 = vrot.lane.b32.xlu1 %v14206_v26, %s6035_s14  ;;  %v5570_v53 = vunpack.i.h.bf16 %v5568_v54  ;;  %v5569_v38 = vunpack.i.l.bf16 %v5568_v54  ;;  %v3015_v22 = vsel %vm1930_vm4, %v6004_v14, %v5555_v24  ;;  %v3036_v59 = vsel %vm1963_vm5, %v3014_v51, %v5559_v6 }
 0x29f   : > { %v14209_v28 = vpack.i.bf16 %v10722_v45, %v10517_v11  ;;  %v3366_v58 = vsel %vm182_vm0, %v3364_v61, %v3365_v40  ;;  %v3371_v29 = vsel %vm182_vm0, %v3365_v40, %v3370_v8  ;;  %v5560_v30 = vunpack.i.h.bf16 %v5558_v16  ;;  %v5578_v52 = vpop.permute.xlu0 %5577 }
 0x2a0   : > { %v14211_v4 = vunpack.i.l.bf16 %v14210_v17  ;;  %v14212_v24 = vunpack.i.h.bf16 %v14210_v17  ;;  %v3462_v43 = vrot.slane %v10916_v1, 1  ;;  %v5565_v11 = vunpack.i.h.bf16 %v11357_v37  ;;  %v14225_v17 = vld [vmem:[#allocation231_spill] sm:$0xff] }
 0x2a1   : > { %5857 = vrot.lane.b32.xlu0 %v14209_v28, %s6035_s14  ;;  %v3560_v2 = vpack.c.bf16 %v3371_v29, %v3366_v58  ;;  %v14213_v62 = vpack.i.bf16 %v10426_v56, %v10794_v21  ;;  %v2365_v16 = vsel %vm2128_vm10, %v2333_v60, %v5569_v38  ;;  %v2366_v20 = vsel %vm2128_vm10, %v2334_v63, %v5570_v53  ;;  %v5593_v63 = vpop.permute.xlu1 %5592  ;;  %v14224_v29 = vld [vmem:[#allocation63_spill] sm:$0xff] }
 0x2a2   : > { %v3140_v36 = vsel %vm2062_vm8, %v3092_v44, %v14211_v4  ;;  %v3141_v6 = vsel %vm2062_vm8, %v3093_v35, %v14212_v24  ;;  %v5580_v61 = vunpack.i.h.bf16 %v5578_v52  ;;  %v5579_v25 = vunpack.i.l.bf16 %v5578_v52  ;;  %v14229_v24 = vld [vmem:[#allocation96_spill] sm:$0xff]  ;;  %v14230_v52 = vld [vmem:[#allocation83_spill] sm:$0xff] }
 0x2a3   : > { %5872 = vrot.lane.b32.xlu1 %v14213_v62, %s6036_s15  ;;  %v3058_v51 = vsel %vm1996_vm6, %v3036_v59, %v5564_v33  ;;  %v3563_v54 = vpack.c.bf16 %v2366_v20, %v2365_v16  ;;  %v14215_v26 = vunpack.i.l.bf16 %v14214_v47  ;;  %v14216_v40 = vunpack.i.h.bf16 %v14214_v47  ;;  %4040 = vmatmul.mubr.bf16.gmra.mrb[20].mxu1 %v3560_v2  ;;  %v5588_v4 = vpop.permute.xlu0 %5587 }
 0x2a4   : > { %v5584_v56 = vunpack.i.l.bf16 %v11423_v3  ;;  %v14217_v60 = vpack.i.bf16 %v10826_v55, %v10589_v49  ;;  %v14218_v33 = vrot.slane %v10954_v39, 1  ;;  %v14219_v46 = vrot.slane %v14185_v31, 1  ;;  %v14223_v31 = vld [vmem:[#allocation209_spill] sm:$0xff] }
 0x2a5   : > { %v3188_v37 = vsel %vm2095_vm9, %v3140_v36, %v14215_v26  ;;  %v3189_v8 = vsel %vm2095_vm9, %v3141_v6, %v14216_v40  ;;  %v5290_v35 = vunpack.i.h.bf16 %v14220_v0  ;;  %v3037_v53 = vsel %vm1963_vm5, %v3015_v22, %v5560_v30  ;;  %3886 = vmatprep.mubr.bf16.mxu0 %v3563_v54 }
 0x2a6   : > { %5867 = vrot.lane.b32.xlu0 %v14217_v60, %s6036_s15  ;;  %v11458_v44 = vsel %vm182_vm0, %v14219_v46, %v14218_v33  ;;  %v3094_v38 = vsel %vm2029_vm7, %v3058_v51, %v5579_v25  ;;  %v14221_v14 = vpack.c.bf16 %v11066_v48, %v11056_v5  ;;  %v14222_v49 = vmov %v14218_v33  ;;  %v14228_v48 = vld [vmem:[#allocation76_spill] sm:$0xff] }
 0x2a7   : > { %v11470_v59 = vsel %vm182_vm0, %v14222_v49, %v3462_v43  ;;  %v5350_v28 = vunpack.i.h.bf16 %v14223_v31  ;;  %v5349_v58 = vunpack.i.l.bf16 %v14223_v31  ;;  %v14226_v22 = vpack.c.bf16 %v14224_v29, %v14225_v17  ;;  %v5598_v33 = vpop.permute.xlu0 %5597 }
 0x2a8   : > { %4207 = vmatprep.mubr.msk.bf16.mxu1 %vm1930_vm4, %v14221_v14  ;;  %v5594_v30 = vunpack.i.l.bf16 %v5593_v63  ;;  %v14227_v5 = vpack.i.bf16 %v10794_v21, %v10826_v55  ;;  %v3402_v36 = vrot.slane %v14228_v48, 1  ;;  %v3095_v6 = vsel %vm2029_vm7, %v14229_v24, %v5580_v61  ;;  %v5603_v55 = vpop.permute.xlu1 %5602 }
 0x2a9   : > { %3887 = vmatmul.mubr.bf16.gmra.mrb[24].mxu0 %v14226_v22  ;;  %v5589_v43 = vunpack.i.l.bf16 %v5588_v4  ;;  %v14231_v2 = vunpack.i.l.bf16 %v14230_v52  ;;  %v14232_v16 = vunpack.i.h.bf16 %v14230_v52  ;;  %v5585_v25 = vunpack.i.h.bf16 %v11423_v3 }
 0x2aa   : > { %5882 = vrot.lane.b32.xlu1 %v14227_v5, %s6031_s2  ;;  %v3142_v51 = vsel %vm2062_vm8, %v3094_v38, %v5584_v56  ;;  %v14233_v21 = vpack.i.bf16 %v10667_v41, %v10722_v45  ;;  %v3059_v61 = vsel %vm1996_vm6, %v3037_v53, %v5565_v11  ;;  %v3597_v54 = vpack.c.bf16 %v11470_v59, %v11458_v44  ;;  %v14237_v53 = vld [vmem:[#allocation194_spill] sm:$0xff] }
 0x2ab   : > { %v3236_v62 = vsel %vm2128_vm10, %v3188_v37, %v14231_v2  ;;  %v3237_v20 = vsel %vm2128_vm10, %v3189_v8, %v14232_v16  ;;  %v5595_v47 = vunpack.i.h.bf16 %v5593_v63  ;;  %v3190_v26 = vsel %vm2095_vm9, %v3142_v51, %v5589_v43  ;;  %v14234_v8 = vld [vmem:[#allocation239_spill] sm:$0xff]  ;;  %v11531_v16 = vpop.permute.xlu0 %5607 }
 0x2ac   : > { %5877 = vrot.lane.b32.xlu0 %v14233_v21, %s6030_s1  ;;  %v5605_v37 = vunpack.i.h.bf16 %v5603_v55  ;;  %v5604_v40 = vunpack.i.l.bf16 %v5603_v55  ;;  %v14235_v3 = vunpack.i.l.bf16 %v14234_v8  ;;  %v3238_v60 = vsel %vm2128_vm10, %v3190_v26, %v5594_v30  ;;  %v14247_v26 = vld [vmem:[#allocation92_spill] sm:$0xff] }
 0x2ad   : > { %v14236_v41 = vpack.i.bf16 %v10913_v13, %v10429_v9  ;;  %v3374_v45 = vrot.slane %v3236_v62, 1  ;;  %v3375_v11 = vrot.slane %v3237_v20, 1  ;;  %v5590_v46 = vunpack.i.h.bf16 %v5588_v4  ;;  %v11519_v13 = vpop.permute.xlu1 %5612  ;;  %v14240_v4 = vld [vmem:[#allocation266_spill] sm:$0xff] }
 0x2ae   : > { %v3143_v56 = vsel %vm2062_vm8, %v3095_v6, %v14235_v3  ;;  %v3380_v63 = vrot.slane %v3238_v60, 1  ;;  %v3096_v38 = vsel %vm2029_vm7, %v14237_v53, %v5604_v40  ;;  %v3097_v14 = vsel %vm2029_vm7, %v3059_v61, %v5605_v37 }
 0x2af   : > { %5892 = vrot.lane.b32.xlu1 %v14236_v41, %s6036_s15  ;;  %v14238_v49 = vunpack.i.h.bf16 %v14234_v8  ;;  %v3145_v17 = vsel %vm2062_vm8, %v3097_v14, %v5585_v25  ;;  %v5600_v22 = vunpack.i.h.bf16 %v5598_v33  ;;  %v5599_v30 = vunpack.i.l.bf16 %v5598_v33  ;;  %v14244_v25 = vld [vmem:[#allocation183_spill] sm:$0xff]  ;;  %v14251_v33 = vld [vmem:[#allocation157_spill] sm:$0xff]  ;;  %v11564_v53 = vpop.permute.xlu0 %5617 }
 0x2b0   : > { %v14239_v9 = vpack.i.bf16 %v10916_v1, %v10954_v39  ;;  %v14241_v5 = vunpack.i.l.bf16 %v14240_v4  ;;  %v14242_v6 = vunpack.i.h.bf16 %v14240_v4  ;;  %v3193_v52 = vsel %vm2095_vm9, %v3145_v17, %v5590_v46  ;;  %v14254_v46 = vld [vmem:[#allocation79_spill] sm:$0xff] }
 0x2b1   : > { %v3144_v29 = vsel %vm2062_vm8, %v3096_v38, %v14238_v49  ;;  %v2367_v2 = vsel %vm2128_vm10, %v11351_v7, %v5595_v47  ;;  %v3241_v62 = vsel %vm2128_vm10, %v3193_v52, %v5600_v22  ;;  %v2368_v1 = vsel %vm2128_vm10, %v11388_v32, %v5599_v30  ;;  %v5623_v40 = vpop.permute.xlu1 %5622 }
 0x2b2   : > { %5887 = vrot.lane.b32.xlu0 %v14239_v9, %s6032_s11  ;;  %v3191_v24 = vsel %vm2095_vm9, %v3143_v56, %v14241_v5  ;;  %v3192_v43 = vsel %vm2095_vm9, %v3144_v29, %v14242_v6  ;;  %v3381_v39 = vsel %vm182_vm0, %v3375_v11, %v3380_v63  ;;  %v14243_v20 = vpack.i.bf16 %v11085_v42, %v10664_v23  ;;  %v14249_v56 = vld [vmem:[#allocation158_spill] sm:$0xff]  ;;  %v14258_v9 = vld [vmem:[#allocation132_spill] sm:$0xff] }
 0x2b3   : > { %v14245_v51 = vunpack.i.h.bf16 %v14244_v25  ;;  %v3567_v55 = vpack.c.bf16 %v2368_v1, %v2367_v2  ;;  %v3376_v7 = vsel %vm182_vm0, %v3374_v45, %v3375_v11  ;;  %v14246_v61 = vrot.slane %v11085_v42, 2  ;;  %v5628_v2 = vpop.permute.xlu0 %5627  ;;  %v6005_v1 = vld [vmem:[%s6322_s10 + $0x118] sm:$0xf] }
 0x2b4   : > { %5902 = vrot.lane.b32.xlu1 %v14243_v20, %s6034_s13  ;;  %v3569_v32 = vpack.c.bf16 %v11256_v10, %v11241_v50  ;;  %v5354_v37 = vunpack.i.l.bf16 %v14247_v26  ;;  %v3564_v23 = vpack.c.bf16 %v3381_v39, %v3376_v7  ;;  %v14248_v8 = vunpack.i.l.bf16 %v14244_v25  ;;  %v14259_v7 = vld [vmem:[#allocation80_spill] sm:$0xff] }
 0x2b5   : > { %v3240_v21 = vsel %vm2128_vm10, %v3192_v43, %v14245_v51  ;;  %v5911_v47 = vpack.i.bf16 %v14246_v61, %v11234_v19  ;;  %v14250_v60 = vrot.slane %v14249_v56, 1  ;;  %v14252_v41 = vrot.slane %v14251_v33, 1  ;;  %3894 = vmatprep.mubr.bf16.mxu0 %v3567_v55 }
 0x2b6   : > { %5897 = vrot.lane.b32.xlu0 %v11217_v15, %s6033_s12  ;;  %v3239_v3 = vsel %vm2128_vm10, %v3191_v24, %v14248_v8  ;;  %v3390_v19 = vrot.slane %v3241_v62, 1  ;;  %v5625_v50 = vunpack.i.h.bf16 %v5623_v40  ;;  %v5624_v10 = vunpack.i.l.bf16 %v5623_v40  ;;  %4048 = vmatmul.mubr.bf16.gmra.mrb[24].mxu1 %v3564_v23  ;;  %v14253_v15 = vld [vmem:[#allocation58_spill] sm:$0xff]  ;;  %v14263_v8 = vld [vmem:[#allocation135_spill] sm:$0xff] }
 0x2b7   : > { %v3399_v42 = vsel %vm182_vm0, %v14252_v41, %v14250_v60  ;;  %v3385_v45 = vrot.slane %v3240_v21, 1  ;;  %v5355_v11 = vunpack.i.h.bf16 %v14247_v26  ;;  %v14255_v63 = vpack.c.bf16 %v14253_v15, %v14254_v46  ;;  %4208 = vmatprep.mubr.msk.bf16.mxu1 %vm1930_vm4, %v3569_v32  ;;  %v14261_v26 = vld [vmem:[#allocation189_spill] sm:$0xff]  ;;  %v14262_v23 = vld [vmem:[#allocation94_spill] sm:$0xff]  ;;  %v14270_v15 = vld [vmem:[#allocation148_spill] sm:$0xff] }
 0x2b8   : > { %v2337_v38 = vsel %vm2095_vm9, %v10861_v12, %v5349_v58  ;;  %v2338_v14 = vsel %vm2095_vm9, %v10865_v57, %v5350_v28  ;;  %v14256_v49 = vmov %v14250_v60  ;;  %v5609_v17 = vunpack.i.l.bf16 %v11531_v16  ;;  %5912 = vrot.lane.b32.xlu1 %v5911_v47, %s6036_s15  ;;  %v14257_v57 = vld [vmem:[#allocation203_spill] sm:$0xff]  ;;  %v14260_v47 = vld [vmem:[#allocation82_spill] sm:$0xff] }
 0x2b9   : > { %3895 = vmatmul.mubr.bf16.gmra.mrb[28].mxu0 %v14255_v63  ;;  %v3403_v29 = vsel %vm182_vm0, %v14256_v49, %v3402_v36  ;;  %v2369_v22 = vsel %vm2128_vm10, %v2337_v38, %v5624_v10  ;;  %v2370_v12 = vsel %vm2128_vm10, %v2338_v14, %v5625_v50  ;;  %v3384_v31 = vrot.slane %v3239_v3, 1  ;;  %v5633_v36 = vpop.permute.xlu1 %5632  ;;  %v14264_v60 = vld [vmem:[#allocation238_spill] sm:$0xff]  ;;  %v14267_v50 = vld [vmem:[#allocation271_spill] sm:$0xff]  ;;  %v14271_v38 = vld [vmem:[#allocation265_spill] sm:$0xff] }
 0x2ba   : > { %v5289_v58 = vunpack.i.l.bf16 %v14220_v0  ;;  %v5365_v28 = vunpack.i.h.bf16 %v14257_v57  ;;  %v5364_v48 = vunpack.i.l.bf16 %v14257_v57  ;;  %5907 = vrot.lane.b32.xlu0 %v11227_v34, %s6035_s14  ;;  %v3571_v30 = vpack.c.bf16 %v2370_v12, %v2369_v22  ;;  %v14268_v10 = vld [vmem:[#allocation270_spill] sm:$0xff] }
 0x2bb   : > { %v5359_v4 = vunpack.i.l.bf16 %v14258_v9  ;;  %v3386_v5 = vsel %vm182_vm0, %v3384_v31, %v3385_v45  ;;  %v3391_v24 = vsel %vm182_vm0, %v3385_v45, %v3390_v19  ;;  %v2339_v6 = vsel %vm2095_vm9, %v10842_v27, %v5354_v37  ;;  %v14341_v0 = vld [vmem:[#allocation130_spill] sm:$0xff] }
 0x2bc   : > { %v5360_v43 = vunpack.i.h.bf16 %v14258_v9  ;;  %v5614_v52 = vunpack.i.l.bf16 %v11519_v13  ;;  %3902 = vmatprep.mubr.bf16.mxu0 %v3571_v30  ;;  %v2340_v34 = vsel %vm2095_vm9, %v10852_v18, %v5355_v11  ;;  %v3573_v62 = vpack.c.bf16 %v3403_v29, %v3399_v42  ;;  %v5638_v11 = vpop.permute.xlu0 %5637  ;;  %v14275_v30 = vld [vmem:[#allocation198_spill] sm:$0xff] }
 0x2bd   : > { %v3016_v39 = vsel %vm1930_vm4, %v6005_v1, %v5609_v17  ;;  %v5619_v20 = vunpack.i.l.bf16 %v11564_v53  ;;  %v5630_v25 = vunpack.i.h.bf16 %v5628_v2  ;;  %v5629_v51 = vunpack.i.l.bf16 %v5628_v2  ;;  %v11601_v27 = vpop.permute.xlu1 %5642  ;;  %v14278_v2 = vld [vmem:[#allocation153_spill] sm:$0xff] }
 0x2be   : > { %v5634_v21 = vunpack.i.l.bf16 %v5633_v36  ;;  %v3568_v55 = vpack.c.bf16 %v3391_v24, %v3386_v5  ;;  %v11605_v61 = vsel %vm2095_vm9, %v14259_v7, %v5364_v48  ;;  %v11609_v32 = vsel %vm2095_vm9, %v14260_v47, %v5365_v28  ;;  %v14274_v48 = vld [vmem:[#allocation136_spill] sm:$0xff]  ;;  %v14276_v24 = vld [vmem:[#allocation154_spill] sm:$0xff] }
 0x2bf   : > { %v5635_v18 = vunpack.i.h.bf16 %v5633_v36  ;;  %v3099_v37 = vsel %vm2029_vm7, %v14261_v26, %v5630_v25  ;;  %v3098_v40 = vsel %vm2029_vm7, %v14262_v23, %v5629_v51  ;;  %v11617_v3 = vsel %vm2095_vm9, %v14263_v8, %v5359_v4  ;;  %v14284_v7 = vld [vmem:[#allocation84_spill] sm:$0xff] }
 0x2c0   : > { %v3038_v56 = vsel %vm1963_vm5, %v3016_v39, %v5614_v52  ;;  %v14265_v33 = vunpack.i.h.bf16 %v14264_v60  ;;  %v14266_v42 = vunpack.i.l.bf16 %v14264_v60  ;;  %4056 = vmatmul.mubr.bf16.gmra.mrb[28].mxu1 %v3568_v55  ;;  %v14269_v45 = vpack.c.bf16 %v14267_v50, %v14268_v10  ;;  %v5648_v1 = vpop.permute.xlu0 %5647  ;;  %v14280_v39 = vld [vmem:[#allocation254_spill] sm:$0xff]  ;;  %v14285_v60 = vld [vmem:[#allocation241_spill] sm:$0xff] }
 0x2c1   : > { %v3412_v46 = vrot.slane %v14270_v15, 1  ;;  %v3060_v63 = vsel %vm1996_vm6, %v3038_v56, %v5619_v20  ;;  %v14272_v14 = vunpack.i.h.bf16 %v14271_v38  ;;  %v14273_v29 = vunpack.i.l.bf16 %v14271_v38  ;;  %4209 = vmatprep.mubr.msk.bf16.mxu1 %vm1930_vm4, %v3573_v62  ;;  %v5653_v28 = vpop.permute.xlu1 %5652  ;;  %v14287_v38 = vld [vmem:[#allocation164_spill] sm:$0xff] }
 0x2c2   : > { %v3147_v41 = vsel %vm2062_vm8, %v3099_v37, %v14265_v33  ;;  %v3146_v19 = vsel %vm2062_vm8, %v3098_v40, %v14266_v42  ;;  %3903 = vmatmul.mubr.bf16.gmra.mrb[32].mxu0 %v14269_v45  ;;  %v5639_v22 = vunpack.i.l.bf16 %v5638_v11  ;;  %v5610_v12 = vunpack.i.h.bf16 %v11531_v16  ;;  %v6006_v40 = vld [vmem:[%s6322_s10 + $0x130] sm:$0xf] }
 0x2c3   : > { %v3195_v49 = vsel %vm2095_vm9, %v3147_v41, %v14272_v14  ;;  %v3194_v17 = vsel %vm2095_vm9, %v3146_v19, %v14273_v29  ;;  %v3100_v31 = vsel %vm2029_vm7, %v3060_v63, %v5634_v21  ;;  %v5644_v57 = vunpack.i.l.bf16 %v11601_v27  ;;  %v14289_v14 = vld [vmem:[#allocation163_spill] sm:$0xff] }
 0x2c4   : > { %v11643_v36 = vsel %vm2095_vm9, %v14274_v48, %v5360_v43  ;;  %v3101_v9 = vsel %vm2029_vm7, %v14275_v30, %v5635_v18  ;;  %v3148_v4 = vsel %vm2062_vm8, %v3100_v31, %v5639_v22  ;;  %v5654_v5 = vunpack.i.l.bf16 %v5653_v28  ;;  %v5658_v15 = vpop.permute.xlu0 %5657  ;;  %v14292_v48 = vld [vmem:[#allocation55_spill] sm:$0xff] }
 0x2c5   : > { %v14277_v52 = vrot.slane %v14276_v24, 1  ;;  %v14279_v16 = vrot.slane %v14278_v2, 1  ;;  %v14281_v20 = vunpack.i.l.bf16 %v14280_v39  ;;  %v14282_v43 = vunpack.i.h.bf16 %v14280_v39  ;;  %v11672_v19 = vpop.permute.xlu1 %5662  ;;  %v14294_v2 = vld [vmem:[#allocation199_spill] sm:$0xff] }
 0x2c6   : > { %v3422_v47 = vrot.slane %v14284_v7, 1  ;;  %v5615_v18 = vunpack.i.h.bf16 %v11519_v13  ;;  %v5650_v26 = vunpack.i.h.bf16 %v5648_v1  ;;  %v5649_v37 = vunpack.i.l.bf16 %v5648_v1  ;;  %v14295_v1 = vld [vmem:[#allocation268_spill] sm:$0xff]  ;;  %v14296_v39 = vld [vmem:[#allocation67_spill] sm:$0xff]  ;;  %v14299_v7 = vld [vmem:[#allocation118_spill] sm:$0xff] }
 0x2c7   : > { %v3409_v62 = vsel %vm182_vm0, %v14279_v16, %v14277_v52  ;;  %v3242_v25 = vsel %vm2128_vm10, %v3194_v17, %v14281_v20  ;;  %v3243_v51 = vsel %vm2128_vm10, %v3195_v49, %v14282_v43  ;;  %v14283_v21 = vmov %v14277_v52 }
 0x2c8   : > { %v3413_v55 = vsel %vm182_vm0, %v14283_v21, %v3412_v46  ;;  %v2372_v23 = vsel %vm2128_vm10, %v2340_v34, %v5654_v5  ;;  %v3017_v8 = vsel %vm1930_vm4, %v6006_v40, %v5610_v12  ;;  %v5620_v56 = vunpack.i.h.bf16 %v11564_v53 }
 0x2c9   : > { %v14286_v33 = vunpack.i.l.bf16 %v14285_v60  ;;  %v3196_v42 = vsel %vm2095_vm9, %v3148_v4, %v5644_v57  ;;  %v2371_v13 = vsel %vm2128_vm10, %v2339_v6, %v5650_v26  ;;  %v3394_v10 = vrot.slane %v3242_v25, 1  ;;  %v11693_v5 = vpop.permute.xlu1 %5672 }
 0x2ca   : > { %v3244_v50 = vsel %vm2128_vm10, %v3196_v42, %v5649_v37  ;;  %v3395_v45 = vrot.slane %v3243_v51, 1  ;;  %v3575_v46 = vpack.c.bf16 %v2372_v23, %v2371_v13  ;;  %v3577_v63 = vpack.c.bf16 %v3413_v55, %v3409_v62  ;;  %v5668_v55 = vpop.permute.xlu0 %5667  ;;  %v14301_v23 = vld [vmem:[#allocation90_spill] sm:$0xff] }
 0x2cb   : > { %v3149_v41 = vsel %vm2062_vm8, %v3101_v9, %v14286_v33  ;;  %v3400_v34 = vrot.slane %v3244_v50, 1  ;;  %v14288_v53 = vrot.slane %v14287_v38, 1  ;;  %v14290_v49 = vrot.slane %v14289_v14, 1 }
 0x2cc   : > { %v3039_v17 = vsel %vm1963_vm5, %v3017_v8, %v5615_v18  ;;  %v5660_v22 = vunpack.i.h.bf16 %v5658_v15  ;;  %v5659_v12 = vunpack.i.l.bf16 %v5658_v15  ;;  %v14293_v30 = vunpack.i.l.bf16 %v14292_v48  ;;  %3910 = vmatprep.mubr.bf16.mxu0 %v3575_v46 }
 0x2cd   : > { %v11681_v29 = vsel %vm182_vm0, %v14290_v49, %v14288_v53  ;;  %v14291_v31 = vmov %v14288_v53  ;;  %v3061_v57 = vsel %vm1996_vm6, %v3039_v17, %v5620_v56  ;;  %v5640_v4 = vunpack.i.h.bf16 %v5638_v11  ;;  %v5683_v56 = vpop.permute.xlu1 %5682 }
 0x2ce   : > { %v11687_v6 = vsel %vm182_vm0, %v14291_v31, %v3422_v47  ;;  %v3197_v9 = vsel %vm2095_vm9, %v3149_v41, %v14293_v30  ;;  %v3401_v24 = vsel %vm182_vm0, %v3395_v45, %v3400_v34  ;;  %v5645_v52 = vunpack.i.h.bf16 %v11601_v27  ;;  %v5678_v46 = vpop.permute.xlu0 %5677  ;;  %v14306_v31 = vld [vmem:[#allocation196_spill] sm:$0xff] }
 0x2cf   : > { %v3102_v16 = vsel %vm2029_vm7, %v14294_v2, %v5659_v12  ;;  %v3103_v62 = vsel %vm2029_vm7, %v3061_v57, %v5660_v22  ;;  %v14297_v20 = vpack.c.bf16 %v14295_v1, %v14296_v39  ;;  %v3396_v25 = vsel %vm182_vm0, %v3394_v10, %v3395_v45  ;;  %v14304_v45 = vld [vmem:[#allocation155_spill] sm:$0xff]  ;;  %v14305_v22 = vld [vmem:[#allocation97_spill] sm:$0xff]  ;;  %v14307_v2 = vld [vmem:[#allocation240_spill] sm:$0xff] }
 0x2d0   : > { %v5655_v43 = vunpack.i.h.bf16 %v5653_v28  ;;  %v14298_v11 = vunpack.i.h.bf16 %v14285_v60  ;;  %v3151_v21 = vsel %vm2062_vm8, %v3103_v62, %v5640_v4  ;;  %v3572_v27 = vpack.c.bf16 %v3401_v24, %v3396_v25 }
 0x2d1   : > { %3911 = vmatmul.mubr.bf16.gmra.mrb[36].mxu0 %v14297_v20  ;;  %v5370_v47 = vunpack.i.h.bf16 %v14299_v7  ;;  %v14300_v18 = vunpack.i.h.bf16 %v14292_v48  ;;  %v3199_v37 = vsel %vm2095_vm9, %v3151_v21, %v5645_v52  ;;  %v14302_v40 = vunpack.i.l.bf16 %v14301_v23  ;;  %v6007_v48 = vld [vmem:[%s6322_s10 + $0x148] sm:$0xf]  ;;  %v6008_v20 = vld [vmem:[%s6322_s10 + $0x160] sm:$0xf] }
 0x2d2   : > { %v3150_v51 = vsel %vm2062_vm8, %v3102_v16, %v14298_v11  ;;  %v5664_v8 = vunpack.i.l.bf16 %v11672_v19  ;;  %4064 = vmatmul.mubr.bf16.gmra.mrb[32].mxu1 %v3572_v27  ;;  %v14303_v60 = vunpack.i.h.bf16 %v14301_v23  ;;  %v3247_v41 = vsel %vm2128_vm10, %v3199_v37, %v5655_v43  ;;  %v5688_v43 = vpop.permute.xlu0 %5687  ;;  %v14310_v37 = vld [vmem:[#allocation267_spill] sm:$0xff] }
 0x2d3   : > { %v3198_v26 = vsel %vm2095_vm9, %v3150_v51, %v14300_v18  ;;  %v3245_v28 = vsel %vm2128_vm10, %v3197_v9, %v14302_v40  ;;  %v3581_v42 = vpack.c.bf16 %v11687_v6, %v11681_v29  ;;  %v5669_v50 = vunpack.i.l.bf16 %v5668_v55  ;;  %4210 = vmatprep.mubr.msk.bf16.mxu1 %vm1930_vm4, %v3577_v63  ;;  %v5693_v9 = vpop.permute.xlu1 %5692 }
 0x2d4   : > { %v3246_v33 = vsel %vm2128_vm10, %v3198_v26, %v14303_v60  ;;  %v5685_v13 = vunpack.i.h.bf16 %v5683_v56  ;;  %v5684_v10 = vunpack.i.l.bf16 %v5683_v56  ;;  %v3432_v34 = vrot.slane %v14304_v45, 1 }
 0x2d5   : > { %v5665_v15 = vunpack.i.h.bf16 %v11672_v19  ;;  %v3404_v53 = vrot.slane %v3245_v28, 1  ;;  %v3405_v49 = vrot.slane %v3246_v33, 1  ;;  %v3410_v17 = vrot.slane %v3247_v41, 1  ;;  %v14313_v41 = vld [vmem:[#allocation161_spill] sm:$0xff] }
 0x2d6   : > { %v3104_v12 = vsel %vm2029_vm7, %v14305_v22, %v5684_v10  ;;  %v3105_v29 = vsel %vm2029_vm7, %v14306_v31, %v5685_v13  ;;  %v5680_v6 = vunpack.i.h.bf16 %v5678_v46  ;;  %v5679_v57 = vunpack.i.l.bf16 %v5678_v46  ;;  %v14315_v13 = vld [vmem:[#allocation160_spill] sm:$0xff]  ;;  %v14318_v46 = vld [vmem:[#allocation159_spill] sm:$0xff]  ;;  %v14321_v31 = vld [vmem:[#allocation213_spill] sm:$0xff] }
 0x2d7   : > { %v3018_v63 = vsel %vm1930_vm4, %v6007_v48, %v5664_v8  ;;  %v5674_v30 = vunpack.i.l.bf16 %v11693_v5  ;;  %v3406_v19 = vsel %vm182_vm0, %v3404_v53, %v3405_v49  ;;  %v3411_v4 = vsel %vm182_vm0, %v3405_v49, %v3410_v17  ;;  %v5698_v17 = vpop.permute.xlu0 %5697 }
 0x2d8   : > { %v5670_v24 = vunpack.i.h.bf16 %v5668_v55  ;;  %v3040_v52 = vsel %vm1963_vm5, %v3018_v63, %v5669_v50  ;;  %v14308_v16 = vunpack.i.l.bf16 %v14307_v2  ;;  %v14309_v1 = vunpack.i.h.bf16 %v14307_v2 }
 0x2d9   : > { %v3019_v25 = vsel %vm1930_vm4, %v6008_v20, %v5665_v15  ;;  %v3576_v11 = vpack.c.bf16 %v3411_v4, %v3406_v19  ;;  %v2373_v51 = vsel %vm2128_vm10, %v11617_v3, %v5679_v57  ;;  %v2374_v21 = vsel %vm2128_vm10, %v11643_v36, %v5680_v6  ;;  %v5703_v3 = vpop.permute.xlu1 %5702  ;;  %v14317_v15 = vld [vmem:[#allocation162_spill] sm:$0xff]  ;;  %v14323_v57 = vld [vmem:[#allocation201_spill] sm:$0xff] }
 0x2da   : > { %v3152_v62 = vsel %vm2062_vm8, %v3104_v12, %v14308_v16  ;;  %v3153_v39 = vsel %vm2062_vm8, %v3105_v29, %v14309_v1  ;;  %v5675_v55 = vunpack.i.h.bf16 %v11693_v5  ;;  %v5690_v27 = vunpack.i.h.bf16 %v5688_v43  ;;  %v14327_v1 = vld [vmem:[#allocation208_spill] sm:$0xff] }
 0x2db   : > { %v5689_v18 = vunpack.i.l.bf16 %v5688_v43  ;;  %v3579_v26 = vpack.c.bf16 %v2374_v21, %v2373_v51  ;;  %v14311_v23 = vunpack.i.l.bf16 %v14310_v37  ;;  %v14312_v28 = vunpack.i.h.bf16 %v14310_v37  ;;  %4072 = vmatmul.mubr.bf16.gmra.mrb[36].mxu1 %v3576_v11  ;;  %v14328_v51 = vld [vmem:[#allocation245_spill] sm:$0xff] }
 0x2dc   : > { %v5694_v56 = vunpack.i.l.bf16 %v5693_v9  ;;  %v3062_v60 = vsel %vm1996_vm6, %v3040_v52, %v5674_v30  ;;  %v5369_v36 = vunpack.i.l.bf16 %v14299_v7  ;;  %v3041_v5 = vsel %vm1963_vm5, %v3019_v25, %v5670_v24  ;;  %4211 = vmatprep.mubr.msk.bf16.mxu1 %vm1930_vm4, %v3581_v42  ;;  %v14322_v42 = vld [vmem:[#allocation215_spill] sm:$0xff]  ;;  %v14324_v30 = vld [vmem:[#allocation88_spill] sm:$0xff] }
 0x2dd   : > { %v3200_v40 = vsel %vm2095_vm9, %v3152_v62, %v14311_v23  ;;  %v3201_v8 = vsel %vm2095_vm9, %v3153_v39, %v14312_v28  ;;  %v3106_v33 = vsel %vm2029_vm7, %v3062_v60, %v5689_v18  ;;  %3918 = vmatprep.mubr.bf16.mxu0 %v3579_v26  ;;  %v14314_v50 = vrot.slane %v14313_v41, 1  ;;  %v5708_v26 = vpop.permute.xlu0 %5707  ;;  %v14330_v28 = vld [vmem:[#allocation105_spill] sm:$0xff] }
 0x2de   : > { %v14316_v10 = vrot.slane %v14315_v13, 1  ;;  %v14319_v53 = vpack.c.bf16 %v14317_v15, %v14318_v46  ;;  %v5704_v49 = vunpack.i.l.bf16 %v5703_v3  ;;  %v3437_v29 = vrot.slane %v14321_v31, 1 }
 0x2df   : > { %v14320_v22 = vmov %v14314_v50  ;;  %v3438_v6 = vrot.slane %v14322_v42, 1  ;;  %v3107_v48 = vsel %vm2029_vm7, %v14323_v57, %v5690_v27  ;;  %v5699_v63 = vunpack.i.l.bf16 %v5698_v17 }
 0x2e0   : > { %v11765_v45 = vsel %vm182_vm0, %v14316_v10, %v14314_v50  ;;  %3919 = vmatmul.mubr.bf16.gmra.mrb[40].mxu0 %v14319_v53  ;;  %v3433_v12 = vsel %vm182_vm0, %v14320_v22, %v3432_v34  ;;  %v14325_v19 = vunpack.i.l.bf16 %v14324_v30  ;;  %v14326_v24 = vunpack.i.h.bf16 %v14324_v30  ;;  %v5713_v34 = vpop.permute.xlu1 %5712  ;;  %v14332_v10 = vld [vmem:[#allocation244_spill] sm:$0xff] }
 0x2e1   : > { %v5695_v2 = vunpack.i.h.bf16 %v5693_v9  ;;  %v3154_v16 = vsel %vm2062_vm8, %v3106_v33, %v5694_v56  ;;  %v3063_v62 = vsel %vm1996_vm6, %v3041_v5, %v5675_v55  ;;  %v3442_v39 = vrot.slane %v14327_v1, 1 }
 0x2e2   : > { %v3248_v4 = vsel %vm2128_vm10, %v3200_v40, %v14325_v19  ;;  %v3249_v52 = vsel %vm2128_vm10, %v3201_v8, %v14326_v24  ;;  %v5705_v20 = vunpack.i.h.bf16 %v5703_v3  ;;  %v3202_v25 = vsel %vm2095_vm9, %v3154_v16, %v5699_v63  ;;  %v11810_v63 = vpop.permute.xlu0 %5717  ;;  %v14335_v24 = vld [vmem:[#allocation187_spill] sm:$0xff] }
 0x2e3   : > { %v5715_v43 = vunpack.i.h.bf16 %v5713_v34  ;;  %v5714_v11 = vunpack.i.l.bf16 %v5713_v34  ;;  %v14329_v21 = vunpack.i.l.bf16 %v14328_v51  ;;  %v3250_v18 = vsel %vm2128_vm10, %v3202_v25, %v5704_v49  ;;  %v14337_v16 = vld [vmem:[#allocation115_spill] sm:$0xff] }
 0x2e4   : > { %v3414_v9 = vrot.slane %v3248_v4, 1  ;;  %v3415_v37 = vrot.slane %v3249_v52, 1  ;;  %v5700_v23 = vunpack.i.h.bf16 %v5698_v17  ;;  %v3420_v40 = vrot.slane %v3250_v18, 1  ;;  %v11798_v50 = vpop.permute.xlu1 %5722 }
 0x2e5   : > { %v3155_v27 = vsel %vm2062_vm8, %v3107_v48, %v14329_v21  ;;  %v3108_v55 = vsel %vm2029_vm7, %v14330_v28, %v5714_v11  ;;  %v3109_v8 = vsel %vm2029_vm7, %v3063_v62, %v5715_v43  ;;  %v14331_v56 = vunpack.i.h.bf16 %v14328_v51 }
 0x2e6   : > { %v3157_v3 = vsel %vm2062_vm8, %v3109_v8, %v5695_v2  ;;  %v5710_v5 = vunpack.i.h.bf16 %v5708_v26  ;;  %v5709_v33 = vunpack.i.l.bf16 %v5708_v26  ;;  %v14333_v15 = vunpack.i.l.bf16 %v14332_v10 }
 0x2e7   : > { %v3156_v60 = vsel %vm2062_vm8, %v3108_v55, %v14331_v56  ;;  %v14334_v53 = vunpack.i.h.bf16 %v14332_v10  ;;  %v3205_v17 = vsel %vm2095_vm9, %v3157_v3, %v5700_v23  ;;  %v2375_v22 = vsel %vm2128_vm10, %v11605_v61, %v5705_v20  ;;  %v14338_v20 = vld [vmem:[#allocation102_spill] sm:$0xff] }
 0x2e8   : > { %v3203_v46 = vsel %vm2095_vm9, %v3155_v27, %v14333_v15  ;;  %v3253_v48 = vsel %vm2128_vm10, %v3205_v17, %v5710_v5  ;;  %v2376_v19 = vsel %vm2128_vm10, %v11609_v32, %v5709_v33  ;;  %v3421_v4 = vsel %vm182_vm0, %v3415_v37, %v3420_v40  ;;  %v5733_v43 = vpop.permute.xlu1 %5732  ;;  %v14344_v5 = vld [vmem:[#allocation72_spill] sm:$0xff]  ;;  %v14349_v17 = vld [vmem:[#allocation269_spill] sm:$0xff] }
 0x2e9   : > { %v3204_v49 = vsel %vm2095_vm9, %v3156_v60, %v14334_v53  ;;  %v14336_v52 = vunpack.i.h.bf16 %v14335_v24  ;;  %v2313_v34 = vsel %vm2062_vm8, %v14337_v16, %v5289_v58  ;;  %v3583_v62 = vpack.c.bf16 %v2376_v19, %v2375_v22 }
 0x2ea   : > { %v3416_v61 = vsel %vm182_vm0, %v3414_v9, %v3415_v37  ;;  %v3585_v1 = vpack.c.bf16 %v3433_v12, %v11765_v45  ;;  %v2314_v32 = vsel %vm2062_vm8, %v14338_v20, %v5290_v35  ;;  %v2345_v11 = vsel %vm2095_vm9, %v2313_v34, %v5369_v36  ;;  %v14340_v37 = vld [vmem:[#allocation143_spill] sm:$0xff]  ;;  %v14342_v12 = vld [vmem:[#allocation129_spill] sm:$0xff]  ;;  %v11836_v35 = vpop.permute.xlu0 %5727 }
 0x2eb   : > { %v3252_v2 = vsel %vm2128_vm10, %v3204_v49, %v14336_v52  ;;  %v3580_v25 = vpack.c.bf16 %v3421_v4, %v3416_v61  ;;  %v14339_v21 = vunpack.i.l.bf16 %v14335_v24  ;;  %v3430_v18 = vrot.slane %v3253_v48, 1  ;;  %3926 = vmatprep.mubr.bf16.mxu0 %v3583_v62  ;;  %v6009_v61 = vld [vmem:[%s6322_s10 + $0x178] sm:$0xf] }
 0x2ec   : > { %v5735_v58 = vunpack.i.h.bf16 %v5733_v43  ;;  %v5734_v26 = vunpack.i.l.bf16 %v5733_v43  ;;  %v3425_v9 = vrot.slane %v3252_v2, 1  ;;  %v5054_v45 = vunpack.i.l.bf16 %v14340_v37  ;;  %v11849_v15 = vpop.permute.xlu1 %5742 }
 0x2ed   : > { %v3251_v27 = vsel %vm2128_vm10, %v3203_v46, %v14339_v21  ;;  %4080 = vmatmul.mubr.bf16.gmra.mrb[40].mxu1 %v3580_v25  ;;  %v14343_v23 = vpack.c.bf16 %v14341_v0, %v14342_v12  ;;  %v2346_v36 = vsel %vm2095_vm9, %v2314_v32, %v5370_v47  ;;  %v3439_v40 = vsel %vm182_vm0, %v3437_v29, %v3438_v6  ;;  %v14345_v29 = vld [vmem:[#allocation167_spill] sm:$0xff] }
 0x2ee   : > { %v3443_v55 = vsel %vm182_vm0, %v3438_v6, %v3442_v39  ;;  %v5719_v8 = vunpack.i.l.bf16 %v11810_v63  ;;  %4212 = vmatprep.mubr.msk.bf16.mxu1 %vm1930_vm4, %v3585_v1  ;;  %v2377_v56 = vsel %vm2128_vm10, %v2345_v11, %v5734_v26  ;;  %v2378_v60 = vsel %vm2128_vm10, %v2346_v36, %v5735_v58  ;;  %v14346_v46 = vld [vmem:[#allocation99_spill] sm:$0xff]  ;;  %v14347_v39 = vld [vmem:[#allocation113_spill] sm:$0xff]  ;;  %v5738_v34 = vpop.permute.xlu0 %5737  ;;  %v14352_v26 = vld [vmem:[#allocation200_spill] sm:$0xff] }
 0x2ef   : > { %3927 = vmatmul.mubr.bf16.gmra.mrb[44].mxu0 %v14343_v23  ;;  %v3424_v3 = vrot.slane %v3251_v27, 1  ;;  %v4904_v33 = vunpack.i.l.bf16 %v14344_v5  ;;  %v5055_v7 = vunpack.i.h.bf16 %v14340_v37  ;;  %v3587_v47 = vpack.c.bf16 %v2378_v60, %v2377_v56  ;;  %v14353_v37 = vld [vmem:[#allocation103_spill] sm:$0xff]  ;;  %v14354_v23 = vld [vmem:[#allocation242_spill] sm:$0xff] }
 0x2f0   : > { %v3586_v6 = vpack.c.bf16 %v14346_v46, %v14345_v29  ;;  %v14348_v53 = vunpack.i.l.bf16 %v14347_v39  ;;  %v5134_v22 = vunpack.i.l.bf16 %v14349_v17  ;;  %v3431_v19 = vsel %vm182_vm0, %v3425_v9, %v3430_v18  ;;  %v11872_v21 = vpop.permute.xlu1 %5752  ;;  %v14351_v18 = vld [vmem:[#allocation111_spill] sm:$0xff] }
 0x2f1   : > { %v3426_v48 = vsel %vm182_vm0, %v3424_v3, %v3425_v9  ;;  %v14350_v4 = vunpack.i.h.bf16 %v14347_v39  ;;  %v5724_v16 = vunpack.i.l.bf16 %v11798_v50  ;;  %3934 = vmatprep.mubr.bf16.mxu0 %v3587_v47  ;;  %v3589_v62 = vpack.c.bf16 %v3443_v55, %v3439_v40  ;;  %v14357_v3 = vld [vmem:[#allocation77_spill] sm:$0xff] }
 0x2f2   : > { %v2187_v49 = vsel %vm1930_vm4, %v14289_v14, %v14348_v53  ;;  %v3020_v14 = vsel %vm1930_vm4, %v6009_v61, %v5719_v8  ;;  %v5729_v1 = vunpack.i.l.bf16 %v11836_v35  ;;  %v5740_v20 = vunpack.i.h.bf16 %v5738_v34  ;;  %v11888_v56 = vpop.permute.xlu0 %5747  ;;  %v14360_v53 = vld [vmem:[#allocation177_spill] sm:$0xff] }
 0x2f3   : > { %v2188_v52 = vsel %vm1930_vm4, %v14287_v38, %v14350_v4  ;;  %v2219_v2 = vsel %vm1963_vm5, %v2187_v49, %v5054_v45  ;;  %v5739_v32 = vunpack.i.l.bf16 %v5738_v34  ;;  %v5135_v43 = vunpack.i.h.bf16 %v14349_v17  ;;  %v14363_v34 = vld [vmem:[#allocation248_spill] sm:$0xff] }
 0x2f4   : > { %v2220_v25 = vsel %vm1963_vm5, %v2188_v52, %v5055_v7  ;;  %v5744_v38 = vunpack.i.l.bf16 %v11849_v15  ;;  %v3584_v11 = vpack.c.bf16 %v3431_v19, %v3426_v48  ;;  %v2251_v27 = vsel %vm1996_vm6, %v2219_v2, %v5134_v22  ;;  %v5763_v22 = vpop.permute.xlu1 %5762  ;;  %v14361_v48 = vld [vmem:[#allocation216_spill] sm:$0xff] }
 0x2f5   : > { %v5214_v58 = vunpack.i.l.bf16 %v14351_v18  ;;  %v3111_v9 = vsel %vm2029_vm7, %v14352_v26, %v5740_v20  ;;  %v3110_v45 = vsel %vm2029_vm7, %v14353_v37, %v5739_v32  ;;  %v5215_v0 = vunpack.i.h.bf16 %v14351_v18  ;;  %v14366_v26 = vld [vmem:[#allocation214_spill] sm:$0xff]  ;;  %v14368_v37 = vld [vmem:[#allocation219_spill] sm:$0xff] }
 0x2f6   : > { %v3042_v12 = vsel %vm1963_vm5, %v3020_v14, %v5724_v16  ;;  %v14355_v36 = vunpack.i.h.bf16 %v14354_v23  ;;  %v14356_v55 = vunpack.i.l.bf16 %v14354_v23  ;;  %4088 = vmatmul.mubr.bf16.gmra.mrb[44].mxu1 %v3584_v11  ;;  %v14358_v7 = vunpack.i.h.bf16 %v14357_v3 }
 0x2f7   : > { %3935 = vmatmul.mubr.bf16.gmra.mrb[48].mxu0 %v3586_v6  ;;  %v3064_v60 = vsel %vm1996_vm6, %v3042_v12, %v5729_v1  ;;  %v14359_v29 = vunpack.i.l.bf16 %v14357_v3  ;;  %v5749_v39 = vunpack.i.l.bf16 %v11888_v56  ;;  %4213 = vmatprep.mubr.msk.bf16.mxu1 %vm1930_vm4, %v3589_v62  ;;  %v5294_v49 = vunpack.i.l.bf16 %v14360_v53  ;;  %v5758_v1 = vpop.permute.xlu0 %5757 }
 0x2f8   : > { %v3159_v40 = vsel %vm2062_vm8, %v3111_v9, %v14355_v36  ;;  %v3158_v8 = vsel %vm2062_vm8, %v3110_v45, %v14356_v55  ;;  %v3112_v6 = vsel %vm2029_vm7, %v3064_v60, %v5744_v38  ;;  %v5754_v17 = vunpack.i.l.bf16 %v11872_v21 }
 0x2f9   : > { %v3207_v47 = vsel %vm2095_vm9, %v3159_v40, %v14358_v7  ;;  %v3206_v46 = vsel %vm2095_vm9, %v3158_v8, %v14359_v29  ;;  %v3452_v19 = vrot.slane %v14361_v48, 1  ;;  %v2252_v4 = vsel %vm1996_vm6, %v2220_v25, %v5135_v43  ;;  %v14365_v43 = vld [vmem:[#allocation119_spill] sm:$0xff] }
 0x2fa   : > { %v2283_v52 = vsel %vm2029_vm7, %v2251_v27, %v5214_v58  ;;  %v3160_v2 = vsel %vm2062_vm8, %v3112_v6, %v5749_v39  ;;  %v14362_v16 = vunpack.i.h.bf16 %v14324_v30  ;;  %v5295_v61 = vunpack.i.h.bf16 %v14360_v53  ;;  %v5773_v58 = vpop.permute.xlu1 %5772 }
 0x2fb   : > { %v5720_v14 = vunpack.i.h.bf16 %v11810_v63  ;;  %v3254_v20 = vsel %vm2128_vm10, %v3206_v46, %v4904_v33  ;;  %v14364_v32 = vunpack.i.h.bf16 %v14344_v5  ;;  %v2284_v30 = vsel %vm2029_vm7, %v2252_v4, %v5215_v0  ;;  %v5768_v53 = vpop.permute.xlu0 %5767 }
 0x2fc   : > { %v11910_v62 = vsel %vm2128_vm10, %v14363_v34, %v14362_v16  ;;  %v5375_v38 = vunpack.i.h.bf16 %v14365_v43  ;;  %v5374_v11 = vunpack.i.l.bf16 %v14365_v43  ;;  %v5759_v27 = vunpack.i.l.bf16 %v5758_v1  ;;  %v6012_v43 = vld [vmem:[%s6322_s10 + $0x190] sm:$0xf] }
 0x2fd   : > { %v3255_v25 = vsel %vm2128_vm10, %v3207_v47, %v14364_v32  ;;  %v2315_v18 = vsel %vm2062_vm8, %v2283_v52, %v5294_v49  ;;  %v3208_v63 = vsel %vm2095_vm9, %v3160_v2, %v5754_v17  ;;  %v14367_v9 = vrot.slane %v14366_v26, 1  ;;  %v6010_v47 = vld [vmem:[%s6322_s10 + $0x180] sm:$0xff] }
 0x2fe   : > { %v14369_v45 = vrot.slane %v14368_v37, 1  ;;  %v5725_v40 = vunpack.i.h.bf16 %v11798_v50  ;;  %v3256_v55 = vsel %vm2128_vm10, %v3208_v63, %v5759_v27  ;;  %v3434_v8 = vrot.slane %v3254_v20, 1  ;;  %v5783_v4 = vpop.permute.xlu1 %5782  ;;  %v6011_v20 = vld [vmem:[%s6322_s10 + $0x188] sm:$0xff] }
 0x2ff   : > { %v14370_v36 = vmov %v14367_v9  ;;  %v3435_v60 = vrot.slane %v3255_v25, 1  ;;  %v2316_v7 = vsel %vm2062_vm8, %v2284_v30, %v5295_v61  ;;  %v3021_v29 = vsel %vm1930_vm4, %v6010_v47, %v5720_v14  ;;  %v5778_v30 = vpop.permute.xlu0 %5777 }
 0x300   : > { %v3449_v12 = vsel %vm182_vm0, %v14369_v45, %v14367_v9  ;;  %v3453_v0 = vsel %vm182_vm0, %v14370_v36, %v3452_v19  ;;  %v5764_v46 = vunpack.i.l.bf16 %v5763_v22  ;;  %v3440_v39 = vrot.slane %v3256_v55, 1 }
 0x301   : > { %v5765_v49 = vunpack.i.h.bf16 %v5763_v22  ;;  %v5769_v6 = vunpack.i.l.bf16 %v5768_v53  ;;  %v2347_v17 = vsel %vm2095_vm9, %v2315_v18, %v5374_v11  ;;  %v2348_v48 = vsel %vm2095_vm9, %v2316_v7, %v5375_v38 }
 0x302   : > { %v5730_v50 = vunpack.i.h.bf16 %v11836_v35  ;;  %v5770_v19 = vunpack.i.h.bf16 %v5768_v53  ;;  %v3441_v52 = vsel %vm182_vm0, %v3435_v60, %v3440_v39  ;;  %v3593_v2 = vpack.c.bf16 %v3453_v0, %v3449_v12  ;;  %v14371_v12 = vld [vmem:[#allocation165_spill] sm:$0xff] }
 0x303   : > { %v3043_v16 = vsel %vm1963_vm5, %v3021_v29, %v5725_v40  ;;  %v5745_v34 = vunpack.i.h.bf16 %v11849_v15  ;;  %v5760_v61 = vunpack.i.h.bf16 %v5758_v1  ;;  %v3436_v22 = vsel %vm182_vm0, %v3434_v8, %v3435_v60  ;;  %v5788_v55 = vpop.permute.xlu0 %5787 }
 0x304   : > { %v5750_v14 = vunpack.i.h.bf16 %v11888_v56  ;;  %v3022_v32 = vsel %vm1930_vm4, %v6011_v20, %v5764_v46  ;;  %v5774_v25 = vunpack.i.l.bf16 %v5773_v58  ;;  %v3588_v35 = vpack.c.bf16 %v3441_v52, %v3436_v22  ;;  %v5793_v56 = vpop.permute.xlu1 %5792  ;;  %v14379_v20 = vld [vmem:[#allocation218_spill] sm:$0xff] }
 0x305   : > { %v3023_v38 = vsel %vm1930_vm4, %v6012_v43, %v5765_v49  ;;  %v5775_v11 = vunpack.i.h.bf16 %v5773_v58  ;;  %v3044_v27 = vsel %vm1963_vm5, %v3022_v32, %v5769_v6  ;;  %v5779_v18 = vunpack.i.l.bf16 %v5778_v30 }
 0x306   : > { %v3065_v15 = vsel %vm1996_vm6, %v3043_v16, %v5730_v50  ;;  %v3045_v1 = vsel %vm1963_vm5, %v3023_v38, %v5770_v19  ;;  %v5785_v63 = vunpack.i.h.bf16 %v5783_v4  ;;  %v5784_v26 = vunpack.i.l.bf16 %v5783_v4  ;;  %4096 = vmatmul.mubr.bf16.gmra.mrb[48].mxu1 %v3588_v35 }
 0x307   : > { %v3113_v9 = vsel %vm2029_vm7, %v3065_v15, %v5745_v34  ;;  %v2379_v37 = vsel %vm2128_vm10, %v2347_v17, %v5760_v61  ;;  %v2380_v45 = vsel %vm2128_vm10, %v2348_v48, %v5779_v18  ;;  %v3590_v58 = vpack.c.bf16 %v11910_v62, %v14371_v12  ;;  %4214 = vmatprep.mubr.msk.bf16.mxu1 %vm1930_vm4, %v3593_v2  ;;  %v14376_v2 = vld [vmem:[#allocation112_spill] sm:$0xff] }
 0x308   : > { %v5755_v36 = vunpack.i.h.bf16 %v11872_v21  ;;  %v3161_v0 = vsel %vm2062_vm8, %v3113_v9, %v5750_v14  ;;  %v3066_v40 = vsel %vm1996_vm6, %v3044_v27, %v5774_v25  ;;  %v3591_v8 = vpack.c.bf16 %v2380_v45, %v2379_v37  ;;  %v11965_v49 = vpop.permute.xlu1 %5802  ;;  %v14372_v21 = vld [vmem:[#allocation226_spill] sm:$0xff]  ;;  %v5798_v14 = vpop.permute.xlu0 %5797 }
 0x309   : > { %v3067_v60 = vsel %vm1996_vm6, %v3045_v1, %v5775_v11  ;;  %v5780_v7 = vunpack.i.h.bf16 %v5778_v30  ;;  %v5790_v47 = vunpack.i.h.bf16 %v5788_v55  ;;  %v5789_v29 = vunpack.i.l.bf16 %v5788_v55 }
 0x30a   : > { %v3114_v46 = vsel %vm2029_vm7, %v3066_v40, %v5784_v26  ;;  %v3115_v39 = vsel %vm2029_vm7, %v3067_v60, %v5785_v63  ;;  %v5795_v62 = vunpack.i.h.bf16 %v5793_v56  ;;  %v5794_v53 = vunpack.i.l.bf16 %v5793_v56  ;;  %3942 = vmatprep.mubr.bf16.mxu0 %v3591_v8  ;;  %v14382_v63 = vld [vmem:[#allocation149_spill] sm:$0xff] }
 0x30b   : > { %v14373_v6 = vunpack.i.l.bf16 %v14372_v21  ;;  %v14374_v48 = vunpack.i.h.bf16 %v14372_v21  ;;  %v3162_v19 = vsel %vm2062_vm8, %v3114_v46, %v5789_v29  ;;  %v3163_v4 = vsel %vm2062_vm8, %v3115_v39, %v5790_v47  ;;  %3943 = vmatmul.mubr.bf16.gmra.mrb[52].mxu0 %v3590_v58  ;;  %v14386_v21 = vld [vmem:[#allocation272_spill] sm:$0xff] }
 0x30c   : > { %v14375_v52 = vunpack.i.l.bf16 %v14354_v23  ;;  %v14377_v34 = vunpack.i.l.bf16 %v14328_v51  ;;  %v14378_v61 = vunpack.i.h.bf16 %v14328_v51  ;;  %v4979_v32 = vunpack.i.l.bf16 %v14379_v20  ;;  %v11994_v11 = vpop.permute.xlu1 %5812 }
 0x30d   : > { %v2058_v17 = vsel %vm2029_vm7, %v14323_v57, %v14373_v6  ;;  %v2059_v50 = vsel %vm2029_vm7, %v14330_v28, %v14374_v48  ;;  %v3209_v28 = vsel %vm2095_vm9, %v3161_v0, %v5755_v36  ;;  %v5800_v30 = vunpack.i.h.bf16 %v5798_v14  ;;  %v12007_v36 = vpop.permute.xlu0 %5807  ;;  %v14383_v0 = vld [vmem:[#allocation273_spill] sm:$0xff] }
 0x30e   : > { %v11981_v16 = vsel %vm2062_vm8, %v14376_v2, %v14375_v52  ;;  %v2091_v57 = vsel %vm2062_vm8, %v2058_v17, %v14377_v34  ;;  %v2092_v22 = vsel %vm2062_vm8, %v2059_v50, %v14378_v61  ;;  %v3257_v25 = vsel %vm2128_vm10, %v3209_v28, %v5780_v7  ;;  %v14385_v7 = vld [vmem:[#allocation127_spill] sm:$0xff]  ;;  %v14388_v34 = vld [vmem:[#allocation217_spill] sm:$0xff] }
 0x30f   : > { %v5799_v35 = vunpack.i.l.bf16 %v5798_v14  ;;  %v3210_v43 = vsel %vm2095_vm9, %v3162_v19, %v5794_v53  ;;  %v3211_v38 = vsel %vm2095_vm9, %v3163_v4, %v5795_v62  ;;  %v14380_v27 = vunpack.i.l.bf16 %v14332_v10  ;;  %v14387_v50 = vld [vmem:[#allocation223_spill] sm:$0xff] }
 0x310   : > { %v14381_v18 = vunpack.i.h.bf16 %v14332_v10  ;;  %v4980_v1 = vunpack.i.h.bf16 %v14379_v20  ;;  %v5059_v26 = vunpack.i.l.bf16 %v14382_v63  ;;  %v3259_v9 = vsel %vm2128_vm10, %v3211_v38, %v5800_v30  ;;  %v12018_v46 = vpop.permute.xlu1 %5822  ;;  %v14390_v20 = vld [vmem:[#allocation230_spill] sm:$0xff] }
 0x311   : > { %v2124_v51 = vsel %vm2095_vm9, %v2091_v57, %v14380_v27  ;;  %v3258_v56 = vsel %vm2128_vm10, %v3210_v43, %v5799_v35  ;;  %v5060_v37 = vunpack.i.h.bf16 %v14382_v63  ;;  %v3444_v45 = vrot.slane %v3257_v25, 1  ;;  %v12030_v52 = vpop.permute.xlu0 %5817  ;;  %v6013_v63 = vld [vmem:[%s6322_s10 + $0x1c8] sm:$0xff] }
 0x312   : > { %v2125_v15 = vsel %vm2095_vm9, %v2092_v22, %v14381_v18  ;;  %v3445_v12 = vrot.slane %v3258_v56, 1  ;;  %v3450_v58 = vrot.slane %v3259_v9, 1  ;;  %v2189_v10 = vsel %vm1930_vm4, %v14315_v13, %v4979_v32 }
 0x313   : > { %v5140_v40 = vunpack.i.h.bf16 %v14383_v0  ;;  %v5139_v55 = vunpack.i.l.bf16 %v14383_v0  ;;  %v14384_v8 = vunpack.i.l.bf16 %v14335_v24  ;;  %v5220_v47 = vunpack.i.h.bf16 %v14385_v7 }
 0x314   : > { %v5219_v29 = vunpack.i.l.bf16 %v14385_v7  ;;  %v3446_v39 = vsel %vm182_vm0, %v3444_v45, %v3445_v12  ;;  %v3451_v62 = vsel %vm182_vm0, %v3445_v12, %v3450_v58  ;;  %v2190_v13 = vsel %vm1930_vm4, %v14313_v41, %v4980_v1  ;;  %v5833_v35 = vpop.permute.xlu1 %5832  ;;  %v6015_v12 = vld [vmem:[%s6322_s10 + $0x1d8] sm:$0xf]  ;;  %v14394_v7 = vld [vmem:[#allocation116_spill] sm:$0xff] }
 0x315   : > { %v2157_v60 = vsel %vm2128_vm10, %v2124_v51, %v14384_v8  ;;  %v2221_v53 = vsel %vm1963_vm5, %v2189_v10, %v5059_v26  ;;  %v5300_v6 = vunpack.i.h.bf16 %v14386_v21  ;;  %v5299_v17 = vunpack.i.l.bf16 %v14386_v21  ;;  %v12049_v18 = vpop.permute.xlu0 %5827  ;;  %v14393_v10 = vld [vmem:[#allocation66_spill] sm:$0xff] }
 0x316   : > { %v2222_v48 = vsel %vm1963_vm5, %v2190_v13, %v5060_v37  ;;  %v5380_v19 = vunpack.i.h.bf16 %v14387_v50  ;;  %v5379_v4 = vunpack.i.l.bf16 %v14387_v50  ;;  %v3592_v2 = vpack.c.bf16 %v3451_v62, %v3446_v39  ;;  %v6014_v37 = vld [vmem:[%s6322_s10 + $0x1d0] sm:$0xff] }
 0x317   : > { %v4985_v57 = vunpack.i.h.bf16 %v14388_v34  ;;  %v2253_v61 = vsel %vm1996_vm6, %v2221_v53, %v5139_v55  ;;  %v2254_v41 = vsel %vm1996_vm6, %v2222_v48, %v5140_v40  ;;  %v14389_v22 = vunpack.i.h.bf16 %v14335_v24 }
 0x318   : > { %v4984_v14 = vunpack.i.l.bf16 %v14388_v34  ;;  %v5065_v32 = vunpack.i.h.bf16 %v14390_v20  ;;  %v2285_v25 = vsel %vm2029_vm7, %v2253_v61, %v5219_v29  ;;  %v2286_v30 = vsel %vm2029_vm7, %v2254_v41, %v5220_v47  ;;  %4104 = vmatmul.mubr.bf16.gmra.mrb[52].mxu1 %v3592_v2  ;;  %v12064_v55 = vpop.permute.xlu1 %5842 }
 0x319   : > { %v2158_v28 = vsel %vm2128_vm10, %v2125_v15, %v14389_v22  ;;  %v2317_v43 = vsel %vm2062_vm8, %v2285_v25, %v5299_v17  ;;  %v2318_v38 = vsel %vm2062_vm8, %v2286_v30, %v5300_v6  ;;  %v5835_v24 = vunpack.i.h.bf16 %v5833_v35  ;;  %4215 = vmatprep.mubr.msk.bf16.mxu1 %vm1930_vm4, %v3597_v54  ;;  %v14392_v54 = vld [vmem:[#allocation212_spill] sm:$0xff]  ;;  %v5838_v21 = vpop.permute.xlu0 %5837 }
 0x31a   : > { %v5834_v27 = vunpack.i.l.bf16 %v5833_v35  ;;  %v5064_v51 = vunpack.i.l.bf16 %v14390_v20  ;;  %v2349_v15 = vsel %vm2095_vm9, %v2317_v43, %v5379_v4  ;;  %v2350_v1 = vsel %vm2095_vm9, %v2318_v38, %v5380_v19  ;;  %v6016_v43 = vld [vmem:[%s6322_s10 + $0x1a0] sm:$0xff] }
 0x31b   : > { %v3003_v26 = vrot.slane %v6013_v63, 3  ;;  %v2382_v9 = vsel %vm2128_vm10, %v2350_v1, %v5835_v24  ;;  %v3004_v45 = vrot.slane %v6014_v37, 3  ;;  %v3006_v44 = vrot.slane %v6015_v12, 3  ;;  %v6017_v24 = vld [vmem:[%s6322_s10 + $0x198] sm:$0xff]  ;;  %v6018_v63 = vld [vmem:[%s6322_s10 + $0x1a8] sm:$0xf] }
 0x31c   : > { %v2381_v56 = vsel %vm2128_vm10, %v2349_v15, %v5834_v27  ;;  %v14391_v59 = vunpack.i.h.bf16 %v14354_v23  ;;  %v5145_v0 = vunpack.i.h.bf16 %v14393_v10  ;;  %v5144_v40 = vunpack.i.l.bf16 %v14393_v10  ;;  %v12098_v4 = vpop.permute.xlu1 %5852 }
 0x31d   : > { %v3595_v8 = vpack.c.bf16 %v2382_v9, %v2381_v56  ;;  %v5225_v47 = vunpack.i.h.bf16 %v14394_v7  ;;  %v5224_v29 = vunpack.i.l.bf16 %v14394_v7  ;;  %v3594_v39 = vpack.c.bf16 %v2158_v28, %v2157_v60 }
 0x31e   : > { %v2094_v58 = vsel %vm2062_vm8, %v14392_v54, %v14391_v59  ;;  %v14395_v62 = vunpack.i.l.bf16 %v14357_v3  ;;  %v2192_v13 = vsel %vm1930_vm4, %v14322_v42, %v4985_v57  ;;  %v2191_v53 = vsel %vm1930_vm4, %v14321_v31, %v4984_v14  ;;  %v14397_v57 = vld [vmem:[#allocation60_spill] sm:$0xff]  ;;  %v5848_v14 = vpop.permute.xlu0 %5847 }
 0x31f   : > { %3950 = vmatprep.mubr.bf16.mxu0 %v3595_v8  ;;  %v14396_v6 = vunpack.i.h.bf16 %v14357_v3  ;;  %v2224_v48 = vsel %vm1963_vm5, %v2192_v13, %v5065_v32  ;;  %v12089_v42 = vsel %vm536_vm2, %v3003_v26, %v3004_v45  ;;  %v12092_v31 = vsel %vm536_vm2, %v3004_v45, %v3006_v44  ;;  %v14398_v13 = vld [vmem:[#allocation75_spill] sm:$0xff] }
 0x320   : > { %v2126_v23 = vsel %vm2095_vm9, %v11981_v16, %v14395_v62  ;;  %v2223_v16 = vsel %vm1963_vm5, %v2191_v53, %v5064_v51  ;;  %3951 = vmatmul.mubr.bf16.gmra.mrb[56].mxu0 %v3594_v39  ;;  %v2256_v50 = vsel %vm1996_vm6, %v2224_v48, %v5145_v0  ;;  %v5805_v19 = vunpack.i.h.bf16 %v11965_v49  ;;  %v12121_v1 = vpop.permute.xlu1 %5862 }
 0x321   : > { %v12079_v17 = vsel %vm2095_vm9, %v2094_v58, %v14396_v6  ;;  %v12084_v60 = vsel %vm2128_vm10, %v2126_v23, %v4904_v33  ;;  %v2255_v3 = vsel %vm1996_vm6, %v2223_v16, %v5144_v40  ;;  %v5804_v33 = vunpack.i.l.bf16 %v11965_v49 }
 0x322   : > { %v12101_v2 = vsel %vm2029_vm7, %v2255_v3, %v5224_v29  ;;  %v12104_v34 = vsel %vm2029_vm7, %v2256_v50, %v5225_v47  ;;  %v5305_v61 = vunpack.i.h.bf16 %v14397_v57  ;;  %v5809_v41 = vunpack.i.l.bf16 %v12007_v36  ;;  %v5858_v59 = vpop.permute.xlu0 %5857 }
 0x323   : > { %v5304_v22 = vunpack.i.l.bf16 %v14397_v57  ;;  %v5819_v28 = vunpack.i.l.bf16 %v12030_v52  ;;  %v3467_v49 = vrot.slane %v12089_v42, 1  ;;  %v3468_v20 = vrot.slane %v12092_v31, 1 }
 0x324   : > { %v5815_v32 = vunpack.i.h.bf16 %v11994_v11  ;;  %v5814_v25 = vunpack.i.l.bf16 %v11994_v11  ;;  %v5829_v30 = vunpack.i.l.bf16 %v12049_v18  ;;  %v3472_v35 = vrot.slane %v3006_v44, 1  ;;  %v5873_v47 = vpop.permute.xlu1 %5872 }
 0x325   : > { %v3025_v38 = vsel %vm1930_vm4, %v6016_v43, %v5805_v19  ;;  %v3024_v27 = vsel %vm1930_vm4, %v6017_v24, %v5804_v33  ;;  %v5824_v51 = vunpack.i.l.bf16 %v12018_v46  ;;  %v5844_v15 = vunpack.i.l.bf16 %v12064_v55 }
 0x326   : > { %v3026_v26 = vsel %vm1930_vm4, %v6018_v63, %v5809_v41  ;;  %v5825_v11 = vunpack.i.h.bf16 %v12018_v46  ;;  %v5839_v56 = vunpack.i.l.bf16 %v5838_v21  ;;  %v5854_v9 = vunpack.i.l.bf16 %v12098_v4  ;;  %v5868_v48 = vpop.permute.xlu0 %5867 }
 0x327   : > { %v3048_v37 = vsel %vm1963_vm5, %v3026_v26, %v5819_v28  ;;  %v5840_v45 = vunpack.i.h.bf16 %v5838_v21  ;;  %v5849_v12 = vunpack.i.l.bf16 %v5848_v14  ;;  %v5864_v44 = vunpack.i.l.bf16 %v12121_v1 }
 0x328   : > { %v3046_v54 = vsel %vm1963_vm5, %v3024_v27, %v5814_v25  ;;  %v3047_v58 = vsel %vm1963_vm5, %v3025_v38, %v5815_v32  ;;  %v3070_v10 = vsel %vm1996_vm6, %v3048_v37, %v5829_v30  ;;  %v5850_v0 = vunpack.i.h.bf16 %v5848_v14  ;;  %v5883_v14 = vpop.permute.xlu1 %5882 }
 0x329   : > { %v3068_v40 = vsel %vm1996_vm6, %v3046_v54, %v5824_v51  ;;  %v3118_v46 = vsel %vm2029_vm7, %v3070_v10, %v5844_v15  ;;  %v5860_v8 = vunpack.i.h.bf16 %v5858_v59  ;;  %v5859_v7 = vunpack.i.l.bf16 %v5858_v59 }
 0x32a   : > { %v3069_v29 = vsel %vm1996_vm6, %v3047_v58, %v5825_v11  ;;  %v3116_v39 = vsel %vm2029_vm7, %v3068_v40, %v5839_v56  ;;  %v3166_v62 = vsel %vm2062_vm8, %v3118_v46, %v5854_v9  ;;  %v5874_v23 = vunpack.i.l.bf16 %v5873_v47  ;;  %v5878_v15 = vpop.permute.xlu0 %5877  ;;  %v6020_v58 = vld [vmem:[%s6322_s10 + $0x1c0] sm:$0xf] }
 0x32b   : > { %v5385_v53 = vunpack.i.h.bf16 %v14398_v13  ;;  %v3117_v21 = vsel %vm2029_vm7, %v3069_v29, %v5840_v45  ;;  %v3164_v6 = vsel %vm2062_vm8, %v3116_v39, %v5849_v12  ;;  %v3214_v16 = vsel %vm2095_vm9, %v3166_v62, %v5864_v44 }
 0x32c   : > { %v3165_v42 = vsel %vm2062_vm8, %v3117_v21, %v5850_v0  ;;  %v3262_v31 = vsel %vm2128_vm10, %v3214_v16, %v5874_v23  ;;  %v5870_v3 = vunpack.i.h.bf16 %v5868_v48  ;;  %v5869_v50 = vunpack.i.l.bf16 %v5868_v48  ;;  %v5893_v11 = vpop.permute.xlu1 %5892  ;;  %v6021_v0 = vld [vmem:[%s6322_s10 + $0x1b8] sm:$0xff] }
 0x32d   : > { %v5384_v19 = vunpack.i.l.bf16 %v14398_v13  ;;  %v3212_v33 = vsel %vm2095_vm9, %v3164_v6, %v5859_v7  ;;  %v3213_v41 = vsel %vm2095_vm9, %v3165_v42, %v5860_v8  ;;  %v3460_v28 = vrot.slane %v3262_v31, 1 }
 0x32e   : > { %v3260_v32 = vsel %vm2128_vm10, %v3212_v33, %v5869_v50  ;;  %v3261_v25 = vsel %vm2128_vm10, %v3213_v41, %v5870_v3  ;;  %v3469_v30 = vsel %vm182_vm0, %v3467_v49, %v3468_v20  ;;  %v3473_v43 = vsel %vm182_vm0, %v3468_v20, %v3472_v35  ;;  %v5888_v45 = vpop.permute.xlu0 %5887 }
 0x32f   : > { %v5810_v38 = vunpack.i.h.bf16 %v12007_v36  ;;  %v5875_v24 = vunpack.i.h.bf16 %v5873_v47  ;;  %v3454_v27 = vrot.slane %v3260_v32, 1  ;;  %v3455_v51 = vrot.slane %v3261_v25, 1 }
 0x330   : > { %v2319_v63 = vsel %vm2062_vm8, %v12101_v2, %v5304_v22  ;;  %v2320_v26 = vsel %vm2062_vm8, %v12104_v34, %v5305_v61  ;;  %v5880_v49 = vunpack.i.h.bf16 %v5878_v15  ;;  %v14399_v20 = vunpack.i.h.bf16 %v14344_v5  ;;  %v6019_v5 = vld [vmem:[%s6322_s10 + $0x1b0] sm:$0xff]  ;;  %v5903_v7 = vpop.permute.xlu1 %5902 }
 0x331   : > { %v5879_v35 = vunpack.i.l.bf16 %v5878_v15  ;;  %v3456_v56 = vsel %vm182_vm0, %v3454_v27, %v3455_v51  ;;  %v3461_v9 = vsel %vm182_vm0, %v3455_v51, %v3460_v28  ;;  %v2351_v2 = vsel %vm2095_vm9, %v2319_v63, %v5384_v19 }
 0x332   : > { %v2160_v36 = vsel %vm2128_vm10, %v12079_v17, %v14399_v20  ;;  %v5820_v57 = vunpack.i.h.bf16 %v12030_v52  ;;  %v5894_v22 = vunpack.i.l.bf16 %v5893_v11  ;;  %v2352_v34 = vsel %vm2095_vm9, %v2320_v26, %v5385_v53  ;;  %v5898_v21 = vpop.permute.xlu0 %5897 }
 0x333   : > { %v3601_v61 = vpack.c.bf16 %v3473_v43, %v3469_v30  ;;  %v3027_v37 = vsel %vm1930_vm4, %v6019_v5, %v5810_v38  ;;  %v5830_v17 = vunpack.i.h.bf16 %v12049_v18  ;;  %v3596_v12 = vpack.c.bf16 %v3461_v9, %v3456_v56  ;;  %v4234_v56 = vpop.f32.mrb[0].mxu0 }
 0x334   : > { %v2383_v44 = vsel %vm2128_vm10, %v2351_v2, %v5875_v24  ;;  %v5885_v59 = vunpack.i.h.bf16 %v5883_v14  ;;  %v5884_v54 = vunpack.i.l.bf16 %v5883_v14  ;;  %v3029_v10 = vsel %vm1930_vm4, %v6020_v58, %v5880_v49  ;;  %v5913_v19 = vpop.permute.xlu1 %5912  ;;  %v4235_v9 = vpop.f32.mrb[1].mxu0 }
 0x335   : > { %v2384_v52 = vsel %vm2128_vm10, %v2352_v34, %v5894_v22  ;;  %v3028_v40 = vsel %vm1930_vm4, %v6021_v0, %v5879_v35  ;;  %v5890_v46 = vunpack.i.h.bf16 %v5888_v45  ;;  %v5889_v8 = vunpack.i.l.bf16 %v5888_v45  ;;  %4112 = vmatmul.mubr.bf16.gmra.mrb[56].mxu1 %v3596_v12  ;;  %v14400_v0 = vld [vmem:[#allocation52_spill] sm:$0xff] }
 0x336   : > { %v3599_v47 = vpack.c.bf16 %v2384_v52, %v2383_v44  ;;  %v3049_v18 = vsel %vm1963_vm5, %v3027_v37, %v5820_v57  ;;  %v5845_v29 = vunpack.i.h.bf16 %v12064_v55  ;;  %v3598_v39 = vpack.c.bf16 %v2160_v36, %v12084_v60  ;;  %4216 = vmatprep.mubr.msk.bf16.mxu1 %vm1930_vm4, %v3601_v61  ;;  %v5908_v41 = vpop.permute.xlu0 %5907  ;;  %v4237_v57 = vpop.f32.mrb[2].mxu0 }
 0x337   : > { %v3071_v62 = vsel %vm1996_vm6, %v3049_v18, %v5830_v17  ;;  %v5855_v23 = vunpack.i.h.bf16 %v12098_v4  ;;  %v5865_v13 = vunpack.i.h.bf16 %v12121_v1  ;;  %v5895_v53 = vunpack.i.h.bf16 %v5893_v11  ;;  %v4238_v22 = vpop.f32.mrb[3].mxu0 }
 0x338   : > { %3958 = vmatprep.mubr.bf16.mxu0 %v3599_v47  ;;  %v3050_v6 = vsel %vm1963_vm5, %v3028_v40, %v5884_v54  ;;  %v3051_v16 = vsel %vm1963_vm5, %v3029_v10, %v5885_v59  ;;  %v5900_v48 = vunpack.i.h.bf16 %v5898_v21  ;;  %v5899_v42 = vunpack.i.l.bf16 %v5898_v21  ;;  %v4240_v61 = vpop.f32.mrb[4].mxu0 }
 0x339   : > { %3959 = vmatmul.mubr.bf16.gmra.mrb[60].mxu0 %v3598_v39  ;;  %v3072_v55 = vsel %vm1996_vm6, %v3050_v6, %v5889_v8  ;;  %v3073_v60 = vsel %vm1996_vm6, %v3051_v16, %v5890_v46  ;;  %v5905_v31 = vunpack.i.h.bf16 %v5903_v7  ;;  %v5904_v3 = vunpack.i.l.bf16 %v5903_v7  ;;  %v4241_v5 = vpop.f32.mrb[5].mxu0  ;;  %v4001_v8 = vpop.f32.mrb[0].mxu1 }
 0x33a   : > { %v3119_v4 = vsel %vm2029_vm7, %v3071_v62, %v5845_v29  ;;  %v3120_v1 = vsel %vm2029_vm7, %v3072_v55, %v5899_v42  ;;  %v3121_v50 = vsel %vm2029_vm7, %v3073_v60, %v5900_v48  ;;  %v5915_v28 = vunpack.i.h.bf16 %v5913_v19  ;;  %v4243_v17 = vpop.f32.mrb[6].mxu0  ;;  %v4003_v39 = vpop.f32.mrb[1].mxu1 }
 0x33b   : > { %v3167_v33 = vsel %vm2062_vm8, %v3119_v4, %v5855_v23  ;;  %v5914_v14 = vunpack.i.l.bf16 %v5913_v19  ;;  %v5910_v25 = vunpack.i.h.bf16 %v5908_v41  ;;  %v5909_v30 = vunpack.i.l.bf16 %v5908_v41  ;;  %v4244_v45 = vpop.f32.mrb[7].mxu0  ;;  %v4004_v23 = vpop.f32.mrb[2].mxu1 }
 0x33c   : > { %v3215_v32 = vsel %vm2095_vm9, %v3167_v33, %v5865_v13  ;;  %v3168_v38 = vsel %vm2062_vm8, %v3120_v1, %v5904_v3  ;;  %v3169_v24 = vsel %vm2062_vm8, %v3121_v50, %v5905_v31  ;;  %v4236_v2 = vadd.f32 %v4235_v9, %v4234_v56  ;;  %v4246_v44 = vpop.f32.mrb[8].mxu0  ;;  %v4006_v6 = vpop.f32.mrb[3].mxu1 }
 0x33d   : > { %v3263_v43 = vsel %vm2128_vm10, %v3215_v32, %v5895_v53  ;;  %v3216_v27 = vsel %vm2095_vm9, %v3168_v38, %v5909_v30  ;;  %v3217_v51 = vsel %vm2095_vm9, %v3169_v24, %v5910_v25  ;;  %v4239_v34 = vadd.f32 %v4238_v22, %v4237_v57  ;;  %v4247_v59 = vpop.f32.mrb[9].mxu0 }
 0x33e   : > { %v3264_v15 = vsel %vm2128_vm10, %v3216_v27, %v5914_v14  ;;  %v3265_v63 = vsel %vm2128_vm10, %v3217_v51, %v5915_v28  ;;  %v3464_v26 = vrot.slane %v3263_v43, 1  ;;  %v4242_v37 = vadd.f32 %v4241_v5, %v4240_v61  ;;  %v4249_v58 = vpop.f32.mrb[10].mxu0 }
 0x33f   : > { %v3465_v49 = vrot.slane %v3264_v15, 1  ;;  %v3470_v20 = vrot.slane %v3265_v63, 1  ;;  %v4245_v12 = vadd.f32 %v4244_v45, %v4243_v17  ;;  %v4248_v54 = vadd.f32 %v4247_v59, %v4246_v44  ;;  %v4250_v10 = vpop.f32.mrb[11].mxu0 }
 0x340   : > { %v4251_v52 = vadd.f32 %v4250_v10, %v4249_v58  ;;  %v3841_v40 = vadd.f32 %v4236_v2, %v14400_v0  ;;  %v4252_v46 = vpop.f32.mrb[12].mxu0  ;;  %v3844_v47 = vadd.f32 %v4239_v34, %v14400_v0  ;;  %v3849_v16 = vadd.f32 %v4242_v37, %v14400_v0 }
 0x341   : > { %v3466_v36 = vsel %vm182_vm0, %v3464_v26, %v3465_v49  ;;  %v3471_v35 = vsel %vm182_vm0, %v3465_v49, %v3470_v20  ;;  %v4253_v7 = vpop.f32.mrb[13].mxu0  ;;  %v3852_v42 = vadd.f32 %v4245_v12, %v14400_v0  ;;  %v3857_v1 = vadd.f32 %v4248_v54, %v14400_v0 }
 0x342   : > { %v3600_v11 = vpack.c.bf16 %v3471_v35, %v3466_v36  ;;  %v4002_v18 = vadd.f32 %v4001_v8, %v3841_v40  ;;  %v4254_v29 = vadd.f32 %v4253_v7, %v4252_v46  ;;  %v4255_v62 = vpop.f32.mrb[14].mxu0  ;;  %v4005_v53 = vadd.f32 %v4004_v23, %v3844_v47 }
 0x343   : > { %v4256_v13 = vpop.f32.mrb[15].mxu0  ;;  %v3860_v33 = vadd.f32 %v4251_v52, %v14400_v0 }
 0x344   : > { %4120 = vmatmul.mubr.bf16.gmra.mrb[60].mxu1 %v3600_v11  ;;  %4130 = vst [vmem:[%s12207_s19] sm:$0xff] %v4002_v18  ;;  %v4257_v21 = vadd.f32 %v4256_v13, %v4255_v62  ;;  %4131 = vst [vmem:[%s12207_s19 + $0x8] sm:$0xff] %v4005_v53  ;;  %v3865_v51 = vadd.f32 %v4254_v29, %v14400_v0 }
 0x345   : > { %v4009_v48 = vpop.f32.mrb[4].mxu1 }
 0x346   : > { %v4010_v55 = vadd.f32 %v4009_v48, %v3849_v16  ;;  %v4011_v60 = vpop.f32.mrb[5].mxu1  ;;  %v3868_v63 = vadd.f32 %v4257_v21, %v14400_v0 }
 0x347   : > { %v4012_v31 = vpop.f32.mrb[6].mxu1 }
 0x348   : > { %4132 = vst [vmem:[%s12207_s19 + $0x10] sm:$0xff] %v4010_v55  ;;  %v4013_v3 = vadd.f32 %v4012_v31, %v3852_v42  ;;  %v4014_v4 = vpop.f32.mrb[7].mxu1 }
 0x34a   : > { %4133 = vst [vmem:[%s12207_s19 + $0x18] sm:$0xff] %v4013_v3 }
 0x353   : > { %v4017_v50 = vpop.f32.mrb[8].mxu1 }
 0x354   : > { %v4018_v41 = vadd.f32 %v4017_v50, %v3857_v1  ;;  %v4019_v28 = vpop.f32.mrb[9].mxu1 }
 0x355   : > { %v4258_v19 = vpop.f32.mrb[16].mxu0  ;;  %v4020_v25 = vpop.f32.mrb[10].mxu1 }
 0x356   : > { %v4259_v14 = vpop.f32.mrb[17].mxu0  ;;  %4134 = vst [vmem:[%s12207_s19 + $0x20] sm:$0xff] %v4018_v41  ;;  %v4021_v43 = vadd.f32 %v4020_v25, %v3860_v33  ;;  %v4022_v38 = vpop.f32.mrb[11].mxu1 }
 0x357   : > { %v4260_v32 = vadd.f32 %v4259_v14, %v4258_v19  ;;  %v4261_v30 = vpop.f32.mrb[18].mxu0 }
 0x358   : > { %v4262_v24 = vpop.f32.mrb[19].mxu0  ;;  %4135 = vst [vmem:[%s12207_s19 + $0x28] sm:$0xff] %v4021_v43 }
 0x359   : > { %v4263_v27 = vadd.f32 %v4262_v24, %v4261_v30  ;;  %v3873_v9 = vadd.f32 %v4260_v32, %v14400_v0 }
 0x35b   : > { %v3876_v61 = vadd.f32 %v4263_v27, %v14400_v0 }
 0x35c   : > { %v4025_v15 = vpop.f32.mrb[12].mxu1 }
 0x35d   : > { %v4026_v26 = vadd.f32 %v4025_v15, %v3865_v51  ;;  %v4027_v49 = vpop.f32.mrb[13].mxu1 }
 0x35e   : > { %v4028_v20 = vpop.f32.mrb[14].mxu1 }
 0x35f   : > { %4136 = vst [vmem:[%s12207_s19 + $0x30] sm:$0xff] %v4026_v26  ;;  %v4029_v36 = vadd.f32 %v4028_v20, %v3868_v63  ;;  %v4030_v35 = vpop.f32.mrb[15].mxu1 }
 0x361   : > { %4137 = vst [vmem:[%s12207_s19 + $0x38] sm:$0xff] %v4029_v36 }
 0x36a   : > { %v4264_v11 = vpop.f32.mrb[20].mxu0 }
 0x36b   : > { %v4265_v56 = vpop.f32.mrb[21].mxu0 }
 0x36c   : > { %v4266_v2 = vadd.f32 %v4265_v56, %v4264_v11  ;;  %v4267_v57 = vpop.f32.mrb[22].mxu0 }
 0x36d   : > { %v4033_v22 = vpop.f32.mrb[16].mxu1  ;;  %v4268_v34 = vpop.f32.mrb[23].mxu0 }
 0x36e   : > { %v4034_v5 = vadd.f32 %v4033_v22, %v3873_v9  ;;  %v4269_v37 = vadd.f32 %v4268_v34, %v4267_v57  ;;  %v4035_v17 = vpop.f32.mrb[17].mxu1  ;;  %v3881_v59 = vadd.f32 %v4266_v2, %v14400_v0 }
 0x36f   : > { %v4036_v45 = vpop.f32.mrb[18].mxu1 }
 0x370   : > { %4138 = vst [vmem:[%s12207_s19 + $0x40] sm:$0xff] %v4034_v5  ;;  %v4037_v12 = vadd.f32 %v4036_v45, %v3876_v61  ;;  %v4038_v44 = vpop.f32.mrb[19].mxu1  ;;  %v3884_v58 = vadd.f32 %v4269_v37, %v14400_v0 }
 0x372   : > { %4139 = vst [vmem:[%s12207_s19 + $0x48] sm:$0xff] %v4037_v12 }
 0x376   : > { %v4041_v54 = vpop.f32.mrb[20].mxu1 }
 0x377   : > { %v4042_v10 = vadd.f32 %v4041_v54, %v3881_v59  ;;  %v4043_v52 = vpop.f32.mrb[21].mxu1 }
 0x378   : > { %v4044_v46 = vpop.f32.mrb[22].mxu1 }
 0x379   : > { %4140 = vst [vmem:[%s12207_s19 + $0x50] sm:$0xff] %v4042_v10  ;;  %v4045_v8 = vadd.f32 %v4044_v46, %v3884_v58  ;;  %v4046_v47 = vpop.f32.mrb[23].mxu1 }
 0x37b   : > { %4141 = vst [vmem:[%s12207_s19 + $0x58] sm:$0xff] %v4045_v8 }
 0x37c   : > { %v4270_v40 = vpop.f32.mrb[24].mxu0 }
 0x37d   : > { %v4271_v7 = vpop.f32.mrb[25].mxu0 }
 0x37e   : > { %v4272_v18 = vadd.f32 %v4271_v7, %v4270_v40  ;;  %v4273_v29 = vpop.f32.mrb[26].mxu0 }
 0x37f   : > { %v4274_v39 = vpop.f32.mrb[27].mxu0 }
 0x380   : > { %v4275_v62 = vadd.f32 %v4274_v39, %v4273_v29  ;;  %v3889_v23 = vadd.f32 %v4272_v18, %v14400_v0 }
 0x382   : > { %v3892_v21 = vadd.f32 %v4275_v62, %v14400_v0 }
 0x389   : > { %v4049_v13 = vpop.f32.mrb[24].mxu1 }
 0x38a   : > { %v4050_v6 = vadd.f32 %v4049_v13, %v3889_v23  ;;  %v4051_v16 = vpop.f32.mrb[25].mxu1 }
 0x38b   : > { %v4052_v55 = vpop.f32.mrb[26].mxu1 }
 0x38c   : > { %v4276_v53 = vpop.f32.mrb[28].mxu0  ;;  %4142 = vst [vmem:[%s12207_s19 + $0x60] sm:$0xff] %v4050_v6  ;;  %v4053_v31 = vadd.f32 %v4052_v55, %v3892_v21  ;;  %v4054_v3 = vpop.f32.mrb[27].mxu1 }
 0x38d   : > { %v4277_v48 = vpop.f32.mrb[29].mxu0 }
 0x38e   : > { %v4278_v42 = vadd.f32 %v4277_v48, %v4276_v53  ;;  %v4279_v60 = vpop.f32.mrb[30].mxu0  ;;  %4143 = vst [vmem:[%s12207_s19 + $0x68] sm:$0xff] %v4053_v31 }
 0x38f   : > { %v4280_v4 = vpop.f32.mrb[31].mxu0 }
 0x390   : > { %v4281_v1 = vadd.f32 %v4280_v4, %v4279_v60  ;;  %v3897_v50 = vadd.f32 %v4278_v42, %v14400_v0 }
 0x392   : > { %v3900_v41 = vadd.f32 %v4281_v1, %v14400_v0 }
 0x393   : > { %v4057_v19 = vpop.f32.mrb[28].mxu1 }
 0x394   : > { %v4058_v28 = vadd.f32 %v4057_v19, %v3897_v50  ;;  %v4059_v14 = vpop.f32.mrb[29].mxu1 }
 0x395   : > { %v4282_v33 = vpop.f32.mrb[32].mxu0  ;;  %v4060_v30 = vpop.f32.mrb[30].mxu1 }
 0x396   : > { %v4283_v32 = vpop.f32.mrb[33].mxu0  ;;  %4144 = vst [vmem:[%s12207_s19 + $0x70] sm:$0xff] %v4058_v28  ;;  %v4061_v38 = vadd.f32 %v4060_v30, %v3900_v41  ;;  %v4062_v24 = vpop.f32.mrb[31].mxu1 }
 0x397   : > { %v4284_v25 = vadd.f32 %v4283_v32, %v4282_v33  ;;  %v4285_v43 = vpop.f32.mrb[34].mxu0 }
 0x398   : > { %v4286_v27 = vpop.f32.mrb[35].mxu0  ;;  %4145 = vst [vmem:[%s12207_s19 + $0x78] sm:$0xff] %v4061_v38 }
 0x399   : > { %v4287_v51 = vadd.f32 %v4286_v27, %v4285_v43  ;;  %v3905_v26 = vadd.f32 %v4284_v25, %v14400_v0 }
 0x39b   : > { %v3908_v11 = vadd.f32 %v4287_v51, %v14400_v0 }
 0x3a4   : > { %v4288_v15 = vpop.f32.mrb[36].mxu0 }
 0x3a5   : > { %v4289_v63 = vpop.f32.mrb[37].mxu0  ;;  %v4065_v36 = vpop.f32.mrb[32].mxu1 }
 0x3a6   : > { %v4290_v49 = vadd.f32 %v4289_v63, %v4288_v15  ;;  %v4291_v20 = vpop.f32.mrb[38].mxu0  ;;  %v4066_v56 = vadd.f32 %v4065_v36, %v3905_v26  ;;  %v4067_v2 = vpop.f32.mrb[33].mxu1 }
 0x3a7   : > { %v4292_v35 = vpop.f32.mrb[39].mxu0  ;;  %v4068_v57 = vpop.f32.mrb[34].mxu1 }
 0x3a8   : > { %v4293_v9 = vadd.f32 %v4292_v35, %v4291_v20  ;;  %4146 = vst [vmem:[%s12207_s19 + $0x80] sm:$0xff] %v4066_v56  ;;  %v4069_v22 = vadd.f32 %v4068_v57, %v3908_v11  ;;  %v4070_v34 = vpop.f32.mrb[35].mxu1  ;;  %v3913_v61 = vadd.f32 %v4290_v49, %v14400_v0 }
 0x3aa   : > { %4147 = vst [vmem:[%s12207_s19 + $0x88] sm:$0xff] %v4069_v22  ;;  %v3916_v37 = vadd.f32 %v4293_v9, %v14400_v0 }
 0x3ae   : > { %v4073_v5 = vpop.f32.mrb[36].mxu1 }
 0x3af   : > { %v4074_v17 = vadd.f32 %v4073_v5, %v3913_v61  ;;  %v4075_v45 = vpop.f32.mrb[37].mxu1 }
 0x3b0   : > { %v4076_v44 = vpop.f32.mrb[38].mxu1 }
 0x3b1   : > { %4148 = vst [vmem:[%s12207_s19 + $0x90] sm:$0xff] %v4074_v17  ;;  %v4077_v59 = vadd.f32 %v4076_v44, %v3916_v37  ;;  %v4078_v58 = vpop.f32.mrb[39].mxu1 }
 0x3b3   : > { %v4294_v12 = vpop.f32.mrb[40].mxu0  ;;  %4149 = vst [vmem:[%s12207_s19 + $0x98] sm:$0xff] %v4077_v59 }
 0x3b4   : > { %v4295_v54 = vpop.f32.mrb[41].mxu0 }
 0x3b5   : > { %v4296_v10 = vadd.f32 %v4295_v54, %v4294_v12  ;;  %v4297_v52 = vpop.f32.mrb[42].mxu0 }
 0x3b6   : > { %v4298_v40 = vpop.f32.mrb[43].mxu0 }
 0x3b7   : > { %v4299_v46 = vadd.f32 %v4298_v40, %v4297_v52  ;;  %v3921_v8 = vadd.f32 %v4296_v10, %v14400_v0 }
 0x3b9   : > { %v3924_v18 = vadd.f32 %v4299_v46, %v14400_v0 }
 0x3c0   : > { %v4081_v7 = vpop.f32.mrb[40].mxu1 }
 0x3c1   : > { %v4082_v29 = vadd.f32 %v4081_v7, %v3921_v8  ;;  %v4083_v39 = vpop.f32.mrb[41].mxu1 }
 0x3c2   : > { %v4300_v47 = vpop.f32.mrb[44].mxu0  ;;  %v4084_v13 = vpop.f32.mrb[42].mxu1 }
 0x3c3   : > { %v4301_v62 = vpop.f32.mrb[45].mxu0  ;;  %4150 = vst [vmem:[%s12207_s19 + $0xa0] sm:$0xff] %v4082_v29  ;;  %v4085_v21 = vadd.f32 %v4084_v13, %v3924_v18  ;;  %v4086_v6 = vpop.f32.mrb[43].mxu1 }
 0x3c4   : > { %v4302_v23 = vadd.f32 %v4301_v62, %v4300_v47  ;;  %v4303_v53 = vpop.f32.mrb[46].mxu0 }
 0x3c5   : > { %v4304_v16 = vpop.f32.mrb[47].mxu0  ;;  %4151 = vst [vmem:[%s12207_s19 + $0xa8] sm:$0xff] %v4085_v21 }
 0x3c6   : > { %v4305_v48 = vadd.f32 %v4304_v16, %v4303_v53  ;;  %v3929_v42 = vadd.f32 %v4302_v23, %v14400_v0 }
 0x3c8   : > { %v3932_v31 = vadd.f32 %v4305_v48, %v14400_v0 }
 0x3c9   : > { %v4089_v55 = vpop.f32.mrb[44].mxu1 }
 0x3ca   : > { %v4306_v60 = vpop.f32.mrb[48].mxu0  ;;  %v4090_v3 = vadd.f32 %v4089_v55, %v3929_v42  ;;  %v4091_v4 = vpop.f32.mrb[45].mxu1 }
 0x3cb   : > { %v4307_v1 = vpop.f32.mrb[49].mxu0  ;;  %v4092_v19 = vpop.f32.mrb[46].mxu1 }
 0x3cc   : > { %v4308_v50 = vadd.f32 %v4307_v1, %v4306_v60  ;;  %v4309_v33 = vpop.f32.mrb[50].mxu0  ;;  %4152 = vst [vmem:[%s12207_s19 + $0xb0] sm:$0xff] %v4090_v3  ;;  %v4093_v41 = vadd.f32 %v4092_v19, %v3932_v31  ;;  %v4094_v28 = vpop.f32.mrb[47].mxu1 }
 0x3cd   : > { %v4310_v14 = vpop.f32.mrb[51].mxu0 }
 0x3ce   : > { %v4311_v32 = vadd.f32 %v4310_v14, %v4309_v33  ;;  %4153 = vst [vmem:[%s12207_s19 + $0xb8] sm:$0xff] %v4093_v41  ;;  %v3937_v25 = vadd.f32 %v4308_v50, %v14400_v0 }
 0x3d0   : > { %v3940_v43 = vadd.f32 %v4311_v32, %v14400_v0 }
 0x3d9   : > { %v4097_v30 = vpop.f32.mrb[48].mxu1 }
 0x3da   : > { %v4098_v38 = vadd.f32 %v4097_v30, %v3937_v25  ;;  %v4099_v24 = vpop.f32.mrb[49].mxu1 }
 0x3db   : > { %v4100_v27 = vpop.f32.mrb[50].mxu1 }
 0x3dc   : > { %4154 = vst [vmem:[%s12207_s19 + $0xc0] sm:$0xff] %v4098_v38  ;;  %v4101_v51 = vadd.f32 %v4100_v27, %v3940_v43  ;;  %v4102_v15 = vpop.f32.mrb[51].mxu1 }
 0x3de   : > { %4155 = vst [vmem:[%s12207_s19 + $0xc8] sm:$0xff] %v4101_v51  ;;  %v4312_v63 = vpop.f32.mrb[52].mxu0 }
 0x3df   : > { %v4313_v26 = vpop.f32.mrb[53].mxu0 }
 0x3e0   : > { %v4314_v49 = vadd.f32 %v4313_v26, %v4312_v63  ;;  %v4315_v20 = vpop.f32.mrb[54].mxu0 }
 0x3e1   : > { %v4316_v36 = vpop.f32.mrb[55].mxu0 }
 0x3e2   : > { %v4317_v35 = vadd.f32 %v4316_v36, %v4315_v20  ;;  %v3945_v11 = vadd.f32 %v4314_v49, %v14400_v0 }
 0x3e4   : > { %v3948_v9 = vadd.f32 %v4317_v35, %v14400_v0 }
 0x3eb   : > { %v4105_v56 = vpop.f32.mrb[52].mxu1 }
 0x3ec   : > { %v4106_v2 = vadd.f32 %v4105_v56, %v3945_v11  ;;  %v4107_v57 = vpop.f32.mrb[53].mxu1 }
 0x3ed   : > { %v4108_v22 = vpop.f32.mrb[54].mxu1 }
 0x3ee   : > { %4156 = vst [vmem:[%s12207_s19 + $0xd0] sm:$0xff] %v4106_v2  ;;  %v4109_v34 = vadd.f32 %v4108_v22, %v3948_v9  ;;  %v4110_v61 = vpop.f32.mrb[55].mxu1 }
 0x3f0   : > { %4157 = vst [vmem:[%s12207_s19 + $0xd8] sm:$0xff] %v4109_v34 }
 0x3f3   : > { %v4318_v5 = vpop.f32.mrb[56].mxu0 }
 0x3f4   : > { %v4319_v37 = vpop.f32.mrb[57].mxu0 }
 0x3f5   : > { %v4320_v17 = vadd.f32 %v4319_v37, %v4318_v5  ;;  %v4321_v45 = vpop.f32.mrb[58].mxu0 }
 0x3f6   : > { %v4322_v12 = vpop.f32.mrb[59].mxu0 }
 0x3f7   : > { %v4323_v44 = vadd.f32 %v4322_v12, %v4321_v45  ;;  %v3953_v59 = vadd.f32 %v4320_v17, %v14400_v0 }
 0x3f9   : > { %v3956_v58 = vadd.f32 %v4323_v44, %v14400_v0 }
 0x408   : > { %v4113_v54 = vpop.f32.mrb[56].mxu1 }
 0x409   : > { %v4114_v10 = vadd.f32 %v4113_v54, %v3953_v59  ;;  %v4115_v52 = vpop.f32.mrb[57].mxu1 }
 0x40a   : > { %v4116_v40 = vpop.f32.mrb[58].mxu1 }
 0x40b   : > { %4158 = vst [vmem:[%s12207_s19 + $0xe0] sm:$0xff] %v4114_v10  ;;  %v4117_v46 = vadd.f32 %v4116_v40, %v3956_v58  ;;  %v4118_v8 = vpop.f32.mrb[59].mxu1 }
 0x40c   : > { %v4324_v7 = vpop.f32.mrb[60].mxu0 }
 0x40d   : > { %v4325_v47 = vpop.f32.mrb[61].mxu0  ;;  %4159 = vst [vmem:[%s12207_s19 + $0xe8] sm:$0xff] %v4117_v46 }
 0x40e   : > { %v4326_v18 = vadd.f32 %v4325_v47, %v4324_v7  ;;  %v4327_v29 = vpop.f32.mrb[62].mxu0 }
 0x40f   : > { %v4328_v39 = vpop.f32.mrb[63].mxu0 }
 0x410   : > { %v4329_v62 = vadd.f32 %v4328_v39, %v4327_v29  ;;  %v3961_v23 = vadd.f32 %v4326_v18, %v14400_v0 }
 0x412   : > { %v3964_v53 = vadd.f32 %v4329_v62, %v14400_v0 }
 0x416   :  { %70 = sbr.rel (!%p68_p0) target bundleno = 28 (0x1c), region = 41 }
 0x417   : > { %v4121_v13 = vpop.f32.mrb[60].mxu1 }
 0x418   : > { %v4122_v21 = vadd.f32 %v4121_v13, %v3961_v23  ;;  %v4123_v6 = vpop.f32.mrb[61].mxu1 }
 0x419   : > { %v4124_v16 = vpop.f32.mrb[62].mxu1 }
 0x41a   : > { %4160 = vst [vmem:[%s12207_s19 + $0xf0] sm:$0xff] %v4122_v21  ;;  %v4125_v48 = vadd.f32 %v4124_v16, %v3964_v53  ;;  %v4126_v42 = vpop.f32.mrb[63].mxu1 }
 0x41c   : > { %4161 = vst [vmem:[%s12207_s19 + $0xf8] sm:$0xff] %v4125_v48 }

</bundles_post_ra>
